<compile_context>
chip_gen: v6e
topology: v6e:2x2x1
jax: 0.10.0
libtpu: 0.0.40
codegen_flags: <defaults>
</compile_context>

<pallas_src>
import numpy as np
import jax
import jax.numpy as jnp
from jax import lax
from jax.experimental import pallas as pl
from jax.experimental.pallas import tpu as pltpu

D_MODEL = 32            # must be divisible by 8 (GroupNorm(8, d_model))
NUM_GROUPS = 8
GN_EPS = 1e-5
INV_SQRT2 = 0.7071067811865476
TAPS = tuple((dy, dx) for dy in range(3) for dx in range(3))   # 3x3 conv taps


# ---------------------------------------------------------------------------
# Bilinear (align_corners=False) helpers.  F.upsample(..., mode='bilinear')
# with align_corners unspecified behaves like align_corners=False.
# ---------------------------------------------------------------------------
def _bilinear_taps(out_size, in_size):
    scale = in_size / out_size
    taps = []
    for o in range(out_size):
        src = max((o + 0.5) * scale - 0.5, 0.0)
        i0 = min(int(np.floor(src)), in_size - 1)
        i1 = min(i0 + 1, in_size - 1)
        l1 = float(src - i0)
        taps.append((i0, i1, 1.0 - l1, l1))
    return taps


def _bilinear_matrix(out_size, in_size):
    """(out_size, in_size) interpolation matrix: out = R @ in (1-D bilinear)."""
    R = np.zeros((out_size, in_size), dtype=np.float32)
    for o, (i0, i1, l0, l1) in enumerate(_bilinear_taps(out_size, in_size)):
        R[o, i0] += l0
        R[o, i1] += l1
    return R


# ---------------------------------------------------------------------------
# Per-level Pallas kernel (specialised for static H, W, C).
# ---------------------------------------------------------------------------
def _make_level_kernel(H, W, C):
    Hm, Wm = H - 2, W - 2          # spatial size after 3x3/stride-1 pooling
    C2 = 2 * C
    inv_n = 1.0 / float(H * W * (C // NUM_GROUPS))   # elems per GroupNorm group

    def kernel(x_ref, wb_ref, bb_ref, gnw_ref, gnb_ref, gmat_ref,
               w1_ref, b1_ref, rup_ref, o_ref,
               pad1_ref, pad2_ref, pool_ref, im1_ref, im2_ref):
        f32 = jnp.float32

        # -- zero only the 1-px padding ring; interiors are fully rewritten below
        #    (review: no full zeros_like fills of the pad scratch per step).
        for pad, ch in ((pad1_ref, C), (pad2_ref, C2)):
            pad[0:1, :, :] = jnp.zeros((1, W + 2, ch), f32)
            pad[H + 1:H + 2, :, :] = jnp.zeros((1, W + 2, ch), f32)
            pad[:, 0:1, :] = jnp.zeros((H + 2, 1, ch), f32)
            pad[:, W + 1:W + 2, :] = jnp.zeros((H + 2, 1, ch), f32)

        def im2col(pad, ch, im_ref):
            # 9 shifted views of the zero-padded image -> one (H*W, 9*ch) matrix.
            for t, (dy, dx) in enumerate(TAPS):
                im_ref[:, t * ch:(t + 1) * ch] = (
                    pad[dy:dy + H, dx:dx + W, :]
                    .reshape(H * W, ch).astype(im_ref.dtype))
            return im_ref[...]

        # -- branch1 + branch2 conv: shared im2col, ONE (H*W,9C)x(9C,2C) matmul --
        pad1_ref[1:H + 1, 1:W + 1, :] = x_ref[0]
        patches = im2col(pad1_ref, C, im1_ref)
        y = jnp.dot(patches, wb_ref[...],
                    preferred_element_type=f32) + bb_ref[...]           # (H*W, 2C)

        # -- fused GroupNorm(8, C) on both branches (ONE stats matmul) + GELU --
        ssum = jnp.sum(y, axis=0, keepdims=True)                        # (1, 2C)
        ssq = jnp.sum(y * y, axis=0, keepdims=True)                     # (1, 2C)
        rowid = lax.broadcasted_iota(jnp.int32, (2, C2), 0)
        stats = jnp.where(rowid == 0,
                          jnp.broadcast_to(ssum, (2, C2)),
                          jnp.broadcast_to(ssq, (2, C2)))               # (2, 2C)
        gstats = jnp.dot(stats, gmat_ref[...], preferred_element_type=f32)
        mean = gstats[0:1, :] * inv_n
        var = jnp.maximum(gstats[1:2, :] * inv_n - mean * mean, 0.0)    # clamp >= 0
        inv = lax.rsqrt(var + GN_EPS)
        g = (y - mean) * inv * gnw_ref[...] + gnb_ref[...]
        g = 0.5 * g * (1.0 + lax.erf(g * INV_SQRT2))                    # exact GELU

        # -- 3x3 / stride-1 pooling: avg on branch-1 half, max on branch-2 half --
        g3 = g.reshape(H, W, C2)
        psum = jnp.zeros((Hm, Wm, C2), f32)
        pmax = jnp.full((Hm, Wm, C2), -jnp.inf, f32)
        for dy, dx in TAPS:
            sl = lax.slice(g3, (dy, dx, 0), (dy + Hm, dx + Wm, C2))
            psum = psum + sl
            pmax = jnp.maximum(pmax, sl)
        lane = lax.broadcasted_iota(jnp.int32, (Hm, Wm, C2), 2)
        pooled = jnp.where(lane < C, psum * (1.0 / 9.0), pmax)          # (Hm, Wm, 2C)

        # flatten row-major (Hm, Wm) into the upsample matmul operand
        for i in range(Hm):
            pool_ref[i * Wm:(i + 1) * Wm, :] = pooled[i].astype(pool_ref.dtype)

        # -- bilinear upsample (Hm,Wm)->(H,W): ONE matmul with kron(Rh, Rw) --
        up = jnp.dot(rup_ref[...], pool_ref[...],
                     preferred_element_type=f32)                        # (H*W, 2C)

        # -- conv1 on cat(avg, max): im2col + ONE (H*W,18C)x(18C,C) matmul --
        pad2_ref[1:H + 1, 1:W + 1, :] = up.reshape(H, W, C2)
        patches2 = im2col(pad2_ref, C2, im2_ref)
        out = jnp.dot(patches2, w1_ref[...],
                      preferred_element_type=f32) + b1_ref[...]         # (H*W, C)

        o_ref[0] = out

    return kernel


# ---------------------------------------------------------------------------
# Per-level wrapper around pallas_call.
# ---------------------------------------------------------------------------
def _level_forward(x, params, H, W, C, mxu_dtype=jnp.float32):
    """x: (B, H, W, C) float32 -> (B, H*W, C) float32."""
    B = x.shape[0]
    Hm, Wm = H - 2, W - 2
    C2 = 2 * C
    gs = C // NUM_GROUPS

    # Stack branch1/branch2 into single operands (fused conv + fused GN stats).
    wb = jnp.concatenate([params["w_b1"], params["w_b2"]], axis=3)      # (3,3,C,2C)
    wb = wb.reshape(9 * C, C2).astype(mxu_dtype)
    bb = jnp.concatenate([params["b_b1"], params["b_b2"]]).reshape(1, C2)
    gnw = jnp.concatenate([params["gn1_w"], params["gn2_w"]]).reshape(1, C2)
    gnb = jnp.concatenate([params["gn1_b"], params["gn2_b"]]).reshape(1, C2)
    w1 = params["w_c1"].reshape(9 * C2, C).astype(mxu_dtype)            # (18C, C)
    b1 = params["b_c1"].reshape(1, C)

    gidx = np.arange(C2) // gs                                          # 16 groups
    gmat = jnp.asarray((gidx[:, None] == gidx[None, :]).astype(np.float32))
    # Separable align_corners=False bilinear folded into ONE (H*W, Hm*Wm) matrix.
    rup = jnp.asarray(np.kron(_bilinear_matrix(H, Hm),
                              _bilinear_matrix(W, Wm))).astype(mxu_dtype)

    kernel = _make_level_kernel(H, W, C)

    def const_spec(shape):
        n = len(shape)
        return pl.BlockSpec(shape, lambda b, _n=n: (0,) * _n)

    grid_spec = pltpu.PrefetchScalarGridSpec(
        num_scalar_prefetch=0,
        grid=(B,),
        in_specs=[
            pl.BlockSpec((1, H, W, C), lambda b: (b, 0, 0, 0)),   # x
            const_spec((9 * C, C2)),                              # stacked branch conv W
            const_spec((1, C2)),                                  # stacked branch bias
            const_spec((1, C2)), const_spec((1, C2)),             # stacked GN gamma/beta
            const_spec((C2, C2)),                                 # group-membership mat
            const_spec((9 * C2, C)),                              # conv1 weight (im2col)
            const_spec((1, C)),                                   # conv1 bias
            const_spec((H * W, Hm * Wm)),                         # kron(Rh, Rw)
        ],
        out_specs=pl.BlockSpec((1, H * W, C), lambda b: (b, 0, 0)),
        scratch_shapes=[
            pltpu.VMEM((H + 2, W + 2, C), jnp.float32),           # padded input
            pltpu.VMEM((H + 2, W + 2, C2), jnp.float32),          # padded upsample
            pltpu.VMEM((Hm * Wm, C2), mxu_dtype),                 # flattened pooled
            pltpu.VMEM((H * W, 9 * C), mxu_dtype),                # im2col (branches)
            pltpu.VMEM((H * W, 9 * C2), mxu_dtype),               # im2col (conv1)
        ],
    )

    return pl.pallas_call(
        kernel,
        out_shape=jax.ShapeDtypeStruct((B, H * W, C), jnp.float32),
        grid_spec=grid_spec,
        compiler_params=pltpu.CompilerParams(dimension_semantics=("parallel",)),
    )(x, wb, bb, gnw, gnb, gmat, w1, b1, rup)


def feed_forward_network(src, spatial_shapes, params, d_model,
                         mxu_dtype=jnp.float32):
    """src: (B, sum(w*h), d_model) -> (B, sum(w*h), d_model)."""
    B = src.shape[0]
    outs, start = [], 0
    for (w, h) in spatial_shapes:
        n = w * h
        x = src[:, start:start + n, :].reshape(B, w, h, d_model)  # == view(-1,w,h,C)
        start += n
        outs.append(_level_forward(x, params, w, h, d_model, mxu_dtype))
    return jnp.concatenate(outs, axis=1)


# ---------------------------------------------------------------------------
# Pure-JAX reference (same math, XLA ops) used as a correctness guard.
# ---------------------------------------------------------------------------
def _reference_level(x, params, H, W, C):
    hi = lax.Precision.HIGHEST

    def conv(inp, w, b):
        y = lax.conv_general_dilated(
            inp, w, window_strides=(1, 1), padding=((1, 1), (1, 1)),
            dimension_numbers=("NHWC", "HWIO", "NHWC"), precision=hi)
        return y + b.reshape(1, 1, 1, -1)

    def gn_gelu(y, gamma, beta):
        Bb, Hh, Ww, Cc = y.shape
        g = y.reshape(Bb, Hh * Ww, NUM_GROUPS, Cc // NUM_GROUPS)
        mean = g.mean(axis=(1, 3), keepdims=True)
        var = g.var(axis=(1, 3), keepdims=True)
        g = (g - mean) * lax.rsqrt(var + GN_EPS)
        g = g.reshape(Bb, Hh, Ww, Cc) * gamma.reshape(1, 1, 1, -1) \
            + beta.reshape(1, 1, 1, -1)
        return 0.5 * g * (1.0 + lax.erf(g * INV_SQRT2))

    y1 = gn_gelu(conv(x, params["w_b1"], params["b_b1"]),
                 params["gn1_w"], params["gn1_b"])
    y2 = gn_gelu(conv(x, params["w_b2"], params["b_b2"]),
                 params["gn2_w"], params["gn2_b"])
    avg1 = lax.reduce_window(y1, 0.0, lax.add,
                             (1, 3, 3, 1), (1, 1, 1, 1), "VALID") / 9.0
    max2 = lax.reduce_window(y2, -jnp.inf, lax.max,
                             (1, 3, 3, 1), (1, 1, 1, 1), "VALID")
    p = jnp.concatenate([avg1, max2], axis=-1)                   # (B, H-2, W-2, 2C)
    Rh = jnp.asarray(_bilinear_matrix(H, H - 2))
    Rw = jnp.asarray(_bilinear_matrix(W, W - 2))
    up = jnp.einsum("hi,wj,bijc->bhwc", Rh, Rw, p, precision=hi)
    out = conv(up, params["w_c1"], params["b_c1"])
    return out.reshape(x.shape[0], H * W, C)


def feed_forward_reference(src, spatial_shapes, params, d_model):
    B = src.shape[0]
    outs, start = [], 0
    for (w, h) in spatial_shapes:
        n = w * h
        x = src[:, start:start + n, :].reshape(B, w, h, d_model)
        start += n
        outs.append(_reference_level(x, params, w, h, d_model))
    return jnp.concatenate(outs, axis=1)


# ---------------------------------------------------------------------------
# Deterministic synthetic parameters (shapes from the PyTorch __init__, HWIO).
# ---------------------------------------------------------------------------
def make_params(key, C):
    ks = jax.random.split(key, 10)

    def rn(k, shape, scale=0.1):
        return scale * jax.random.normal(k, shape, jnp.float32)

    return dict(
        w_b1=rn(ks[0], (3, 3, C, C)), b_b1=rn(ks[1], (C,)),
        gn1_w=1.0 + rn(ks[2], (C,)), gn1_b=rn(ks[3], (C,)),
        w_b2=rn(ks[4], (3, 3, C, C)), b_b2=rn(ks[5], (C,)),
        gn2_w=1.0 + rn(ks[6], (C,)), gn2_b=rn(ks[7], (C,)),
        w_c1=rn(ks[8], (3, 3, 2 * C, C)), b_c1=rn(ks[9], (C,)),
    )


if __name__ == "__main__":
    B = 2
    C = D_MODEL
    spatial_shapes = [(16, 16), (8, 8)]
    total = sum(w * h for w, h in spatial_shapes)

    key = jax.random.PRNGKey(0)
    k_src, k_par = jax.random.split(key)
    src = jax.random.normal(k_src, (B, total, C), jnp.float32)
    params = make_params(k_par, C)

    out = feed_forward_network(src, spatial_shapes, params, C)
    out = jax.block_until_ready(out)

    assert out.shape == (B, total, C), out.shape
    assert bool(jnp.all(jnp.isfinite(out)))

    ref = feed_forward_reference(src, spatial_shapes, params, C)
    ref = jax.block_until_ready(ref)
    max_err = float(jnp.max(jnp.abs(out - ref)))
    assert max_err < 0.1, f"kernel/reference mismatch: max |diff| = {max_err}"

    print("KERNEL_OK")
</pallas_src>

<mosaic_0001>
module attributes {stable_mosaic.version = 11 : i64} {
  func.func @kernel(%arg0: i32, %arg1: memref<1x16x16x32xf32, #tpu.memory_space<vmem>>, %arg2: memref<288x64xf32, #tpu.memory_space<vmem>>, %arg3: memref<1x64xf32, #tpu.memory_space<vmem>>, %arg4: memref<1x64xf32, #tpu.memory_space<vmem>>, %arg5: memref<1x64xf32, #tpu.memory_space<vmem>>, %arg6: memref<64x64xf32, #tpu.memory_space<vmem>>, %arg7: memref<576x32xf32, #tpu.memory_space<vmem>>, %arg8: memref<1x32xf32, #tpu.memory_space<vmem>>, %arg9: memref<256x196xf32, #tpu.memory_space<vmem>>, %arg10: memref<1x256x32xf32, #tpu.memory_space<vmem>>, %arg11: memref<18x18x32xf32, #tpu.memory_space<vmem>>, %arg12: memref<18x18x64xf32, #tpu.memory_space<vmem>>, %arg13: memref<196x64xf32, #tpu.memory_space<vmem>>, %arg14: memref<256x288xf32, #tpu.memory_space<vmem>>, %arg15: memref<256x576xf32, #tpu.memory_space<vmem>>) attributes {dimension_semantics = [#tpu.dimension_semantics<parallel>], iteration_bounds = array<i64: 2>, scalar_prefetch = 0 : i64, scratch_operands = 5 : i64, tpu.core_type = #tpu.core_type<tc>, window_params = [{transform_indices = @transform_0, window_bounds = array<i64: 1, 16, 16, 32>}, {pipeline_mode = #tpu.pipeline_mode<synchronous>, transform_indices = @transform_1, window_bounds = array<i64: 288, 64>}, {pipeline_mode = #tpu.pipeline_mode<synchronous>, transform_indices = @transform_2, window_bounds = array<i64: 1, 64>}, {pipeline_mode = #tpu.pipeline_mode<synchronous>, transform_indices = @transform_3, window_bounds = array<i64: 1, 64>}, {pipeline_mode = #tpu.pipeline_mode<synchronous>, transform_indices = @transform_4, window_bounds = array<i64: 1, 64>}, {pipeline_mode = #tpu.pipeline_mode<synchronous>, transform_indices = @transform_5, window_bounds = array<i64: 64, 64>}, {pipeline_mode = #tpu.pipeline_mode<synchronous>, transform_indices = @transform_6, window_bounds = array<i64: 576, 32>}, {pipeline_mode = #tpu.pipeline_mode<synchronous>, transform_indices = @transform_7, window_bounds = array<i64: 1, 32>}, {pipeline_mode = #tpu.pipeline_mode<synchronous>, transform_indices = @transform_8, window_bounds = array<i64: 256, 196>}, {transform_indices = @transform_9, window_bounds = array<i64: 1, 256, 32>}]} {
    %cst = arith.constant 0.000000e+00 : f32
    %0 = vector.broadcast %cst : f32 to vector<1x18x32xf32>
    %c0 = arith.constant 0 : index
    %c0_0 = arith.constant 0 : index
    %c0_1 = arith.constant 0 : index
    %1 = vector.load %arg11[%c0, %c0_0, %c0_1] : memref<18x18x32xf32, #tpu.memory_space<vmem>>, vector<1x18x32xf32>
    tpu.vector_store %arg11[%c0, %c0_0, %c0_1], %0 {strides = array<i32>} : memref<18x18x32xf32, #tpu.memory_space<vmem>>, vector<1x18x32xf32>,
    %cst_2 = arith.constant 0.000000e+00 : f32
    %2 = vector.broadcast %cst_2 : f32 to vector<1x18x32xf32>
    %c17 = arith.constant 17 : index
    %c0_3 = arith.constant 0 : index
    %c0_4 = arith.constant 0 : index
    %3 = vector.load %arg11[%c17, %c0_3, %c0_4] : memref<18x18x32xf32, #tpu.memory_space<vmem>>, vector<1x18x32xf32>
    tpu.vector_store %arg11[%c17, %c0_3, %c0_4], %2 {strides = array<i32>} : memref<18x18x32xf32, #tpu.memory_space<vmem>>, vector<1x18x32xf32>,
    %cst_5 = arith.constant 0.000000e+00 : f32
    %4 = vector.broadcast %cst_5 : f32 to vector<18x1x32xf32>
    %c0_6 = arith.constant 0 : index
    %c0_7 = arith.constant 0 : index
    %c0_8 = arith.constant 0 : index
    %5 = vector.load %arg11[%c0_6, %c0_7, %c0_8] : memref<18x18x32xf32, #tpu.memory_space<vmem>>, vector<18x1x32xf32>
    tpu.vector_store %arg11[%c0_6, %c0_7, %c0_8], %4 {strides = array<i32>} : memref<18x18x32xf32, #tpu.memory_space<vmem>>, vector<18x1x32xf32>,
    %cst_9 = arith.constant 0.000000e+00 : f32
    %6 = vector.broadcast %cst_9 : f32 to vector<18x1x32xf32>
    %c0_10 = arith.constant 0 : index
    %c17_11 = arith.constant 17 : index
    %c0_12 = arith.constant 0 : index
    %7 = vector.load %arg11[%c0_10, %c17_11, %c0_12] : memref<18x18x32xf32, #tpu.memory_space<vmem>>, vector<18x1x32xf32>
    tpu.vector_store %arg11[%c0_10, %c17_11, %c0_12], %6 {strides = array<i32>} : memref<18x18x32xf32, #tpu.memory_space<vmem>>, vector<18x1x32xf32>,
    %cst_13 = arith.constant 0.000000e+00 : f32
    %8 = vector.broadcast %cst_13 : f32 to vector<1x18x64xf32>
    %c0_14 = arith.constant 0 : index
    %c0_15 = arith.constant 0 : index
    %c0_16 = arith.constant 0 : index
    %9 = vector.load %arg12[%c0_14, %c0_15, %c0_16] : memref<18x18x64xf32, #tpu.memory_space<vmem>>, vector<1x18x64xf32>
    tpu.vector_store %arg12[%c0_14, %c0_15, %c0_16], %8 {strides = array<i32>} : memref<18x18x64xf32, #tpu.memory_space<vmem>>, vector<1x18x64xf32>,
    %cst_17 = arith.constant 0.000000e+00 : f32
    %10 = vector.broadcast %cst_17 : f32 to vector<1x18x64xf32>
    %c17_18 = arith.constant 17 : index
    %c0_19 = arith.constant 0 : index
    %c0_20 = arith.constant 0 : index
    %11 = vector.load %arg12[%c17_18, %c0_19, %c0_20] : memref<18x18x64xf32, #tpu.memory_space<vmem>>, vector<1x18x64xf32>
    tpu.vector_store %arg12[%c17_18, %c0_19, %c0_20], %10 {strides = array<i32>} : memref<18x18x64xf32, #tpu.memory_space<vmem>>, vector<1x18x64xf32>,
    %cst_21 = arith.constant 0.000000e+00 : f32
    %12 = vector.broadcast %cst_21 : f32 to vector<18x1x64xf32>
    %c0_22 = arith.constant 0 : index
    %c0_23 = arith.constant 0 : index
    %c0_24 = arith.constant 0 : index
    %13 = vector.load %arg12[%c0_22, %c0_23, %c0_24] : memref<18x18x64xf32, #tpu.memory_space<vmem>>, vector<18x1x64xf32>
    tpu.vector_store %arg12[%c0_22, %c0_23, %c0_24], %12 {strides = array<i32>} : memref<18x18x64xf32, #tpu.memory_space<vmem>>, vector<18x1x64xf32>,
    %cst_25 = arith.constant 0.000000e+00 : f32
    %14 = vector.broadcast %cst_25 : f32 to vector<18x1x64xf32>
    %c0_26 = arith.constant 0 : index
    %c17_27 = arith.constant 17 : index
    %c0_28 = arith.constant 0 : index
    %15 = vector.load %arg12[%c0_26, %c17_27, %c0_28] : memref<18x18x64xf32, #tpu.memory_space<vmem>>, vector<18x1x64xf32>
    tpu.vector_store %arg12[%c0_26, %c17_27, %c0_28], %14 {strides = array<i32>} : memref<18x18x64xf32, #tpu.memory_space<vmem>>, vector<18x1x64xf32>,
    %c0_29 = arith.constant 0 : index
    %c0_30 = arith.constant 0 : index
    %c0_31 = arith.constant 0 : index
    %c0_32 = arith.constant 0 : index
    %16 = vector.load %arg1[%c0_29, %c0_30, %c0_31, %c0_32] : memref<1x16x16x32xf32, #tpu.memory_space<vmem>>, vector<1x16x16x32xf32>
    %17 = vector.shape_cast %16 : vector<1x16x16x32xf32> to vector<16x16x32xf32>
    %c1 = arith.constant 1 : index
    %c1_33 = arith.constant 1 : index
    %c0_34 = arith.constant 0 : index
    %18 = vector.load %arg11[%c1, %c1_33, %c0_34] : memref<18x18x32xf32, #tpu.memory_space<vmem>>, vector<16x16x32xf32>
    tpu.vector_store %arg11[%c1, %c1_33, %c0_34], %17 {strides = array<i32>} : memref<18x18x32xf32, #tpu.memory_space<vmem>>, vector<16x16x32xf32>,
    %c0_35 = arith.constant 0 : index
    %c0_36 = arith.constant 0 : index
    %c0_37 = arith.constant 0 : index
    %19 = vector.load %arg11[%c0_35, %c0_36, %c0_37] : memref<18x18x32xf32, #tpu.memory_space<vmem>>, vector<16x16x32xf32>
    %20 = vector.shape_cast %19 : vector<16x16x32xf32> to vector<256x32xf32>
    %c0_38 = arith.constant 0 : index
    %c0_39 = arith.constant 0 : index
    %21 = vector.load %arg14[%c0_38, %c0_39] : memref<256x288xf32, #tpu.memory_space<vmem>>, vector<256x32xf32>
    tpu.vector_store %arg14[%c0_38, %c0_39], %20 {strides = array<i32>} : memref<256x288xf32, #tpu.memory_space<vmem>>, vector<256x32xf32>,
    %c0_40 = arith.constant 0 : index
    %c1_41 = arith.constant 1 : index
    %c0_42 = arith.constant 0 : index
    %22 = vector.load %arg11[%c0_40, %c1_41, %c0_42] : memref<18x18x32xf32, #tpu.memory_space<vmem>>, vector<16x16x32xf32>
    %23 = vector.shape_cast %22 : vector<16x16x32xf32> to vector<256x32xf32>
    %c0_43 = arith.constant 0 : index
    %c32 = arith.constant 32 : index
    %24 = vector.load %arg14[%c0_43, %c32] : memref<256x288xf32, #tpu.memory_space<vmem>>, vector<256x32xf32>
    tpu.vector_store %arg14[%c0_43, %c32], %23 {strides = array<i32>} : memref<256x288xf32, #tpu.memory_space<vmem>>, vector<256x32xf32>,
    %c0_44 = arith.constant 0 : index
    %c2 = arith.constant 2 : index
    %c0_45 = arith.constant 0 : index
    %25 = vector.load %arg11[%c0_44, %c2, %c0_45] : memref<18x18x32xf32, #tpu.memory_space<vmem>>, vector<16x16x32xf32>
    %26 = vector.shape_cast %25 : vector<16x16x32xf32> to vector<256x32xf32>
    %c0_46 = arith.constant 0 : index
    %c64 = arith.constant 64 : index
    %27 = vector.load %arg14[%c0_46, %c64] : memref<256x288xf32, #tpu.memory_space<vmem>>, vector<256x32xf32>
    tpu.vector_store %arg14[%c0_46, %c64], %26 {strides = array<i32>} : memref<256x288xf32, #tpu.memory_space<vmem>>, vector<256x32xf32>,
    %c1_47 = arith.constant 1 : index
    %c0_48 = arith.constant 0 : index
    %c0_49 = arith.constant 0 : index
    %28 = vector.load %arg11[%c1_47, %c0_48, %c0_49] : memref<18x18x32xf32, #tpu.memory_space<vmem>>, vector<16x16x32xf32>
    %29 = vector.shape_cast %28 : vector<16x16x32xf32> to vector<256x32xf32>
    %c0_50 = arith.constant 0 : index
    %c96 = arith.constant 96 : index
    %30 = vector.load %arg14[%c0_50, %c96] : memref<256x288xf32, #tpu.memory_space<vmem>>, vector<256x32xf32>
    tpu.vector_store %arg14[%c0_50, %c96], %29 {strides = array<i32>} : memref<256x288xf32, #tpu.memory_space<vmem>>, vector<256x32xf32>,
    %c1_51 = arith.constant 1 : index
    %c1_52 = arith.constant 1 : index
    %c0_53 = arith.constant 0 : index
    %31 = vector.load %arg11[%c1_51, %c1_52, %c0_53] : memref<18x18x32xf32, #tpu.memory_space<vmem>>, vector<16x16x32xf32>
    %32 = vector.shape_cast %31 : vector<16x16x32xf32> to vector<256x32xf32>
    %c0_54 = arith.constant 0 : index
    %c128 = arith.constant 128 : index
    %33 = vector.load %arg14[%c0_54, %c128] : memref<256x288xf32, #tpu.memory_space<vmem>>, vector<256x32xf32>
    tpu.vector_store %arg14[%c0_54, %c128], %32 {strides = array<i32>} : memref<256x288xf32, #tpu.memory_space<vmem>>, vector<256x32xf32>,
    %c1_55 = arith.constant 1 : index
    %c2_56 = arith.constant 2 : index
    %c0_57 = arith.constant 0 : index
    %34 = vector.load %arg11[%c1_55, %c2_56, %c0_57] : memref<18x18x32xf32, #tpu.memory_space<vmem>>, vector<16x16x32xf32>
    %35 = vector.shape_cast %34 : vector<16x16x32xf32> to vector<256x32xf32>
    %c0_58 = arith.constant 0 : index
    %c160 = arith.constant 160 : index
    %36 = vector.load %arg14[%c0_58, %c160] : memref<256x288xf32, #tpu.memory_space<vmem>>, vector<256x32xf32>
    tpu.vector_store %arg14[%c0_58, %c160], %35 {strides = array<i32>} : memref<256x288xf32, #tpu.memory_space<vmem>>, vector<256x32xf32>,
    %c2_59 = arith.constant 2 : index
    %c0_60 = arith.constant 0 : index
    %c0_61 = arith.constant 0 : index
    %37 = vector.load %arg11[%c2_59, %c0_60, %c0_61] : memref<18x18x32xf32, #tpu.memory_space<vmem>>, vector<16x16x32xf32>
    %38 = vector.shape_cast %37 : vector<16x16x32xf32> to vector<256x32xf32>
    %c0_62 = arith.constant 0 : index
    %c192 = arith.constant 192 : index
    %39 = vector.load %arg14[%c0_62, %c192] : memref<256x288xf32, #tpu.memory_space<vmem>>, vector<256x32xf32>
    tpu.vector_store %arg14[%c0_62, %c192], %38 {strides = array<i32>} : memref<256x288xf32, #tpu.memory_space<vmem>>, vector<256x32xf32>,
    %c2_63 = arith.constant 2 : index
    %c1_64 = arith.constant 1 : index
    %c0_65 = arith.constant 0 : index
    %40 = vector.load %arg11[%c2_63, %c1_64, %c0_65] : memref<18x18x32xf32, #tpu.memory_space<vmem>>, vector<16x16x32xf32>
    %41 = vector.shape_cast %40 : vector<16x16x32xf32> to vector<256x32xf32>
    %c0_66 = arith.constant 0 : index
    %c224 = arith.constant 224 : index
    %42 = vector.load %arg14[%c0_66, %c224] : memref<256x288xf32, #tpu.memory_space<vmem>>, vector<256x32xf32>
    tpu.vector_store %arg14[%c0_66, %c224], %41 {strides = array<i32>} : memref<256x288xf32, #tpu.memory_space<vmem>>, vector<256x32xf32>,
    %c2_67 = arith.constant 2 : index
    %c2_68 = arith.constant 2 : index
    %c0_69 = arith.constant 0 : index
    %43 = vector.load %arg11[%c2_67, %c2_68, %c0_69] : memref<18x18x32xf32, #tpu.memory_space<vmem>>, vector<16x16x32xf32>
    %44 = vector.shape_cast %43 : vector<16x16x32xf32> to vector<256x32xf32>
    %c0_70 = arith.constant 0 : index
    %c256 = arith.constant 256 : index
    %45 = vector.load %arg14[%c0_70, %c256] : memref<256x288xf32, #tpu.memory_space<vmem>>, vector<256x32xf32>
    tpu.vector_store %arg14[%c0_70, %c256], %44 {strides = array<i32>} : memref<256x288xf32, #tpu.memory_space<vmem>>, vector<256x32xf32>,
    %c0_71 = arith.constant 0 : index
    %c0_72 = arith.constant 0 : index
    %46 = vector.load %arg14[%c0_71, %c0_72] : memref<256x288xf32, #tpu.memory_space<vmem>>, vector<256x288xf32>
    %c0_73 = arith.constant 0 : index
    %c0_74 = arith.constant 0 : index
    %47 = vector.load %arg2[%c0_73, %c0_74] : memref<288x64xf32, #tpu.memory_space<vmem>>, vector<288x64xf32>
    %cst_75 = arith.constant dense<0.000000e+00> : vector<256x64xf32>
    %48 = tpu.matmul %46, %47, %cst_75 {dimension_numbers = #tpu.dot_dimension_numbers<[1], [0], [0], [1], [0, 0, 1, 1], [], []>} : vector<256x288xf32>, vector<288x64xf32>, vector<256x64xf32> -> vector<256x64xf32>
    %c0_76 = arith.constant 0 : index
    %c0_77 = arith.constant 0 : index
    %49 = vector.load %arg3[%c0_76, %c0_77] : memref<1x64xf32, #tpu.memory_space<vmem>>, vector<1x64xf32>
    %50 = vector.broadcast %49 : vector<1x64xf32> to vector<256x64xf32>
    %51 = arith.addf %48, %50 : vector<256x64xf32>
    %cst_78 = arith.constant dense<0.000000e+00> : vector<64xf32>
    %52 = vector.multi_reduction <add>, %51, %cst_78 [0] : vector<256x64xf32> to vector<64xf32>
    %53 = vector.shape_cast %52 : vector<64xf32> to vector<1x64xf32>
    %54 = arith.mulf %51, %51 : vector<256x64xf32>
    %cst_79 = arith.constant dense<0.000000e+00> : vector<64xf32>
    %55 = vector.multi_reduction <add>, %54, %cst_79 [0] : vector<256x64xf32> to vector<64xf32>
    %56 = vector.shape_cast %55 : vector<64xf32> to vector<1x64xf32>
    %57 = tpu.iota {dimensions = array<i32: 0>} : vector<2x64xi32>
    %c0_i32 = arith.constant 0 : i32
    %58 = vector.broadcast %c0_i32 : i32 to vector<2x64xi32>
    %59 = arith.cmpi eq, %57, %58 : vector<2x64xi32>
    %60 = vector.shape_cast %53 : vector<1x64xf32> to vector<1x64xf32>
    %61 = vector.broadcast %60 : vector<1x64xf32> to vector<2x64xf32>
    %62 = vector.shape_cast %56 : vector<1x64xf32> to vector<1x64xf32>
    %63 = vector.broadcast %62 : vector<1x64xf32> to vector<2x64xf32>
    %64 = arith.select %59, %61, %63 : vector<2x64xi1>, vector<2x64xf32>
    %c0_80 = arith.constant 0 : index
    %c0_81 = arith.constant 0 : index
    %65 = vector.load %arg6[%c0_80, %c0_81] : memref<64x64xf32, #tpu.memory_space<vmem>>, vector<64x64xf32>
    %cst_82 = arith.constant dense<0.000000e+00> : vector<2x64xf32>
    %66 = tpu.matmul %64, %65, %cst_82 {dimension_numbers = #tpu.dot_dimension_numbers<[1], [0], [0], [1], [0, 0, 1, 1], [], []>} : vector<2x64xf32>, vector<64x64xf32>, vector<2x64xf32> -> vector<2x64xf32>
    %67 = vector.extract_strided_slice %66 {offsets = [0, 0], sizes = [1, 64], strides = [1, 1]} : vector<2x64xf32> to vector<1x64xf32>
    %cst_83 = arith.constant 9.765625E-4 : f32
    %68 = vector.broadcast %cst_83 : f32 to vector<1x64xf32>
    %69 = arith.mulf %67, %68 : vector<1x64xf32>
    %70 = vector.extract_strided_slice %66 {offsets = [1, 0], sizes = [1, 64], strides = [1, 1]} : vector<2x64xf32> to vector<1x64xf32>
    %cst_84 = arith.constant 9.765625E-4 : f32
    %71 = vector.broadcast %cst_84 : f32 to vector<1x64xf32>
    %72 = arith.mulf %70, %71 : vector<1x64xf32>
    %73 = arith.mulf %69, %69 : vector<1x64xf32>
    %74 = arith.subf %72, %73 : vector<1x64xf32>
    %cst_85 = arith.constant 0.000000e+00 : f32
    %75 = vector.broadcast %cst_85 : f32 to vector<1x64xf32>
    %76 = arith.maximumf %74, %75 : vector<1x64xf32>
    %cst_86 = arith.constant 9.99999974E-6 : f32
    %77 = vector.broadcast %cst_86 : f32 to vector<1x64xf32>
    %78 = arith.addf %76, %77 : vector<1x64xf32>
    %79 = math.rsqrt %78 : vector<1x64xf32>
    %80 = vector.broadcast %69 : vector<1x64xf32> to vector<256x64xf32>
    %81 = arith.subf %51, %80 : vector<256x64xf32>
    %82 = vector.broadcast %79 : vector<1x64xf32> to vector<256x64xf32>
    %83 = arith.mulf %81, %82 : vector<256x64xf32>
    %c0_87 = arith.constant 0 : index
    %c0_88 = arith.constant 0 : index
    %84 = vector.load %arg4[%c0_87, %c0_88] : memref<1x64xf32, #tpu.memory_space<vmem>>, vector<1x64xf32>
    %85 = vector.broadcast %84 : vector<1x64xf32> to vector<256x64xf32>
    %86 = arith.mulf %83, %85 : vector<256x64xf32>
    %c0_89 = arith.constant 0 : index
    %c0_90 = arith.constant 0 : index
    %87 = vector.load %arg5[%c0_89, %c0_90] : memref<1x64xf32, #tpu.memory_space<vmem>>, vector<1x64xf32>
    %88 = vector.broadcast %87 : vector<1x64xf32> to vector<256x64xf32>
    %89 = arith.addf %86, %88 : vector<256x64xf32>
    %cst_91 = arith.constant 5.000000e-01 : f32
    %90 = vector.broadcast %cst_91 : f32 to vector<256x64xf32>
    %91 = arith.mulf %90, %89 : vector<256x64xf32>
    %cst_92 = arith.constant 0.707106769 : f32
    %92 = vector.broadcast %cst_92 : f32 to vector<256x64xf32>
    %93 = arith.mulf %89, %92 : vector<256x64xf32>
    %94 = math.erf %93 : vector<256x64xf32>
    %cst_93 = arith.constant 1.000000e+00 : f32
    %95 = vector.broadcast %cst_93 : f32 to vector<256x64xf32>
    %96 = arith.addf %95, %94 : vector<256x64xf32>
    %97 = arith.mulf %91, %96 : vector<256x64xf32>
    %98 = vector.shape_cast %97 : vector<256x64xf32> to vector<16x16x64xf32>
    %cst_94 = arith.constant 0.000000e+00 : f32
    %99 = vector.broadcast %cst_94 : f32 to vector<14x14x64xf32>
    %cst_95 = arith.constant 0xFF800000 : f32
    %100 = vector.broadcast %cst_95 : f32 to vector<14x14x64xf32>
    %101 = vector.extract_strided_slice %98 {offsets = [0, 0, 0], sizes = [14, 14, 64], strides = [1, 1, 1]} : vector<16x16x64xf32> to vector<14x14x64xf32>
    %102 = arith.addf %99, %101 : vector<14x14x64xf32>
    %103 = arith.maximumf %100, %101 : vector<14x14x64xf32>
    %104 = vector.extract_strided_slice %98 {offsets = [0, 1, 0], sizes = [14, 14, 64], strides = [1, 1, 1]} : vector<16x16x64xf32> to vector<14x14x64xf32>
    %105 = arith.addf %102, %104 : vector<14x14x64xf32>
    %106 = arith.maximumf %103, %104 : vector<14x14x64xf32>
    %107 = vector.extract_strided_slice %98 {offsets = [0, 2, 0], sizes = [14, 14, 64], strides = [1, 1, 1]} : vector<16x16x64xf32> to vector<14x14x64xf32>
    %108 = arith.addf %105, %107 : vector<14x14x64xf32>
    %109 = arith.maximumf %106, %107 : vector<14x14x64xf32>
    %110 = vector.extract_strided_slice %98 {offsets = [1, 0, 0], sizes = [14, 14, 64], strides = [1, 1, 1]} : vector<16x16x64xf32> to vector<14x14x64xf32>
    %111 = arith.addf %108, %110 : vector<14x14x64xf32>
    %112 = arith.maximumf %109, %110 : vector<14x14x64xf32>
    %113 = vector.extract_strided_slice %98 {offsets = [1, 1, 0], sizes = [14, 14, 64], strides = [1, 1, 1]} : vector<16x16x64xf32> to vector<14x14x64xf32>
    %114 = arith.addf %111, %113 : vector<14x14x64xf32>
    %115 = arith.maximumf %112, %113 : vector<14x14x64xf32>
    %116 = vector.extract_strided_slice %98 {offsets = [1, 2, 0], sizes = [14, 14, 64], strides = [1, 1, 1]} : vector<16x16x64xf32> to vector<14x14x64xf32>
    %117 = arith.addf %114, %116 : vector<14x14x64xf32>
    %118 = arith.maximumf %115, %116 : vector<14x14x64xf32>
    %119 = vector.extract_strided_slice %98 {offsets = [2, 0, 0], sizes = [14, 14, 64], strides = [1, 1, 1]} : vector<16x16x64xf32> to vector<14x14x64xf32>
    %120 = arith.addf %117, %119 : vector<14x14x64xf32>
    %121 = arith.maximumf %118, %119 : vector<14x14x64xf32>
    %122 = vector.extract_strided_slice %98 {offsets = [2, 1, 0], sizes = [14, 14, 64], strides = [1, 1, 1]} : vector<16x16x64xf32> to vector<14x14x64xf32>
    %123 = arith.addf %120, %122 : vector<14x14x64xf32>
    %124 = arith.maximumf %121, %122 : vector<14x14x64xf32>
    %125 = vector.extract_strided_slice %98 {offsets = [2, 2, 0], sizes = [14, 14, 64], strides = [1, 1, 1]} : vector<16x16x64xf32> to vector<14x14x64xf32>
    %126 = arith.addf %123, %125 : vector<14x14x64xf32>
    %127 = arith.maximumf %124, %125 : vector<14x14x64xf32>
    %128 = tpu.iota {dimensions = array<i32: 2>} : vector<14x14x64xi32>
    %c32_i32 = arith.constant 32 : i32
    %129 = vector.broadcast %c32_i32 : i32 to vector<14x14x64xi32>
    %130 = arith.cmpi slt, %128, %129 : vector<14x14x64xi32>
    %cst_96 = arith.constant 0.111111112 : f32
    %131 = vector.broadcast %cst_96 : f32 to vector<14x14x64xf32>
    %132 = arith.mulf %126, %131 : vector<14x14x64xf32>
    %133 = arith.select %130, %132, %127 : vector<14x14x64xi1>, vector<14x14x64xf32>
    %134 = vector.extract_strided_slice %133 {offsets = [0, 0, 0], sizes = [1, 14, 64], strides = [1, 1, 1]} : vector<14x14x64xf32> to vector<1x14x64xf32>
    %135 = vector.shape_cast %134 : vector<1x14x64xf32> to vector<14x64xf32>
    %c0_97 = arith.constant 0 : index
    %c0_98 = arith.constant 0 : index
    %136 = vector.load %arg13[%c0_97, %c0_98] : memref<196x64xf32, #tpu.memory_space<vmem>>, vector<14x64xf32>
    tpu.vector_store %arg13[%c0_97, %c0_98], %135 {strides = array<i32>} : memref<196x64xf32, #tpu.memory_space<vmem>>, vector<14x64xf32>,
    %137 = vector.extract_strided_slice %133 {offsets = [1, 0, 0], sizes = [1, 14, 64], strides = [1, 1, 1]} : vector<14x14x64xf32> to vector<1x14x64xf32>
    %138 = vector.shape_cast %137 : vector<1x14x64xf32> to vector<14x64xf32>
    %c14 = arith.constant 14 : index
    %c0_99 = arith.constant 0 : index
    %139 = vector.load %arg13[%c14, %c0_99] : memref<196x64xf32, #tpu.memory_space<vmem>>, vector<14x64xf32>
    tpu.vector_store %arg13[%c14, %c0_99], %138 {strides = array<i32>} : memref<196x64xf32, #tpu.memory_space<vmem>>, vector<14x64xf32>,
    %140 = vector.extract_strided_slice %133 {offsets = [2, 0, 0], sizes = [1, 14, 64], strides = [1, 1, 1]} : vector<14x14x64xf32> to vector<1x14x64xf32>
    %141 = vector.shape_cast %140 : vector<1x14x64xf32> to vector<14x64xf32>
    %c28 = arith.constant 28 : index
    %c0_100 = arith.constant 0 : index
    %142 = vector.load %arg13[%c28, %c0_100] : memref<196x64xf32, #tpu.memory_space<vmem>>, vector<14x64xf32>
    tpu.vector_store %arg13[%c28, %c0_100], %141 {strides = array<i32>} : memref<196x64xf32, #tpu.memory_space<vmem>>, vector<14x64xf32>,
    %143 = vector.extract_strided_slice %133 {offsets = [3, 0, 0], sizes = [1, 14, 64], strides = [1, 1, 1]} : vector<14x14x64xf32> to vector<1x14x64xf32>
    %144 = vector.shape_cast %143 : vector<1x14x64xf32> to vector<14x64xf32>
    %c42 = arith.constant 42 : index
    %c0_101 = arith.constant 0 : index
    %145 = vector.load %arg13[%c42, %c0_101] : memref<196x64xf32, #tpu.memory_space<vmem>>, vector<14x64xf32>
    tpu.vector_store %arg13[%c42, %c0_101], %144 {strides = array<i32>} : memref<196x64xf32, #tpu.memory_space<vmem>>, vector<14x64xf32>,
    %146 = vector.extract_strided_slice %133 {offsets = [4, 0, 0], sizes = [1, 14, 64], strides = [1, 1, 1]} : vector<14x14x64xf32> to vector<1x14x64xf32>
    %147 = vector.shape_cast %146 : vector<1x14x64xf32> to vector<14x64xf32>
    %c56 = arith.constant 56 : index
    %c0_102 = arith.constant 0 : index
    %148 = vector.load %arg13[%c56, %c0_102] : memref<196x64xf32, #tpu.memory_space<vmem>>, vector<14x64xf32>
    tpu.vector_store %arg13[%c56, %c0_102], %147 {strides = array<i32>} : memref<196x64xf32, #tpu.memory_space<vmem>>, vector<14x64xf32>,
    %149 = vector.extract_strided_slice %133 {offsets = [5, 0, 0], sizes = [1, 14, 64], strides = [1, 1, 1]} : vector<14x14x64xf32> to vector<1x14x64xf32>
    %150 = vector.shape_cast %149 : vector<1x14x64xf32> to vector<14x64xf32>
    %c70 = arith.constant 70 : index
    %c0_103 = arith.constant 0 : index
    %151 = vector.load %arg13[%c70, %c0_103] : memref<196x64xf32, #tpu.memory_space<vmem>>, vector<14x64xf32>
    tpu.vector_store %arg13[%c70, %c0_103], %150 {strides = array<i32>} : memref<196x64xf32, #tpu.memory_space<vmem>>, vector<14x64xf32>,
    %152 = vector.extract_strided_slice %133 {offsets = [6, 0, 0], sizes = [1, 14, 64], strides = [1, 1, 1]} : vector<14x14x64xf32> to vector<1x14x64xf32>
    %153 = vector.shape_cast %152 : vector<1x14x64xf32> to vector<14x64xf32>
    %c84 = arith.constant 84 : index
    %c0_104 = arith.constant 0 : index
    %154 = vector.load %arg13[%c84, %c0_104] : memref<196x64xf32, #tpu.memory_space<vmem>>, vector<14x64xf32>
    tpu.vector_store %arg13[%c84, %c0_104], %153 {strides = array<i32>} : memref<196x64xf32, #tpu.memory_space<vmem>>, vector<14x64xf32>,
    %155 = vector.extract_strided_slice %133 {offsets = [7, 0, 0], sizes = [1, 14, 64], strides = [1, 1, 1]} : vector<14x14x64xf32> to vector<1x14x64xf32>
    %156 = vector.shape_cast %155 : vector<1x14x64xf32> to vector<14x64xf32>
    %c98 = arith.constant 98 : index
    %c0_105 = arith.constant 0 : index
    %157 = vector.load %arg13[%c98, %c0_105] : memref<196x64xf32, #tpu.memory_space<vmem>>, vector<14x64xf32>
    tpu.vector_store %arg13[%c98, %c0_105], %156 {strides = array<i32>} : memref<196x64xf32, #tpu.memory_space<vmem>>, vector<14x64xf32>,
    %158 = vector.extract_strided_slice %133 {offsets = [8, 0, 0], sizes = [1, 14, 64], strides = [1, 1, 1]} : vector<14x14x64xf32> to vector<1x14x64xf32>
    %159 = vector.shape_cast %158 : vector<1x14x64xf32> to vector<14x64xf32>
    %c112 = arith.constant 112 : index
    %c0_106 = arith.constant 0 : index
    %160 = vector.load %arg13[%c112, %c0_106] : memref<196x64xf32, #tpu.memory_space<vmem>>, vector<14x64xf32>
    tpu.vector_store %arg13[%c112, %c0_106], %159 {strides = array<i32>} : memref<196x64xf32, #tpu.memory_space<vmem>>, vector<14x64xf32>,
    %161 = vector.extract_strided_slice %133 {offsets = [9, 0, 0], sizes = [1, 14, 64], strides = [1, 1, 1]} : vector<14x14x64xf32> to vector<1x14x64xf32>
    %162 = vector.shape_cast %161 : vector<1x14x64xf32> to vector<14x64xf32>
    %c126 = arith.constant 126 : index
    %c0_107 = arith.constant 0 : index
    %163 = vector.load %arg13[%c126, %c0_107] : memref<196x64xf32, #tpu.memory_space<vmem>>, vector<14x64xf32>
    tpu.vector_store %arg13[%c126, %c0_107], %162 {strides = array<i32>} : memref<196x64xf32, #tpu.memory_space<vmem>>, vector<14x64xf32>,
    %164 = vector.extract_strided_slice %133 {offsets = [10, 0, 0], sizes = [1, 14, 64], strides = [1, 1, 1]} : vector<14x14x64xf32> to vector<1x14x64xf32>
    %165 = vector.shape_cast %164 : vector<1x14x64xf32> to vector<14x64xf32>
    %c140 = arith.constant 140 : index
    %c0_108 = arith.constant 0 : index
    %166 = vector.load %arg13[%c140, %c0_108] : memref<196x64xf32, #tpu.memory_space<vmem>>, vector<14x64xf32>
    tpu.vector_store %arg13[%c140, %c0_108], %165 {strides = array<i32>} : memref<196x64xf32, #tpu.memory_space<vmem>>, vector<14x64xf32>,
    %167 = vector.extract_strided_slice %133 {offsets = [11, 0, 0], sizes = [1, 14, 64], strides = [1, 1, 1]} : vector<14x14x64xf32> to vector<1x14x64xf32>
    %168 = vector.shape_cast %167 : vector<1x14x64xf32> to vector<14x64xf32>
    %c154 = arith.constant 154 : index
    %c0_109 = arith.constant 0 : index
    %169 = vector.load %arg13[%c154, %c0_109] : memref<196x64xf32, #tpu.memory_space<vmem>>, vector<14x64xf32>
    tpu.vector_store %arg13[%c154, %c0_109], %168 {strides = array<i32>} : memref<196x64xf32, #tpu.memory_space<vmem>>, vector<14x64xf32>,
    %170 = vector.extract_strided_slice %133 {offsets = [12, 0, 0], sizes = [1, 14, 64], strides = [1, 1, 1]} : vector<14x14x64xf32> to vector<1x14x64xf32>
    %171 = vector.shape_cast %170 : vector<1x14x64xf32> to vector<14x64xf32>
    %c168 = arith.constant 168 : index
    %c0_110 = arith.constant 0 : index
    %172 = vector.load %arg13[%c168, %c0_110] : memref<196x64xf32, #tpu.memory_space<vmem>>, vector<14x64xf32>
    tpu.vector_store %arg13[%c168, %c0_110], %171 {strides = array<i32>} : memref<196x64xf32, #tpu.memory_space<vmem>>, vector<14x64xf32>,
    %173 = vector.extract_strided_slice %133 {offsets = [13, 0, 0], sizes = [1, 14, 64], strides = [1, 1, 1]} : vector<14x14x64xf32> to vector<1x14x64xf32>
    %174 = vector.shape_cast %173 : vector<1x14x64xf32> to vector<14x64xf32>
    %c182 = arith.constant 182 : index
    %c0_111 = arith.constant 0 : index
    %175 = vector.load %arg13[%c182, %c0_111] : memref<196x64xf32, #tpu.memory_space<vmem>>, vector<14x64xf32>
    tpu.vector_store %arg13[%c182, %c0_111], %174 {strides = array<i32>} : memref<196x64xf32, #tpu.memory_space<vmem>>, vector<14x64xf32>,
    %c0_112 = arith.constant 0 : index
    %c0_113 = arith.constant 0 : index
    %176 = vector.load %arg9[%c0_112, %c0_113] : memref<256x196xf32, #tpu.memory_space<vmem>>, vector<256x196xf32>
    %c0_114 = arith.constant 0 : index
    %c0_115 = arith.constant 0 : index
    %177 = vector.load %arg13[%c0_114, %c0_115] : memref<196x64xf32, #tpu.memory_space<vmem>>, vector<196x64xf32>
    %cst_116 = arith.constant dense<0.000000e+00> : vector<256x64xf32>
    %178 = tpu.matmul %176, %177, %cst_116 {dimension_numbers = #tpu.dot_dimension_numbers<[1], [0], [0], [1], [0, 0, 1, 1], [], []>} : vector<256x196xf32>, vector<196x64xf32>, vector<256x64xf32> -> vector<256x64xf32>
    %179 = vector.shape_cast %178 : vector<256x64xf32> to vector<16x16x64xf32>
    %c1_117 = arith.constant 1 : index
    %c1_118 = arith.constant 1 : index
    %c0_119 = arith.constant 0 : index
    %180 = vector.load %arg12[%c1_117, %c1_118, %c0_119] : memref<18x18x64xf32, #tpu.memory_space<vmem>>, vector<16x16x64xf32>
    tpu.vector_store %arg12[%c1_117, %c1_118, %c0_119], %179 {strides = array<i32>} : memref<18x18x64xf32, #tpu.memory_space<vmem>>, vector<16x16x64xf32>,
    %c0_120 = arith.constant 0 : index
    %c0_121 = arith.constant 0 : index
    %c0_122 = arith.constant 0 : index
    %181 = vector.load %arg12[%c0_120, %c0_121, %c0_122] : memref<18x18x64xf32, #tpu.memory_space<vmem>>, vector<16x16x64xf32>
    %182 = vector.shape_cast %181 : vector<16x16x64xf32> to vector<256x64xf32>
    %c0_123 = arith.constant 0 : index
    %c0_124 = arith.constant 0 : index
    %183 = vector.load %arg15[%c0_123, %c0_124] : memref<256x576xf32, #tpu.memory_space<vmem>>, vector<256x64xf32>
    tpu.vector_store %arg15[%c0_123, %c0_124], %182 {strides = array<i32>} : memref<256x576xf32, #tpu.memory_space<vmem>>, vector<256x64xf32>,
    %c0_125 = arith.constant 0 : index
    %c1_126 = arith.constant 1 : index
    %c0_127 = arith.constant 0 : index
    %184 = vector.load %arg12[%c0_125, %c1_126, %c0_127] : memref<18x18x64xf32, #tpu.memory_space<vmem>>, vector<16x16x64xf32>
    %185 = vector.shape_cast %184 : vector<16x16x64xf32> to vector<256x64xf32>
    %c0_128 = arith.constant 0 : index
    %c64_129 = arith.constant 64 : index
    %186 = vector.load %arg15[%c0_128, %c64_129] : memref<256x576xf32, #tpu.memory_space<vmem>>, vector<256x64xf32>
    tpu.vector_store %arg15[%c0_128, %c64_129], %185 {strides = array<i32>} : memref<256x576xf32, #tpu.memory_space<vmem>>, vector<256x64xf32>,
    %c0_130 = arith.constant 0 : index
    %c2_131 = arith.constant 2 : index
    %c0_132 = arith.constant 0 : index
    %187 = vector.load %arg12[%c0_130, %c2_131, %c0_132] : memref<18x18x64xf32, #tpu.memory_space<vmem>>, vector<16x16x64xf32>
    %188 = vector.shape_cast %187 : vector<16x16x64xf32> to vector<256x64xf32>
    %c0_133 = arith.constant 0 : index
    %c128_134 = arith.constant 128 : index
    %189 = vector.load %arg15[%c0_133, %c128_134] : memref<256x576xf32, #tpu.memory_space<vmem>>, vector<256x64xf32>
    tpu.vector_store %arg15[%c0_133, %c128_134], %188 {strides = array<i32>} : memref<256x576xf32, #tpu.memory_space<vmem>>, vector<256x64xf32>,
    %c1_135 = arith.constant 1 : index
    %c0_136 = arith.constant 0 : index
    %c0_137 = arith.constant 0 : index
    %190 = vector.load %arg12[%c1_135, %c0_136, %c0_137] : memref<18x18x64xf32, #tpu.memory_space<vmem>>, vector<16x16x64xf32>
    %191 = vector.shape_cast %190 : vector<16x16x64xf32> to vector<256x64xf32>
    %c0_138 = arith.constant 0 : index
    %c192_139 = arith.constant 192 : index
    %192 = vector.load %arg15[%c0_138, %c192_139] : memref<256x576xf32, #tpu.memory_space<vmem>>, vector<256x64xf32>
    tpu.vector_store %arg15[%c0_138, %c192_139], %191 {strides = array<i32>} : memref<256x576xf32, #tpu.memory_space<vmem>>, vector<256x64xf32>,
    %c1_140 = arith.constant 1 : index
    %c1_141 = arith.constant 1 : index
    %c0_142 = arith.constant 0 : index
    %193 = vector.load %arg12[%c1_140, %c1_141, %c0_142] : memref<18x18x64xf32, #tpu.memory_space<vmem>>, vector<16x16x64xf32>
    %194 = vector.shape_cast %193 : vector<16x16x64xf32> to vector<256x64xf32>
    %c0_143 = arith.constant 0 : index
    %c256_144 = arith.constant 256 : index
    %195 = vector.load %arg15[%c0_143, %c256_144] : memref<256x576xf32, #tpu.memory_space<vmem>>, vector<256x64xf32>
    tpu.vector_store %arg15[%c0_143, %c256_144], %194 {strides = array<i32>} : memref<256x576xf32, #tpu.memory_space<vmem>>, vector<256x64xf32>,
    %c1_145 = arith.constant 1 : index
    %c2_146 = arith.constant 2 : index
    %c0_147 = arith.constant 0 : index
    %196 = vector.load %arg12[%c1_145, %c2_146, %c0_147] : memref<18x18x64xf32, #tpu.memory_space<vmem>>, vector<16x16x64xf32>
    %197 = vector.shape_cast %196 : vector<16x16x64xf32> to vector<256x64xf32>
    %c0_148 = arith.constant 0 : index
    %c320 = arith.constant 320 : index
    %198 = vector.load %arg15[%c0_148, %c320] : memref<256x576xf32, #tpu.memory_space<vmem>>, vector<256x64xf32>
    tpu.vector_store %arg15[%c0_148, %c320], %197 {strides = array<i32>} : memref<256x576xf32, #tpu.memory_space<vmem>>, vector<256x64xf32>,
    %c2_149 = arith.constant 2 : index
    %c0_150 = arith.constant 0 : index
    %c0_151 = arith.constant 0 : index
    %199 = vector.load %arg12[%c2_149, %c0_150, %c0_151] : memref<18x18x64xf32, #tpu.memory_space<vmem>>, vector<16x16x64xf32>
    %200 = vector.shape_cast %199 : vector<16x16x64xf32> to vector<256x64xf32>
    %c0_152 = arith.constant 0 : index
    %c384 = arith.constant 384 : index
    %201 = vector.load %arg15[%c0_152, %c384] : memref<256x576xf32, #tpu.memory_space<vmem>>, vector<256x64xf32>
    tpu.vector_store %arg15[%c0_152, %c384], %200 {strides = array<i32>} : memref<256x576xf32, #tpu.memory_space<vmem>>, vector<256x64xf32>,
    %c2_153 = arith.constant 2 : index
    %c1_154 = arith.constant 1 : index
    %c0_155 = arith.constant 0 : index
    %202 = vector.load %arg12[%c2_153, %c1_154, %c0_155] : memref<18x18x64xf32, #tpu.memory_space<vmem>>, vector<16x16x64xf32>
    %203 = vector.shape_cast %202 : vector<16x16x64xf32> to vector<256x64xf32>
    %c0_156 = arith.constant 0 : index
    %c448 = arith.constant 448 : index
    %204 = vector.load %arg15[%c0_156, %c448] : memref<256x576xf32, #tpu.memory_space<vmem>>, vector<256x64xf32>
    tpu.vector_store %arg15[%c0_156, %c448], %203 {strides = array<i32>} : memref<256x576xf32, #tpu.memory_space<vmem>>, vector<256x64xf32>,
    %c2_157 = arith.constant 2 : index
    %c2_158 = arith.constant 2 : index
    %c0_159 = arith.constant 0 : index
    %205 = vector.load %arg12[%c2_157, %c2_158, %c0_159] : memref<18x18x64xf32, #tpu.memory_space<vmem>>, vector<16x16x64xf32>
    %206 = vector.shape_cast %205 : vector<16x16x64xf32> to vector<256x64xf32>
    %c0_160 = arith.constant 0 : index
    %c512 = arith.constant 512 : index
    %207 = vector.load %arg15[%c0_160, %c512] : memref<256x576xf32, #tpu.memory_space<vmem>>, vector<256x64xf32>
    tpu.vector_store %arg15[%c0_160, %c512], %206 {strides = array<i32>} : memref<256x576xf32, #tpu.memory_space<vmem>>, vector<256x64xf32>,
    %c0_161 = arith.constant 0 : index
    %c0_162 = arith.constant 0 : index
    %208 = vector.load %arg15[%c0_161, %c0_162] : memref<256x576xf32, #tpu.memory_space<vmem>>, vector<256x576xf32>
    %c0_163 = arith.constant 0 : index
    %c0_164 = arith.constant 0 : index
    %209 = vector.load %arg7[%c0_163, %c0_164] : memref<576x32xf32, #tpu.memory_space<vmem>>, vector<576x32xf32>
    %cst_165 = arith.constant dense<0.000000e+00> : vector<256x32xf32>
    %210 = tpu.matmul %208, %209, %cst_165 {dimension_numbers = #tpu.dot_dimension_numbers<[1], [0], [0], [1], [0, 0, 1, 1], [], []>} : vector<256x576xf32>, vector<576x32xf32>, vector<256x32xf32> -> vector<256x32xf32>
    %c0_166 = arith.constant 0 : index
    %c0_167 = arith.constant 0 : index
    %211 = vector.load %arg8[%c0_166, %c0_167] : memref<1x32xf32, #tpu.memory_space<vmem>>, vector<1x32xf32>
    %212 = vector.broadcast %211 : vector<1x32xf32> to vector<256x32xf32>
    %213 = arith.addf %210, %212 : vector<256x32xf32>
    %c0_168 = arith.constant 0 : index
    %c0_169 = arith.constant 0 : index
    %c0_170 = arith.constant 0 : index
    %214 = vector.load %arg10[%c0_168, %c0_169, %c0_170] : memref<1x256x32xf32, #tpu.memory_space<vmem>>, vector<1x256x32xf32>
    %215 = vector.shape_cast %214 : vector<1x256x32xf32> to vector<256x32xf32>
    %216 = vector.shape_cast %213 : vector<256x32xf32> to vector<1x256x32xf32>
    tpu.vector_store %arg10[%c0_168, %c0_169, %c0_170], %216 {strides = array<i32>} : memref<1x256x32xf32, #tpu.memory_space<vmem>>, vector<1x256x32xf32>,
    return
  }
  func.func @transform_0(%arg0: i32) -> (i32, i32, i32, i32) {
    %c0_i32 = arith.constant 0 : i32
    %c0_i32_0 = arith.constant 0 : i32
    %c0_i32_1 = arith.constant 0 : i32
    %c0_i32_2 = arith.constant 0 : i32
    return %arg0, %c0_i32, %c0_i32_0, %c0_i32_1 : i32, i32, i32, i32
  }
  func.func @transform_1(%arg0: i32) -> (i32, i32) {
    %c0_i32 = arith.constant 0 : i32
    %c0_i32_0 = arith.constant 0 : i32
    %c0_i32_1 = arith.constant 0 : i32
    return %c0_i32, %c0_i32_0 : i32, i32
  }
  func.func @transform_2(%arg0: i32) -> (i32, i32) {
    %c0_i32 = arith.constant 0 : i32
    %c0_i32_0 = arith.constant 0 : i32
    %c0_i32_1 = arith.constant 0 : i32
    return %c0_i32, %c0_i32_0 : i32, i32
  }
  func.func @transform_3(%arg0: i32) -> (i32, i32) {
    %c0_i32 = arith.constant 0 : i32
    %c0_i32_0 = arith.constant 0 : i32
    %c0_i32_1 = arith.constant 0 : i32
    return %c0_i32, %c0_i32_0 : i32, i32
  }
  func.func @transform_4(%arg0: i32) -> (i32, i32) {
    %c0_i32 = arith.constant 0 : i32
    %c0_i32_0 = arith.constant 0 : i32
    %c0_i32_1 = arith.constant 0 : i32
    return %c0_i32, %c0_i32_0 : i32, i32
  }
  func.func @transform_5(%arg0: i32) -> (i32, i32) {
    %c0_i32 = arith.constant 0 : i32
    %c0_i32_0 = arith.constant 0 : i32
    %c0_i32_1 = arith.constant 0 : i32
    return %c0_i32, %c0_i32_0 : i32, i32
  }
  func.func @transform_6(%arg0: i32) -> (i32, i32) {
    %c0_i32 = arith.constant 0 : i32
    %c0_i32_0 = arith.constant 0 : i32
    %c0_i32_1 = arith.constant 0 : i32
    return %c0_i32, %c0_i32_0 : i32, i32
  }
  func.func @transform_7(%arg0: i32) -> (i32, i32) {
    %c0_i32 = arith.constant 0 : i32
    %c0_i32_0 = arith.constant 0 : i32
    %c0_i32_1 = arith.constant 0 : i32
    return %c0_i32, %c0_i32_0 : i32, i32
  }
  func.func @transform_8(%arg0: i32) -> (i32, i32) {
    %c0_i32 = arith.constant 0 : i32
    %c0_i32_0 = arith.constant 0 : i32
    %c0_i32_1 = arith.constant 0 : i32
    return %c0_i32, %c0_i32_0 : i32, i32
  }
  func.func @transform_9(%arg0: i32) -> (i32, i32, i32) {
    %c0_i32 = arith.constant 0 : i32
    %c0_i32_0 = arith.constant 0 : i32
    %c0_i32_1 = arith.constant 0 : i32
    return %arg0, %c0_i32, %c0_i32_0 : i32, i32, i32
  }
}

</mosaic_0001>

<bundles_post_ra>
// kernel: tpu_custom_call.1
= control target key start
LH: loop header
LB: loop body
LE: loop exit
PB: predicated region body
PF: predicated region fallthrough
CT: control target
= control target key end

     0   :  { %s6971_s30 = smov 0   ;;  %s11777_s0 = inlined_call_operand.vmem [shape: f32[2,16,16,32], index: 0, kind: input, shape index: {}]   ;;  %s11778_s1 = inlined_call_operand.vmem [shape: f32[288,64], index: 1, kind: input, shape index: {}]   ;;  %s11779_s2 = inlined_call_operand.vmem [shape: f32[1,64], index: 2, kind: input, shape index: {}]   ;;  %s11780_s3 = inlined_call_operand.vmem [shape: f32[1,64], index: 3, kind: input, shape index: {}]   ;;  %s11781_s4 = inlined_call_operand.vmem [shape: f32[1,64], index: 4, kind: input, shape index: {}]   ;;  %s11782_s5 = inlined_call_operand.vmem [shape: f32[64,64], index: 5, kind: input, shape index: {}]   ;;  %s11783_s6 = inlined_call_operand.vmem [shape: f32[576,32], index: 6, kind: input, shape index: {}]   ;;  %s11784_s7 = inlined_call_operand.vmem [shape: f32[1,32], index: 7, kind: input, shape index: {}]   ;;  %s11785_s8 = inlined_call_operand.vmem [shape: f32[256,196], index: 8, kind: input, shape index: {}]   ;;  %s11786_s9 = inlined_call_operand.vmem [shape: f32[2,256,32], index: 9, kind: output, shape index: {}]  }
   0x1 LB: > { %s6490_s10 = sadd.s32 4294967295, %s6914_s30   ;;  %p6494_p0 = scmp.ge.s32.totalorder %s6914_s30, 1  ;;  %s6914_s30 = sphi %s6971_s30, %s19_s30  }
   0x2   : > { %p287_p1 = scmp.lt.s32.totalorder %s6914_s30, 3 }
   0x4   : > { %p288_p2 = pnand %p6494_p0, %p287_p1 }
   0x6   : > { %291 = sbr.rel (%p288_p2) target bundleno = 2008 (0x7d8), region = 56 }
   0xb   : > { %vm333_vm0 = vcmask 261120   ;;  %vm342_vm1 = vcmask 253952   ;;  %vm336_vm2 = vcmask 254976   ;;  %v11787_v0 = vmov 0.0   ;;  %p323_p3 = scmp.lt.s32.totalorder %s6490_s10, 1  ;;  %v1949_v1 = vld [vmem:[%s11778_s1 + $0x78] sm:$0xff] }
   0xc   : > { %334 = vst.msk [vmem:[#allocation2] sm:$0xff] %vm333_vm0, %v11787_v0  ;;  %335 = vst.msk [vmem:[#allocation2 + $0x8] sm:$0xff] %vm333_vm0, %v11787_v0  ;;  %2073 = vmatprep.subr.mxu0 %v11787_v0  ;;  %v1948_v2 = vld [vmem:[%s11778_s1 + $0x70] sm:$0xff]  ;;  %v1947_v3 = vld [vmem:[%s11778_s1 + $0x68] sm:$0xff]  ;;  %s6917_s27 = smov 64   ;;  %s6918_s28 = smov 32  }
   0xd   : > { %339 = vst.msk [vmem:[#allocation2 + $0x198] sm:$0xff] %vm333_vm0, %v11787_v0  ;;  %340 = vst.msk [vmem:[#allocation2 + $0x1a0] sm:$0xff] %vm333_vm0, %v11787_v0  ;;  %2074 = vmatpush1.msra.mxu0 %v1949_v1  ;;  %s12409_s10 = smov (!%p323_p3, %s6490_s10), 1  ;;  %v1946_v4 = vld [vmem:[%s11778_s1 + $0x60] sm:$0xff]  ;;  %v1945_v5 = vld [vmem:[%s11778_s1 + $0x58] sm:$0xff]  ;;  %s6919_s21 = smov 96  }
   0xe   : > { %344 = vst.msk [vmem:[#allocation2 + $0x18] sm:$0x1] %vm342_vm1, %v11787_v0  ;;  %345 = vst.msk [vmem:[#allocation2 + $0x30] sm:$0x1] %vm342_vm1, %v11787_v0  ;;  %2075 = vmatprep.subr.mxu0 %v11787_v0  ;;  %s6603_s17 = sshll.u32 %s12409_s10, 8  ;;  %v1944_v11 = vld [vmem:[%s11778_s1 + $0x50] sm:$0xff] }
   0xf   : > { %346 = vst.msk [vmem:[#allocation2 + $0x48] sm:$0x1] %vm342_vm1, %v11787_v0  ;;  %347 = vst.msk [vmem:[#allocation2 + $0x60] sm:$0x1] %vm342_vm1, %v11787_v0  ;;  %2076 = vmatpush1.msra.mxu0 %v1948_v2  ;;  %s7090_s22 = scalar_lea.vmem %s11777_s0, %s6603_s17  ;;  %v1943_v21 = vld [vmem:[%s11778_s1 + $0x48] sm:$0xff]  ;;  %v1942_v24 = vld [vmem:[%s11778_s1 + $0x40] sm:$0xff]  ;;  %s11637_s20 = scalar_lea.vmem %s11786_s9, %s6603_s17 }
  0x10   : > { %348 = vst.msk [vmem:[#allocation2 + $0x78] sm:$0x1] %vm342_vm1, %v11787_v0  ;;  %349 = vst.msk [vmem:[#allocation2 + $0x90] sm:$0x1] %vm342_vm1, %v11787_v0  ;;  %2077 = vmatprep.subr.mxu0 %v11787_v0  ;;  %v425_v6 = vld [vmem:[%s7090_s22] sm:$0xff]  ;;  %v426_v7 = vld [vmem:[%s7090_s22 + $0x8] sm:$0xff] }
  0x11   : > { %350 = vst.msk [vmem:[#allocation2 + $0xa8] sm:$0x1] %vm342_vm1, %v11787_v0  ;;  %351 = vst.msk [vmem:[#allocation2 + $0xc0] sm:$0x1] %vm342_vm1, %v11787_v0  ;;  %2078 = vmatpush1.msra.mxu0 %v1947_v3  ;;  %v427_v8 = vld [vmem:[%s7090_s22 + $0x10] sm:$0xff]  ;;  %v428_v13 = vld [vmem:[%s7090_s22 + $0x18] sm:$0xff] }
  0x12   : > { %352 = vst.msk [vmem:[#allocation2 + $0xd8] sm:$0x1] %vm342_vm1, %v11787_v0  ;;  %353 = vst.msk [vmem:[#allocation2 + $0xf0] sm:$0x1] %vm342_vm1, %v11787_v0  ;;  %2079 = vmatprep.subr.mxu0 %v11787_v0  ;;  %v429_v14 = vld [vmem:[%s7090_s22 + $0x20] sm:$0xff]  ;;  %v430_v15 = vld [vmem:[%s7090_s22 + $0x28] sm:$0xff] }
  0x13   : > { %354 = vst.msk [vmem:[#allocation2 + $0x108] sm:$0x1] %vm342_vm1, %v11787_v0  ;;  %355 = vst.msk [vmem:[#allocation2 + $0x120] sm:$0x1] %vm342_vm1, %v11787_v0  ;;  %v747_v9 = vld [vmem:[#allocation2 + $0x2] sm:$0xff]  ;;  %2080 = vmatpush1.msra.mxu0 %v1946_v4  ;;  %v431_v16 = vld [vmem:[%s7090_s22 + $0x30] sm:$0xff] }
  0x14   : > { %356 = vst.msk [vmem:[#allocation2 + $0x138] sm:$0x1] %vm342_vm1, %v11787_v0  ;;  %357 = vst.msk [vmem:[#allocation2 + $0x150] sm:$0x1] %vm342_vm1, %v11787_v0  ;;  %v554_v10 = vld [vmem:[#allocation2 + $0x1] sm:$0xff]  ;;  %811 = vrot.lane.b32.xlu1 %v747_v9, %s6917_s27  ;;  %v432_v17 = vld [vmem:[%s7090_s22 + $0x38] sm:$0xff]  ;;  %2081 = vmatprep.subr.mxu0 %v11787_v0 }
  0x15   : > { %358 = vst.msk [vmem:[#allocation2 + $0x168] sm:$0x1] %vm342_vm1, %v11787_v0  ;;  %359 = vst.msk [vmem:[#allocation2 + $0x180] sm:$0x1] %vm342_vm1, %v11787_v0  ;;  %618 = vrot.lane.b32.xlu0 %v554_v10, %s6918_s28  ;;  %v433_v18 = vld [vmem:[%s7090_s22 + $0x40] sm:$0xff]  ;;  %2082 = vmatpush1.msra.mxu0 %v1945_v5  ;;  %v434_v19 = vld [vmem:[%s7090_s22 + $0x48] sm:$0xff] }
  0x16   : > { %362 = vst.msk [vmem:[#allocation2 + $0x29] sm:$0x1] %vm342_vm1, %v11787_v0  ;;  %363 = vst.msk [vmem:[#allocation2 + $0x41] sm:$0x1] %vm342_vm1, %v11787_v0  ;;  %v435_v20 = vld [vmem:[%s7090_s22 + $0x50] sm:$0xff]  ;;  %2083 = vmatprep.subr.mxu0 %v11787_v0  ;;  %v436_v22 = vld [vmem:[%s7090_s22 + $0x58] sm:$0xff] }
  0x17   : > { %364 = vst.msk [vmem:[#allocation2 + $0x59] sm:$0x1] %vm342_vm1, %v11787_v0  ;;  %365 = vst.msk [vmem:[#allocation2 + $0x71] sm:$0x1] %vm342_vm1, %v11787_v0  ;;  %2084 = vmatpush1.msra.mxu0 %v1944_v11  ;;  %v1941_v25 = vld [vmem:[%s11778_s1 + $0x38] sm:$0xff]  ;;  %v491_v26 = vld [vmem:[#allocation2 + $0x8] sm:$0xff] }
  0x18   : > { %366 = vst.msk [vmem:[#allocation2 + $0x89] sm:$0x1] %vm342_vm1, %v11787_v0  ;;  %367 = vst.msk [vmem:[#allocation2 + $0xa1] sm:$0x1] %vm342_vm1, %v11787_v0  ;;  %2085 = vmatprep.subr.mxu0 %v11787_v0  ;;  %v1940_v32 = vld [vmem:[%s11778_s1 + $0x30] sm:$0xff]  ;;  %v1939_v39 = vld [vmem:[%s11778_s1 + $0x28] sm:$0xff] }
  0x19   : > { %368 = vst.msk [vmem:[#allocation2 + $0xb9] sm:$0x1] %vm342_vm1, %v11787_v0  ;;  %369 = vst.msk [vmem:[#allocation2 + $0xd1] sm:$0x1] %vm342_vm1, %v11787_v0  ;;  %2086 = vmatpush1.msra.mxu0 %v1943_v21  ;;  %v1938_v47 = vld [vmem:[%s11778_s1 + $0x20] sm:$0xff]  ;;  %v1937_v57 = vld [vmem:[%s11778_s1 + $0x18] sm:$0xff] }
  0x1a   : > { %370 = vst.msk [vmem:[#allocation2 + $0xe9] sm:$0x1] %vm342_vm1, %v11787_v0  ;;  %371 = vst.msk [vmem:[#allocation2 + $0x101] sm:$0x1] %vm342_vm1, %v11787_v0  ;;  %2087 = vmatprep.subr.mxu0 %v11787_v0  ;;  %v1936_v61 = vld [vmem:[%s11778_s1 + $0x10] sm:$0xff]  ;;  %v437_v1 = vld [vmem:[%s7090_s22 + $0x60] sm:$0xff] }
  0x1b   : > { %372 = vst.msk [vmem:[#allocation2 + $0x119] sm:$0x1] %vm342_vm1, %v11787_v0  ;;  %373 = vst.msk [vmem:[#allocation2 + $0x131] sm:$0x1] %vm342_vm1, %v11787_v0  ;;  %2088 = vmatpush1.msra.mxu0 %v1942_v24  ;;  %v1935_v2 = vld [vmem:[%s11778_s1 + $0x8] sm:$0xff]  ;;  %v1969_v3 = vld [vmem:[%s11778_s1 + $0x118] sm:$0xff] }
  0x1c   : > { %374 = vst.msk [vmem:[#allocation2 + $0x149] sm:$0x1] %vm342_vm1, %v11787_v0  ;;  %375 = vst.msk [vmem:[#allocation2 + $0x161] sm:$0x1] %vm342_vm1, %v11787_v0  ;;  %2089 = vmatprep.subr.mxu0 %v11787_v0  ;;  %v1934_v4 = vld [vmem:[%s11778_s1] sm:$0xff]  ;;  %6690 = vmatprep.subr.mxu1 %v1969_v3  ;;  %v439_v9 = vld [vmem:[%s7090_s22 + $0x70] sm:$0xff] }
  0x1d   : > { %376 = vst.msk [vmem:[#allocation2 + $0x179] sm:$0x1] %vm342_vm1, %v11787_v0  ;;  %377 = vst.msk [vmem:[#allocation2 + $0x191] sm:$0x1] %vm342_vm1, %v11787_v0  ;;  %2090 = vmatpush1.msra.mxu0 %v1941_v25  ;;  %6691 = vmatpush3.msra.mxu1 %v1969_v3  ;;  %v1964_v10 = vld [vmem:[%s11778_s1 + $0xf0] sm:$0xff]  ;;  %v1950_v3 = vld [vmem:[%s11778_s1 + $0x80] sm:$0xff] }
  0x1e   : > { %337 = vst.msk [vmem:[#allocation2 + $0x10] sm:$0x3] %vm336_vm2, %v11787_v0  ;;  %341 = vst.msk [vmem:[#allocation2 + $0x1a8] sm:$0x3] %vm336_vm2, %v11787_v0  ;;  %2091 = vmatprep.subr.mxu0 %v11787_v0  ;;  %v1960_v24 = vld [vmem:[%s11778_s1 + $0xd0] sm:$0xff]  ;;  %vm714_vm3 = vcmask 523520  }
  0x1f   : > { %343 = vst.msk [vmem:[#allocation2] sm:$0x1] %vm342_vm1, %v11787_v0  ;;  %360 = vst.msk [vmem:[#allocation2 + $0x198] sm:$0x1] %vm342_vm1, %v11787_v0  ;;  %2092 = vmatpush1.msra.mxu0 %v1940_v32  ;;  %vm907_vm4 = vcmask 785920   ;;  %vm1100_vm5 = vcmask 1048320  }
  0x20   : > { %361 = vst.msk [vmem:[#allocation2 + $0x11] sm:$0x1] %vm342_vm1, %v11787_v0  ;;  %378 = vst.msk [vmem:[#allocation2 + $0x1a9] sm:$0x1] %vm342_vm1, %v11787_v0  ;;  %2093 = vmatprep.subr.mxu0 %v11787_v0  ;;  %vm379_vm6 = vcmask 523264   ;;  %vm6920_vm7 = vmmov 0  }
  0x21   : > { %458 = vst.msk [vmem:[#allocation2 + $0x19] sm:$0xff] %vm333_vm0, %v425_v6  ;;  %459 = vst.msk [vmem:[#allocation2 + $0x21] sm:$0xff] %vm333_vm0, %v426_v7  ;;  %2094 = vmatpush1.msra.mxu0 %v1939_v39  ;;  %v1968_v6 = vld [vmem:[%s11778_s1 + $0x110] sm:$0xff]  ;;  %v1965_v7 = vld [vmem:[%s11778_s1 + $0xf8] sm:$0xff]  ;;  %vm3153_vm9 = vcmask 1046528   ;;  %vm3280_vm10 = vcmask 1045504  }
  0x22   : > { %460 = vst.msk [vmem:[#allocation2 + $0x31] sm:$0xff] %vm333_vm0, %v427_v8  ;;  %461 = vst.msk [vmem:[#allocation2 + $0x39] sm:$0xff] %vm333_vm0, %v428_v13  ;;  %2095 = vmatprep.subr.mxu0 %v11787_v0  ;;  %v438_v8 = vld [vmem:[%s7090_s22 + $0x68] sm:$0xff]  ;;  %6692 = vmatprep.subr.mxu1 %v1968_v6  ;;  %v440_v13 = vld [vmem:[%s7090_s22 + $0x78] sm:$0xff]  ;;  %vm3827_vm12 = vcmask 521216   ;;  %vm3944_vm13 = vcmask 556032  }
  0x23   : > { %462 = vst.msk [vmem:[#allocation2 + $0x49] sm:$0xff] %vm333_vm0, %v429_v14  ;;  %463 = vst.msk [vmem:[#allocation2 + $0x51] sm:$0xff] %vm333_vm0, %v430_v15  ;;  %2096 = vmatpush1.msra.mxu0 %v1938_v47  ;;  %6693 = vmatpush3.msra.mxu1 %v1968_v6  ;;  %v1963_v14 = vld [vmem:[%s11778_s1 + $0xe8] sm:$0xff]  ;;  %v1962_v15 = vld [vmem:[%s11778_s1 + $0xe0] sm:$0xff]  ;;  %vm4041_vm14 = vcmask 1043456   ;;  %vm382_vm15 = vcmask 517120  }
  0x24   : > { %464 = vst.msk [vmem:[#allocation2 + $0x61] sm:$0xff] %vm333_vm0, %v431_v16  ;;  %465 = vst.msk [vmem:[#allocation2 + $0x69] sm:$0xff] %vm333_vm0, %v432_v17  ;;  %2097 = vmatprep.subr.mxu0 %v11787_v0  ;;  %v1961_v16 = vld [vmem:[%s11778_s1 + $0xd8] sm:$0xff]  ;;  %v1966_v17 = vld [vmem:[%s11778_s1 + $0x100] sm:$0xff]  ;;  %vm388_vm1 = vcmask 516096   ;;  %vm4527_vm2 = vcmask 1048064  }
  0x25   : > { %v555_v12 = vld [vmem:[#allocation2 + $0x9] sm:$0xff]  ;;  %466 = vst.msk [vmem:[#allocation2 + $0x79] sm:$0xff] %vm333_vm0, %v433_v18  ;;  %467 = vst.msk [vmem:[#allocation2 + $0x81] sm:$0xff] %vm333_vm0, %v434_v19  ;;  %2098 = vmatpush1.msra.mxu0 %v1937_v57  ;;  %v1957_v39 = vld [vmem:[%s11778_s1 + $0xb8] sm:$0xff] }
  0x26   : > { %468 = vst.msk [vmem:[#allocation2 + $0x91] sm:$0xff] %vm333_vm0, %v435_v20  ;;  %620 = vrot.lane.b32.xlu1 %v555_v12, %s6918_s28  ;;  %v490_v23 = vld [vmem:[#allocation2] sm:$0xff]  ;;  %469 = vst.msk [vmem:[#allocation2 + $0x99] sm:$0xff] %vm333_vm0, %v436_v22  ;;  %2099 = vmatprep.subr.mxu0 %v11787_v0  ;;  %v1967_v12 = vld [vmem:[%s11778_s1 + $0x108] sm:$0xff] }
  0x27   : > { %522 = vst.msk [vmem:[#allocation5] sm:$0xff] %vm333_vm0, %v490_v23  ;;  %523 = vst.msk [vmem:[#allocation5 + $0x18] sm:$0xff] %vm333_vm0, %v491_v26  ;;  %v748_v51 = vld [vmem:[#allocation2 + $0xa] sm:$0xff]  ;;  %2100 = vmatpush1.msra.mxu0 %v1936_v61  ;;  %6694 = vmatprep.subr.mxu1 %v1967_v12  ;;  %v1954_v57 = vld [vmem:[%s11778_s1 + $0xa0] sm:$0xff] }
  0x28   : > { %v7139_v27 = vld [vmem:[#allocation2 + $0x1a] sm:$0xff]  ;;  %v7185_v40 = vld [vmem:[#allocation2 + $0x22] sm:$0xff]  ;;  %470 = vst.msk [vmem:[#allocation2 + $0xa9] sm:$0xff] %vm333_vm0, %v437_v1  ;;  %2101 = vmatprep.subr.mxu0 %v11787_v0  ;;  %471 = vst.msk [vmem:[#allocation2 + $0xb1] sm:$0xff] %vm333_vm0, %v438_v8  ;;  %6695 = vmatpush3.msra.mxu1 %v1967_v12 }
  0x29   : > { %v7141_v28 = vld [vmem:[#allocation2 + $0x30] sm:$0xff]  ;;  %1261 = vrot.lane.b32.xlu0 %v7139_v27, %s6918_s28  ;;  %v940_v30 = vld [vmem:[#allocation2 + $0x18] sm:$0xff]  ;;  %v7148_v31 = vld [vmem:[#allocation2 + $0x20] sm:$0xff]  ;;  %2102 = vmatpush1.msra.mxu0 %v1935_v2  ;;  %472 = vst.msk [vmem:[#allocation2 + $0xc1] sm:$0xff] %vm333_vm0, %v439_v9 }
  0x2a   : > { %v7143_v29 = vld [vmem:[#allocation2 + $0x31] sm:$0xff]  ;;  %526 = vst.msk [vmem:[#allocation5 + $0x60] sm:$0xff] %vm333_vm0, %v7141_v28  ;;  %1454 = vrot.lane.b32.xlu1 %v7141_v28, %s6917_s27  ;;  %v7162_v34 = vld [vmem:[#allocation2 + $0x39] sm:$0xff]  ;;  %524 = vst.msk [vmem:[#allocation5 + $0x30] sm:$0xff] %vm333_vm0, %v940_v30  ;;  %2103 = vmatprep.subr.mxu0 %v11787_v0 }
  0x2b   : > { %1167 = vst.msk [vmem:[#allocation5 + $0x38] sm:$0xff] %vm333_vm0, %v7143_v29  ;;  %v7160_v33 = vld [vmem:[#allocation2 + $0x38] sm:$0xff]  ;;  %525 = vst.msk [vmem:[#allocation5 + $0x48] sm:$0xff] %vm333_vm0, %v7148_v31  ;;  %v7171_v37 = vld [vmem:[#allocation2 + $0x48] sm:$0xff]  ;;  %2104 = vmatpush1.msra.mxu0 %v1934_v4  ;;  %6696 = vmatprep.subr.mxu1 %v1966_v17 }
  0x2c   : > { %v7164_v35 = vld [vmem:[#allocation2 + $0x32] sm:$0xff]  ;;  %v7173_v38 = vld [vmem:[#allocation2 + $0x49] sm:$0xff]  ;;  %1168 = vst.msk [vmem:[#allocation5 + $0x50] sm:$0xff] %vm333_vm0, %v7162_v34  ;;  %527 = vst.msk [vmem:[#allocation5 + $0x78] sm:$0xff] %vm333_vm0, %v7160_v33  ;;  %2105 = vmatprep.subr.mxu0 %v11787_v0  ;;  %6697 = vmatpush3.msra.mxu1 %v1966_v17 }
  0x2d   : > { %v7169_v36 = vld [vmem:[#allocation2 + $0x19] sm:$0xff]  ;;  %1806 = vst.msk [vmem:[#allocation5 + $0x10] sm:$0xff] %vm333_vm0, %v7164_v35  ;;  %v7189_v42 = vld [vmem:[#allocation2 + $0x21] sm:$0xff]  ;;  %v7191_v43 = vld [vmem:[#allocation2 + $0x50] sm:$0xff]  ;;  %1646 = vrot.lane.b32.xlu0 %v7143_v29, %s6919_s21  ;;  %2106 = vmatpush2.msra.mxu0 %v1965_v7 }
  0x2e   : > { %v7187_v41 = vld [vmem:[#allocation2 + $0x3a] sm:$0xff]  ;;  %1165 = vst.msk [vmem:[#allocation5 + $0x8] sm:$0xff] %vm333_vm0, %v7169_v36  ;;  %1169 = vst.msk [vmem:[#allocation5 + $0x68] sm:$0xff] %vm333_vm0, %v7173_v38  ;;  %v7201_v44 = vld [vmem:[#allocation2 + $0x51] sm:$0xff]  ;;  %1004 = vrot.lane.b32.xlu1 %v940_v30, %s6919_s21  ;;  %2107 = vmatprep.subr.mxu0 %v11787_v0 }
  0x2f   : > { %528 = vst.msk [vmem:[#allocation5 + $0x90] sm:$0xff] %vm333_vm0, %v7171_v37  ;;  %v7203_v45 = vld [vmem:[#allocation2 + $0x4a] sm:$0xff]  ;;  %v7205_v46 = vld [vmem:[#allocation2 + $0x60] sm:$0xff]  ;;  %1166 = vst.msk [vmem:[#allocation5 + $0x20] sm:$0xff] %vm333_vm0, %v7189_v42  ;;  %2108 = vmatpush2.msra.mxu0 %v1964_v10  ;;  %6746 = vmatprep.subr.mxu1 %v11787_v0 }
  0x30   : > { %1807 = vst.msk [vmem:[#allocation5 + $0x28] sm:$0xff] %vm333_vm0, %v7187_v41  ;;  %529 = vst.msk [vmem:[#allocation5 + $0xa8] sm:$0xff] %vm333_vm0, %v7191_v43  ;;  %v7218_v48 = vld [vmem:[#allocation2 + $0x61] sm:$0xff]  ;;  %v7220_v49 = vld [vmem:[#allocation2 + $0x52] sm:$0xff]  ;;  %2109 = vmatprep.subr.mxu0 %v11787_v0 }
  0x31   : > { %v7222_v50 = vld [vmem:[#allocation2 + $0x68] sm:$0xff]  ;;  %1808 = vst.msk [vmem:[#allocation5 + $0x40] sm:$0xff] %vm333_vm0, %v7203_v45  ;;  %1170 = vst.msk [vmem:[#allocation5 + $0x80] sm:$0xff] %vm333_vm0, %v7201_v44  ;;  %v7241_v54 = vld [vmem:[#allocation2 + $0x79] sm:$0xff]  ;;  %1263 = vrot.lane.b32.xlu0 %v7185_v40, %s6918_s28  ;;  %2110 = vmatpush2.msra.mxu0 %v1963_v14 }
  0x32   : > { %530 = vst.msk [vmem:[#allocation5 + $0xc0] sm:$0xff] %vm333_vm0, %v7205_v46  ;;  %v7230_v52 = vld [vmem:[#allocation2 + $0x69] sm:$0xff]  ;;  %1809 = vst.msk [vmem:[#allocation5 + $0x58] sm:$0xff] %vm333_vm0, %v7220_v49  ;;  %v7252_v56 = vld [vmem:[#allocation2 + $0x81] sm:$0xff]  ;;  %813 = vrot.lane.b32.xlu1 %v748_v51, %s6917_s27  ;;  %2111 = vmatprep.subr.mxu0 %v11787_v0 }
  0x33   : > { %v7232_v53 = vld [vmem:[#allocation2 + $0x62] sm:$0xff]  ;;  %1171 = vst.msk [vmem:[#allocation5 + $0x98] sm:$0xff] %vm333_vm0, %v7218_v48  ;;  %531 = vst.msk [vmem:[#allocation5 + $0xd8] sm:$0xff] %vm333_vm0, %v7222_v50  ;;  %v7243_v55 = vld [vmem:[#allocation2 + $0x6a] sm:$0xff]  ;;  %2112 = vmatpush2.msra.mxu0 %v1962_v15 }
  0x34   : > { %1810 = vst.msk [vmem:[#allocation5 + $0x70] sm:$0xff] %vm333_vm0, %v7232_v53  ;;  %1172 = vst.msk [vmem:[#allocation5 + $0xb0] sm:$0xff] %vm333_vm0, %v7230_v52  ;;  %v7257_v58 = vld [vmem:[#allocation2 + $0x7a] sm:$0xff]  ;;  %v7264_v59 = vld [vmem:[#allocation2 + $0x91] sm:$0xff]  ;;  %2113 = vmatprep.subr.mxu0 %v11787_v0 }
  0x35   : > { %1811 = vst.msk [vmem:[#allocation5 + $0x88] sm:$0xff] %vm333_vm0, %v7243_v55  ;;  %1173 = vst.msk [vmem:[#allocation5 + $0xc8] sm:$0xff] %vm333_vm0, %v7241_v54  ;;  %v7266_v60 = vld [vmem:[#allocation2 + $0x82] sm:$0xff]  ;;  %v7276_v62 = vld [vmem:[#allocation2 + $0x99] sm:$0xff]  ;;  %1456 = vrot.lane.b32.xlu0 %v7160_v33, %s6917_s27  ;;  %2114 = vmatpush2.msra.mxu0 %v1961_v16 }
  0x36   : > { %1812 = vst.msk [vmem:[#allocation5 + $0xa0] sm:$0xff] %vm333_vm0, %v7257_v58  ;;  %1174 = vst.msk [vmem:[#allocation5 + $0xe0] sm:$0xff] %vm333_vm0, %v7252_v56  ;;  %v7278_v63 = vld [vmem:[#allocation2 + $0x92] sm:$0xff]  ;;  %1006 = vrot.lane.b32.xlu1 %v7148_v31, %s6919_s21  ;;  %v7305_v5 = vld [vmem:[#allocation2 + $0x9a] sm:$0xff]  ;;  %2115 = vmatprep.subr.mxu0 %v11787_v0 }
  0x37   : > { %1813 = vst.msk [vmem:[#allocation5 + $0xb8] sm:$0xff] %vm333_vm0, %v7266_v60  ;;  %1175 = vst.msk [vmem:[#allocation5 + $0xf8] sm:$0xff] %vm333_vm0, %v7264_v59  ;;  %v7328_v11 = vld [vmem:[#allocation2 + $0xa9] sm:$0xff]  ;;  %v7360_v19 = vld [vmem:[#allocation2 + $0xb1] sm:$0xff]  ;;  %2116 = vmatpush2.msra.mxu0 %v1960_v24 }
  0x38   : > { %1814 = vst.msk [vmem:[#allocation5 + $0xd0] sm:$0xff] %vm333_vm0, %v7278_v63  ;;  %1176 = vst.msk [vmem:[#allocation5 + $0x110] sm:$0xff] %vm333_vm0, %v7276_v62  ;;  %v7358_v18 = vld [vmem:[#allocation2 + $0xb0] sm:$0xff]  ;;  %v7366_v21 = vld [vmem:[#allocation2 + $0xc0] sm:$0xff]  ;;  %2117 = vmatprep.subr.mxu0 %v11787_v0 }
  0x39   : > { %1815 = vst.msk [vmem:[#allocation5 + $0xe8] sm:$0xff] %vm333_vm0, %v7305_v5  ;;  %1648 = vrot.lane.b32.xlu0 %v7162_v34, %s6919_s21  ;;  %473 = vst.msk [vmem:[#allocation2 + $0xc9] sm:$0xff] %vm333_vm0, %v440_v13  ;;  %v7362_v20 = vld [vmem:[#allocation2 + $0xaa] sm:$0xff]  ;;  %v7368_v22 = vld [vmem:[#allocation2 + $0xc1] sm:$0xff] }
  0x3a   : > { %622 = vrot.lane.b32.xlu1 %v7169_v36, %s6918_s28  ;;  %1177 = vst.msk [vmem:[#allocation5 + $0x128] sm:$0xff] %vm333_vm0, %v7328_v11  ;;  %v7370_v23 = vld [vmem:[#allocation2 + $0xb2] sm:$0xff]  ;;  %1816 = vst.msk [vmem:[#allocation5 + $0x100] sm:$0xff] %vm333_vm0, %v7362_v20  ;;  %v1958_v30 = vld [vmem:[%s11778_s1 + $0xc0] sm:$0xff] }
  0x3b   : > { %1178 = vst.msk [vmem:[#allocation5 + $0x140] sm:$0xff] %vm333_vm0, %v7360_v19  ;;  %537 = vst.msk [vmem:[#allocation5 + $0x168] sm:$0xff] %vm333_vm0, %v7358_v18  ;;  %v1840_v25 = vld [vmem:[#allocation5 + $0x10] sm:$0xff]  ;;  %v1846_v31 = vld [vmem:[#allocation5 + $0x40] sm:$0xff] }
  0x3c   : > { %1817 = vst.msk [vmem:[#allocation5 + $0x118] sm:$0xff] %vm333_vm0, %v7370_v23  ;;  %1179 = vst.msk [vmem:[#allocation5 + $0x158] sm:$0xff] %vm333_vm0, %v7368_v22  ;;  %6698 = vmatprep.mubr.msk.f32.mxu1 %vm333_vm0, %v1840_v25  ;;  %v441_v36 = vld [vmem:[%s7090_s22 + $0x80] sm:$0xff]  ;;  %v1956_v47 = vld [vmem:[%s11778_s1 + $0xb0] sm:$0xff] }
  0x3d   : > { %1265 = vrot.lane.b32.xlu0 %v7164_v35, %s6918_s28  ;;  %538 = vst.msk [vmem:[#allocation5 + $0x180] sm:$0xff] %vm333_vm0, %v7366_v21  ;;  %474 = vst.msk [vmem:[#allocation2 + $0xd9] sm:$0xff] %vm333_vm0, %v441_v36  ;;  %v1953_v61 = vld [vmem:[%s11778_s1 + $0x98] sm:$0xff]  ;;  %v442_v2 = vld [vmem:[%s7090_s22 + $0x88] sm:$0xff] }
  0x3e   : > { %815 = vrot.lane.b32.xlu1 %v7139_v27, %s6917_s27  ;;  %v1959_v27 = vld [vmem:[%s11778_s1 + $0xc8] sm:$0xff]  ;;  %475 = vst.msk [vmem:[#allocation2 + $0xe1] sm:$0xff] %vm333_vm0, %v442_v2  ;;  %v1852_v4 = vld [vmem:[#allocation5 + $0x70] sm:$0xff]  ;;  %v1855_v6 = vld [vmem:[#allocation5 + $0x88] sm:$0xff] }
  0x3f   : > { %2118 = vmatpush2.msra.mxu0 %v1959_v27  ;;  %v443_v8 = vld [vmem:[%s7090_s22 + $0x90] sm:$0xff]  ;;  %v1396_v9 = vld [vmem:[#allocation2 + $0x78] sm:$0xff]  ;;  %v445_v12 = vld [vmem:[%s7090_s22 + $0xa0] sm:$0xff]  ;;  %380 = vst.msk [vmem:[#allocation3] sm:$0xff] %vm379_vm6, %v11787_v0 }
  0x40   : > { %v7388_v26 = vld [vmem:[#allocation2 + $0xc8] sm:$0xff]  ;;  %2119 = vmatprep.subr.mxu0 %v11787_v0  ;;  %476 = vst.msk [vmem:[#allocation2 + $0xf1] sm:$0xff] %vm333_vm0, %v443_v8  ;;  %478 = vst.msk [vmem:[#allocation2 + $0x109] sm:$0xff] %vm333_vm0, %v445_v12  ;;  %v1397_v13 = vld [vmem:[#allocation2 + $0x80] sm:$0xff] }
  0x41   : > { %1458 = vrot.lane.b32.xlu0 %v7171_v37, %s6917_s27  ;;  %539 = vst.msk [vmem:[#allocation5 + $0x198] sm:$0xff] %vm333_vm0, %v7388_v26  ;;  %v7406_v32 = vld [vmem:[#allocation2 + $0xc9] sm:$0xff]  ;;  %2120 = vmatpush2.msra.mxu0 %v1958_v30  ;;  %v7586_v24 = vld [vmem:[#allocation2 + $0x98] sm:$0xff]  ;;  %v501_v30 = vld [vmem:[#allocation2 + $0x80] sm:$0xff] }
  0x42   : > { %1008 = vrot.lane.b32.xlu1 %v7141_v28, %s6919_s21  ;;  %v1843_v28 = vld [vmem:[#allocation5 + $0x28] sm:$0xff]  ;;  %1180 = vst.msk [vmem:[#allocation5 + $0x170] sm:$0xff] %vm333_vm0, %v7406_v32  ;;  %2121 = vmatprep.subr.mxu0 %v11787_v0  ;;  %v7426_v51 = vld [vmem:[#allocation2 + $0xc2] sm:$0xff]  ;;  %533 = vst.msk [vmem:[#allocation5 + $0x108] sm:$0xff] %vm333_vm0, %v501_v30 }
  0x43   : > { %6699 = vmatmul.mubr.msk.f32.vlgmr.msra.gmra.mxu1 %vm333_vm0, %v1843_v28  ;;  %2122 = vmatpush2.msra.mxu0 %v1957_v39  ;;  %1818 = vst.msk [vmem:[#allocation5 + $0x130] sm:$0xff] %vm333_vm0, %v7426_v51  ;;  %v7474_v7 = vld [vmem:[#allocation2 + $0xca] sm:$0xff]  ;;  %v448_v39 = vld [vmem:[%s7090_s22 + $0xb8] sm:$0xff] }
  0x44   : > { %6701 = vmatprep.mubr.msk.f32.mxu1 %vm333_vm0, %v1846_v31  ;;  %2123 = vmatprep.subr.mxu0 %v11787_v0  ;;  %v7455_v1 = vld [vmem:[#allocation2 + $0xd9] sm:$0xff]  ;;  %1819 = vst.msk [vmem:[#allocation5 + $0x148] sm:$0xff] %vm333_vm0, %v7474_v7  ;;  %v446_v14 = vld [vmem:[%s7090_s22 + $0xa8] sm:$0xff]  ;;  %v447_v17 = vld [vmem:[%s7090_s22 + $0xb0] sm:$0xff] }
  0x45   : > { %1650 = vrot.lane.b32.xlu0 %v7173_v38, %s6919_s21  ;;  %2124 = vmatpush2.msra.mxu0 %v1956_v47  ;;  %1181 = vst.msk [vmem:[#allocation5 + $0x188] sm:$0xff] %vm333_vm0, %v7455_v1  ;;  %v7522_v10 = vld [vmem:[#allocation2 + $0xe2] sm:$0xff]  ;;  %479 = vst.msk [vmem:[#allocation2 + $0x111] sm:$0xff] %vm333_vm0, %v446_v14 }
  0x46   : > { %624 = vrot.lane.b32.xlu1 %v7189_v42, %s6918_s28  ;;  %v1849_v42 = vld [vmem:[#allocation5 + $0x58] sm:$0xff]  ;;  %2125 = vmatprep.subr.mxu0 %v11787_v0  ;;  %1821 = vst.msk [vmem:[#allocation5 + $0x178] sm:$0xff] %vm333_vm0, %v7522_v10  ;;  %480 = vst.msk [vmem:[#allocation2 + $0x121] sm:$0xff] %vm333_vm0, %v447_v17  ;;  %v1870_v47 = vld [vmem:[#allocation5 + $0x100] sm:$0xff] }
  0x47   : > { %6702 = vmatmul.mubr.msk.f32.gmra.mxu1 %vm333_vm0, %v1849_v42  ;;  %481 = vst.msk [vmem:[#allocation2 + $0x129] sm:$0xff] %vm333_vm0, %v448_v39  ;;  %v504_v39 = vld [vmem:[#allocation2 + $0xa8] sm:$0xff] }
  0x48   : > { %6704 = vmatprep.mubr.msk.f32.mxu1 %vm333_vm0, %v1852_v4  ;;  %536 = vst.msk [vmem:[#allocation5 + $0x150] sm:$0xff] %vm333_vm0, %v504_v39 }
  0x49   : > { %1267 = vrot.lane.b32.xlu0 %v7187_v41, %s6918_s28  ;;  %381 = vst.msk [vmem:[#allocation3 + $0x8] sm:$0xff] %vm379_vm6, %v11787_v0  ;;  %385 = vst.msk [vmem:[#allocation3 + $0x198] sm:$0xff] %vm379_vm6, %v11787_v0 }
  0x4a   : > { %817 = vrot.lane.b32.xlu1 %v7185_v40, %s6917_s27  ;;  %v1955_v40 = vld [vmem:[%s11778_s1 + $0xa8] sm:$0xff]  ;;  %v1876_v17 = vld [vmem:[#allocation5 + $0x130] sm:$0xff]  ;;  %386 = vst.msk [vmem:[#allocation3 + $0x1a0] sm:$0xff] %vm379_vm6, %v11787_v0 }
  0x4b   : > { %2126 = vmatpush2.msra.mxu0 %v1955_v40  ;;  %6705 = vmatmul.mubr.msk.f32.gmra.mxu1 %vm333_vm0, %v1855_v6 }
  0x4c   : > { %2127 = vmatprep.subr.mxu0 %v11787_v0  ;;  %v7578_v16 = vld [vmem:[#allocation2 + $0x111] sm:$0xff] }
  0x4d   : > { %1460 = vrot.lane.b32.xlu0 %v7191_v43, %s6917_s27  ;;  %2128 = vmatpush2.msra.mxu0 %v1954_v57  ;;  %1186 = vst.msk [vmem:[#allocation5 + $0x200] sm:$0xff] %vm333_vm0, %v7578_v16  ;;  %v7590_v27 = vld [vmem:[#allocation2 + $0x10a] sm:$0xff]  ;;  %v7606_v36 = vld [vmem:[#allocation2 + $0x121] sm:$0xff] }
  0x4e   : > { %1010 = vrot.lane.b32.xlu1 %v7160_v33, %s6919_s21  ;;  %2129 = vmatprep.subr.mxu0 %v11787_v0  ;;  %v1952_v33 = vld [vmem:[%s11778_s1 + $0x90] sm:$0xff]  ;;  %1824 = vst.msk [vmem:[#allocation5 + $0x1c0] sm:$0xff] %vm333_vm0, %v7590_v27  ;;  %1187 = vst.msk [vmem:[#allocation5 + $0x218] sm:$0xff] %vm333_vm0, %v7606_v36  ;;  %v1873_v57 = vld [vmem:[#allocation5 + $0x118] sm:$0xff] }
  0x4f   : > { %2130 = vmatpush2.msra.mxu0 %v1953_v61  ;;  %v7621_v61 = vld [vmem:[#allocation2 + $0x112] sm:$0xff]  ;;  %v7638_v8 = vld [vmem:[#allocation2 + $0x129] sm:$0xff] }
  0x50   : > { %2131 = vmatprep.subr.mxu0 %v11787_v0  ;;  %1825 = vst.msk [vmem:[#allocation5 + $0x1d8] sm:$0xff] %vm333_vm0, %v7621_v61  ;;  %1188 = vst.msk [vmem:[#allocation5 + $0x230] sm:$0xff] %vm333_vm0, %v7638_v8 }
  0x51   : > { %1652 = vrot.lane.b32.xlu0 %v7201_v44, %s6919_s21  ;;  %2132 = vmatpush2.msra.mxu0 %v1952_v33 }
  0x52   : > { %626 = vrot.lane.b32.xlu1 %v7143_v29, %s6918_s28  ;;  %v1951_v29 = vld [vmem:[%s11778_s1 + $0x88] sm:$0xff]  ;;  %2133 = vmatprep.subr.mxu0 %v11787_v0 }
  0x53   : > { %2134 = vmatpush2.msra.mxu0 %v1951_v29 }
  0x54   : > { %2135 = vmatprep.subr.mxu0 %v11787_v0 }
  0x55   : > { %1269 = vrot.lane.b32.xlu0 %v7203_v45, %s6918_s28  ;;  %2136 = vmatpush2.msra.mxu0 %v1950_v3  ;;  %v502_v3 = vld [vmem:[#allocation2 + $0x90] sm:$0xff] }
  0x56   : > { %819 = vrot.lane.b32.xlu1 %v7164_v35, %s6917_s27  ;;  %5728 = vmatprep.subr.mxu0 %v11787_v0  ;;  %v7489_v35 = vld [vmem:[#allocation2 + $0xe1] sm:$0xff]  ;;  %534 = vst.msk [vmem:[#allocation5 + $0x120] sm:$0xff] %vm333_vm0, %v502_v3 }
  0x57   : > { %1182 = vst.msk [vmem:[#allocation5 + $0x1a0] sm:$0xff] %vm333_vm0, %v7489_v35 }
  0x59   : > { %1462 = vrot.lane.b32.xlu0 %v7205_v46, %s6917_s27 }
  0x5a   : > { %1012 = vrot.lane.b32.xlu1 %v7171_v37, %s6919_s21  ;;  %v7499_v37 = vld [vmem:[#allocation2 + $0xda] sm:$0xff] }
  0x5b   : > { %1820 = vst.msk [vmem:[#allocation5 + $0x160] sm:$0xff] %vm333_vm0, %v7499_v37 }
  0x5d   : > { %1654 = vrot.lane.b32.xlu0 %v7218_v48, %s6919_s21 }
  0x5e   : > { %628 = vrot.lane.b32.xlu1 %v7162_v34, %s6918_s28  ;;  %v7511_v34 = vld [vmem:[#allocation2 + $0xf1] sm:$0xff] }
  0x5f   : > { %1183 = vst.msk [vmem:[#allocation5 + $0x1b8] sm:$0xff] %vm333_vm0, %v7511_v34 }
  0x61   : > { %1271 = vrot.lane.b32.xlu0 %v7220_v49, %s6918_s28 }
  0x62   : > { %821 = vrot.lane.b32.xlu1 %v7187_v41, %s6917_s27  ;;  %v444_v41 = vld [vmem:[%s7090_s22 + $0x98] sm:$0xff] }
  0x63   : > { %477 = vst.msk [vmem:[#allocation2 + $0xf9] sm:$0xff] %vm333_vm0, %v444_v41  ;;  %v449_v41 = vld [vmem:[%s7090_s22 + $0xc0] sm:$0xff] }
  0x64   : > { %482 = vst.msk [vmem:[#allocation2 + $0x139] sm:$0xff] %vm333_vm0, %v449_v41  ;;  %v1882_v41 = vld [vmem:[#allocation5 + $0x160] sm:$0xff] }
  0x65   : > { %1464 = vrot.lane.b32.xlu0 %v7222_v50, %s6917_s27 }
  0x66   : > { %1014 = vrot.lane.b32.xlu1 %v7191_v43, %s6919_s21  ;;  %v1858_v43 = vld [vmem:[#allocation5 + $0xa0] sm:$0xff] }
  0x67   : > { %6707 = vmatprep.mubr.msk.f32.mxu1 %vm333_vm0, %v1858_v43  ;;  %v7650_v43 = vld [vmem:[#allocation2 + $0x122] sm:$0xff] }
  0x68   : > { %1826 = vst.msk [vmem:[#allocation5 + $0x1f0] sm:$0xff] %vm333_vm0, %v7650_v43 }
  0x69   : > { %1656 = vrot.lane.b32.xlu0 %v7230_v52, %s6919_s21 }
  0x6a   : > { %630 = vrot.lane.b32.xlu1 %v7173_v38, %s6918_s28  ;;  %v1861_v38 = vld [vmem:[#allocation5 + $0xb8] sm:$0xff] }
  0x6b   : > { %6708 = vmatmul.mubr.msk.f32.gmra.mxu1 %vm333_vm0, %v1861_v38  ;;  %v7566_v15 = vld [vmem:[#allocation2 + $0xfa] sm:$0xff] }
  0x6c   : > { %1823 = vst.msk [vmem:[#allocation5 + $0x1a8] sm:$0xff] %vm333_vm0, %v7566_v15 }
  0x6d   : > { %1273 = vrot.lane.b32.xlu0 %v7232_v53, %s6918_s28 }
  0x6e   : > { %823 = vrot.lane.b32.xlu1 %v7203_v45, %s6917_s27  ;;  %v7534_v45 = vld [vmem:[#allocation2 + $0xf9] sm:$0xff] }
  0x6f   : > { %1184 = vst.msk [vmem:[#allocation5 + $0x1d0] sm:$0xff] %vm333_vm0, %v7534_v45 }
  0x71   : > { %1466 = vrot.lane.b32.xlu0 %v1396_v9, %s6917_s27 }
  0x72   : > { %1016 = vrot.lane.b32.xlu1 %v7205_v46, %s6919_s21  ;;  %v7544_v46 = vld [vmem:[#allocation2 + $0xf2] sm:$0xff] }
  0x73   : > { %1822 = vst.msk [vmem:[#allocation5 + $0x190] sm:$0xff] %vm333_vm0, %v7544_v46 }
  0x75   : > { %1658 = vrot.lane.b32.xlu0 %v7241_v54, %s6919_s21 }
  0x76   : > { %632 = vrot.lane.b32.xlu1 %v7201_v44, %s6918_s28  ;;  %v7555_v44 = vld [vmem:[#allocation2 + $0x109] sm:$0xff] }
  0x77   : > { %1185 = vst.msk [vmem:[#allocation5 + $0x1e8] sm:$0xff] %vm333_vm0, %v7555_v44 }
  0x79   : > { %1275 = vrot.lane.b32.xlu0 %v7243_v55, %s6918_s28 }
  0x7a   : > { %825 = vrot.lane.b32.xlu1 %v7220_v49, %s6917_s27  ;;  %v1398_v49 = vld [vmem:[#allocation2 + $0x90] sm:$0xff]  ;;  %v1888_v39 = vld [vmem:[#allocation5 + $0x190] sm:$0xff] }
  0x7d   : > { %1468 = vrot.lane.b32.xlu0 %v1397_v13, %s6917_s27 }
  0x7e   : > { %1018 = vrot.lane.b32.xlu1 %v7222_v50, %s6919_s21  ;;  %v1864_v50 = vld [vmem:[#allocation5 + $0xd0] sm:$0xff] }
  0x7f   : > { %6710 = vmatprep.mubr.msk.f32.mxu1 %vm333_vm0, %v1864_v50 }
  0x81   : > { %1660 = vrot.lane.b32.xlu0 %v7252_v56, %s6919_s21 }
  0x82   : > { %634 = vrot.lane.b32.xlu1 %v7218_v48, %s6918_s28  ;;  %v1867_v48 = vld [vmem:[#allocation5 + $0xe8] sm:$0xff] }
  0x83   : > { %6711 = vmatmul.mubr.msk.f32.gmra.mxu1 %vm333_vm0, %v1867_v48  ;;  %v7667_v48 = vld [vmem:[#allocation2 + $0x139] sm:$0xff] }
  0x84   : > { %6713 = vmatprep.mubr.msk.f32.mxu1 %vm333_vm0, %v1870_v47  ;;  %1189 = vst.msk [vmem:[#allocation5 + $0x248] sm:$0xff] %vm333_vm0, %v7667_v48  ;;  %v451_v47 = vld [vmem:[%s7090_s22 + $0xd0] sm:$0xff] }
  0x85   : > { %1277 = vrot.lane.b32.xlu0 %v7257_v58, %s6918_s28  ;;  %484 = vst.msk [vmem:[#allocation2 + $0x151] sm:$0xff] %vm333_vm0, %v451_v47  ;;  %v1891_v47 = vld [vmem:[#allocation5 + $0x1a8] sm:$0xff] }
  0x86   : > { %827 = vrot.lane.b32.xlu1 %v7232_v53, %s6917_s27  ;;  %v500_v53 = vld [vmem:[#allocation2 + $0x78] sm:$0xff] }
  0x87   : > { %532 = vst.msk [vmem:[#allocation5 + $0xf0] sm:$0xff] %vm333_vm0, %v500_v53  ;;  %v619_v25 = vpop.permute.xlu0 %618  ;;  %6714 = vmatmul.mubr.msk.f32.gmra.mxu1 %vm333_vm0, %v1873_v57  ;;  %v450_v53 = vld [vmem:[%s7090_s22 + $0xc8] sm:$0xff] }
  0x88   : > { %715 = vst.msk [vmem:[#allocation5] sm:$0xff] %vm714_vm3, %v619_v25  ;;  %6716 = vmatprep.mubr.msk.f32.mxu1 %vm333_vm0, %v1876_v17  ;;  %v7680_v25 = vld [vmem:[#allocation2 + $0x12a] sm:$0xff] }
  0x89   : > { %1470 = vrot.lane.b32.xlu0 %v1398_v49, %s6917_s27  ;;  %483 = vst.msk [vmem:[#allocation2 + $0x141] sm:$0xff] %vm333_vm0, %v450_v53  ;;  %1827 = vst.msk [vmem:[#allocation5 + $0x208] sm:$0xff] %vm333_vm0, %v7680_v25 }
  0x8a   : > { %1020 = vrot.lane.b32.xlu1 %v1396_v9, %s6919_s21 }
  0x8d   : > { %1662 = vrot.lane.b32.xlu0 %v7264_v59, %s6919_s21 }
  0x8e   : > { %636 = vrot.lane.b32.xlu1 %v7230_v52, %s6918_s28  ;;  %v812_v52 = vpop.permute.xlu1 %811 }
  0x8f   : > { %908 = vst.msk [vmem:[#allocation5] sm:$0xff] %vm907_vm4, %v812_v52  ;;  %v1879_v52 = vld [vmem:[#allocation5 + $0x148] sm:$0xff] }
  0x90   : > { %6717 = vmatmul.mubr.msk.f32.gmra.mxu1 %vm333_vm0, %v1879_v52  ;;  %v7710_v57 = vld [vmem:[#allocation2 + $0x13a] sm:$0xff] }
  0x91   : > { %1279 = vrot.lane.b32.xlu0 %v7266_v60, %s6918_s28  ;;  %1828 = vst.msk [vmem:[#allocation5 + $0x220] sm:$0xff] %vm333_vm0, %v7710_v57  ;;  %6719 = vmatprep.mubr.msk.f32.mxu1 %vm333_vm0, %v1882_v41 }
  0x92   : > { %829 = vrot.lane.b32.xlu1 %v7243_v55, %s6917_s27 }
  0x95   : > { %1472 = vrot.lane.b32.xlu0 %v7586_v24, %s6917_s27 }
  0x96   : > { %1022 = vrot.lane.b32.xlu1 %v1397_v13, %s6919_s21 }
  0x98   : > { %v621_v55 = vpop.permute.xlu1 %620 }
  0x99   : > { %1664 = vrot.lane.b32.xlu0 %v7276_v62, %s6919_s21  ;;  %716 = vst.msk [vmem:[#allocation5 + $0x18] sm:$0xff] %vm714_vm3, %v621_v55 }
  0x9a   : > { %638 = vrot.lane.b32.xlu1 %v7241_v54, %s6918_s28  ;;  %v7615_v54 = vld [vmem:[#allocation2 + $0xa8] sm:$0xff] }
  0x9b   : > { %v1262_v28 = vpop.permute.xlu0 %1261 }
  0x9c   : > { %1357 = vst.msk [vmem:[#allocation5 + $0x8] sm:$0xff] %vm714_vm3, %v1262_v28  ;;  %v1455_v31 = vpop.permute.xlu1 %1454 }
  0x9d   : > { %1281 = vrot.lane.b32.xlu0 %v7278_v63, %s6918_s28  ;;  %1550 = vst.msk [vmem:[#allocation5 + $0x8] sm:$0xff] %vm907_vm4, %v1455_v31 }
  0x9e   : > { %831 = vrot.lane.b32.xlu1 %v7257_v58, %s6917_s27 }
  0x9f   : > { %v1647_v42 = vpop.permute.xlu0 %1646 }
  0xa0   : > { %1742 = vst.msk [vmem:[#allocation5 + $0x8] sm:$0xff] %vm1100_vm5, %v1647_v42  ;;  %v1005_v40 = vpop.permute.xlu1 %1004  ;;  %v7698_v42 = vld [vmem:[#allocation2 + $0x141] sm:$0xff] }
  0xa1   : > { %1474 = vrot.lane.b32.xlu0 %v7615_v54, %s6917_s27  ;;  %1101 = vst.msk [vmem:[#allocation5] sm:$0xff] %vm1100_vm5, %v1005_v40 }
  0xa2   : > { %1024 = vrot.lane.b32.xlu1 %v1398_v49, %s6919_s21  ;;  %v503_v49 = vld [vmem:[#allocation2 + $0x98] sm:$0xff]  ;;  %1190 = vst.msk [vmem:[#allocation5 + $0x260] sm:$0xff] %vm333_vm0, %v7698_v42 }
  0xa3   : > { %v1264_v58 = vpop.permute.xlu0 %1263  ;;  %535 = vst.msk [vmem:[#allocation5 + $0x138] sm:$0xff] %vm333_vm0, %v503_v49 }
  0xa4   : > { %1358 = vst.msk [vmem:[#allocation5 + $0x20] sm:$0xff] %vm714_vm3, %v1264_v58  ;;  %v814_v33 = vpop.permute.xlu1 %813 }
  0xa5   : > { %1666 = vrot.lane.b32.xlu0 %v7328_v11, %s6919_s21  ;;  %909 = vst.msk [vmem:[#allocation5 + $0x18] sm:$0xff] %vm907_vm4, %v814_v33 }
  0xa6   : > { %640 = vrot.lane.b32.xlu1 %v7252_v56, %s6918_s28 }
  0xa7   : > { %v1457_v2 = vpop.permute.xlu0 %1456  ;;  %v1839_v29 = vld [vmem:[#allocation5 + $0x8] sm:$0xff] }
  0xa8   : > { %1551 = vst.msk [vmem:[#allocation5 + $0x20] sm:$0xff] %vm907_vm4, %v1457_v2  ;;  %2137 = vmatprep.mubr.f32.mxu0 %v1839_v29  ;;  %v1838_v4 = vld [vmem:[#allocation5] sm:$0xff]  ;;  %v1007_v6 = vpop.permute.xlu1 %1006 }
  0xa9   : > { %1283 = vrot.lane.b32.xlu0 %v7305_v5, %s6918_s28  ;;  %2138 = vmatmul.mubr.f32.vlgmr.msra.gmra.mxu0 %v1838_v4  ;;  %1102 = vst.msk [vmem:[#allocation5 + $0x18] sm:$0xff] %vm1100_vm5, %v1007_v6  ;;  %v452_v4 = vld [vmem:[%s7090_s22 + $0xd8] sm:$0xff] }
  0xaa   : > { %833 = vrot.lane.b32.xlu1 %v7266_v60, %s6917_s27  ;;  %485 = vst.msk [vmem:[#allocation2 + $0x159] sm:$0xff] %vm333_vm0, %v452_v4  ;;  %v7837_v4 = vld [vmem:[#allocation2 + $0xf8] sm:$0xff] }
  0xab   : > { %v1649_v56 = vpop.permute.xlu0 %1648 }
  0xac   : > { %1743 = vst.msk [vmem:[#allocation5 + $0x20] sm:$0xff] %vm1100_vm5, %v1649_v56  ;;  %v623_v9 = vpop.permute.xlu1 %622 }
  0xad   : > { %1476 = vrot.lane.b32.xlu0 %v7358_v18, %s6917_s27  ;;  %717 = vst.msk [vmem:[#allocation5 + $0x30] sm:$0xff] %vm714_vm3, %v623_v9  ;;  %v1885_v9 = vld [vmem:[#allocation5 + $0x178] sm:$0xff] }
  0xae   : > { %1026 = vrot.lane.b32.xlu1 %v7586_v24, %s6919_s21  ;;  %6720 = vmatmul.mubr.msk.f32.gmra.mxu1 %vm333_vm0, %v1885_v9 }
  0xaf   : > { %v1266_v38 = vpop.permute.xlu0 %1265  ;;  %6722 = vmatprep.mubr.msk.f32.mxu1 %vm333_vm0, %v1888_v39 }
  0xb0   : > { %1359 = vst.msk [vmem:[#allocation5 + $0x38] sm:$0xff] %vm714_vm3, %v1266_v38  ;;  %v816_v60 = vpop.permute.xlu1 %815  ;;  %v1841_v12 = vld [vmem:[#allocation5 + $0x18] sm:$0xff] }
  0xb1   : > { %1668 = vrot.lane.b32.xlu0 %v7360_v19, %s6919_s21  ;;  %910 = vst.msk [vmem:[#allocation5 + $0x30] sm:$0xff] %vm907_vm4, %v816_v60  ;;  %v7741_v38 = vld [vmem:[#allocation2 + $0x142] sm:$0xff]  ;;  %v7772_v17 = vld [vmem:[#allocation2 + $0x152] sm:$0xff] }
  0xb2   : > { %642 = vrot.lane.b32.xlu1 %v7264_v59, %s6918_s28  ;;  %1829 = vst.msk [vmem:[#allocation5 + $0x238] sm:$0xff] %vm333_vm0, %v7741_v38  ;;  %1830 = vst.msk [vmem:[#allocation5 + $0x250] sm:$0xff] %vm333_vm0, %v7772_v17  ;;  %6723 = vmatmul.mubr.msk.f32.gmra.mxu1 %vm333_vm0, %v1891_v47 }
  0xb3   : > { %v1459_v13 = vpop.permute.xlu0 %1458  ;;  %v1842_v14 = vld [vmem:[#allocation5 + $0x20] sm:$0xff] }
  0xb4   : > { %1552 = vst.msk [vmem:[#allocation5 + $0x38] sm:$0xff] %vm907_vm4, %v1459_v13  ;;  %2142 = vmatprep.mubr.f32.mxu0 %v1842_v14  ;;  %v1009_v50 = vpop.permute.xlu1 %1008 }
  0xb5   : > { %1285 = vrot.lane.b32.xlu0 %v7362_v20, %s6918_s28  ;;  %2143 = vmatmul.mubr.f32.gmra.mxu0 %v1841_v12  ;;  %1103 = vst.msk [vmem:[#allocation5 + $0x30] sm:$0xff] %vm1100_vm5, %v1009_v50  ;;  %v453_v50 = vld [vmem:[%s7090_s22 + $0xe0] sm:$0xff] }
  0xb6   : > { %835 = vrot.lane.b32.xlu1 %v7278_v63, %s6917_s27  ;;  %486 = vst.msk [vmem:[#allocation2 + $0x169] sm:$0xff] %vm333_vm0, %v453_v50 }
  0xb7   : > { %v1651_v59 = vpop.permute.xlu0 %1650 }
  0xb8   : > { %1744 = vst.msk [vmem:[#allocation5 + $0x38] sm:$0xff] %vm1100_vm5, %v1651_v59  ;;  %v625_v24 = vpop.permute.xlu1 %624 }
  0xb9   : > { %1478 = vrot.lane.b32.xlu0 %v7366_v21, %s6917_s27  ;;  %718 = vst.msk [vmem:[#allocation5 + $0x48] sm:$0xff] %vm714_vm3, %v625_v24 }
  0xba   : > { %1028 = vrot.lane.b32.xlu1 %v7615_v54, %s6919_s21 }
  0xbb   : > { %v1268_v63 = vpop.permute.xlu0 %1267 }
  0xbc   : > { %1360 = vst.msk [vmem:[#allocation5 + $0x50] sm:$0xff] %vm714_vm3, %v1268_v63  ;;  %v818_v55 = vpop.permute.xlu1 %817  ;;  %v1844_v28 = vld [vmem:[#allocation5 + $0x30] sm:$0xff] }
  0xbd   : > { %1670 = vrot.lane.b32.xlu0 %v7368_v22, %s6919_s21  ;;  %911 = vst.msk [vmem:[#allocation5 + $0x48] sm:$0xff] %vm907_vm4, %v818_v55 }
  0xbe   : > { %644 = vrot.lane.b32.xlu1 %v7276_v62, %s6918_s28 }
  0xbf   : > { %v1461_v30 = vpop.permute.xlu0 %1460  ;;  %v1845_v31 = vld [vmem:[#allocation5 + $0x38] sm:$0xff] }
  0xc0   : > { %1553 = vst.msk [vmem:[#allocation5 + $0x50] sm:$0xff] %vm907_vm4, %v1461_v30  ;;  %2147 = vmatprep.mubr.f32.mxu0 %v1845_v31  ;;  %v1011_v54 = vpop.permute.xlu1 %1010  ;;  %v454_v30 = vld [vmem:[%s7090_s22 + $0xe8] sm:$0xff] }
  0xc1   : > { %1287 = vrot.lane.b32.xlu0 %v7370_v23, %s6918_s28  ;;  %2148 = vmatmul.mubr.f32.gmra.mxu0 %v1844_v28  ;;  %1104 = vst.msk [vmem:[#allocation5 + $0x48] sm:$0xff] %vm1100_vm5, %v1011_v54 }
  0xc2   : > { %837 = vrot.lane.b32.xlu1 %v7305_v5, %s6917_s27  ;;  %487 = vst.msk [vmem:[#allocation2 + $0x171] sm:$0xff] %vm333_vm0, %v454_v30 }
  0xc3   : > { %v1653_v62 = vpop.permute.xlu0 %1652 }
  0xc4   : > { %1745 = vst.msk [vmem:[#allocation5 + $0x50] sm:$0xff] %vm1100_vm5, %v1653_v62  ;;  %v627_v40 = vpop.permute.xlu1 %626  ;;  %v7803_v62 = vld [vmem:[#allocation2 + $0x15a] sm:$0xff] }
  0xc5   : > { %1480 = vrot.lane.b32.xlu0 %v7388_v26, %s6917_s27  ;;  %719 = vst.msk [vmem:[#allocation5 + $0x60] sm:$0xff] %vm714_vm3, %v627_v40 }
  0xc6   : > { %1030 = vrot.lane.b32.xlu1 %v7358_v18, %s6919_s21  ;;  %v7726_v18 = vld [vmem:[#allocation2 + $0x151] sm:$0xff]  ;;  %1831 = vst.msk [vmem:[#allocation5 + $0x268] sm:$0xff] %vm333_vm0, %v7803_v62 }
  0xc7   : > { %v1270_v58 = vpop.permute.xlu0 %1269  ;;  %1191 = vst.msk [vmem:[#allocation5 + $0x278] sm:$0xff] %vm333_vm0, %v7726_v18 }
  0xc8   : > { %1361 = vst.msk [vmem:[#allocation5 + $0x68] sm:$0xff] %vm714_vm3, %v1270_v58  ;;  %v820_v5 = vpop.permute.xlu1 %819  ;;  %v1847_v33 = vld [vmem:[#allocation5 + $0x48] sm:$0xff] }
  0xc9   : > { %1672 = vrot.lane.b32.xlu0 %v7406_v32, %s6919_s21  ;;  %912 = vst.msk [vmem:[#allocation5 + $0x60] sm:$0xff] %vm907_vm4, %v820_v5  ;;  %v7843_v41 = vld [vmem:[#allocation2 + $0x16a] sm:$0xff] }
  0xca   : > { %646 = vrot.lane.b32.xlu1 %v7328_v11, %s6918_s28  ;;  %v7735_v11 = vld [vmem:[#allocation2 + $0xd8] sm:$0xff]  ;;  %1832 = vst.msk [vmem:[#allocation5 + $0x280] sm:$0xff] %vm333_vm0, %v7843_v41 }
  0xcb   : > { %v1463_v2 = vpop.permute.xlu0 %1462  ;;  %v1848_v29 = vld [vmem:[#allocation5 + $0x50] sm:$0xff] }
  0xcc   : > { %1554 = vst.msk [vmem:[#allocation5 + $0x68] sm:$0xff] %vm907_vm4, %v1463_v2  ;;  %2152 = vmatprep.mubr.f32.mxu0 %v1848_v29  ;;  %v1013_v3 = vpop.permute.xlu1 %1012  ;;  %v508_v2 = vld [vmem:[#allocation2 + $0xd8] sm:$0xff] }
  0xcd   : > { %1289 = vrot.lane.b32.xlu0 %v7426_v51, %s6918_s28  ;;  %2153 = vmatmul.mubr.f32.gmra.mxu0 %v1847_v33  ;;  %1105 = vst.msk [vmem:[#allocation5 + $0x60] sm:$0xff] %vm1100_vm5, %v1013_v3  ;;  %v7829_v29 = vld [vmem:[#allocation2 + $0x171] sm:$0xff] }
  0xce   : > { %839 = vrot.lane.b32.xlu1 %v7362_v20, %s6917_s27  ;;  %540 = vst.msk [vmem:[#allocation5 + $0x1b0] sm:$0xff] %vm333_vm0, %v508_v2  ;;  %v455_v3 = vld [vmem:[%s7090_s22 + $0xf0] sm:$0xff]  ;;  %1194 = vst.msk [vmem:[#allocation5 + $0x2c0] sm:$0xff] %vm333_vm0, %v7829_v29  ;;  %v7925_v2 = vld [vmem:[#allocation2 + $0x120] sm:$0xff] }
  0xcf   : > { %v1655_v6 = vpop.permute.xlu0 %1654  ;;  %488 = vst.msk [vmem:[#allocation2 + $0x181] sm:$0xff] %vm333_vm0, %v455_v3 }
  0xd0   : > { %1746 = vst.msk [vmem:[#allocation5 + $0x68] sm:$0xff] %vm1100_vm5, %v1655_v6  ;;  %v629_v56 = vpop.permute.xlu1 %628 }
  0xd1   : > { %1482 = vrot.lane.b32.xlu0 %v7735_v11, %s6917_s27  ;;  %720 = vst.msk [vmem:[#allocation5 + $0x78] sm:$0xff] %vm714_vm3, %v629_v56 }
  0xd2   : > { %1032 = vrot.lane.b32.xlu1 %v7366_v21, %s6919_s21  ;;  %v7758_v21 = vld [vmem:[#allocation2 + $0x159] sm:$0xff] }
  0xd3   : > { %v1272_v20 = vpop.permute.xlu0 %1271  ;;  %1192 = vst.msk [vmem:[#allocation5 + $0x290] sm:$0xff] %vm333_vm0, %v7758_v21 }
  0xd4   : > { %1362 = vst.msk [vmem:[#allocation5 + $0x80] sm:$0xff] %vm714_vm3, %v1272_v20  ;;  %v822_v60 = vpop.permute.xlu1 %821  ;;  %v1850_v12 = vld [vmem:[#allocation5 + $0x60] sm:$0xff] }
  0xd5   : > { %1674 = vrot.lane.b32.xlu0 %v7455_v1, %s6919_s21  ;;  %913 = vst.msk [vmem:[#allocation5 + $0x78] sm:$0xff] %vm907_vm4, %v822_v60 }
  0xd6   : > { %648 = vrot.lane.b32.xlu1 %v7360_v19, %s6918_s28  ;;  %v7767_v19 = vld [vmem:[#allocation2 + $0xe0] sm:$0xff] }
  0xd7   : > { %v1465_v13 = vpop.permute.xlu0 %1464  ;;  %v1851_v14 = vld [vmem:[#allocation5 + $0x68] sm:$0xff] }
  0xd8   : > { %1555 = vst.msk [vmem:[#allocation5 + $0x80] sm:$0xff] %vm907_vm4, %v1465_v13  ;;  %2157 = vmatprep.mubr.f32.mxu0 %v1851_v14  ;;  %v1015_v49 = vpop.permute.xlu1 %1014  ;;  %v7860_v14 = vld [vmem:[#allocation2 + $0x181] sm:$0xff] }
  0xd9   : > { %1291 = vrot.lane.b32.xlu0 %v7474_v7, %s6918_s28  ;;  %2158 = vmatmul.mubr.f32.gmra.mxu0 %v1850_v12  ;;  %1106 = vst.msk [vmem:[#allocation5 + $0x78] sm:$0xff] %vm1100_vm5, %v1015_v49  ;;  %v509_v12 = vld [vmem:[#allocation2 + $0xe0] sm:$0xff]  ;;  %v456_v49 = vld [vmem:[%s7090_s22 + $0xf8] sm:$0xff] }
  0xda   : > { %841 = vrot.lane.b32.xlu1 %v7370_v23, %s6917_s27  ;;  %541 = vst.msk [vmem:[#allocation5 + $0x1c8] sm:$0xff] %vm333_vm0, %v509_v12  ;;  %489 = vst.msk [vmem:[#allocation2 + $0x189] sm:$0xff] %vm333_vm0, %v456_v49  ;;  %v1411_v12 = vld [vmem:[#allocation2 + $0x128] sm:$0xff] }
  0xdb   : > { %v1657_v53 = vpop.permute.xlu0 %1656  ;;  %1195 = vst.msk [vmem:[#allocation5 + $0x2d8] sm:$0xff] %vm333_vm0, %v7860_v14 }
  0xdc   : > { %1747 = vst.msk [vmem:[#allocation5 + $0x80] sm:$0xff] %vm1100_vm5, %v1657_v53  ;;  %v631_v59 = vpop.permute.xlu1 %630 }
  0xdd   : > { %1484 = vrot.lane.b32.xlu0 %v7767_v19, %s6917_s27  ;;  %721 = vst.msk [vmem:[#allocation5 + $0x90] sm:$0xff] %vm714_vm3, %v631_v59  ;;  %v1897_v59 = vld [vmem:[#allocation5 + $0x1d8] sm:$0xff] }
  0xde   : > { %1034 = vrot.lane.b32.xlu1 %v7388_v26, %s6919_s21  ;;  %v7788_v26 = vld [vmem:[#allocation2 + $0x169] sm:$0xff] }
  0xdf   : > { %v1274_v24 = vpop.permute.xlu0 %1273  ;;  %1193 = vst.msk [vmem:[#allocation5 + $0x2a8] sm:$0xff] %vm333_vm0, %v7788_v26 }
  0xe0   : > { %1363 = vst.msk [vmem:[#allocation5 + $0x98] sm:$0xff] %vm714_vm3, %v1274_v24  ;;  %v824_v23 = vpop.permute.xlu1 %823  ;;  %v1853_v52 = vld [vmem:[#allocation5 + $0x78] sm:$0xff]  ;;  %v7875_v24 = vld [vmem:[#allocation2 + $0x172] sm:$0xff] }
  0xe1   : > { %1676 = vrot.lane.b32.xlu0 %v7489_v35, %s6919_s21  ;;  %914 = vst.msk [vmem:[#allocation5 + $0x90] sm:$0xff] %vm907_vm4, %v824_v23 }
  0xe2   : > { %650 = vrot.lane.b32.xlu1 %v7368_v22, %s6918_s28  ;;  %v7797_v22 = vld [vmem:[#allocation2 + $0xf0] sm:$0xff]  ;;  %1833 = vst.msk [vmem:[#allocation5 + $0x298] sm:$0xff] %vm333_vm0, %v7875_v24 }
  0xe3   : > { %v1467_v63 = vpop.permute.xlu0 %1466  ;;  %v1854_v55 = vld [vmem:[#allocation5 + $0x80] sm:$0xff] }
  0xe4   : > { %1556 = vst.msk [vmem:[#allocation5 + $0x98] sm:$0xff] %vm907_vm4, %v1467_v63  ;;  %2162 = vmatprep.mubr.f32.mxu0 %v1854_v55  ;;  %v1017_v28 = vpop.permute.xlu1 %1016 }
  0xe5   : > { %1293 = vrot.lane.b32.xlu0 %v7499_v37, %s6918_s28  ;;  %2163 = vmatmul.mubr.f32.gmra.mxu0 %v1853_v52  ;;  %1107 = vst.msk [vmem:[#allocation5 + $0x90] sm:$0xff] %vm1100_vm5, %v1017_v28  ;;  %v510_v28 = vld [vmem:[#allocation2 + $0xf0] sm:$0xff] }
  0xe6   : > { %843 = vrot.lane.b32.xlu1 %v7426_v51, %s6917_s27  ;;  %542 = vst.msk [vmem:[#allocation5 + $0x1e0] sm:$0xff] %vm333_vm0, %v510_v28 }
  0xe7   : > { %v1659_v31 = vpop.permute.xlu0 %1658 }
  0xe8   : > { %1748 = vst.msk [vmem:[#allocation5 + $0x98] sm:$0xff] %vm1100_vm5, %v1659_v31  ;;  %v633_v54 = vpop.permute.xlu1 %632 }
  0xe9   : > { %1486 = vrot.lane.b32.xlu0 %v7797_v22, %s6917_s27  ;;  %722 = vst.msk [vmem:[#allocation5 + $0xa8] sm:$0xff] %vm714_vm3, %v633_v54  ;;  %v7905_v54 = vld [vmem:[#allocation2 + $0x182] sm:$0xff] }
  0xea   : > { %1036 = vrot.lane.b32.xlu1 %v7735_v11, %s6919_s21  ;;  %1834 = vst.msk [vmem:[#allocation5 + $0x2b0] sm:$0xff] %vm333_vm0, %v7905_v54 }
  0xeb   : > { %v1276_v51 = vpop.permute.xlu0 %1275 }
  0xec   : > { %1364 = vst.msk [vmem:[#allocation5 + $0xb0] sm:$0xff] %vm714_vm3, %v1276_v51  ;;  %v826_v40 = vpop.permute.xlu1 %825  ;;  %v1856_v58 = vld [vmem:[#allocation5 + $0x90] sm:$0xff] }
  0xed   : > { %1678 = vrot.lane.b32.xlu0 %v7511_v34, %s6919_s21  ;;  %915 = vst.msk [vmem:[#allocation5 + $0xa8] sm:$0xff] %vm907_vm4, %v826_v40 }
  0xee   : > { %652 = vrot.lane.b32.xlu1 %v7406_v32, %s6918_s28 }
  0xef   : > { %v1469_v5 = vpop.permute.xlu0 %1468  ;;  %v1857_v33 = vld [vmem:[#allocation5 + $0x98] sm:$0xff] }
  0xf0   : > { %1557 = vst.msk [vmem:[#allocation5 + $0xb0] sm:$0xff] %vm907_vm4, %v1469_v5  ;;  %2167 = vmatprep.mubr.f32.mxu0 %v1857_v33  ;;  %v1019_v32 = vpop.permute.xlu1 %1018  ;;  %v511_v5 = vld [vmem:[#allocation2 + $0xf8] sm:$0xff] }
  0xf1   : > { %1295 = vrot.lane.b32.xlu0 %v7522_v10, %s6918_s28  ;;  %2168 = vmatmul.mubr.f32.gmra.mxu0 %v1856_v58  ;;  %1108 = vst.msk [vmem:[#allocation5 + $0xa8] sm:$0xff] %vm1100_vm5, %v1019_v32  ;;  %v1900_v32 = vld [vmem:[#allocation5 + $0x1f0] sm:$0xff] }
  0xf2   : > { %845 = vrot.lane.b32.xlu1 %v7474_v7, %s6917_s27  ;;  %543 = vst.msk [vmem:[#allocation5 + $0x1f8] sm:$0xff] %vm333_vm0, %v511_v5 }
  0xf3   : > { %v1661_v11 = vpop.permute.xlu0 %1660 }
  0xf4   : > { %1749 = vst.msk [vmem:[#allocation5 + $0xb0] sm:$0xff] %vm1100_vm5, %v1661_v11  ;;  %v635_v6 = vpop.permute.xlu1 %634  ;;  %v7931_v11 = vld [vmem:[#allocation2 + $0x18a] sm:$0xff] }
  0xf5   : > { %1488 = vrot.lane.b32.xlu0 %v7837_v4, %s6917_s27  ;;  %723 = vst.msk [vmem:[#allocation5 + $0xc0] sm:$0xff] %vm714_vm3, %v635_v6 }
  0xf6   : > { %1038 = vrot.lane.b32.xlu1 %v7767_v19, %s6919_s21  ;;  %v1894_v19 = vld [vmem:[#allocation5 + $0x1c0] sm:$0xff]  ;;  %1835 = vst.msk [vmem:[#allocation5 + $0x2c8] sm:$0xff] %vm333_vm0, %v7931_v11 }
  0xf7   : > { %v1278_v7 = vpop.permute.xlu0 %1277  ;;  %6725 = vmatprep.mubr.msk.f32.mxu1 %vm333_vm0, %v1894_v19 }
  0xf8   : > { %1365 = vst.msk [vmem:[#allocation5 + $0xc8] sm:$0xff] %vm714_vm3, %v1278_v7  ;;  %v828_v56 = vpop.permute.xlu1 %827  ;;  %v1859_v9 = vld [vmem:[#allocation5 + $0xa8] sm:$0xff]  ;;  %6726 = vmatmul.mubr.msk.f32.gmra.mxu1 %vm333_vm0, %v1897_v59 }
  0xf9   : > { %1680 = vrot.lane.b32.xlu0 %v7534_v45, %s6919_s21  ;;  %916 = vst.msk [vmem:[#allocation5 + $0xc0] sm:$0xff] %vm907_vm4, %v828_v56  ;;  %6728 = vmatprep.mubr.msk.f32.mxu1 %vm333_vm0, %v1900_v32  ;;  %v1912_v32 = vld [vmem:[#allocation5 + $0x250] sm:$0xff] }
  0xfa   : > { %654 = vrot.lane.b32.xlu1 %v7455_v1, %s6918_s28  ;;  %v7869_v1 = vld [vmem:[#allocation2 + $0x108] sm:$0xff] }
  0xfb   : > { %v1471_v20 = vpop.permute.xlu0 %1470  ;;  %v1860_v60 = vld [vmem:[#allocation5 + $0xb0] sm:$0xff] }
  0xfc   : > { %1558 = vst.msk [vmem:[#allocation5 + $0xc8] sm:$0xff] %vm907_vm4, %v1471_v20  ;;  %2172 = vmatprep.mubr.f32.mxu0 %v1860_v60  ;;  %v1021_v13 = vpop.permute.xlu1 %1020  ;;  %v512_v20 = vld [vmem:[#allocation2 + $0x108] sm:$0xff] }
  0xfd   : > { %1297 = vrot.lane.b32.xlu0 %v7544_v46, %s6918_s28  ;;  %2173 = vmatmul.mubr.f32.gmra.mxu0 %v1859_v9  ;;  %1109 = vst.msk [vmem:[#allocation5 + $0xc0] sm:$0xff] %vm1100_vm5, %v1021_v13 }
  0xfe   : > { %847 = vrot.lane.b32.xlu1 %v7499_v37, %s6917_s27  ;;  %544 = vst.msk [vmem:[#allocation5 + $0x210] sm:$0xff] %vm333_vm0, %v512_v20 }
  0xff   : > { %v1663_v50 = vpop.permute.xlu0 %1662 }
 0x100   : > { %1750 = vst.msk [vmem:[#allocation5 + $0xc8] sm:$0xff] %vm1100_vm5, %v1663_v50  ;;  %v637_v53 = vpop.permute.xlu1 %636 }
 0x101   : > { %1490 = vrot.lane.b32.xlu0 %v7869_v1, %s6917_s27  ;;  %724 = vst.msk [vmem:[#allocation5 + $0xd8] sm:$0xff] %vm714_vm3, %v637_v53  ;;  %v513_v53 = vld [vmem:[#allocation2 + $0x110] sm:$0xff] }
 0x102   : > { %1040 = vrot.lane.b32.xlu1 %v7797_v22, %s6919_s21  ;;  %v7893_v22 = vld [vmem:[#allocation2 + $0x189] sm:$0xff]  ;;  %545 = vst.msk [vmem:[#allocation5 + $0x228] sm:$0xff] %vm333_vm0, %v513_v53 }
 0x103   : > { %v1280_v37 = vpop.permute.xlu0 %1279  ;;  %1196 = vst.msk [vmem:[#allocation5 + $0x2f0] sm:$0xff] %vm333_vm0, %v7893_v22  ;;  %v1918_v53 = vld [vmem:[#allocation5 + $0x280] sm:$0xff] }
 0x104   : > { %1366 = vst.msk [vmem:[#allocation5 + $0xe0] sm:$0xff] %vm714_vm3, %v1280_v37  ;;  %v830_v23 = vpop.permute.xlu1 %829  ;;  %v1862_v52 = vld [vmem:[#allocation5 + $0xc0] sm:$0xff]  ;;  %v7970_v37 = vld [vmem:[#allocation2 + $0x138] sm:$0xff] }
 0x105   : > { %1682 = vrot.lane.b32.xlu0 %v7555_v44, %s6919_s21  ;;  %917 = vst.msk [vmem:[#allocation5 + $0xd8] sm:$0xff] %vm907_vm4, %v830_v23  ;;  %v1906_v23 = vld [vmem:[#allocation5 + $0x220] sm:$0xff] }
 0x106   : > { %656 = vrot.lane.b32.xlu1 %v7489_v35, %s6918_s28  ;;  %v7900_v35 = vld [vmem:[#allocation2 + $0x110] sm:$0xff] }
 0x107   : > { %v1473_v63 = vpop.permute.xlu0 %1472  ;;  %v1863_v55 = vld [vmem:[#allocation5 + $0xc8] sm:$0xff] }
 0x108   : > { %1559 = vst.msk [vmem:[#allocation5 + $0xe0] sm:$0xff] %vm907_vm4, %v1473_v63  ;;  %2177 = vmatprep.mubr.f32.mxu0 %v1863_v55  ;;  %v1023_v30 = vpop.permute.xlu1 %1022  ;;  %v1909_v63 = vld [vmem:[#allocation5 + $0x238] sm:$0xff] }
 0x109   : > { %1299 = vrot.lane.b32.xlu0 %v7566_v15, %s6918_s28  ;;  %2178 = vmatmul.mubr.f32.gmra.mxu0 %v1862_v52  ;;  %1110 = vst.msk [vmem:[#allocation5 + $0xd8] sm:$0xff] %vm1100_vm5, %v1023_v30 }
 0x10a   : > { %849 = vrot.lane.b32.xlu1 %v7522_v10, %s6917_s27 }
 0x10b   : > { %v1665_v31 = vpop.permute.xlu0 %1664 }
 0x10c   : > { %1751 = vst.msk [vmem:[#allocation5 + $0xe0] sm:$0xff] %vm1100_vm5, %v1665_v31  ;;  %v639_v39 = vpop.permute.xlu1 %638  ;;  %v514_v31 = vld [vmem:[#allocation2 + $0x120] sm:$0xff] }
 0x10d   : > { %1492 = vrot.lane.b32.xlu0 %v7900_v35, %s6917_s27  ;;  %725 = vst.msk [vmem:[#allocation5 + $0xf0] sm:$0xff] %vm714_vm3, %v639_v39 }
 0x10e   : > { %1042 = vrot.lane.b32.xlu1 %v7837_v4, %s6919_s21  ;;  %v1903_v4 = vld [vmem:[#allocation5 + $0x208] sm:$0xff]  ;;  %546 = vst.msk [vmem:[#allocation5 + $0x240] sm:$0xff] %vm333_vm0, %v514_v31 }
 0x10f   : > { %v1282_v47 = vpop.permute.xlu0 %1281  ;;  %6729 = vmatmul.mubr.msk.f32.gmra.mxu1 %vm333_vm0, %v1903_v4  ;;  %v1915_v4 = vld [vmem:[#allocation5 + $0x268] sm:$0xff] }
 0x110   : > { %1367 = vst.msk [vmem:[#allocation5 + $0xf8] sm:$0xff] %vm714_vm3, %v1282_v47  ;;  %v832_v10 = vpop.permute.xlu1 %831  ;;  %v1865_v51 = vld [vmem:[#allocation5 + $0xd8] sm:$0xff]  ;;  %6731 = vmatprep.mubr.msk.f32.mxu1 %vm333_vm0, %v1906_v23 }
 0x111   : > { %1684 = vrot.lane.b32.xlu0 %v7578_v16, %s6919_s21  ;;  %918 = vst.msk [vmem:[#allocation5 + $0xf0] sm:$0xff] %vm907_vm4, %v832_v10  ;;  %v1413_v47 = vld [vmem:[#allocation2 + $0x140] sm:$0xff] }
 0x112   : > { %658 = vrot.lane.b32.xlu1 %v7511_v34, %s6918_s28 }
 0x113   : > { %v1475_v40 = vpop.permute.xlu0 %1474  ;;  %v1866_v58 = vld [vmem:[#allocation5 + $0xe0] sm:$0xff]  ;;  %6732 = vmatmul.mubr.msk.f32.gmra.mxu1 %vm333_vm0, %v1909_v63 }
 0x114   : > { %1560 = vst.msk [vmem:[#allocation5 + $0xf8] sm:$0xff] %vm907_vm4, %v1475_v40  ;;  %2182 = vmatprep.mubr.f32.mxu0 %v1866_v58  ;;  %v1025_v33 = vpop.permute.xlu1 %1024  ;;  %6734 = vmatprep.mubr.msk.f32.mxu1 %vm333_vm0, %v1912_v32 }
 0x115   : > { %1301 = vrot.lane.b32.xlu0 %v7590_v27, %s6918_s28  ;;  %2183 = vmatmul.mubr.f32.gmra.mxu0 %v1865_v51  ;;  %1111 = vst.msk [vmem:[#allocation5 + $0xf0] sm:$0xff] %vm1100_vm5, %v1025_v33  ;;  %v515_v33 = vld [vmem:[#allocation2 + $0x128] sm:$0xff] }
 0x116   : > { %851 = vrot.lane.b32.xlu1 %v7544_v46, %s6917_s27  ;;  %547 = vst.msk [vmem:[#allocation5 + $0x258] sm:$0xff] %vm333_vm0, %v515_v33  ;;  %v1924_v33 = vld [vmem:[#allocation5 + $0x2b0] sm:$0xff] }
 0x117   : > { %v1667_v34 = vpop.permute.xlu0 %1666  ;;  %6735 = vmatmul.mubr.msk.f32.gmra.mxu1 %vm333_vm0, %v1915_v4 }
 0x118   : > { %1752 = vst.msk [vmem:[#allocation5 + $0xf8] sm:$0xff] %vm1100_vm5, %v1667_v34  ;;  %v641_v3 = vpop.permute.xlu1 %640  ;;  %v8010_v34 = vld [vmem:[#allocation2 + $0x150] sm:$0xff]  ;;  %6737 = vmatprep.mubr.msk.f32.mxu1 %vm333_vm0, %v1918_v53 }
 0x119   : > { %1494 = vrot.lane.b32.xlu0 %v7925_v2, %s6917_s27  ;;  %726 = vst.msk [vmem:[#allocation5 + $0x108] sm:$0xff] %vm714_vm3, %v641_v3 }
 0x11a   : > { %1044 = vrot.lane.b32.xlu1 %v7869_v1, %s6919_s21 }
 0x11b   : > { %v1284_v46 = vpop.permute.xlu0 %1283 }
 0x11c   : > { %1368 = vst.msk [vmem:[#allocation5 + $0x110] sm:$0xff] %vm714_vm3, %v1284_v46  ;;  %v834_v6 = vpop.permute.xlu1 %833  ;;  %v1868_v7 = vld [vmem:[#allocation5 + $0xf0] sm:$0xff] }
 0x11d   : > { %1686 = vrot.lane.b32.xlu0 %v7606_v36, %s6919_s21  ;;  %919 = vst.msk [vmem:[#allocation5 + $0x108] sm:$0xff] %vm907_vm4, %v834_v6 }
 0x11e   : > { %660 = vrot.lane.b32.xlu1 %v7534_v45, %s6918_s28 }
 0x11f   : > { %v1477_v56 = vpop.permute.xlu0 %1476  ;;  %v1869_v9 = vld [vmem:[#allocation5 + $0xf8] sm:$0xff] }
 0x120   : > { %1561 = vst.msk [vmem:[#allocation5 + $0x110] sm:$0xff] %vm907_vm4, %v1477_v56  ;;  %2187 = vmatprep.mubr.f32.mxu0 %v1869_v9  ;;  %v1027_v60 = vpop.permute.xlu1 %1026  ;;  %v516_v9 = vld [vmem:[#allocation2 + $0x138] sm:$0xff] }
 0x121   : > { %1303 = vrot.lane.b32.xlu0 %v7621_v61, %s6918_s28  ;;  %2188 = vmatmul.mubr.f32.gmra.mxu0 %v1868_v7  ;;  %1112 = vst.msk [vmem:[#allocation5 + $0x108] sm:$0xff] %vm1100_vm5, %v1027_v60  ;;  %v8033_v60 = vld [vmem:[#allocation2 + $0x158] sm:$0xff] }
 0x122   : > { %853 = vrot.lane.b32.xlu1 %v7566_v15, %s6917_s27  ;;  %548 = vst.msk [vmem:[#allocation5 + $0x270] sm:$0xff] %vm333_vm0, %v516_v9 }
 0x123   : > { %v1669_v45 = vpop.permute.xlu0 %1668 }
 0x124   : > { %1753 = vst.msk [vmem:[#allocation5 + $0x110] sm:$0xff] %vm1100_vm5, %v1669_v45  ;;  %v643_v13 = vpop.permute.xlu1 %642 }
 0x125   : > { %1496 = vrot.lane.b32.xlu0 %v1411_v12, %s6917_s27  ;;  %727 = vst.msk [vmem:[#allocation5 + $0x120] sm:$0xff] %vm714_vm3, %v643_v13 }
 0x126   : > { %1046 = vrot.lane.b32.xlu1 %v7900_v35, %s6919_s21 }
 0x127   : > { %v1286_v49 = vpop.permute.xlu0 %1285 }
 0x128   : > { %1369 = vst.msk [vmem:[#allocation5 + $0x128] sm:$0xff] %vm714_vm3, %v1286_v49  ;;  %v836_v1 = vpop.permute.xlu1 %835  ;;  %v1871_v15 = vld [vmem:[#allocation5 + $0x108] sm:$0xff] }
 0x129   : > { %1688 = vrot.lane.b32.xlu0 %v7638_v8, %s6919_s21  ;;  %920 = vst.msk [vmem:[#allocation5 + $0x120] sm:$0xff] %vm907_vm4, %v836_v1 }
 0x12a   : > { %662 = vrot.lane.b32.xlu1 %v7555_v44, %s6918_s28 }
 0x12b   : > { %v1479_v50 = vpop.permute.xlu0 %1478  ;;  %v1872_v19 = vld [vmem:[#allocation5 + $0x110] sm:$0xff] }
 0x12c   : > { %1562 = vst.msk [vmem:[#allocation5 + $0x128] sm:$0xff] %vm907_vm4, %v1479_v50  ;;  %2192 = vmatprep.mubr.f32.mxu0 %v1872_v19  ;;  %v1029_v59 = vpop.permute.xlu1 %1028  ;;  %v8053_v19 = vld [vmem:[#allocation2 + $0x168] sm:$0xff] }
 0x12d   : > { %1305 = vrot.lane.b32.xlu0 %v7650_v43, %s6918_s28  ;;  %2193 = vmatmul.mubr.f32.gmra.mxu0 %v1871_v15  ;;  %1113 = vst.msk [vmem:[#allocation5 + $0x120] sm:$0xff] %vm1100_vm5, %v1029_v59  ;;  %v517_v15 = vld [vmem:[#allocation2 + $0x140] sm:$0xff] }
 0x12e   : > { %855 = vrot.lane.b32.xlu1 %v7590_v27, %s6917_s27  ;;  %549 = vst.msk [vmem:[#allocation5 + $0x288] sm:$0xff] %vm333_vm0, %v517_v15 }
 0x12f   : > { %v1671_v44 = vpop.permute.xlu0 %1670 }
 0x130   : > { %1754 = vst.msk [vmem:[#allocation5 + $0x128] sm:$0xff] %vm1100_vm5, %v1671_v44  ;;  %v645_v52 = vpop.permute.xlu1 %644 }
 0x131   : > { %1498 = vrot.lane.b32.xlu0 %v7970_v37, %s6917_s27  ;;  %728 = vst.msk [vmem:[#allocation5 + $0x138] sm:$0xff] %vm714_vm3, %v645_v52 }
 0x132   : > { %1048 = vrot.lane.b32.xlu1 %v7925_v2, %s6919_s21 }
 0x133   : > { %v1288_v55 = vpop.permute.xlu0 %1287 }
 0x134   : > { %1370 = vst.msk [vmem:[#allocation5 + $0x140] sm:$0xff] %vm714_vm3, %v1288_v55  ;;  %v838_v27 = vpop.permute.xlu1 %837  ;;  %v1874_v28 = vld [vmem:[#allocation5 + $0x120] sm:$0xff]  ;;  %v518_v55 = vld [vmem:[#allocation2 + $0x150] sm:$0xff] }
 0x135   : > { %1690 = vrot.lane.b32.xlu0 %v7667_v48, %s6919_s21  ;;  %921 = vst.msk [vmem:[#allocation5 + $0x138] sm:$0xff] %vm907_vm4, %v838_v27 }
 0x136   : > { %664 = vrot.lane.b32.xlu1 %v7578_v16, %s6918_s28  ;;  %550 = vst.msk [vmem:[#allocation5 + $0x2a0] sm:$0xff] %vm333_vm0, %v518_v55  ;;  %v1613_v55 = vld [vmem:[#allocation2 + $0x1a1] sm:$0xff] }
 0x137   : > { %v1481_v30 = vpop.permute.xlu0 %1480  ;;  %v1875_v35 = vld [vmem:[#allocation5 + $0x128] sm:$0xff] }
 0x138   : > { %1563 = vst.msk [vmem:[#allocation5 + $0x140] sm:$0xff] %vm907_vm4, %v1481_v30  ;;  %2197 = vmatprep.mubr.f32.mxu0 %v1875_v35  ;;  %v1031_v39 = vpop.permute.xlu1 %1030  ;;  %v8078_v30 = vld [vmem:[#allocation2 + $0x170] sm:$0xff] }
 0x139   : > { %1307 = vrot.lane.b32.xlu0 %v7680_v25, %s6918_s28  ;;  %2198 = vmatmul.mubr.f32.gmra.mxu0 %v1874_v28  ;;  %1114 = vst.msk [vmem:[#allocation5 + $0x138] sm:$0xff] %vm1100_vm5, %v1031_v39 }
 0x13a   : > { %857 = vrot.lane.b32.xlu1 %v7621_v61, %s6917_s27 }
 0x13b   : > { %v1673_v16 = vpop.permute.xlu0 %1672 }
 0x13c   : > { %1755 = vst.msk [vmem:[#allocation5 + $0x140] sm:$0xff] %vm1100_vm5, %v1673_v16  ;;  %v647_v10 = vpop.permute.xlu1 %646 }
 0x13d   : > { %1500 = vrot.lane.b32.xlu0 %v1413_v47, %s6917_s27  ;;  %729 = vst.msk [vmem:[#allocation5 + $0x150] sm:$0xff] %vm714_vm3, %v647_v10 }
 0x13e   : > { %1050 = vrot.lane.b32.xlu1 %v1411_v12, %s6919_s21 }
 0x13f   : > { %v1290_v51 = vpop.permute.xlu0 %1289 }
 0x140   : > { %1371 = vst.msk [vmem:[#allocation5 + $0x158] sm:$0xff] %vm714_vm3, %v1290_v51  ;;  %v840_v40 = vpop.permute.xlu1 %839  ;;  %v1877_v61 = vld [vmem:[#allocation5 + $0x138] sm:$0xff]  ;;  %v519_v51 = vld [vmem:[#allocation2 + $0x158] sm:$0xff] }
 0x141   : > { %1692 = vrot.lane.b32.xlu0 %v7698_v42, %s6919_s21  ;;  %922 = vst.msk [vmem:[#allocation5 + $0x150] sm:$0xff] %vm907_vm4, %v840_v40 }
 0x142   : > { %666 = vrot.lane.b32.xlu1 %v7606_v36, %s6918_s28  ;;  %551 = vst.msk [vmem:[#allocation5 + $0x2b8] sm:$0xff] %vm333_vm0, %v519_v51 }
 0x143   : > { %v1483_v58 = vpop.permute.xlu0 %1482  ;;  %v1878_v5 = vld [vmem:[#allocation5 + $0x140] sm:$0xff] }
 0x144   : > { %1564 = vst.msk [vmem:[#allocation5 + $0x158] sm:$0xff] %vm907_vm4, %v1483_v58  ;;  %2202 = vmatprep.mubr.f32.mxu0 %v1878_v5  ;;  %v1033_v2 = vpop.permute.xlu1 %1032  ;;  %v8101_v58 = vld [vmem:[#allocation2 + $0x180] sm:$0xff] }
 0x145   : > { %1309 = vrot.lane.b32.xlu0 %v7710_v57, %s6918_s28  ;;  %2203 = vmatmul.mubr.f32.gmra.mxu0 %v1877_v61  ;;  %1115 = vst.msk [vmem:[#allocation5 + $0x150] sm:$0xff] %vm1100_vm5, %v1033_v2 }
 0x146   : > { %859 = vrot.lane.b32.xlu1 %v7650_v43, %s6917_s27 }
 0x147   : > { %v1675_v36 = vpop.permute.xlu0 %1674 }
 0x148   : > { %1756 = vst.msk [vmem:[#allocation5 + $0x158] sm:$0xff] %vm1100_vm5, %v1675_v36  ;;  %v649_v3 = vpop.permute.xlu1 %648 }
 0x149   : > { %1502 = vrot.lane.b32.xlu0 %v8010_v34, %s6917_s27  ;;  %730 = vst.msk [vmem:[#allocation5 + $0x168] sm:$0xff] %vm714_vm3, %v649_v3 }
 0x14a   : > { %1052 = vrot.lane.b32.xlu1 %v7970_v37, %s6919_s21  ;;  %v1921_v37 = vld [vmem:[#allocation5 + $0x298] sm:$0xff] }
 0x14b   : > { %v1292_v46 = vpop.permute.xlu0 %1291  ;;  %6738 = vmatmul.mubr.msk.f32.gmra.mxu1 %vm333_vm0, %v1921_v37 }
 0x14c   : > { %1372 = vst.msk [vmem:[#allocation5 + $0x170] sm:$0xff] %vm714_vm3, %v1292_v46  ;;  %v842_v43 = vpop.permute.xlu1 %841  ;;  %v1880_v6 = vld [vmem:[#allocation5 + $0x150] sm:$0xff]  ;;  %6740 = vmatprep.mubr.msk.f32.mxu1 %vm333_vm0, %v1924_v33  ;;  %v520_v46 = vld [vmem:[#allocation2 + $0x168] sm:$0xff] }
 0x14d   : > { %1694 = vrot.lane.b32.xlu0 %v7726_v18, %s6919_s21  ;;  %923 = vst.msk [vmem:[#allocation5 + $0x168] sm:$0xff] %vm907_vm4, %v842_v43 }
 0x14e   : > { %668 = vrot.lane.b32.xlu1 %v7638_v8, %s6918_s28  ;;  %552 = vst.msk [vmem:[#allocation5 + $0x2d0] sm:$0xff] %vm333_vm0, %v520_v46 }
 0x14f   : > { %v1485_v7 = vpop.permute.xlu0 %1484  ;;  %v1881_v56 = vld [vmem:[#allocation5 + $0x158] sm:$0xff] }
 0x150   : > { %1565 = vst.msk [vmem:[#allocation5 + $0x170] sm:$0xff] %vm907_vm4, %v1485_v7  ;;  %2207 = vmatprep.mubr.f32.mxu0 %v1881_v56  ;;  %v1035_v20 = vpop.permute.xlu1 %1034 }
 0x151   : > { %1311 = vrot.lane.b32.xlu0 %v7741_v38, %s6918_s28  ;;  %2208 = vmatmul.mubr.f32.gmra.mxu0 %v1880_v6  ;;  %1116 = vst.msk [vmem:[#allocation5 + $0x168] sm:$0xff] %vm1100_vm5, %v1035_v20  ;;  %v1804_v20 = vld [vmem:[#allocation2 + $0x19a] sm:$0xff] }
 0x152   : > { %861 = vrot.lane.b32.xlu1 %v7680_v25, %s6917_s27  ;;  %1836 = vst.msk [vmem:[#allocation5 + $0x2e0] sm:$0xff] %vm333_vm0, %v1804_v20 }
 0x153   : > { %v1677_v8 = vpop.permute.xlu0 %1676 }
 0x154   : > { %1757 = vst.msk [vmem:[#allocation5 + $0x170] sm:$0xff] %vm1100_vm5, %v1677_v8  ;;  %v651_v12 = vpop.permute.xlu1 %650 }
 0x155   : > { %1504 = vrot.lane.b32.xlu0 %v8033_v60, %s6917_s27  ;;  %731 = vst.msk [vmem:[#allocation5 + $0x180] sm:$0xff] %vm714_vm3, %v651_v12 }
 0x156   : > { %1054 = vrot.lane.b32.xlu1 %v1413_v47, %s6919_s21 }
 0x157   : > { %v1294_v45 = vpop.permute.xlu0 %1293 }
 0x158   : > { %1373 = vst.msk [vmem:[#allocation5 + $0x188] sm:$0xff] %vm714_vm3, %v1294_v45  ;;  %v844_v13 = vpop.permute.xlu1 %843  ;;  %v1883_v25 = vld [vmem:[#allocation5 + $0x168] sm:$0xff] }
 0x159   : > { %1696 = vrot.lane.b32.xlu0 %v7758_v21, %s6919_s21  ;;  %924 = vst.msk [vmem:[#allocation5 + $0x180] sm:$0xff] %vm907_vm4, %v844_v13  ;;  %v521_v13 = vld [vmem:[#allocation2 + $0x170] sm:$0xff]  ;;  %v1930_v15 = vld [vmem:[#allocation5 + $0x2e0] sm:$0xff] }
 0x15a   : > { %670 = vrot.lane.b32.xlu1 %v7667_v48, %s6918_s28  ;;  %553 = vst.msk [vmem:[#allocation5 + $0x2e8] sm:$0xff] %vm333_vm0, %v521_v13 }
 0x15b   : > { %v1487_v49 = vpop.permute.xlu0 %1486  ;;  %v1884_v1 = vld [vmem:[#allocation5 + $0x170] sm:$0xff] }
 0x15c   : > { %1566 = vst.msk [vmem:[#allocation5 + $0x188] sm:$0xff] %vm907_vm4, %v1487_v49  ;;  %2212 = vmatprep.mubr.f32.mxu0 %v1884_v1  ;;  %v1037_v50 = vpop.permute.xlu1 %1036  ;;  %v1420_v49 = vld [vmem:[#allocation2 + $0x198] sm:$0xff] }
 0x15d   : > { %1313 = vrot.lane.b32.xlu0 %v7772_v17, %s6918_s28  ;;  %2213 = vmatmul.mubr.f32.gmra.mxu0 %v1883_v25  ;;  %1117 = vst.msk [vmem:[#allocation5 + $0x180] sm:$0xff] %vm1100_vm5, %v1037_v50 }
 0x15e   : > { %863 = vrot.lane.b32.xlu1 %v7710_v57, %s6917_s27 }
 0x15f   : > { %v1679_v48 = vpop.permute.xlu0 %1678 }
 0x160   : > { %1758 = vst.msk [vmem:[#allocation5 + $0x188] sm:$0xff] %vm1100_vm5, %v1679_v48  ;;  %v653_v59 = vpop.permute.xlu1 %652 }
 0x161   : > { %1506 = vrot.lane.b32.xlu0 %v8053_v19, %s6917_s27  ;;  %732 = vst.msk [vmem:[#allocation5 + $0x198] sm:$0xff] %vm714_vm3, %v653_v59 }
 0x162   : > { %1056 = vrot.lane.b32.xlu1 %v8010_v34, %s6919_s21  ;;  %v1927_v34 = vld [vmem:[#allocation5 + $0x2c8] sm:$0xff] }
 0x163   : > { %v1296_v44 = vpop.permute.xlu0 %1295  ;;  %6741 = vmatmul.mubr.msk.f32.gmra.mxu1 %vm333_vm0, %v1927_v34 }
 0x164   : > { %1374 = vst.msk [vmem:[#allocation5 + $0x1a0] sm:$0xff] %vm714_vm3, %v1296_v44  ;;  %v846_v57 = vpop.permute.xlu1 %845  ;;  %v1886_v23 = vld [vmem:[#allocation5 + $0x180] sm:$0xff]  ;;  %6743 = vmatprep.mubr.msk.f32.mxu1 %vm333_vm0, %v1930_v15 }
 0x165   : > { %1698 = vrot.lane.b32.xlu0 %v7788_v26, %s6919_s21  ;;  %925 = vst.msk [vmem:[#allocation5 + $0x198] sm:$0xff] %vm907_vm4, %v846_v57 }
 0x166   : > { %672 = vrot.lane.b32.xlu1 %v7698_v42, %s6918_s28 }
 0x167   : > { %v1489_v52 = vpop.permute.xlu0 %1488  ;;  %v1887_v63 = vld [vmem:[#allocation5 + $0x188] sm:$0xff] }
 0x168   : > { %1567 = vst.msk [vmem:[#allocation5 + $0x1a0] sm:$0xff] %vm907_vm4, %v1489_v52  ;;  %2217 = vmatprep.mubr.f32.mxu0 %v1887_v63  ;;  %v1039_v27 = vpop.permute.xlu1 %1038 }
 0x169   : > { %1315 = vrot.lane.b32.xlu0 %v7803_v62, %s6918_s28  ;;  %2218 = vmatmul.mubr.f32.gmra.mxu0 %v1886_v23  ;;  %v8075_v28 = vpop.f32.mrf.mxu0  ;;  %1118 = vst.msk [vmem:[#allocation5 + $0x198] sm:$0xff] %vm1100_vm5, %v1039_v27  ;;  %v1421_v23 = vld [vmem:[#allocation2 + $0x1a0] sm:$0xff] }
 0x16a   : > { %865 = vrot.lane.b32.xlu1 %v7741_v38, %s6917_s27 }
 0x16b   : > { %v1681_v42 = vpop.permute.xlu0 %1680  ;;  %v2141_v35 = vpop.f32.mrf.mxu0 }
 0x16c   : > { %1759 = vst.msk [vmem:[#allocation5 + $0x1a0] sm:$0xff] %vm1100_vm5, %v1681_v42  ;;  %v655_v31 = vpop.permute.xlu1 %654 }
 0x16d   : > { %1508 = vrot.lane.b32.xlu0 %v8078_v30, %s6917_s27  ;;  %733 = vst.msk [vmem:[#allocation5 + $0x1b0] sm:$0xff] %vm714_vm3, %v655_v31 }
 0x16e   : > { %1058 = vrot.lane.b32.xlu1 %v8033_v60, %s6919_s21 }
 0x16f   : > { %v1298_v39 = vpop.permute.xlu0 %1297 }
 0x170   : > { %1375 = vst.msk [vmem:[#allocation5 + $0x1b8] sm:$0xff] %vm714_vm3, %v1298_v39  ;;  %v848_v47 = vpop.permute.xlu1 %847  ;;  %v1889_v38 = vld [vmem:[#allocation5 + $0x198] sm:$0xff] }
 0x171   : > { %1700 = vrot.lane.b32.xlu0 %v7829_v29, %s6919_s21  ;;  %926 = vst.msk [vmem:[#allocation5 + $0x1b0] sm:$0xff] %vm907_vm4, %v848_v47 }
 0x172   : > { %674 = vrot.lane.b32.xlu1 %v7726_v18, %s6918_s28 }
 0x173   : > { %v1491_v16 = vpop.permute.xlu0 %1490  ;;  %v1890_v10 = vld [vmem:[#allocation5 + $0x1a0] sm:$0xff] }
 0x174   : > { %1568 = vst.msk [vmem:[#allocation5 + $0x1b8] sm:$0xff] %vm907_vm4, %v1491_v16  ;;  %2222 = vmatprep.mubr.f32.mxu0 %v1890_v10  ;;  %v1041_v40 = vpop.permute.xlu1 %1040 }
 0x175   : > { %1317 = vrot.lane.b32.xlu0 %v7843_v41, %s6918_s28  ;;  %v8098_v61 = vpop.f32.mrf.mxu0  ;;  %2223 = vmatmul.mubr.f32.gmra.mxu0 %v1889_v38  ;;  %1119 = vst.msk [vmem:[#allocation5 + $0x1b0] sm:$0xff] %vm1100_vm5, %v1041_v40 }
 0x176   : > { %867 = vrot.lane.b32.xlu1 %v7772_v17, %s6917_s27 }
 0x177   : > { %v1683_v18 = vpop.permute.xlu0 %1682  ;;  %v2146_v5 = vpop.f32.mrf.mxu0 }
 0x178   : > { %1760 = vst.msk [vmem:[#allocation5 + $0x1b8] sm:$0xff] %vm1100_vm5, %v1683_v18  ;;  %v657_v2 = vpop.permute.xlu1 %656 }
 0x179   : > { %1510 = vrot.lane.b32.xlu0 %v8101_v58, %s6917_s27  ;;  %734 = vst.msk [vmem:[#allocation5 + $0x1c8] sm:$0xff] %vm714_vm3, %v657_v2 }
 0x17a   : > { %1060 = vrot.lane.b32.xlu1 %v8053_v19, %s6919_s21 }
 0x17b   : > { %v1300_v17 = vpop.permute.xlu0 %1299 }
 0x17c   : > { %1376 = vst.msk [vmem:[#allocation5 + $0x1d0] sm:$0xff] %vm714_vm3, %v1300_v17  ;;  %v850_v36 = vpop.permute.xlu1 %849  ;;  %v1892_v32 = vld [vmem:[#allocation5 + $0x1b0] sm:$0xff] }
 0x17d   : > { %1702 = vrot.lane.b32.xlu0 %v7860_v14, %s6919_s21  ;;  %927 = vst.msk [vmem:[#allocation5 + $0x1c8] sm:$0xff] %vm907_vm4, %v850_v36  ;;  %v8126_v14 = vld [vmem:[#allocation2 + $0x188] sm:$0xff] }
 0x17e   : > { %676 = vrot.lane.b32.xlu1 %v7758_v21, %s6918_s28 }
 0x17f   : > { %v1493_v3 = vpop.permute.xlu0 %1492  ;;  %v1893_v4 = vld [vmem:[#allocation5 + $0x1b8] sm:$0xff] }
 0x180   : > { %1569 = vst.msk [vmem:[#allocation5 + $0x1d0] sm:$0xff] %vm907_vm4, %v1493_v3  ;;  %2227 = vmatprep.mubr.f32.mxu0 %v1893_v4  ;;  %v1043_v43 = vpop.permute.xlu1 %1042 }
 0x181   : > { %1319 = vrot.lane.b32.xlu0 %v7875_v24, %s6918_s28  ;;  %v8123_v6 = vpop.f32.mrf.mxu0  ;;  %2228 = vmatmul.mubr.f32.gmra.mxu0 %v1892_v32  ;;  %1120 = vst.msk [vmem:[#allocation5 + $0x1c8] sm:$0xff] %vm1100_vm5, %v1043_v43 }
 0x182   : > { %869 = vrot.lane.b32.xlu1 %v7803_v62, %s6917_s27  ;;  %v1805_v62 = vld [vmem:[#allocation2 + $0x1a2] sm:$0xff] }
 0x183   : > { %v1685_v21 = vpop.permute.xlu0 %1684  ;;  %v2151_v7 = vpop.f32.mrf.mxu0  ;;  %1837 = vst.msk [vmem:[#allocation5 + $0x2f8] sm:$0xff] %vm333_vm0, %v1805_v62 }
 0x184   : > { %1761 = vst.msk [vmem:[#allocation5 + $0x1d0] sm:$0xff] %vm1100_vm5, %v1685_v21  ;;  %v659_v56 = vpop.permute.xlu1 %658 }
 0x185   : > { %1512 = vrot.lane.b32.xlu0 %v8126_v14, %s6917_s27  ;;  %735 = vst.msk [vmem:[#allocation5 + $0x1e0] sm:$0xff] %vm714_vm3, %v659_v56 }
 0x186   : > { %1062 = vrot.lane.b32.xlu1 %v8078_v30, %s6919_s21 }
 0x187   : > { %v1302_v9 = vpop.permute.xlu0 %1301 }
 0x188   : > { %1377 = vst.msk [vmem:[#allocation5 + $0x1e8] sm:$0xff] %vm714_vm3, %v1302_v9  ;;  %v852_v60 = vpop.permute.xlu1 %851  ;;  %v1895_v8 = vld [vmem:[#allocation5 + $0x1c8] sm:$0xff] }
 0x189   : > { %1704 = vrot.lane.b32.xlu0 %v7893_v22, %s6919_s21  ;;  %928 = vst.msk [vmem:[#allocation5 + $0x1e0] sm:$0xff] %vm907_vm4, %v852_v60 }
 0x18a   : > { %678 = vrot.lane.b32.xlu1 %v7788_v26, %s6918_s28  ;;  %v1933_v19 = vld [vmem:[#allocation5 + $0x2f8] sm:$0xff] }
 0x18b   : > { %v1495_v12 = vpop.permute.xlu0 %1494  ;;  %v1896_v45 = vld [vmem:[#allocation5 + $0x1d0] sm:$0xff]  ;;  %6744 = vmatmul.mubr.msk.f32.gmra.mxu1 %vm333_vm0, %v1933_v19 }
 0x18c   : > { %1570 = vst.msk [vmem:[#allocation5 + $0x1e8] sm:$0xff] %vm907_vm4, %v1495_v12  ;;  %2232 = vmatprep.mubr.f32.mxu0 %v1896_v45  ;;  %v1045_v25 = vpop.permute.xlu1 %1044  ;;  %6762 = vmatprep.mubr.msk.f32.mxu1 %vm6920_vm7, %v11787_v0 }
 0x18d   : > { %1321 = vrot.lane.b32.xlu0 %v7905_v54, %s6918_s28  ;;  %v8148_v22 = vpop.f32.mrf.mxu0  ;;  %2233 = vmatmul.mubr.f32.gmra.mxu0 %v1895_v8  ;;  %1121 = vst.msk [vmem:[#allocation5 + $0x1e0] sm:$0xff] %vm1100_vm5, %v1045_v25  ;;  %v1612_v54 = vld [vmem:[#allocation2 + $0x199] sm:$0xff] }
 0x18e   : > { %871 = vrot.lane.b32.xlu1 %v7843_v41, %s6917_s27 }
 0x18f   : > { %v1687_v26 = vpop.permute.xlu0 %1686  ;;  %v2156_v1 = vpop.f32.mrf.mxu0 }
 0x190   : > { %1762 = vst.msk [vmem:[#allocation5 + $0x1e8] sm:$0xff] %vm1100_vm5, %v1687_v26  ;;  %v661_v50 = vpop.permute.xlu1 %660 }
 0x191   : > { %1514 = vrot.lane.b32.xlu0 %v1420_v49, %s6917_s27  ;;  %736 = vst.msk [vmem:[#allocation5 + $0x1f8] sm:$0xff] %vm714_vm3, %v661_v50 }
 0x192   : > { %1064 = vrot.lane.b32.xlu1 %v8101_v58, %s6919_s21 }
 0x193   : > { %v1304_v41 = vpop.permute.xlu0 %1303 }
 0x194   : > { %1378 = vst.msk [vmem:[#allocation5 + $0x200] sm:$0xff] %vm714_vm3, %v1304_v41  ;;  %v854_v48 = vpop.permute.xlu1 %853  ;;  %v1898_v53 = vld [vmem:[#allocation5 + $0x1e0] sm:$0xff] }
 0x195   : > { %1706 = vrot.lane.b32.xlu0 %v1612_v54, %s6919_s21  ;;  %929 = vst.msk [vmem:[#allocation5 + $0x1f8] sm:$0xff] %vm907_vm4, %v854_v48 }
 0x196   : > { %680 = vrot.lane.b32.xlu1 %v7829_v29, %s6918_s28 }
 0x197   : > { %v1497_v59 = vpop.permute.xlu0 %1496  ;;  %v1899_v37 = vld [vmem:[#allocation5 + $0x1e8] sm:$0xff] }
 0x198   : > { %1571 = vst.msk [vmem:[#allocation5 + $0x200] sm:$0xff] %vm907_vm4, %v1497_v59  ;;  %2237 = vmatprep.mubr.f32.mxu0 %v1899_v37  ;;  %v1047_v44 = vpop.permute.xlu1 %1046 }
 0x199   : > { %1323 = vrot.lane.b32.xlu0 %v7931_v11, %s6918_s28  ;;  %v8168_v57 = vpop.f32.mrf.mxu0  ;;  %2238 = vmatmul.mubr.f32.gmra.mxu0 %v1898_v53  ;;  %1122 = vst.msk [vmem:[#allocation5 + $0x1f8] sm:$0xff] %vm1100_vm5, %v1047_v44 }
 0x19a   : > { %873 = vrot.lane.b32.xlu1 %v7875_v24, %s6917_s27 }
 0x19b   : > { %v1689_v52 = vpop.permute.xlu0 %1688  ;;  %v2161_v29 = vpop.f32.mrf.mxu0 }
 0x19c   : > { %1763 = vst.msk [vmem:[#allocation5 + $0x200] sm:$0xff] %vm1100_vm5, %v1689_v52  ;;  %v663_v63 = vpop.permute.xlu1 %662 }
 0x19d   : > { %1516 = vrot.lane.b32.xlu0 %v1421_v23, %s6917_s27  ;;  %737 = vst.msk [vmem:[#allocation5 + $0x210] sm:$0xff] %vm714_vm3, %v663_v63 }
 0x19e   : > { %1066 = vrot.lane.b32.xlu1 %v8126_v14, %s6919_s21 }
 0x19f   : > { %v1306_v11 = vpop.permute.xlu0 %1305 }
 0x1a0   : > { %1379 = vst.msk [vmem:[#allocation5 + $0x218] sm:$0xff] %vm714_vm3, %v1306_v11  ;;  %v856_v27 = vpop.permute.xlu1 %855  ;;  %v1901_v24 = vld [vmem:[#allocation5 + $0x1f8] sm:$0xff] }
 0x1a1   : > { %1708 = vrot.lane.b32.xlu0 %v1613_v55, %s6919_s21  ;;  %930 = vst.msk [vmem:[#allocation5 + $0x210] sm:$0xff] %vm907_vm4, %v856_v27 }
 0x1a3   : > { %v1499_v30 = vpop.permute.xlu0 %1498  ;;  %v1902_v42 = vld [vmem:[#allocation5 + $0x200] sm:$0xff] }
 0x1a4   : > { %1572 = vst.msk [vmem:[#allocation5 + $0x218] sm:$0xff] %vm907_vm4, %v1499_v30  ;;  %2242 = vmatprep.mubr.f32.mxu0 %v1902_v42  ;;  %v1049_v35 = vpop.permute.xlu1 %1048 }
 0x1a5   : > { %v8182_v31 = vpop.f32.mrf.mxu0  ;;  %2243 = vmatmul.mubr.f32.gmra.mxu0 %v1901_v24  ;;  %1123 = vst.msk [vmem:[#allocation5 + $0x210] sm:$0xff] %vm1100_vm5, %v1049_v35 }
 0x1a7   : > { %v1691_v39 = vpop.permute.xlu0 %1690  ;;  %v2166_v47 = vpop.f32.mrf.mxu0 }
 0x1a8   : > { %1764 = vst.msk [vmem:[#allocation5 + $0x218] sm:$0xff] %vm1100_vm5, %v1691_v39  ;;  %v665_v38 = vpop.permute.xlu1 %664 }
 0x1a9   : > { %738 = vst.msk [vmem:[#allocation5 + $0x228] sm:$0xff] %vm714_vm3, %v665_v38 }
 0x1ab   : > { %v1308_v16 = vpop.permute.xlu0 %1307 }
 0x1ac   : > { %1380 = vst.msk [vmem:[#allocation5 + $0x230] sm:$0xff] %vm714_vm3, %v1308_v16  ;;  %v858_v10 = vpop.permute.xlu1 %857  ;;  %v1904_v51 = vld [vmem:[#allocation5 + $0x210] sm:$0xff] }
 0x1ad   : > { %931 = vst.msk [vmem:[#allocation5 + $0x228] sm:$0xff] %vm907_vm4, %v858_v10 }
 0x1af   : > { %v1501_v40 = vpop.permute.xlu0 %1500  ;;  %v1905_v58 = vld [vmem:[#allocation5 + $0x218] sm:$0xff] }
 0x1b0   : > { %1573 = vst.msk [vmem:[#allocation5 + $0x230] sm:$0xff] %vm907_vm4, %v1501_v40  ;;  %2247 = vmatprep.mubr.f32.mxu0 %v1905_v58  ;;  %v1051_v18 = vpop.permute.xlu1 %1050 }
 0x1b1   : > { %v8190_v5 = vpop.f32.mrf.mxu0  ;;  %2248 = vmatmul.mubr.f32.gmra.mxu0 %v1904_v51  ;;  %1124 = vst.msk [vmem:[#allocation5 + $0x228] sm:$0xff] %vm1100_vm5, %v1051_v18 }
 0x1b3   : > { %v1693_v33 = vpop.permute.xlu0 %1692  ;;  %v2171_v2 = vpop.f32.mrf.mxu0 }
 0x1b4   : > { %1765 = vst.msk [vmem:[#allocation5 + $0x230] sm:$0xff] %vm1100_vm5, %v1693_v33  ;;  %v667_v34 = vpop.permute.xlu1 %666 }
 0x1b5   : > { %739 = vst.msk [vmem:[#allocation5 + $0x240] sm:$0xff] %vm714_vm3, %v667_v34 }
 0x1b7   : > { %v1310_v17 = vpop.permute.xlu0 %1309 }
 0x1b8   : > { %1381 = vst.msk [vmem:[#allocation5 + $0x248] sm:$0xff] %vm714_vm3, %v1310_v17  ;;  %v860_v36 = vpop.permute.xlu1 %859  ;;  %v1907_v32 = vld [vmem:[#allocation5 + $0x228] sm:$0xff] }
 0x1b9   : > { %932 = vst.msk [vmem:[#allocation5 + $0x240] sm:$0xff] %vm907_vm4, %v860_v36 }
 0x1bb   : > { %v1503_v3 = vpop.permute.xlu0 %1502  ;;  %v1908_v4 = vld [vmem:[#allocation5 + $0x230] sm:$0xff] }
 0x1bc   : > { %1574 = vst.msk [vmem:[#allocation5 + $0x248] sm:$0xff] %vm907_vm4, %v1503_v3  ;;  %2252 = vmatprep.mubr.f32.mxu0 %v1908_v4  ;;  %v1053_v46 = vpop.permute.xlu1 %1052 }
 0x1bd   : > { %v8198_v43 = vpop.f32.mrf.mxu0  ;;  %2253 = vmatmul.mubr.f32.gmra.mxu0 %v1907_v32  ;;  %1125 = vst.msk [vmem:[#allocation5 + $0x240] sm:$0xff] %vm1100_vm5, %v1053_v46 }
 0x1bf   : > { %v1695_v14 = vpop.permute.xlu0 %1694  ;;  %v2176_v21 = vpop.f32.mrf.mxu0 }
 0x1c0   : > { %1766 = vst.msk [vmem:[#allocation5 + $0x248] sm:$0xff] %vm1100_vm5, %v1695_v14  ;;  %v669_v7 = vpop.permute.xlu1 %668 }
 0x1c1   : > { %740 = vst.msk [vmem:[#allocation5 + $0x258] sm:$0xff] %vm714_vm3, %v669_v7 }
 0x1c3   : > { %v1312_v56 = vpop.permute.xlu0 %1311 }
 0x1c4   : > { %1382 = vst.msk [vmem:[#allocation5 + $0x260] sm:$0xff] %vm714_vm3, %v1312_v56  ;;  %v862_v9 = vpop.permute.xlu1 %861  ;;  %v1910_v20 = vld [vmem:[#allocation5 + $0x240] sm:$0xff] }
 0x1c5   : > { %933 = vst.msk [vmem:[#allocation5 + $0x258] sm:$0xff] %vm907_vm4, %v862_v9 }
 0x1c7   : > { %v1505_v60 = vpop.permute.xlu0 %1504  ;;  %v1911_v62 = vld [vmem:[#allocation5 + $0x248] sm:$0xff] }
 0x1c8   : > { %1575 = vst.msk [vmem:[#allocation5 + $0x260] sm:$0xff] %vm907_vm4, %v1505_v60  ;;  %2257 = vmatprep.mubr.f32.mxu0 %v1911_v62  ;;  %v1055_v8 = vpop.permute.xlu1 %1054 }
 0x1c9   : > { %v8206_v12 = vpop.f32.mrf.mxu0  ;;  %2258 = vmatmul.mubr.f32.gmra.mxu0 %v1910_v20  ;;  %1126 = vst.msk [vmem:[#allocation5 + $0x258] sm:$0xff] %vm1100_vm5, %v1055_v8 }
 0x1cb   : > { %v1697_v45 = vpop.permute.xlu0 %1696  ;;  %v2181_v13 = vpop.f32.mrf.mxu0 }
 0x1cc   : > { %1767 = vst.msk [vmem:[#allocation5 + $0x260] sm:$0xff] %vm1100_vm5, %v1697_v45  ;;  %v671_v25 = vpop.permute.xlu1 %670 }
 0x1cd   : > { %741 = vst.msk [vmem:[#allocation5 + $0x270] sm:$0xff] %vm714_vm3, %v671_v25 }
 0x1cf   : > { %v1314_v49 = vpop.permute.xlu0 %1313 }
 0x1d0   : > { %1383 = vst.msk [vmem:[#allocation5 + $0x278] sm:$0xff] %vm714_vm3, %v1314_v49  ;;  %v864_v26 = vpop.permute.xlu1 %863  ;;  %v1913_v1 = vld [vmem:[#allocation5 + $0x258] sm:$0xff] }
 0x1d1   : > { %934 = vst.msk [vmem:[#allocation5 + $0x270] sm:$0xff] %vm907_vm4, %v864_v26 }
 0x1d3   : > { %v1507_v15 = vpop.permute.xlu0 %1506  ;;  %v1914_v50 = vld [vmem:[#allocation5 + $0x260] sm:$0xff] }
 0x1d4   : > { %1576 = vst.msk [vmem:[#allocation5 + $0x278] sm:$0xff] %vm907_vm4, %v1507_v15  ;;  %2262 = vmatprep.mubr.f32.mxu0 %v1914_v50  ;;  %v1057_v19 = vpop.permute.xlu1 %1056 }
 0x1d5   : > { %v8214_v54 = vpop.f32.mrf.mxu0  ;;  %2263 = vmatmul.mubr.f32.gmra.mxu0 %v1913_v1  ;;  %1127 = vst.msk [vmem:[#allocation5 + $0x270] sm:$0xff] %vm1100_vm5, %v1057_v19 }
 0x1d7   : > { %v1699_v41 = vpop.permute.xlu0 %1698  ;;  %v2186_v48 = vpop.f32.mrf.mxu0 }
 0x1d8   : > { %1768 = vst.msk [vmem:[#allocation5 + $0x278] sm:$0xff] %vm1100_vm5, %v1699_v41  ;;  %v673_v53 = vpop.permute.xlu1 %672 }
 0x1d9   : > { %742 = vst.msk [vmem:[#allocation5 + $0x288] sm:$0xff] %vm714_vm3, %v673_v53 }
 0x1db   : > { %v1316_v59 = vpop.permute.xlu0 %1315 }
 0x1dc   : > { %1384 = vst.msk [vmem:[#allocation5 + $0x290] sm:$0xff] %vm714_vm3, %v1316_v59  ;;  %v866_v37 = vpop.permute.xlu1 %865  ;;  %v1916_v44 = vld [vmem:[#allocation5 + $0x270] sm:$0xff] }
 0x1dd   : > { %935 = vst.msk [vmem:[#allocation5 + $0x288] sm:$0xff] %vm907_vm4, %v866_v37 }
 0x1df   : > { %v1509_v23 = vpop.permute.xlu0 %1508  ;;  %v1917_v52 = vld [vmem:[#allocation5 + $0x278] sm:$0xff] }
 0x1e0   : > { %1577 = vst.msk [vmem:[#allocation5 + $0x290] sm:$0xff] %vm907_vm4, %v1509_v23  ;;  %2267 = vmatprep.mubr.f32.mxu0 %v1917_v52  ;;  %v1059_v29 = vpop.permute.xlu1 %1058  ;;  %v2704_v23 = vld [vmem:[%s11782_s5 + $0x38] sm:$0xff] }
 0x1e1   : > { %v8222_v63 = vpop.f32.mrf.mxu0  ;;  %2268 = vmatmul.mubr.f32.gmra.mxu0 %v1916_v44  ;;  %1128 = vst.msk [vmem:[#allocation5 + $0x288] sm:$0xff] %vm1100_vm5, %v1059_v29  ;;  %6747 = vmatpush3.msra.mxu1 %v2704_v23 }
 0x1e2   : > { %6748 = vmatprep.subr.mxu1 %v11787_v0 }
 0x1e3   : > { %v1701_v55 = vpop.permute.xlu0 %1700  ;;  %v2191_v11 = vpop.f32.mrf.mxu0 }
 0x1e4   : > { %1769 = vst.msk [vmem:[#allocation5 + $0x290] sm:$0xff] %vm1100_vm5, %v1701_v55  ;;  %v675_v27 = vpop.permute.xlu1 %674  ;;  %v2703_v55 = vld [vmem:[%s11782_s5 + $0x30] sm:$0xff]  ;;  %v2702_v11 = vld [vmem:[%s11782_s5 + $0x28] sm:$0xff] }
 0x1e5   : > { %743 = vst.msk [vmem:[#allocation5 + $0x2a0] sm:$0xff] %vm714_vm3, %v675_v27  ;;  %6749 = vmatpush3.msra.mxu1 %v2703_v55 }
 0x1e6   : > { %6750 = vmatprep.subr.mxu1 %v11787_v0 }
 0x1e7   : > { %v1318_v24 = vpop.permute.xlu0 %1317  ;;  %6751 = vmatpush3.msra.mxu1 %v2702_v11 }
 0x1e8   : > { %1385 = vst.msk [vmem:[#allocation5 + $0x2a8] sm:$0xff] %vm714_vm3, %v1318_v24  ;;  %v868_v30 = vpop.permute.xlu1 %867  ;;  %v1919_v42 = vld [vmem:[#allocation5 + $0x288] sm:$0xff]  ;;  %6752 = vmatprep.subr.mxu1 %v11787_v0 }
 0x1e9   : > { %936 = vst.msk [vmem:[#allocation5 + $0x2a0] sm:$0xff] %vm907_vm4, %v868_v30  ;;  %v2701_v30 = vld [vmem:[%s11782_s5 + $0x20] sm:$0xff] }
 0x1ea   : > { %6753 = vmatpush3.msra.mxu1 %v2701_v30 }
 0x1eb   : > { %v1511_v35 = vpop.permute.xlu0 %1510  ;;  %v1920_v39 = vld [vmem:[#allocation5 + $0x290] sm:$0xff]  ;;  %6754 = vmatprep.subr.mxu1 %v11787_v0 }
 0x1ec   : > { %1578 = vst.msk [vmem:[#allocation5 + $0x2a8] sm:$0xff] %vm907_vm4, %v1511_v35  ;;  %2272 = vmatprep.mubr.f32.mxu0 %v1920_v39  ;;  %v1061_v47 = vpop.permute.xlu1 %1060  ;;  %v2700_v39 = vld [vmem:[%s11782_s5 + $0x18] sm:$0xff] }
 0x1ed   : > { %v8230_v38 = vpop.f32.mrf.mxu0  ;;  %2273 = vmatmul.mubr.f32.gmra.mxu0 %v1919_v42  ;;  %1129 = vst.msk [vmem:[#allocation5 + $0x2a0] sm:$0xff] %vm1100_vm5, %v1061_v47  ;;  %v2699_v47 = vld [vmem:[%s11782_s5 + $0x10] sm:$0xff]  ;;  %6755 = vmatpush3.msra.mxu1 %v2700_v39 }
 0x1ee   : > { %6756 = vmatprep.subr.mxu1 %v11787_v0 }
 0x1ef   : > { %v1703_v16 = vpop.permute.xlu0 %1702  ;;  %v2196_v10 = vpop.f32.mrf.mxu0  ;;  %6757 = vmatpush3.msra.mxu1 %v2699_v47 }
 0x1f0   : > { %1770 = vst.msk [vmem:[#allocation5 + $0x2a8] sm:$0xff] %vm1100_vm5, %v1703_v16  ;;  %v677_v51 = vpop.permute.xlu1 %676  ;;  %6758 = vmatprep.subr.mxu1 %v11787_v0 }
 0x1f1   : > { %744 = vst.msk [vmem:[#allocation5 + $0x2b8] sm:$0xff] %vm714_vm3, %v677_v51 }
 0x1f3   : > { %v1320_v40 = vpop.permute.xlu0 %1319 }
 0x1f4   : > { %1386 = vst.msk [vmem:[#allocation5 + $0x2c0] sm:$0xff] %vm714_vm3, %v1320_v40  ;;  %v870_v58 = vpop.permute.xlu1 %869  ;;  %v1922_v18 = vld [vmem:[#allocation5 + $0x2a0] sm:$0xff] }
 0x1f5   : > { %937 = vst.msk [vmem:[#allocation5 + $0x2b8] sm:$0xff] %vm907_vm4, %v870_v58  ;;  %v2698_v40 = vld [vmem:[%s11782_s5 + $0x8] sm:$0xff]  ;;  %v2697_v58 = vld [vmem:[%s11782_s5] sm:$0xff] }
 0x1f6   : > { %6759 = vmatpush3.msra.mxu1 %v2698_v40 }
 0x1f7   : > { %v1513_v33 = vpop.permute.xlu0 %1512  ;;  %v1923_v2 = vld [vmem:[#allocation5 + $0x2a8] sm:$0xff]  ;;  %6760 = vmatprep.subr.mxu1 %v11787_v0 }
 0x1f8   : > { %1579 = vst.msk [vmem:[#allocation5 + $0x2c0] sm:$0xff] %vm907_vm4, %v1513_v33  ;;  %2277 = vmatprep.mubr.f32.mxu0 %v1923_v2  ;;  %v1063_v34 = vpop.permute.xlu1 %1062  ;;  %6761 = vmatpush3.msra.mxu1 %v2697_v58  ;;  %v6700_v2 = vpop.f32.mrf.mxu1 }
 0x1f9   : > { %v8238_v17 = vpop.f32.mrf.mxu0  ;;  %2278 = vmatmul.mubr.f32.gmra.mxu0 %v1922_v18  ;;  %1130 = vst.msk [vmem:[#allocation5 + $0x2b8] sm:$0xff] %vm1100_vm5, %v1063_v34  ;;  %4045 = vmatprep.subr.mxu1 %v11787_v0 }
 0x1fa   : > { %v2364_v34 = vpop.f32.mrf.mxu1 }
 0x1fb   : > { %v1705_v36 = vpop.permute.xlu0 %1704  ;;  %v2201_v32 = vpop.f32.mrf.mxu0 }
 0x1fc   : > { %1771 = vst.msk [vmem:[#allocation5 + $0x2c0] sm:$0xff] %vm1100_vm5, %v1705_v36  ;;  %v679_v3 = vpop.permute.xlu1 %678  ;;  %v6703_v36 = vpop.f32.mrf.mxu1 }
 0x1fd   : > { %745 = vst.msk [vmem:[#allocation5 + $0x2d0] sm:$0xff] %vm714_vm3, %v679_v3 }
 0x1ff   : > { %v1322_v4 = vpop.permute.xlu0 %1321 }
 0x200   : > { %1387 = vst.msk [vmem:[#allocation5 + $0x2d8] sm:$0xff] %vm714_vm3, %v1322_v4  ;;  %v872_v46 = vpop.permute.xlu1 %871  ;;  %v1925_v14 = vld [vmem:[#allocation5 + $0x2b8] sm:$0xff]  ;;  %v2374_v4 = vpop.f32.mrf.mxu1 }
 0x201   : > { %938 = vst.msk [vmem:[#allocation5 + $0x2d0] sm:$0xff] %vm907_vm4, %v872_v46 }
 0x202   : > { %v6706_v46 = vpop.f32.mrf.mxu1 }
 0x203   : > { %v1515_v21 = vpop.permute.xlu0 %1514  ;;  %v1926_v7 = vld [vmem:[#allocation5 + $0x2c0] sm:$0xff] }
 0x204   : > { %1580 = vst.msk [vmem:[#allocation5 + $0x2d8] sm:$0xff] %vm907_vm4, %v1515_v21  ;;  %2282 = vmatprep.mubr.f32.mxu0 %v1926_v7  ;;  %v1065_v56 = vpop.permute.xlu1 %1064 }
 0x205   : > { %v8246_v9 = vpop.f32.mrf.mxu0  ;;  %2283 = vmatmul.mubr.f32.gmra.mxu0 %v1925_v14  ;;  %1131 = vst.msk [vmem:[#allocation5 + $0x2d0] sm:$0xff] %vm1100_vm5, %v1065_v56  ;;  %v2384_v14 = vpop.f32.mrf.mxu1 }
 0x207   : > { %v1707_v20 = vpop.permute.xlu0 %1706  ;;  %v2206_v60 = vpop.f32.mrf.mxu0 }
 0x208   : > { %1772 = vst.msk [vmem:[#allocation5 + $0x2d8] sm:$0xff] %vm1100_vm5, %v1707_v20  ;;  %v681_v62 = vpop.permute.xlu1 %680  ;;  %v6709_v21 = vpop.f32.mrf.mxu1 }
 0x209   : > { %746 = vst.msk [vmem:[#allocation5 + $0x2e8] sm:$0xff] %vm714_vm3, %v681_v62 }
 0x20a   : > { %v2394_v20 = vpop.f32.mrf.mxu1 }
 0x20b   : > { %v1324_v8 = vpop.permute.xlu0 %1323 }
 0x20c   : > { %1388 = vst.msk [vmem:[#allocation5 + $0x2f0] sm:$0xff] %vm714_vm3, %v1324_v8  ;;  %v874_v45 = vpop.permute.xlu1 %873  ;;  %v1928_v13 = vld [vmem:[#allocation5 + $0x2d0] sm:$0xff]  ;;  %v8311_v60 = vpop.f32.mrf.mxu1 }
 0x20d   : > { %939 = vst.msk [vmem:[#allocation5 + $0x2e8] sm:$0xff] %vm907_vm4, %v874_v45 }
 0x20e   : > { %v2404_v62 = vpop.f32.mrf.mxu1 }
 0x20f   : > { %v1517_v25 = vpop.permute.xlu0 %1516  ;;  %v1929_v49 = vld [vmem:[#allocation5 + $0x2d8] sm:$0xff] }
 0x210   : > { %1581 = vst.msk [vmem:[#allocation5 + $0x2f0] sm:$0xff] %vm907_vm4, %v1517_v25  ;;  %2287 = vmatprep.mubr.f32.mxu0 %v1929_v49  ;;  %v1067_v26 = vpop.permute.xlu1 %1066  ;;  %v8313_v8 = vpop.f32.mrf.mxu1  ;;  %v8320_v25 = vld [vmem:[%s11779_s2] ss:$0 sm:$0xff] }
 0x211   : > { %v8254_v1 = vpop.f32.mrf.mxu0  ;;  %2288 = vmatmul.mubr.f32.gmra.mxu0 %v1928_v13  ;;  %1132 = vst.msk [vmem:[#allocation5 + $0x2e8] sm:$0xff] %vm1100_vm5, %v1067_v26  ;;  %v2145_v26 = vadd.f32 %v8320_v25, %v8098_v61  ;;  %v2160_v61 = vadd.f32 %v8320_v25, %v8168_v57  ;;  %v2170_v47 = vadd.f32 %v8320_v25, %v8190_v5 }
 0x212   : > { %v8322_v49 = vpop.f32.mrf.mxu1 }
 0x213   : > { %v1709_v15 = vpop.permute.xlu0 %1708  ;;  %v2211_v50 = vpop.f32.mrf.mxu0  ;;  %v8360_v39 = vadd.f32 %v2384_v14, %v2160_v61 }
 0x214   : > { %1773 = vst.msk [vmem:[#allocation5 + $0x2f0] sm:$0xff] %vm1100_vm5, %v1709_v15  ;;  %v2140_v15 = vadd.f32 %v8320_v25, %v8075_v28  ;;  %v8328_v50 = vpop.f32.mrf.mxu1 }
 0x215   : > { %v2596_v14 = vmul.f32 %v8360_v39, %v8360_v39 }
 0x216   : > { %v8338_v23 = vpop.f32.mrf.mxu1 }
 0x218   : > { %v1931_v19 = vld [vmem:[#allocation5 + $0x2e8] sm:$0xff]  ;;  %v8344_v28 = vpop.f32.mrf.mxu1 }
 0x21b   : > { %v1932_v41 = vld [vmem:[#allocation5 + $0x2f0] sm:$0xff] }
 0x21c   : > { %2292 = vmatprep.mubr.f32.mxu0 %v1932_v41  ;;  %v8332_v41 = vadd.f32 %v6700_v2, %v2145_v26 }
 0x21d   : > { %v8258_v48 = vpop.f32.mrf.mxu0  ;;  %2293 = vmatmul.mubr.f32.gmra.mxu0 %v1931_v19  ;;  %v2150_v19 = vadd.f32 %v8320_v25, %v8123_v6 }
 0x21e   : > { %v2593_v6 = vmul.f32 %v8332_v41, %v8332_v41 }
 0x21f   : > { %v2216_v53 = vpop.f32.mrf.mxu0 }
 0x220   : > { %v2155_v53 = vadd.f32 %v8320_v25, %v8148_v22  ;;  %v2165_v22 = vadd.f32 %v8320_v25, %v8182_v31  ;;  %v2175_v31 = vadd.f32 %v8320_v25, %v8198_v43  ;;  %v2625_v40 = vsel %vm379_vm6, %v2593_v6, 0.0 }
 0x222   : > { %v8350_v11 = vadd.f32 %v6703_v36, %v2155_v53  ;;  %v8375_v2 = vadd.f32 %v6706_v46, %v2165_v22  ;;  %v2180_v36 = vadd.f32 %v8320_v25, %v8206_v12  ;;  %v8389_v26 = vadd.f32 %v6709_v21, %v2175_v31 }
 0x223   : > { %v2530_v12 = vsel %vm379_vm6, %v8360_v39, 0.0  ;;  %v2185_v53 = vadd.f32 %v8320_v25, %v8214_v54  ;;  %v2631_v21 = vsel %vm379_vm6, %v2596_v14, 0.0 }
 0x224   : > { %v8398_v22 = vadd.f32 %v2404_v62, %v2180_v36  ;;  %v2599_v54 = vmul.f32 %v8389_v26, %v8389_v26 }
 0x229   : > { %v8260_v59 = vpop.f32.mrf.mxu0 }
 0x22b   : > { %v2221_v37 = vpop.f32.mrf.mxu0 }
 0x22c   : > { %v8336_v37 = vadd.f32 %v2364_v34, %v2140_v15 }
 0x235   : > { %v8262_v44 = vpop.f32.mrf.mxu0 }
 0x237   : > { %v2226_v52 = vpop.f32.mrf.mxu0 }
 0x238   : > { %v8340_v52 = vadd.f32 %v2374_v4, %v2150_v19  ;;  %v2528_v4 = vsel %vm379_vm6, %v8350_v11, 0.0  ;;  %v2597_v19 = vmul.f32 %v8375_v2, %v8375_v2 }
 0x23a   : > { %v2594_v57 = vmul.f32 %v8340_v52, %v8340_v52  ;;  %v2526_v58 = vsel %vm379_vm6, %v8340_v52, 0.0  ;;  %v2633_v31 = vsel %vm379_vm6, %v2597_v19, 0.0 }
 0x23c   : > { %v2627_v43 = vsel %vm379_vm6, %v2594_v57, 0.0 }
 0x241   : > { %v8268_v29 = vpop.f32.mrf.mxu0 }
 0x243   : > { %v2231_v27 = vpop.f32.mrf.mxu0 }
 0x244   : > { %v2592_v27 = vmul.f32 %v8336_v37, %v8336_v37 }
 0x246   : > { %v2624_v5 = vsel %vm379_vm6, %v2592_v27, 0.0  ;;  %v2532_v27 = vsel %vm379_vm6, %v8375_v2, 0.0 }
 0x247   : > { %v2626_v46 = vadd.f32 %v2625_v40, %v2624_v5 }
 0x249   : > { %v2628_v61 = vadd.f32 %v2627_v43, %v2626_v46 }
 0x24d   : > { %v8278_v24 = vpop.f32.mrf.mxu0 }
 0x24f   : > { %v2236_v42 = vpop.f32.mrf.mxu0 }
 0x250   : > { %v2524_v42 = vsel %vm379_vm6, %v8332_v41, 0.0 }
 0x259   : > { %v8284_v35 = vpop.f32.mrf.mxu0 }
 0x25b   : > { %v2241_v16 = vpop.f32.mrf.mxu0 }
 0x25c   : > { %v2523_v16 = vsel %vm379_vm6, %v8336_v37, 0.0 }
 0x25d   : > { %v2525_v34 = vadd.f32 %v2524_v42, %v2523_v16  ;;  %v2190_v42 = vadd.f32 %v8320_v25, %v8222_v63  ;;  %v2195_v63 = vadd.f32 %v8320_v25, %v8230_v38  ;;  %v2637_v38 = vsel %vm379_vm6, %v2599_v54, 0.0 }
 0x25f   : > { %v8429_v14 = vadd.f32 %v8322_v49, %v2190_v42  ;;  %v2205_v49 = vadd.f32 %v8320_v25, %v8246_v9 }
 0x265   : > { %v8294_v10 = vpop.f32.mrf.mxu0 }
 0x267   : > { %v2246_v51 = vpop.f32.mrf.mxu0 }
 0x268   : > { %v8368_v51 = vpop.f32.mrf.mxu1 }
 0x271   : > { %v8304_v18 = vpop.f32.mrf.mxu0 }
 0x273   : > { %v2251_v33 = vpop.f32.mrf.mxu0 }
 0x274   : > { %v2595_v33 = vmul.f32 %v8350_v11, %v8350_v11 }
 0x276   : > { %v2629_v15 = vsel %vm379_vm6, %v2595_v33, 0.0 }
 0x277   : > { %v2630_v57 = vadd.f32 %v2629_v15, %v2628_v61 }
 0x279   : > { %v2632_v33 = vadd.f32 %v2631_v21, %v2630_v57 }
 0x27b   : > { %v2634_v46 = vadd.f32 %v2633_v31, %v2632_v33  ;;  %v2542_v31 = vsel %vm379_vm6, %v8429_v14, 0.0 }
 0x27d   : > { %v8307_v32 = vpop.f32.mrf.mxu0 }
 0x27f   : > { %v2256_v3 = vpop.f32.mrf.mxu0 }
 0x280   : > { %v8380_v3 = vpop.f32.mrf.mxu1 }
 0x289   : > { %v8309_v7 = vpop.f32.mrf.mxu0 }
 0x28b   : > { %v2261_v56 = vpop.f32.mrf.mxu0 }
 0x28c   : > { %v8387_v56 = vadd.f32 %v2394_v20, %v2170_v47  ;;  %v8400_v20 = vpop.f32.mrf.mxu1 }
 0x28e   : > { %v8411_v62 = vpop.f32.mrf.mxu1  ;;  %v2534_v40 = vsel %vm379_vm6, %v8387_v56, 0.0 }
 0x290   : > { %v2454_v15 = vpop.f32.mrf.mxu1 }
 0x292   : > { %v8444_v21 = vpop.f32.mrf.mxu1 }
 0x295   : > { %v8315_v45 = vpop.f32.mrf.mxu0 }
 0x297   : > { %v2266_v13 = vpop.f32.mrf.mxu0 }
 0x298   : > { %v2527_v13 = vadd.f32 %v2526_v58, %v2525_v34  ;;  %v8419_v58 = vadd.f32 %v8311_v60, %v2185_v53  ;;  %v2600_v34 = vmul.f32 %v8398_v22, %v8398_v22  ;;  %v2200_v60 = vadd.f32 %v8320_v25, %v8238_v17 }
 0x299   : > { %v8439_v53 = vadd.f32 %v8313_v8, %v2195_v63  ;;  %v2210_v8 = vadd.f32 %v8320_v25, %v8254_v1  ;;  %v8463_v63 = vadd.f32 %v8328_v50, %v2205_v49  ;;  %v2220_v1 = vadd.f32 %v8320_v25, %v8260_v59 }
 0x29a   : > { %v2529_v6 = vadd.f32 %v2528_v4, %v2527_v13  ;;  %v2536_v4 = vsel %vm379_vm6, %v8389_v26, 0.0  ;;  %v2601_v19 = vmul.f32 %v8419_v58, %v8419_v58  ;;  %v2639_v17 = vsel %vm379_vm6, %v2600_v34, 0.0 }
 0x29b   : > { %v8451_v42 = vadd.f32 %v8338_v23, %v2200_v60 }
 0x29c   : > { %v2531_v47 = vadd.f32 %v2530_v12, %v2529_v6  ;;  %v2538_v12 = vsel %vm379_vm6, %v8398_v22, 0.0  ;;  %v2641_v54 = vsel %vm379_vm6, %v2601_v19, 0.0 }
 0x29e   : > { %v2533_v5 = vadd.f32 %v2532_v27, %v2531_v47  ;;  %v2540_v27 = vsel %vm379_vm6, %v8419_v58, 0.0  ;;  %v2215_v47 = vadd.f32 %v8320_v25, %v8258_v48  ;;  %v2544_v48 = vsel %vm379_vm6, %v8439_v53, 0.0 }
 0x2a0   : > { %v2535_v13 = vadd.f32 %v2534_v40, %v2533_v5  ;;  %v2603_v40 = vmul.f32 %v8439_v53, %v8439_v53  ;;  %v2464_v5 = vpop.f32.mrf.mxu1  ;;  %v8476_v60 = vadd.f32 %v8344_v28, %v2215_v47  ;;  %v8490_v28 = vadd.f32 %v8400_v20, %v2220_v1 }
 0x2a1   : > { %v8346_v55 = vpop.f32.mrf.mxu0 }
 0x2a2   : > { %v2537_v6 = vadd.f32 %v2536_v4, %v2535_v13  ;;  %v2645_v13 = vsel %vm379_vm6, %v2603_v40, 0.0 }
 0x2a3   : > { %v2271_v30 = vpop.f32.mrf.mxu0 }
 0x2a4   : > { %v2598_v30 = vmul.f32 %v8387_v56, %v8387_v56  ;;  %v2539_v9 = vadd.f32 %v2538_v12, %v2537_v6  ;;  %v2605_v12 = vmul.f32 %v8463_v63, %v8463_v63 }
 0x2a6   : > { %v2635_v43 = vsel %vm379_vm6, %v2598_v30, 0.0  ;;  %v2602_v30 = vmul.f32 %v8429_v14, %v8429_v14  ;;  %v2541_v33 = vadd.f32 %v2540_v27, %v2539_v9  ;;  %v2649_v20 = vsel %vm379_vm6, %v2605_v12, 0.0 }
 0x2a7   : > { %v2636_v61 = vadd.f32 %v2635_v43, %v2634_v46  ;;  %v8473_v43 = vadd.f32 %v8368_v51, %v2210_v8  ;;  %v8478_v46 = vpop.f32.mrf.mxu1  ;;  %v2225_v51 = vadd.f32 %v8320_v25, %v8262_v44  ;;  %v2607_v44 = vmul.f32 %v8476_v60, %v8476_v60 }
 0x2a8   : > { %v2643_v34 = vsel %vm379_vm6, %v2602_v30, 0.0  ;;  %v2543_v50 = vadd.f32 %v2542_v31, %v2541_v33  ;;  %v2230_v30 = vadd.f32 %v8320_v25, %v8268_v29  ;;  %v2235_v31 = vadd.f32 %v8320_v25, %v8278_v24 }
 0x2a9   : > { %v2638_v57 = vadd.f32 %v2637_v38, %v2636_v61  ;;  %v2546_v38 = vsel %vm379_vm6, %v8451_v42, 0.0  ;;  %v2606_v27 = vmul.f32 %v8473_v43, %v8473_v43  ;;  %v2474_v9 = vpop.f32.mrf.mxu1  ;;  %v2550_v47 = vsel %vm379_vm6, %v8473_v43, 0.0 }
 0x2aa   : > { %v2545_v49 = vadd.f32 %v2544_v48, %v2543_v50  ;;  %v2608_v29 = vmul.f32 %v8490_v28, %v8490_v28  ;;  %v8514_v48 = vadd.f32 %v2454_v15, %v2230_v30  ;;  %v2653_v24 = vsel %vm379_vm6, %v2607_v44, 0.0 }
 0x2ab   : > { %v2640_v23 = vadd.f32 %v2639_v17, %v2638_v57  ;;  %v2548_v17 = vsel %vm379_vm6, %v8463_v63, 0.0  ;;  %v6736_v33 = vpop.f32.mrf.mxu1  ;;  %v2651_v1 = vsel %vm379_vm6, %v2606_v27, 0.0  ;;  %v2554_v50 = vsel %vm379_vm6, %v8490_v28, 0.0 }
 0x2ac   : > { %v2547_v57 = vadd.f32 %v2546_v38, %v2545_v49  ;;  %v8524_v38 = vadd.f32 %v8411_v62, %v2235_v31  ;;  %v2245_v15 = vadd.f32 %v8320_v25, %v8294_v10  ;;  %v2250_v62 = vadd.f32 %v8320_v25, %v8304_v18 }
 0x2ad   : > { %v8413_v16 = vpop.f32.mrf.mxu0  ;;  %v2642_v4 = vadd.f32 %v2641_v54, %v2640_v23  ;;  %v8505_v54 = vadd.f32 %v8380_v3, %v2225_v51  ;;  %v2240_v3 = vadd.f32 %v8320_v25, %v8284_v35  ;;  %v2655_v35 = vsel %vm379_vm6, %v2608_v29, 0.0 }
 0x2ae   : > { %v2549_v23 = vadd.f32 %v2548_v17, %v2547_v57  ;;  %v2255_v10 = vadd.f32 %v8320_v25, %v8307_v32  ;;  %v2558_v44 = vsel %vm379_vm6, %v8514_v48, 0.0  ;;  %v2260_v31 = vadd.f32 %v8320_v25, %v8309_v7 }
 0x2af   : > { %v2276_v36 = vpop.f32.mrf.mxu0  ;;  %v2644_v19 = vadd.f32 %v2643_v34, %v2642_v4  ;;  %v2552_v34 = vsel %vm379_vm6, %v8476_v60, 0.0  ;;  %v2556_v49 = vsel %vm379_vm6, %v8505_v54, 0.0 }
 0x2b0   : > { %v2604_v36 = vmul.f32 %v8451_v42, %v8451_v42  ;;  %v2551_v4 = vadd.f32 %v2550_v47, %v2549_v23  ;;  %v2560_v23 = vsel %vm379_vm6, %v8524_v38, 0.0 }
 0x2b1   : > { %v2646_v8 = vadd.f32 %v2645_v13, %v2644_v19  ;;  %v2609_v13 = vmul.f32 %v8505_v54, %v8505_v54  ;;  %v2484_v19 = vpop.f32.mrf.mxu1 }
 0x2b2   : > { %v2647_v6 = vsel %vm379_vm6, %v2604_v36, 0.0  ;;  %v2553_v51 = vadd.f32 %v2552_v34, %v2551_v4 }
 0x2b3   : > { %v2648_v40 = vadd.f32 %v2647_v6, %v2646_v8  ;;  %v8533_v6 = vadd.f32 %v2464_v5, %v2240_v3  ;;  %v6739_v30 = vpop.f32.mrf.mxu1  ;;  %v2657_v57 = vsel %vm379_vm6, %v2609_v13, 0.0  ;;  %v8545_v5 = vadd.f32 %v8444_v21, %v2245_v15 }
 0x2b4   : > { %v2555_v27 = vadd.f32 %v2554_v50, %v2553_v51  ;;  %v8557_v21 = vadd.f32 %v8478_v46, %v2255_v10  ;;  %v2265_v50 = vadd.f32 %v8320_v25, %v8315_v45  ;;  %v8566_v15 = vadd.f32 %v2484_v19, %v2260_v31 }
 0x2b5   : > { %v2650_v36 = vadd.f32 %v2649_v20, %v2648_v40  ;;  %v2611_v20 = vmul.f32 %v8524_v38, %v8524_v38  ;;  %v2612_v29 = vmul.f32 %v8533_v6, %v8533_v6  ;;  %v2562_v7 = vsel %vm379_vm6, %v8533_v6, 0.0 }
 0x2b6   : > { %v2557_v18 = vadd.f32 %v2556_v49, %v2555_v27  ;;  %v2564_v51 = vsel %vm379_vm6, %v8545_v5, 0.0  ;;  %v2270_v49 = vadd.f32 %v8320_v25, %v8346_v55  ;;  %v2615_v45 = vmul.f32 %v8557_v21, %v8557_v21 }
 0x2b7   : > { %v2652_v12 = vadd.f32 %v2651_v1, %v2650_v36  ;;  %v8554_v1 = vadd.f32 %v2474_v9, %v2250_v62  ;;  %v2494_v36 = vpop.f32.mrf.mxu1  ;;  %v2661_v4 = vsel %vm379_vm6, %v2611_v20, 0.0  ;;  %v2663_v46 = vsel %vm379_vm6, %v2612_v29, 0.0 }
 0x2b8   : > { %v2559_v3 = vadd.f32 %v2558_v44, %v2557_v18  ;;  %v8580_v27 = vadd.f32 %v6736_v33, %v2265_v50  ;;  %v2275_v10 = vadd.f32 %v8320_v25, %v8413_v16  ;;  %v2616_v55 = vmul.f32 %v8566_v15, %v8566_v15 }
 0x2b9   : > { %v8480_v59 = vpop.f32.mrf.mxu0  ;;  %v2654_v17 = vadd.f32 %v2653_v24, %v2652_v12  ;;  %v2613_v24 = vmul.f32 %v8545_v5, %v8545_v5  ;;  %v6742_v12 = vpop.f32.mrf.mxu1  ;;  %v2568_v18 = vsel %vm379_vm6, %v8557_v21, 0.0  ;;  %v8589_v31 = vadd.f32 %v2494_v36, %v2270_v49 }
 0x2ba   : > { %v2561_v9 = vadd.f32 %v2560_v23, %v2559_v3  ;;  %v2280_v33 = vadd.f32 %v8320_v25, %v8480_v59  ;;  %v2669_v16 = vsel %vm379_vm6, %v2615_v45, 0.0  ;;  %v2617_v3 = vmul.f32 %v8580_v27, %v8580_v27 }
 0x2bb   : > { %v2281_v61 = vpop.f32.mrf.mxu0  ;;  %v2656_v47 = vadd.f32 %v2655_v35, %v2654_v17  ;;  %v2614_v35 = vmul.f32 %v8554_v1, %v8554_v1  ;;  %v2665_v19 = vsel %vm379_vm6, %v2613_v24, 0.0  ;;  %v2566_v17 = vsel %vm379_vm6, %v8554_v1, 0.0  ;;  %v2504_v20 = vpop.f32.mrf.mxu1 }
 0x2bc   : > { %v2610_v61 = vmul.f32 %v8514_v48, %v8514_v48  ;;  %v2563_v62 = vadd.f32 %v2562_v7, %v2561_v9  ;;  %v2671_v59 = vsel %vm379_vm6, %v2616_v55, 0.0  ;;  %v2618_v9 = vmul.f32 %v8589_v31, %v8589_v31 }
 0x2bd   : > { %v2658_v34 = vadd.f32 %v2657_v57, %v2656_v47  ;;  %v2667_v47 = vsel %vm379_vm6, %v2614_v35, 0.0  ;;  %v6745_v29 = vpop.f32.mrf.mxu1 }
 0x2be   : > { %v2659_v32 = vsel %vm379_vm6, %v2610_v61, 0.0  ;;  %v2565_v44 = vadd.f32 %v2564_v51, %v2563_v62 }
 0x2bf   : > { %v2660_v13 = vadd.f32 %v2659_v32, %v2658_v34  ;;  %v2570_v34 = vsel %vm379_vm6, %v8566_v15, 0.0  ;;  %v2514_v49 = vpop.f32.mrf.mxu1 }
 0x2c0   : > { %v2567_v32 = vadd.f32 %v2566_v17, %v2565_v44 }
 0x2c1   : > { %v2662_v61 = vadd.f32 %v2661_v4, %v2660_v13  ;;  %v8598_v4 = vadd.f32 %v6739_v30, %v2275_v10  ;;  %v2572_v13 = vsel %vm379_vm6, %v8580_v27, 0.0  ;;  %v2675_v10 = vsel %vm379_vm6, %v2618_v9, 0.0 }
 0x2c2   : > { %v2569_v24 = vadd.f32 %v2568_v18, %v2567_v32 }
 0x2c3   : > { %v2664_v57 = vadd.f32 %v2663_v46, %v2662_v61  ;;  %v8606_v46 = vadd.f32 %v2504_v20, %v2280_v33  ;;  %v2574_v61 = vsel %vm379_vm6, %v8589_v31, 0.0  ;;  %v2619_v62 = vmul.f32 %v8598_v4, %v8598_v4 }
 0x2c4   : > { %v2571_v30 = vadd.f32 %v2570_v34, %v2569_v24 }
 0x2c5   : > { %v2284_v8 = vpop.f32.mrf.mxu0  ;;  %v2620_v44 = vmul.f32 %v8606_v46, %v8606_v46  ;;  %v2677_v18 = vsel %vm379_vm6, %v2619_v62, 0.0 }
 0x2c6   : > { %v2285_v36 = vadd.f32 %v8320_v25, %v2284_v8  ;;  %v2673_v8 = vsel %vm379_vm6, %v2617_v3, 0.0  ;;  %v2573_v17 = vadd.f32 %v2572_v13, %v2571_v30 }
 0x2c7   : > { %v2286_v40 = vpop.f32.mrf.mxu0 }
 0x2c8   : > { %v2666_v40 = vadd.f32 %v2665_v19, %v2664_v57  ;;  %v8614_v45 = vadd.f32 %v6742_v12, %v2285_v36  ;;  %v2576_v57 = vsel %vm379_vm6, %v8598_v4, 0.0  ;;  %v2578_v12 = vsel %vm379_vm6, %v8606_v46, 0.0 }
 0x2ca   : > { %v2668_v7 = vadd.f32 %v2667_v47, %v2666_v40  ;;  %v2575_v47 = vadd.f32 %v2574_v61, %v2573_v17  ;;  %v2621_v33 = vmul.f32 %v8614_v45, %v8614_v45 }
 0x2cc   : > { %v2670_v35 = vadd.f32 %v2669_v16, %v2668_v7  ;;  %v2577_v32 = vadd.f32 %v2576_v57, %v2575_v47  ;;  %v2679_v16 = vsel %vm379_vm6, %v2620_v44, 0.0  ;;  %v2681_v24 = vsel %vm379_vm6, %v2621_v33, 0.0 }
 0x2cd   : > { %v2693_v47 = vlaneseq }
 0x2ce   : > { %v2672_v19 = vadd.f32 %v2671_v59, %v2670_v35  ;;  %v2579_v36 = vadd.f32 %v2578_v12, %v2577_v32 }
 0x2d0   : > { %v2674_v20 = vadd.f32 %v2673_v8, %v2672_v19 }
 0x2d1   : > { %v2289_v23 = vpop.f32.mrf.mxu0 }
 0x2d2   : > { %v2290_v51 = vadd.f32 %v8320_v25, %v2289_v23  ;;  %v2676_v40 = vadd.f32 %v2675_v10, %v2674_v20  ;;  %v2580_v23 = vsel %vm379_vm6, %v8614_v45, 0.0 }
 0x2d3   : > { %v2291_v50 = vpop.f32.mrf.mxu0  ;;  %v2581_v9 = vadd.f32 %v2580_v23, %v2579_v36 }
 0x2d4   : > { %v8621_v55 = vadd.f32 %v2514_v49, %v2290_v51  ;;  %v2678_v3 = vadd.f32 %v2677_v18, %v2676_v40  ;;  %v2694_v40 = vshrl.u32 %v2693_v47, 7 }
 0x2d6   : > { %v2622_v34 = vmul.f32 %v8621_v55, %v8621_v55  ;;  %v2582_v59 = vsel %vm379_vm6, %v8621_v55, 0.0  ;;  %v2680_v13 = vadd.f32 %v2679_v16, %v2678_v3  ;;  %vm2695_vm8 = vcmp.eq.s32.totalorder %v2694_v40, 0 }
 0x2d7   : > { %v2583_v8 = vadd.f32 %v2582_v59, %v2581_v9 }
 0x2d8   : > { %v2683_v35 = vsel %vm379_vm6, %v2622_v34, 0.0  ;;  %v2682_v49 = vadd.f32 %v2681_v24, %v2680_v13 }
 0x2da   : > { %v2684_v19 = vadd.f32 %v2683_v35, %v2682_v49 }
 0x2dd   : > { %v2294_v7 = vpop.f32.mrf.mxu0 }
 0x2de   : > { %v2295_v50 = vadd.f32 %v8320_v25, %v2294_v7  ;;  %v2789_v7 = vsub.s32 0, %v2694_v40 }
 0x2df   : > { %v2296_v51 = vpop.f32.mrf.mxu0 }
 0x2e0   : > { %v8638_v30 = vadd.f32 %v6745_v29, %v2295_v50 }
 0x2e2   : > { %v2584_v61 = vsel %vm379_vm6, %v8638_v30, 0.0  ;;  %v2623_v62 = vmul.f32 %v8638_v30, %v8638_v30 }
 0x2e3   : > { %v2585_v17 = vadd.f32 %v2584_v61, %v2583_v8  ;;  %v2825_v61 = vsub.s32 1, %v2694_v40 }
 0x2e4   : > { %v2685_v10 = vsel %vm379_vm6, %v2623_v62, 0.0 }
 0x2e5   : > { %v2586_v25 = vrot.slane %v2585_v17, 4  ;;  %v2686_v57 = vadd.f32 %v2685_v10, %v2684_v19 }
 0x2e7   : > { %v2587_v44 = vadd.f32 %v2586_v25, %v2585_v17  ;;  %v2687_v20 = vrot.slane %v2686_v57, 4 }
 0x2e9   : > { %v2588_v18 = vrot.slane %v2587_v44, 2  ;;  %v2688_v29 = vadd.f32 %v2687_v20, %v2686_v57 }
 0x2eb   : > { %v2589_v12 = vadd.f32 %v2588_v18, %v2587_v44  ;;  %v2689_v33 = vrot.slane %v2688_v29, 2 }
 0x2ed   : > { %v2590_v32 = vrot.slane %v2589_v12, 1  ;;  %v2690_v16 = vadd.f32 %v2689_v33, %v2688_v29 }
 0x2ef   : > { %v2691_v23 = vrot.slane %v2690_v16, 1  ;;  %v2591_v34 = vadd.f32 %v2590_v32, %v2589_v12 }
 0x2f1   : > { %v2692_v3 = vadd.f32 %v2691_v23, %v2690_v16 }
 0x2f3   : > { %v2696_v36 = vsel %vm2695_vm8, %v2591_v34, %v2692_v3 }
 0x2f4   : > { %6763 = vmatmul.mubr.msk.f32.vlgmr.msra.gmra.mxu1 %vm379_vm6, %v2696_v36 }
 0x3b4   : > { %v2774_v24 = vpop.f32.mrf.mxu1 }
 0x3b5   : > { %v2778_v59 = vmul.f32 0.0009765625, %v2774_v24 }
 0x3b6   : > { %v6764_v50 = vpop.f32.mrf.mxu1 }
 0x3b7   : > { %v2779_v13 = vmul.f32 %v2778_v59, %v2778_v59  ;;  %v8647_v9 = vrot.slane %v2778_v59, %v2789_v7 }
 0x3b9   : > { %v2781_v51 = vrot.slane %v2779_v13, 7  ;;  %v2791_v62 = vsub.f32 %v8336_v37, %v8647_v9  ;;  %v2792_v19 = vsub.f32 %v8332_v41, %v8647_v9  ;;  %v2793_v17 = vsub.f32 %v8340_v52, %v8647_v9 }
 0x3ba   : > { %v2794_v10 = vsub.f32 %v8350_v11, %v8647_v9  ;;  %v2795_v25 = vsub.f32 %v8360_v39, %v8647_v9  ;;  %v2796_v57 = vsub.f32 %v8375_v2, %v8647_v9  ;;  %v2797_v44 = vsub.f32 %v8387_v56, %v8647_v9 }
 0x3bb   : > { %v2783_v35 = vsub.f32 %v2778_v59, %v2781_v51  ;;  %v2798_v37 = vsub.f32 %v8389_v26, %v8647_v9  ;;  %v2799_v41 = vsub.f32 %v8398_v22, %v8647_v9  ;;  %v2800_v52 = vsub.f32 %v8419_v58, %v8647_v9 }
 0x3bc   : > { %v2801_v11 = vsub.f32 %v8429_v14, %v8647_v9  ;;  %v2802_v39 = vsub.f32 %v8439_v53, %v8647_v9  ;;  %v2803_v2 = vsub.f32 %v8451_v42, %v8647_v9  ;;  %v2804_v56 = vsub.f32 %v8463_v63, %v8647_v9 }
 0x3bd   : > { %v2784_v49 = vmax.f32 %v2783_v35, 0.0  ;;  %v2805_v26 = vsub.f32 %v8473_v43, %v8647_v9  ;;  %v2806_v22 = vsub.f32 %v8476_v60, %v8647_v9  ;;  %v2807_v58 = vsub.f32 %v8490_v28, %v8647_v9 }
 0x3be   : > { %v2808_v14 = vsub.f32 %v8505_v54, %v8647_v9  ;;  %v2809_v53 = vsub.f32 %v8514_v48, %v8647_v9  ;;  %v2810_v42 = vsub.f32 %v8524_v38, %v8647_v9  ;;  %v2811_v63 = vsub.f32 %v8533_v6, %v8647_v9 }
 0x3bf   : > { %v2785_v8 = vadd.f32 1e-05, %v2784_v49  ;;  %v2812_v43 = vsub.f32 %v8545_v5, %v8647_v9  ;;  %v2813_v60 = vsub.f32 %v8554_v1, %v8647_v9  ;;  %v2814_v28 = vsub.f32 %v8557_v21, %v8647_v9 }
 0x3c0   : > { %v2815_v54 = vsub.f32 %v8566_v15, %v8647_v9  ;;  %v2816_v38 = vsub.f32 %v8580_v27, %v8647_v9  ;;  %v2817_v6 = vsub.f32 %v8589_v31, %v8647_v9  ;;  %v2818_v18 = vsub.f32 %v8598_v4, %v8647_v9 }
 0x3c1   : > { %6842 = vrsqrt.f32 %v2785_v8  ;;  %v2819_v5 = vsub.f32 %v8606_v46, %v8647_v9  ;;  %v2820_v1 = vsub.f32 %v8614_v45, %v8647_v9  ;;  %v2821_v21 = vsub.f32 %v8621_v55, %v8647_v9 }
 0x3c2   : > { %v2822_v15 = vsub.f32 %v8638_v30, %v8647_v9 }
 0x3ce   : > { %v6843_v20 = vpop.eup %6842 }
 0x3cf   : > { %v2826_v48 = vrot.slane %v6843_v20, %v2825_v61 }
 0x3d1   : > { %v2827_v29 = vmul.f32 %v2826_v48, %v2791_v62  ;;  %v2828_v27 = vmul.f32 %v2826_v48, %v2792_v19  ;;  %v2829_v12 = vmul.f32 %v2826_v48, %v2793_v17  ;;  %v2830_v33 = vmul.f32 %v2826_v48, %v2794_v10 }
 0x3d2   : > { %v2831_v31 = vmul.f32 %v2826_v48, %v2795_v25  ;;  %v2832_v40 = vmul.f32 %v2826_v48, %v2796_v57  ;;  %v2833_v32 = vmul.f32 %v2826_v48, %v2797_v44  ;;  %v2834_v4 = vmul.f32 %v2826_v48, %v2798_v37  ;;  %v6533_v25 = vld [vmem:[%s11780_s3] ss:$0 sm:$0xff] }
 0x3d3   : > { %v2835_v16 = vmul.f32 %v2826_v48, %v2799_v41  ;;  %v2836_v23 = vmul.f32 %v2826_v48, %v2800_v52  ;;  %v2837_v46 = vmul.f32 %v2826_v48, %v2801_v11  ;;  %v2838_v34 = vmul.f32 %v2826_v48, %v2802_v39 }
 0x3d4   : > { %v2839_v3 = vmul.f32 %v2826_v48, %v2803_v2  ;;  %v2840_v45 = vmul.f32 %v2826_v48, %v2804_v56  ;;  %v2841_v36 = vmul.f32 %v2826_v48, %v2805_v26  ;;  %v2842_v7 = vmul.f32 %v2826_v48, %v2806_v22 }
 0x3d5   : > { %v2843_v55 = vmul.f32 %v2826_v48, %v2807_v58  ;;  %v2844_v24 = vmul.f32 %v2826_v48, %v2808_v14  ;;  %v2845_v59 = vmul.f32 %v2826_v48, %v2809_v53  ;;  %v2846_v30 = vmul.f32 %v2826_v48, %v2810_v42 }
 0x3d6   : > { %v2847_v50 = vmul.f32 %v2826_v48, %v2811_v63  ;;  %v2848_v13 = vmul.f32 %v2826_v48, %v2812_v43  ;;  %v2849_v9 = vmul.f32 %v2826_v48, %v2813_v60  ;;  %v2850_v51 = vmul.f32 %v2826_v48, %v2814_v28  ;;  %v6534_v28 = vld [vmem:[%s11781_s4] ss:$0 sm:$0xff] }
 0x3d7   : > { %v2851_v35 = vmul.f32 %v2826_v48, %v2815_v54  ;;  %v2852_v49 = vmul.f32 %v2826_v48, %v2816_v38  ;;  %v2853_v8 = vmul.f32 %v2826_v48, %v2817_v6  ;;  %v2854_v61 = vmul.f32 %v2826_v48, %v2818_v18 }
 0x3d8   : > { %v2855_v62 = vmul.f32 %v2826_v48, %v2819_v5  ;;  %v2856_v19 = vmul.f32 %v2826_v48, %v2820_v1  ;;  %v2857_v17 = vmul.f32 %v2826_v48, %v2821_v21  ;;  %v2858_v10 = vmul.f32 %v2826_v48, %v2822_v15 }
 0x3d9   : > { %v8717_v57 = vand.u32 127, %v2693_v47  ;;  %v2866_v44 = vmul.f32 %v6533_v25, %v2827_v29  ;;  %v2867_v37 = vmul.f32 %v6533_v25, %v2828_v27  ;;  %v2868_v41 = vmul.f32 %v6533_v25, %v2829_v12 }
 0x3da   : > { %v2869_v52 = vmul.f32 %v6533_v25, %v2830_v33  ;;  %v2870_v11 = vmul.f32 %v6533_v25, %v2831_v31  ;;  %v2871_v39 = vmul.f32 %v6533_v25, %v2832_v40  ;;  %v2872_v2 = vmul.f32 %v6533_v25, %v2833_v32 }
 0x3db   : > { %11991 = vst [vmem:[#allocation7_spill] sm:$0xff] %v8717_v57  ;;  %v2873_v56 = vmul.f32 %v6533_v25, %v2834_v4  ;;  %v2874_v26 = vmul.f32 %v6533_v25, %v2835_v16  ;;  %v2875_v22 = vmul.f32 %v6533_v25, %v2836_v23  ;;  %v2876_v58 = vmul.f32 %v6533_v25, %v2837_v46 }
 0x3dc   : > { %v2877_v14 = vmul.f32 %v6533_v25, %v2838_v34  ;;  %v2878_v53 = vmul.f32 %v6533_v25, %v2839_v3  ;;  %v2879_v42 = vmul.f32 %v6533_v25, %v2840_v45  ;;  %v2880_v63 = vmul.f32 %v6533_v25, %v2841_v36 }
 0x3dd   : > { %v2881_v20 = vmul.f32 %v6533_v25, %v2842_v7  ;;  %v2882_v43 = vmul.f32 %v6533_v25, %v2843_v55  ;;  %v2883_v60 = vmul.f32 %v6533_v25, %v2844_v24  ;;  %v2884_v47 = vmul.f32 %v6533_v25, %v2845_v59 }
 0x3de   : > { %v2885_v54 = vmul.f32 %v6533_v25, %v2846_v30  ;;  %v2886_v48 = vmul.f32 %v6533_v25, %v2847_v50  ;;  %v2887_v38 = vmul.f32 %v6533_v25, %v2848_v13  ;;  %v2888_v6 = vmul.f32 %v6533_v25, %v2849_v9 }
 0x3df   : > { %v2889_v18 = vmul.f32 %v6533_v25, %v2850_v51  ;;  %v2890_v5 = vmul.f32 %v6533_v25, %v2851_v35  ;;  %v2891_v1 = vmul.f32 %v6533_v25, %v2852_v49  ;;  %v2892_v21 = vmul.f32 %v6533_v25, %v2853_v8 }
 0x3e0   : > { %v2893_v15 = vmul.f32 %v6533_v25, %v2854_v61  ;;  %v2894_v29 = vmul.f32 %v6533_v25, %v2855_v62  ;;  %v2895_v27 = vmul.f32 %v6533_v25, %v2856_v19  ;;  %v2896_v12 = vmul.f32 %v6533_v25, %v2857_v17 }
 0x3e1   : > { %v2897_v33 = vmul.f32 %v6533_v25, %v2858_v10  ;;  %v2905_v31 = vadd.f32 %v6534_v28, %v2866_v44  ;;  %v2906_v40 = vadd.f32 %v6534_v28, %v2867_v37  ;;  %v2907_v32 = vadd.f32 %v6534_v28, %v2868_v41 }
 0x3e2   : > { %v2908_v4 = vadd.f32 %v6534_v28, %v2869_v52  ;;  %v2909_v16 = vadd.f32 %v6534_v28, %v2870_v11  ;;  %v2910_v23 = vadd.f32 %v6534_v28, %v2871_v39  ;;  %v2911_v46 = vadd.f32 %v6534_v28, %v2872_v2 }
 0x3e3   : > { %v2912_v34 = vadd.f32 %v6534_v28, %v2873_v56  ;;  %v2913_v3 = vadd.f32 %v6534_v28, %v2874_v26  ;;  %v2914_v45 = vadd.f32 %v6534_v28, %v2875_v22  ;;  %v2915_v36 = vadd.f32 %v6534_v28, %v2876_v58 }
 0x3e4   : > { %v8722_v7 = vadd.f32 %v6534_v28, %v2877_v14  ;;  %v8724_v55 = vadd.f32 %v6534_v28, %v2878_v53  ;;  %v8726_v24 = vadd.f32 %v6534_v28, %v2879_v42  ;;  %v8728_v59 = vadd.f32 %v6534_v28, %v2880_v63 }
 0x3e5   : > { %v8730_v30 = vadd.f32 %v6534_v28, %v2881_v20  ;;  %v8732_v50 = vadd.f32 %v6534_v28, %v2882_v43  ;;  %v8734_v13 = vadd.f32 %v6534_v28, %v2883_v60  ;;  %v8736_v9 = vadd.f32 %v6534_v28, %v2884_v47 }
 0x3e6   : > { %v8738_v51 = vadd.f32 %v6534_v28, %v2885_v54  ;;  %v8740_v35 = vadd.f32 %v6534_v28, %v2886_v48  ;;  %v8742_v49 = vadd.f32 %v6534_v28, %v2887_v38  ;;  %v8744_v8 = vadd.f32 %v6534_v28, %v2888_v6 }
 0x3e7   : > { %v8746_v61 = vadd.f32 %v6534_v28, %v2889_v18  ;;  %v8748_v62 = vadd.f32 %v6534_v28, %v2890_v5  ;;  %v8750_v19 = vadd.f32 %v6534_v28, %v2891_v1  ;;  %v8752_v17 = vadd.f32 %v6534_v28, %v2892_v21 }
 0x3e8   : > { %v8754_v10 = vadd.f32 %v6534_v28, %v2893_v15  ;;  %v8756_v25 = vadd.f32 %v6534_v28, %v2894_v29  ;;  %v8758_v44 = vadd.f32 %v6534_v28, %v2895_v27  ;;  %v8760_v37 = vadd.f32 %v6534_v28, %v2896_v12 }
 0x3e9   : > { %v8762_v41 = vmul.f32 0.5, %v2905_v31  ;;  %v8764_v52 = vmul.f32 0.5, %v2906_v40  ;;  %v8766_v11 = vmul.f32 0.5, %v2907_v32  ;;  %v8768_v39 = vmul.f32 0.5, %v2908_v4 }
 0x3ea   : > { %v8770_v2 = vmul.f32 0.5, %v2909_v16  ;;  %v8772_v56 = vmul.f32 0.5, %v2910_v23  ;;  %v8774_v26 = vmul.f32 0.5, %v2911_v46  ;;  %v8776_v22 = vmul.f32 0.5, %v2912_v34 }
 0x3eb   : > { %v8778_v58 = vadd.f32 %v6534_v28, %v2897_v33  ;;  %v2969_v14 = vmul.f32 0.70710677, %v2905_v31  ;;  %v2970_v53 = vmul.f32 0.70710677, %v2906_v40  ;;  %v2971_v42 = vmul.f32 0.70710677, %v2907_v32 }
 0x3ec   : > { %v8780_v63 = vmul.f32 0.5, %v2913_v3  ;;  %v8782_v20 = vmul.f32 0.5, %v2914_v45  ;;  %v8784_v43 = vmul.f32 0.5, %v2915_v36  ;;  %v2972_v60 = vmul.f32 0.70710677, %v2908_v4 }
 0x3ed   : > { %v8787_v47 = vmul.f32 0.5, %v8722_v7  ;;  %v8790_v54 = vmul.f32 0.5, %v8724_v55  ;;  %v2973_v48 = vmul.f32 0.70710677, %v2909_v16  ;;  %6844 = verf.f32 %v2969_v14 }
 0x3ee   : > { %v8793_v28 = vmul.f32 0.5, %v8726_v24  ;;  %v8796_v38 = vmul.f32 0.5, %v8728_v59  ;;  %v2974_v6 = vmul.f32 0.70710677, %v2910_v23  ;;  %6846 = verf.f32 %v2970_v53 }
 0x3ef   : > { %v8799_v18 = vmul.f32 0.5, %v8730_v30  ;;  %v8802_v5 = vmul.f32 0.5, %v8732_v50  ;;  %v2975_v1 = vmul.f32 0.70710677, %v2911_v46  ;;  %6848 = verf.f32 %v2971_v42 }
 0x3f0   : > { %v8805_v21 = vmul.f32 0.5, %v8734_v13  ;;  %v8808_v15 = vmul.f32 0.5, %v8736_v9  ;;  %v2976_v29 = vmul.f32 0.70710677, %v2912_v34  ;;  %6850 = verf.f32 %v2972_v60 }
 0x3f1   : > { %v8811_v27 = vmul.f32 0.5, %v8738_v51  ;;  %v8814_v12 = vmul.f32 0.5, %v8740_v35  ;;  %v2977_v33 = vmul.f32 0.70710677, %v2913_v3  ;;  %6852 = verf.f32 %v2973_v48 }
 0x3f2   : > { %v8817_v31 = vmul.f32 0.5, %v8742_v49  ;;  %v8820_v40 = vmul.f32 0.5, %v8744_v8  ;;  %v2978_v32 = vmul.f32 0.70710677, %v2914_v45  ;;  %6854 = verf.f32 %v2974_v6 }
 0x3f3   : > { %v8823_v4 = vmul.f32 0.5, %v8746_v61  ;;  %v8826_v16 = vmul.f32 0.5, %v8748_v62  ;;  %v2979_v23 = vmul.f32 0.70710677, %v2915_v36  ;;  %6856 = verf.f32 %v2975_v1 }
 0x3f4   : > { %v8829_v46 = vmul.f32 0.5, %v8750_v19  ;;  %v8832_v34 = vmul.f32 0.5, %v8752_v17  ;;  %v2980_v3 = vmul.f32 0.70710677, %v8722_v7  ;;  %6858 = verf.f32 %v2976_v29 }
 0x3f5   : > { %v8836_v45 = vmul.f32 0.5, %v8754_v10  ;;  %v8839_v14 = vmul.f32 0.5, %v8756_v25  ;;  %v2981_v53 = vmul.f32 0.70710677, %v8724_v55  ;;  %6860 = verf.f32 %v2977_v33 }
 0x3f6   : > { %v8843_v36 = vmul.f32 0.5, %v8758_v44  ;;  %v8846_v42 = vmul.f32 0.5, %v8760_v37  ;;  %v2982_v60 = vmul.f32 0.70710677, %v8726_v24  ;;  %6862 = verf.f32 %v2978_v32 }
 0x3f7   : > { %v2983_v7 = vmul.f32 0.70710677, %v8728_v59  ;;  %v2984_v48 = vmul.f32 0.70710677, %v8730_v30  ;;  %v2985_v6 = vmul.f32 0.70710677, %v8732_v50  ;;  %6864 = verf.f32 %v2979_v23 }
 0x3f8   : > { %v2986_v55 = vmul.f32 0.70710677, %v8734_v13  ;;  %v2987_v1 = vmul.f32 0.70710677, %v8736_v9  ;;  %v2988_v29 = vmul.f32 0.70710677, %v8738_v51  ;;  %6866 = verf.f32 %v2980_v3 }
 0x3f9   : > { %v2989_v33 = vmul.f32 0.70710677, %v8740_v35  ;;  %v2990_v24 = vmul.f32 0.70710677, %v8742_v49  ;;  %v2991_v32 = vmul.f32 0.70710677, %v8744_v8  ;;  %6868 = verf.f32 %v2981_v53 }
 0x3fa   : > { %v6845_v59 = vpop.eup %6844  ;;  %v2992_v30 = vmul.f32 0.70710677, %v8746_v61  ;;  %v2993_v50 = vmul.f32 0.70710677, %v8748_v62  ;;  %v2994_v23 = vmul.f32 0.70710677, %v8750_v19  ;;  %6870 = verf.f32 %v2982_v60 }
 0x3fb   : > { %v6847_v13 = vpop.eup %6846  ;;  %v2995_v9 = vmul.f32 0.70710677, %v8752_v17  ;;  %v8863_v51 = vmul.f32 0.70710677, %v8754_v10  ;;  %6872 = verf.f32 %v2983_v7  ;;  %v3033_v35 = vadd.f32 1.0, %v6845_v59 }
 0x3fc   : > { %v6849_v49 = vpop.eup %6848  ;;  %v8866_v8 = vmul.f32 0.70710677, %v8756_v25  ;;  %v8869_v3 = vmul.f32 0.70710677, %v8758_v44  ;;  %6874 = verf.f32 %v2984_v48  ;;  %v3034_v61 = vadd.f32 1.0, %v6847_v13 }
 0x3fd   : > { %v6851_v62 = vpop.eup %6850  ;;  %v8872_v19 = vmul.f32 0.70710677, %v8760_v37  ;;  %6876 = verf.f32 %v2985_v6  ;;  %v3035_v17 = vadd.f32 1.0, %v6849_v49  ;;  %v8875_v10 = vmul.f32 %v3033_v35, %v8762_v41 }
 0x3fe   : > { %v6853_v53 = vpop.eup %6852  ;;  %v8878_v60 = vmul.f32 0.70710677, %v8778_v58  ;;  %6878 = verf.f32 %v2986_v55  ;;  %v3036_v25 = vadd.f32 1.0, %v6851_v62  ;;  %v8881_v44 = vmul.f32 %v3034_v61, %v8764_v52 }
 0x3ff   : > { %v6855_v7 = vpop.eup %6854  ;;  %6880 = verf.f32 %v2987_v1  ;;  %v3037_v48 = vadd.f32 1.0, %v6853_v53  ;;  %v8884_v37 = vmul.f32 %v3035_v17, %v8766_v11  ;;  %v3154_v6 = vrot.slane %v8875_v10, 1 }
 0x400   : > { %v6857_v59 = vpop.eup %6856  ;;  %6882 = verf.f32 %v2988_v29  ;;  %v3038_v41 = vadd.f32 1.0, %v6855_v7  ;;  %v8888_v13 = vmul.f32 %v3036_v25, %v8768_v39  ;;  %v8891_v55 = vrot.slane %v8881_v44, 1 }
 0x401   : > { %11992 = vst [vmem:[#allocation8_spill] sm:$0xff] %v8884_v37  ;;  %v6859_v35 = vpop.eup %6858  ;;  %6884 = verf.f32 %v2989_v33  ;;  %v3039_v52 = vadd.f32 1.0, %v6857_v59  ;;  %v8894_v1 = vmul.f32 %v3037_v48, %v8770_v2  ;;  %v3157_v11 = vrot.slane %v8884_v37, 1 }
 0x402   : > { %v6861_v49 = vpop.eup %6860  ;;  %6886 = verf.f32 %v2990_v24  ;;  %v3040_v61 = vadd.f32 1.0, %v6859_v35  ;;  %v8898_v29 = vmul.f32 %v3038_v41, %v8772_v56  ;;  %v8902_v39 = vsel %vm3153_vm9, %v3154_v6, %v8891_v55 }
 0x403   : > { %11993 = vst [vmem:[#allocation9_spill] sm:$0xff] %v8894_v1  ;;  %v6863_v62 = vpop.eup %6862  ;;  %6888 = verf.f32 %v2991_v32  ;;  %v3041_v17 = vadd.f32 1.0, %v6861_v49  ;;  %v8905_v33 = vmul.f32 %v3039_v52, %v8774_v26  ;;  %v8908_v2 = vrot.slane %v8888_v13, 1 }
 0x404   : > { %11994 = vst [vmem:[#allocation10_spill] sm:$0xff] %v8898_v29  ;;  %v6865_v53 = vpop.eup %6864  ;;  %6890 = verf.f32 %v2992_v30  ;;  %v3042_v24 = vadd.f32 1.0, %v6863_v62  ;;  %v8911_v25 = vmul.f32 %v3040_v61, %v8776_v22  ;;  %v3160_v56 = vrot.slane %v8894_v1, 1 }
 0x405   : > { %11995 = vst [vmem:[#allocation11_spill] sm:$0xff] %v8905_v33  ;;  %11996 = vst [vmem:[#allocation12_spill] sm:$0xff] %v8908_v2  ;;  %v6867_v7 = vpop.eup %6866  ;;  %6892 = verf.f32 %v2993_v50  ;;  %v3043_v48 = vadd.f32 1.0, %v6865_v53  ;;  %v8915_v32 = vmul.f32 %v3041_v17, %v8780_v63  ;;  %v8919_v26 = vsel %vm3153_vm9, %v3157_v11, %v8908_v2 }
 0x406   : > { %11997 = vst [vmem:[#allocation13_spill] sm:$0xff] %v8911_v25  ;;  %11999 = vst [vmem:[#allocation15_spill] sm:$0xff] %v8919_v26  ;;  %v6869_v6 = vpop.eup %6868  ;;  %6894 = verf.f32 %v2994_v23  ;;  %v3044_v59 = vadd.f32 1.0, %v6867_v7  ;;  %v8922_v30 = vmul.f32 %v3042_v24, %v8782_v20  ;;  %v8925_v22 = vrot.slane %v8898_v29, 1 }
 0x407   : > { %11998 = vst [vmem:[#allocation14_spill] sm:$0xff] %v8915_v32  ;;  %v6871_v41 = vpop.eup %6870  ;;  %6896 = verf.f32 %v2995_v9  ;;  %v3045_v50 = vadd.f32 1.0, %v6869_v6  ;;  %v8928_v35 = vmul.f32 %v3043_v48, %v8784_v43  ;;  %v3163_v63 = vrot.slane %v8905_v33, 1 }
 0x408   : > { %12000 = vst [vmem:[#allocation16_spill] sm:$0xff] %v8922_v30  ;;  %12001 = vst [vmem:[#allocation17_spill] sm:$0xff] %v8925_v22  ;;  %v6873_v52 = vpop.eup %6872  ;;  %6898 = verf.f32 %v8863_v51  ;;  %v3046_v11 = vadd.f32 1.0, %v6871_v41  ;;  %v8933_v23 = vmul.f32 %v3044_v59, %v8787_v47  ;;  %v8937_v20 = vsel %vm3153_vm9, %v3160_v56, %v8925_v22 }
 0x409   : > { %12002 = vst [vmem:[#allocation18_spill] sm:$0xff] %v8928_v35  ;;  %12004 = vst [vmem:[#allocation20_spill] sm:$0xff] %v8937_v20  ;;  %v6875_v49 = vpop.eup %6874  ;;  %6900 = verf.f32 %v8866_v8  ;;  %v3047_v9 = vadd.f32 1.0, %v6873_v52  ;;  %v8941_v43 = vmul.f32 %v3045_v50, %v8790_v54  ;;  %v8944_v61 = vrot.slane %v8911_v25, 1 }
 0x40a   : > { %12003 = vst [vmem:[#allocation19_spill] sm:$0xff] %v8933_v23  ;;  %v6877_v62 = vpop.eup %6876  ;;  %6902 = verf.f32 %v8869_v3  ;;  %v3048_v51 = vadd.f32 1.0, %v6875_v49  ;;  %v8948_v47 = vmul.f32 %v3046_v11, %v8793_v28  ;;  %v3166_v17 = vrot.slane %v8915_v32, 1 }
 0x40b   : > { %12005 = vst [vmem:[#allocation21_spill] sm:$0xff] %v8941_v43  ;;  %12006 = vst [vmem:[#allocation22_spill] sm:$0xff] %v8944_v61  ;;  %v6879_v53 = vpop.eup %6878  ;;  %6904 = verf.f32 %v8872_v19  ;;  %v3049_v8 = vadd.f32 1.0, %v6877_v62  ;;  %v8953_v24 = vmul.f32 %v3047_v9, %v8796_v38  ;;  %v8957_v54 = vsel %vm3153_vm9, %v3163_v63, %v8944_v61 }
 0x40c   : > { %12007 = vst [vmem:[#allocation23_spill] sm:$0xff] %v8948_v47  ;;  %12009 = vst [vmem:[#allocation25_spill] sm:$0xff] %v8957_v54  ;;  %v6881_v56 = vpop.eup %6880  ;;  %6906 = verf.f32 %v8878_v60  ;;  %v3050_v3 = vadd.f32 1.0, %v6879_v53  ;;  %v8961_v28 = vmul.f32 %v3048_v51, %v8799_v18  ;;  %v8964_v7 = vrot.slane %v8922_v30, 1 }
 0x40d   : > { %12008 = vst [vmem:[#allocation24_spill] sm:$0xff] %v8953_v24  ;;  %v6883_v48 = vpop.eup %6882  ;;  %v3051_v19 = vadd.f32 1.0, %v6881_v56  ;;  %v8967_v6 = vmul.f32 %v3049_v8, %v8802_v5  ;;  %v3169_v38 = vrot.slane %v8928_v35, 1  ;;  %v8971_v59 = vrot.slane %v8933_v23, 1 }
 0x40e   : > { %12010 = vst [vmem:[#allocation26_spill] sm:$0xff] %v8961_v28  ;;  %12011 = vst [vmem:[#allocation27_spill] sm:$0xff] %v8964_v7  ;;  %v6885_v41 = vpop.eup %6884  ;;  %v3052_v50 = vadd.f32 1.0, %v6883_v48  ;;  %v8974_v60 = vmul.f32 %v3050_v3, %v8805_v21  ;;  %v8978_v18 = vsel %vm3153_vm9, %v3166_v17, %v8964_v7  ;;  %v3172_v63 = vrot.slane %v8941_v43, 1 }
 0x40f   : > { %12012 = vst [vmem:[#allocation28_spill] sm:$0xff] %v8967_v6  ;;  %12013 = vst [vmem:[#allocation29_spill] sm:$0xff] %v8971_v59  ;;  %v6887_v52 = vpop.eup %6886  ;;  %v3053_v11 = vadd.f32 1.0, %v6885_v41  ;;  %v8982_v5 = vmul.f32 %v3051_v19, %v8808_v15  ;;  %v8986_v49 = vsel %vm3153_vm9, %v3169_v38, %v8971_v59  ;;  %v8989_v9 = vrot.slane %v8948_v47, 1 }
 0x410   : > { %12014 = vst [vmem:[#allocation30_spill] sm:$0xff] %v8974_v60  ;;  %12015 = vst [vmem:[#allocation31_spill] sm:$0xff] %v8978_v18  ;;  %v6889_v21 = vpop.eup %6888  ;;  %v3054_v62 = vadd.f32 1.0, %v6887_v52  ;;  %v8992_v51 = vmul.f32 %v3052_v50, %v8811_v27  ;;  %v3175_v17 = vrot.slane %v8953_v24, 1  ;;  %v8996_v53 = vrot.slane %v8961_v28, 1 }
 0x411   : > { %12016 = vst [vmem:[#allocation32_spill] sm:$0xff] %v8982_v5  ;;  %12017 = vst [vmem:[#allocation33_spill] sm:$0xff] %v8986_v49  ;;  %v6891_v8 = vpop.eup %6890  ;;  %v3055_v15 = vadd.f32 1.0, %v6889_v21  ;;  %v8999_v56 = vmul.f32 %v3053_v11, %v8814_v12  ;;  %v9003_v3 = vsel %vm3153_vm9, %v3172_v63, %v8989_v9  ;;  %v3178_v48 = vrot.slane %v8967_v6, 1 }
 0x412   : > { %12018 = vst [vmem:[#allocation34_spill] sm:$0xff] %v8989_v9  ;;  %12019 = vst [vmem:[#allocation35_spill] sm:$0xff] %v8992_v51  ;;  %v6893_v19 = vpop.eup %6892  ;;  %v3056_v38 = vadd.f32 1.0, %v6891_v8  ;;  %v9007_v27 = vmul.f32 %v3054_v62, %v8817_v31  ;;  %v9011_v41 = vsel %vm3153_vm9, %v3175_v17, %v8996_v53  ;;  %v9014_v50 = vrot.slane %v8974_v60, 1 }
 0x413   : > { %12020 = vst [vmem:[#allocation36_spill] sm:$0xff] %v8996_v53  ;;  %12021 = vst [vmem:[#allocation37_spill] sm:$0xff] %v8999_v56  ;;  %v6895_v12 = vpop.eup %6894  ;;  %v3057_v52 = vadd.f32 1.0, %v6893_v19  ;;  %v9017_v11 = vmul.f32 %v3055_v15, %v8820_v40  ;;  %v3181_v63 = vrot.slane %v8982_v5, 1  ;;  %v9021_v21 = vrot.slane %v8992_v51, 1 }
 0x414   : > { %12022 = vst [vmem:[#allocation38_spill] sm:$0xff] %v9003_v3  ;;  %12023 = vst [vmem:[#allocation39_spill] sm:$0xff] %v9007_v27  ;;  %v6897_v8 = vpop.eup %6896  ;;  %v3058_v31 = vadd.f32 1.0, %v6895_v12  ;;  %v9024_v62 = vmul.f32 %v3056_v38, %v8823_v4  ;;  %v9028_v17 = vsel %vm3153_vm9, %v3178_v48, %v9014_v50  ;;  %v3184_v0 = vrot.slane %v8999_v56, 1 }
 0x415   : > { %12024 = vst [vmem:[#allocation40_spill] sm:$0xff] %v9011_v41  ;;  %12025 = vst [vmem:[#allocation41_spill] sm:$0xff] %v9014_v50  ;;  %v6899_v19 = vpop.eup %6898  ;;  %v2968_v40 = vmul.f32 0.5, %v8778_v58  ;;  %v3059_v15 = vadd.f32 1.0, %v6897_v8  ;;  %v9033_v57 = vmul.f32 %v3057_v52, %v8826_v16  ;;  %v9036_v51 = vrot.slane %v9007_v27, 1 }
 0x416   : > { %12026 = vst [vmem:[#allocation42_spill] sm:$0xff] %v9017_v11  ;;  %12027 = vst [vmem:[#allocation43_spill] sm:$0xff] %v9021_v21  ;;  %v6901_v12 = vpop.eup %6900  ;;  %v3060_v5 = vadd.f32 1.0, %v6899_v19  ;;  %v9039_v4 = vmul.f32 %v3058_v31, %v8829_v46  ;;  %v3187_v48 = vrot.slane %v9017_v11, 1  ;;  %v9043_v38 = vrot.slane %v9024_v62, 1 }
 0x417   : > { %12028 = vst [vmem:[#allocation44_spill] sm:$0xff] %v9024_v62  ;;  %12029 = vst [vmem:[#allocation45_spill] sm:$0xff] %v9028_v17  ;;  %v6903_v56 = vpop.eup %6902  ;;  %v3061_v50 = vadd.f32 1.0, %v6901_v12  ;;  %v9046_v58 = vmul.f32 %v3059_v15, %v8832_v34  ;;  %v9050_v16 = vsel %vm3153_vm9, %v3181_v63, %v9021_v21  ;;  %v3190_v52 = vrot.slane %v9033_v57, 1 }
 0x418   : > { %12030 = vst [vmem:[#allocation46_spill] sm:$0xff] %v9033_v57  ;;  %12031 = vst [vmem:[#allocation47_spill] sm:$0xff] %v9036_v51  ;;  %v6905_v8 = vpop.eup %6904  ;;  %v3062_v19 = vadd.f32 1.0, %v6903_v56  ;;  %v9054_v46 = vmul.f32 %v3060_v5, %v8836_v45  ;;  %v9058_v31 = vsel %vm3153_vm9, %v3184_v0, %v9036_v51  ;;  %v9061_v12 = vrot.slane %v9039_v4, 1 }
 0x419   : > { %12032 = vst [vmem:[#allocation48_spill] sm:$0xff] %v9039_v4  ;;  %12033 = vst [vmem:[#allocation49_spill] sm:$0xff] %v9043_v38  ;;  %v6907_v34 = vpop.eup %6906  ;;  %v3063_v15 = vadd.f32 1.0, %v6905_v8  ;;  %v9065_v63 = vsel %vm3153_vm9, %v3187_v48, %v9043_v38  ;;  %v3193_v57 = vrot.slane %v9046_v58, 1  ;;  %v9070_v56 = vadd.f32 %v8902_v39, %v8875_v10 }
 0x41a   : > { %12034 = vst [vmem:[#allocation50_spill] sm:$0xff] %v9046_v58  ;;  %12035 = vst [vmem:[#allocation51_spill] sm:$0xff] %v9050_v16  ;;  %v3064_v45 = vadd.f32 1.0, %v6907_v34  ;;  %v9073_v5 = vmul.f32 %v3061_v50, %v8839_v14  ;;  %v9077_v0 = vsel %vm3153_vm9, %v3190_v52, %v9061_v12  ;;  %v9080_v8 = vrot.slane %v9054_v46, 1 }
 0x41b   : > { %12036 = vst [vmem:[#allocation52_spill] sm:$0xff] %v9054_v46  ;;  %12037 = vst [vmem:[#allocation53_spill] sm:$0xff] %v9058_v31  ;;  %v9083_v48 = vmul.f32 %v3062_v19, %v8843_v36  ;;  %v9086_v58 = vmul.f32 %v3063_v15, %v8846_v42  ;;  %v9094_v14 = vadd.f32 %v8919_v26, %v8884_v37 }
 0x41c   : > { %12038 = vst [vmem:[#allocation54_spill] sm:$0xff] %v9061_v12  ;;  %12039 = vst [vmem:[#allocation55_spill] sm:$0xff] %v9065_v63  ;;  %v9096_v50 = vmul.f32 %v3064_v45, %v2968_v40  ;;  %v9100_v52 = vsel %vm3153_vm9, %v3193_v57, %v9080_v8  ;;  %v9104_v36 = vadd.f32 %v8908_v2, %v8888_v13 }
 0x41d   : > { %12040 = vst [vmem:[#allocation56_spill] sm:$0xff] %v9070_v56  ;;  %12041 = vst [vmem:[#allocation57_spill] sm:$0xff] %v9073_v5  ;;  %v9090_v56 = vadd.f32 %v8891_v55, %v8881_v44  ;;  %v9108_v42 = vadd.f32 %v8937_v20, %v8894_v1  ;;  %v9112_v19 = vadd.f32 %v8925_v22, %v8898_v29 }
 0x41e   : > { %12042 = vst [vmem:[#allocation58_spill] sm:$0xff] %v9077_v0  ;;  %12043 = vst [vmem:[#allocation59_spill] sm:$0xff] %v9080_v8  ;;  %v9116_v40 = vadd.f32 %v8957_v54, %v8905_v33  ;;  %v9120_v57 = vadd.f32 %v8944_v61, %v8911_v25  ;;  %v9124_v34 = vadd.f32 %v8978_v18, %v8915_v32 }
 0x41f   : > { %12044 = vst [vmem:[#allocation60_spill] sm:$0xff] %v9083_v48  ;;  %12045 = vst [vmem:[#allocation61_spill] sm:$0xff] %v9086_v58  ;;  %v9128_v15 = vadd.f32 %v8964_v7, %v8922_v30  ;;  %v9132_v45 = vadd.f32 %v8986_v49, %v8928_v35  ;;  %v9136_v58 = vadd.f32 %v8971_v59, %v8933_v23 }
 0x420   : > { %12046 = vst [vmem:[#allocation62_spill] sm:$0xff] %v9094_v14  ;;  %12047 = vst [vmem:[#allocation63_spill] sm:$0xff] %v9096_v50  ;;  %v9140_v50 = vadd.f32 %v9003_v3, %v8941_v43  ;;  %v9144_v48 = vadd.f32 %v8989_v9, %v8948_v47  ;;  %v9148_v5 = vadd.f32 %v9011_v41, %v8953_v24  ;;  %v9318_v9 = vrot.slane %v8974_v60, 2 }
 0x421   : > { %12048 = vst [vmem:[#allocation64_spill] sm:$0xff] %v9100_v52  ;;  %12049 = vst [vmem:[#allocation65_spill] sm:$0xff] %v9104_v36 }
 0x422   : > { %12050 = vst [vmem:[#allocation66_spill] sm:$0xff] %v9108_v42  ;;  %12051 = vst [vmem:[#allocation67_spill] sm:$0xff] %v9112_v19  ;;  %v9180_v19 = vadd.f32 %v9065_v63, %v9017_v11  ;;  %v9286_v63 = vrot.slane %v8922_v30, 2 }
 0x423   : > { %12052 = vst [vmem:[#allocation68_spill] sm:$0xff] %v9116_v40  ;;  %12053 = vst [vmem:[#allocation69_spill] sm:$0xff] %v9120_v57  ;;  %v12067_v57 = vld [vmem:[#allocation35_spill] sm:$0xff]  ;;  %v12069_v40 = vld [vmem:[#allocation37_spill] sm:$0xff] }
 0x424   : > { %12054 = vst [vmem:[#allocation70_spill] sm:$0xff] %v9124_v34  ;;  %12055 = vst [vmem:[#allocation71_spill] sm:$0xff] %v9128_v15  ;;  %v9152_v15 = vadd.f32 %v8996_v53, %v8961_v28  ;;  %v12065_v34 = vld [vmem:[#allocation32_spill] sm:$0xff] }
 0x425   : > { %12056 = vst [vmem:[#allocation72_spill] sm:$0xff] %v9132_v45  ;;  %12057 = vst [vmem:[#allocation73_spill] sm:$0xff] %v9136_v58  ;;  %v9156_v45 = vadd.f32 %v9028_v17, %v8967_v6  ;;  %v12063_v58 = vld [vmem:[#allocation41_spill] sm:$0xff]  ;;  %v9306_v17 = vrot.slane %v8961_v28, 2  ;;  %v9326_v28 = vrot.slane %v12067_v57, 2 }
 0x426   : > { %12058 = vst [vmem:[#allocation74_spill] sm:$0xff] %v9140_v50  ;;  %12059 = vst [vmem:[#allocation75_spill] sm:$0xff] %v9144_v48  ;;  %v9160_v50 = vadd.f32 %v12063_v58, %v8974_v60  ;;  %v9164_v48 = vadd.f32 %v9050_v16, %v12065_v34  ;;  %v3299_v16 = vrot.slane %v8941_v43, 2  ;;  %v3302_v58 = vrot.slane %v8953_v24, 2 }
 0x427   : > { %12060 = vst [vmem:[#allocation76_spill] sm:$0xff] %v9148_v5  ;;  %12061 = vst [vmem:[#allocation77_spill] sm:$0xff] %v9152_v15  ;;  %v9168_v5 = vadd.f32 %v9021_v21, %v12067_v57  ;;  %v9172_v15 = vadd.f32 %v9058_v31, %v12069_v40  ;;  %v9258_v31 = vrot.slane %v8881_v44, 2  ;;  %v9294_v21 = vrot.slane %v8933_v23, 2  ;;  %v12104_v57 = vld [vmem:[#allocation56_spill] sm:$0xff] }
 0x428   : > { %12062 = vst [vmem:[#allocation78_spill] sm:$0xff] %v9156_v45  ;;  %12064 = vst [vmem:[#allocation79_spill] sm:$0xff] %v9160_v50  ;;  %v9176_v45 = vadd.f32 %v9036_v51, %v9007_v27  ;;  %v9184_v50 = vadd.f32 %v9043_v38, %v9024_v62  ;;  %v9323_v24 = vsel %vm3280_vm10, %v3302_v58, %v9306_v17  ;;  %v3314_v60 = vrot.slane %v9017_v11, 2  ;;  %v12109_v3 = vld [vmem:[#allocation65_spill] sm:$0xff] }
 0x429   : > { %12066 = vst [vmem:[#allocation80_spill] sm:$0xff] %v9164_v48  ;;  %12068 = vst [vmem:[#allocation81_spill] sm:$0xff] %v9168_v5  ;;  %v12074_v48 = vld [vmem:[#allocation46_spill] sm:$0xff]  ;;  %v9192_v5 = vadd.f32 %v9061_v12, %v9039_v4  ;;  %v3293_v12 = vrot.slane %v8915_v32, 2  ;;  %v12110_v43 = vld [vmem:[#allocation67_spill] sm:$0xff] }
 0x42a   : > { %12070 = vst [vmem:[#allocation82_spill] sm:$0xff] %v9172_v15  ;;  %12071 = vst [vmem:[#allocation83_spill] sm:$0xff] %v9176_v45  ;;  %v9188_v36 = vadd.f32 %v9077_v0, %v12074_v48  ;;  %v12077_v15 = vld [vmem:[#allocation50_spill] sm:$0xff]  ;;  %v9200_v45 = vadd.f32 %v9080_v8, %v9054_v46  ;;  %v3317_v58 = vrot.slane %v12074_v48, 2  ;;  %v9360_v48 = vrot.slane %v9054_v46, 2  ;;  %v12111_v59 = vld [vmem:[#allocation68_spill] sm:$0xff] }
 0x42b   : > { %12072 = vst [vmem:[#allocation84_spill] sm:$0xff] %v9180_v19  ;;  %12073 = vst [vmem:[#allocation85_spill] sm:$0xff] %v9184_v50  ;;  %v9196_v42 = vadd.f32 %v9100_v52, %v12077_v15  ;;  %v3284_v19 = vrot.slane %v8884_v37, 2  ;;  %v9262_v50 = vrot.slane %v8888_v13, 2  ;;  %v9274_v52 = vrot.slane %v8911_v25, 2 }
 0x42c   : > { %12075 = vst [vmem:[#allocation86_spill] sm:$0xff] %v9188_v36  ;;  %12076 = vst [vmem:[#allocation87_spill] sm:$0xff] %v9192_v5  ;;  %v3287_v36 = vrot.slane %v8894_v1, 2  ;;  %v9266_v5 = vrot.slane %v8898_v29, 2  ;;  %v12116_v18 = vld [vmem:[#allocation73_spill] sm:$0xff] }
 0x42d   : > { %12078 = vst [vmem:[#allocation88_spill] sm:$0xff] %v9196_v42  ;;  %12079 = vst [vmem:[#allocation89_spill] sm:$0xff] %v9200_v45  ;;  %v3281_v45 = vrot.slane %v8875_v10, 2  ;;  %v3290_v42 = vrot.slane %v8905_v33, 2  ;;  %v9279_v0 = vsel %vm3280_vm10, %v3284_v19, %v9262_v50  ;;  %v9298_v19 = vrot.slane %v8948_v47, 2  ;;  %v12107_v47 = vld [vmem:[#allocation66_spill] sm:$0xff] }
 0x42e   : > { %12080 = vst [vmem:[#allocation90_spill] sm:$0xff] %v9262_v50  ;;  %12081 = vst [vmem:[#allocation91_spill] sm:$0xff] %v9266_v5  ;;  %v9283_v38 = vsel %vm3280_vm10, %v3287_v36, %v9266_v5  ;;  %v9302_v36 = vsel %vm3280_vm10, %v3293_v12, %v9286_v63  ;;  %v3308_v12 = vrot.slane %v12065_v34, 2  ;;  %v9338_v34 = vrot.slane %v9024_v62, 2  ;;  %v12117_v32 = vld [vmem:[#allocation74_spill] sm:$0xff]  ;;  %v12118_v61 = vld [vmem:[#allocation75_spill] sm:$0xff] }
 0x42f   : > { %v9270_v14 = vsel %vm3280_vm10, %v3281_v45, %v9258_v31  ;;  %12082 = vst [vmem:[#allocation92_spill] sm:$0xff] %v9274_v52  ;;  %12083 = vst [vmem:[#allocation93_spill] sm:$0xff] %v9279_v0  ;;  %v3296_v45 = vrot.slane %v8928_v35, 2  ;;  %v9291_v51 = vsel %vm3280_vm10, %v3290_v42, %v9274_v52  ;;  %v3305_v42 = vrot.slane %v8967_v6, 2  ;;  %v12119_v25 = vld [vmem:[#allocation76_spill] sm:$0xff] }
 0x430   : > { %12084 = vst [vmem:[#allocation94_spill] sm:$0xff] %v9283_v38  ;;  %12085 = vst [vmem:[#allocation95_spill] sm:$0xff] %v9286_v63  ;;  %v9315_v41 = vsel %vm3280_vm10, %v3299_v16, %v9298_v19  ;;  %v3311_v6 = vrot.slane %v12069_v40, 2  ;;  %v9345_v40 = vsel %vm3280_vm10, %v3308_v12, %v9326_v28  ;;  %v9357_v62 = vsel %vm3280_vm10, %v3314_v60, %v9338_v34 }
 0x431   : > { %12086 = vst [vmem:[#allocation96_spill] sm:$0xff] %v9291_v51  ;;  %12087 = vst [vmem:[#allocation97_spill] sm:$0xff] %v9294_v21  ;;  %v9311_v53 = vsel %vm3280_vm10, %v3296_v45, %v9294_v21  ;;  %v9330_v45 = vrot.slane %v9007_v27, 2  ;;  %v9334_v16 = vsel %vm3280_vm10, %v3305_v42, %v9318_v9  ;;  %v9348_v27 = vrot.slane %v9039_v4, 2  ;;  %v12106_v4 = vld [vmem:[#allocation62_spill] sm:$0xff] }
 0x432   : > { %12088 = vst [vmem:[#allocation98_spill] sm:$0xff] %v9298_v19  ;;  %12089 = vst [vmem:[#allocation99_spill] sm:$0xff] %v9302_v36  ;;  %v3320_v42 = vrot.slane %v12077_v15, 2  ;;  %v3351_v12 = vadd.f32 %v9270_v14, %v12104_v57  ;;  %v3352_v15 = vadd.f32 %v9258_v31, %v9090_v56  ;;  %v3355_v60 = vadd.f32 %v9283_v38, %v12107_v47  ;;  %v12112_v56 = vld [vmem:[#allocation69_spill] sm:$0xff]  ;;  %v12114_v47 = vld [vmem:[#allocation71_spill] sm:$0xff] }
 0x433   : > { %12090 = vst [vmem:[#allocation100_spill] sm:$0xff] %v9306_v17  ;;  %12091 = vst [vmem:[#allocation101_spill] sm:$0xff] %v9311_v53  ;;  %v9353_v11 = vsel %vm3280_vm10, %v3311_v6, %v9330_v45  ;;  %v9366_v8 = vsel %vm3280_vm10, %v3317_v58, %v9348_v27  ;;  %v3353_v6 = vadd.f32 %v9279_v0, %v12106_v4  ;;  %v12113_v4 = vld [vmem:[#allocation70_spill] sm:$0xff] }
 0x434   : > { %12092 = vst [vmem:[#allocation102_spill] sm:$0xff] %v9315_v41  ;;  %12093 = vst [vmem:[#allocation103_spill] sm:$0xff] %v9318_v9  ;;  %v9376_v46 = vsel %vm3280_vm10, %v3320_v42, %v9360_v48  ;;  %v3354_v57 = vadd.f32 %v9262_v50, %v12109_v3  ;;  %v3356_v58 = vadd.f32 %v9266_v5, %v12110_v43  ;;  %v12115_v42 = vld [vmem:[#allocation72_spill] sm:$0xff] }
 0x435   : > { %12094 = vst [vmem:[#allocation104_spill] sm:$0xff] %v9323_v24  ;;  %12095 = vst [vmem:[#allocation105_spill] sm:$0xff] %v9326_v28  ;;  %v3357_v23 = vadd.f32 %v9291_v51, %v12111_v59  ;;  %v3358_v49 = vadd.f32 %v9274_v52, %v12112_v56  ;;  %v3359_v35 = vadd.f32 %v9302_v36, %v12113_v4  ;;  %v12120_v52 = vld [vmem:[#allocation77_spill] sm:$0xff]  ;;  %v12121_v36 = vld [vmem:[#allocation78_spill] sm:$0xff] }
 0x436   : > { %12096 = vst [vmem:[#allocation106_spill] sm:$0xff] %v9330_v45  ;;  %12097 = vst [vmem:[#allocation107_spill] sm:$0xff] %v9334_v16  ;;  %v3360_v7 = vadd.f32 %v9286_v63, %v12114_v47  ;;  %v3361_v30 = vadd.f32 %v9311_v53, %v12115_v42  ;;  %v3362_v3 = vadd.f32 %v9294_v21, %v12116_v18  ;;  %v12122_v63 = vld [vmem:[#allocation79_spill] sm:$0xff]  ;;  %v12123_v53 = vld [vmem:[#allocation80_spill] sm:$0xff] }
 0x437   : > { %12098 = vst [vmem:[#allocation108_spill] sm:$0xff] %v9338_v34  ;;  %12099 = vst [vmem:[#allocation109_spill] sm:$0xff] %v9345_v40  ;;  %v3363_v43 = vadd.f32 %v9315_v41, %v12117_v32  ;;  %v3364_v59 = vadd.f32 %v9298_v19, %v12118_v61  ;;  %v3365_v56 = vadd.f32 %v9323_v24, %v12119_v25  ;;  %v12124_v21 = vld [vmem:[#allocation81_spill] sm:$0xff]  ;;  %v12125_v41 = vld [vmem:[#allocation82_spill] sm:$0xff] }
 0x438   : > { %12100 = vst [vmem:[#allocation110_spill] sm:$0xff] %v9348_v27  ;;  %12101 = vst [vmem:[#allocation111_spill] sm:$0xff] %v9353_v11  ;;  %v3366_v4 = vadd.f32 %v9306_v17, %v12120_v52  ;;  %v3367_v47 = vadd.f32 %v9334_v16, %v12121_v36  ;;  %v3368_v42 = vadd.f32 %v9318_v9, %v12122_v63  ;;  %v12126_v19 = vld [vmem:[#allocation83_spill] sm:$0xff]  ;;  %v12127_v24 = vld [vmem:[#allocation84_spill] sm:$0xff] }
 0x439   : > { %12102 = vst [vmem:[#allocation112_spill] sm:$0xff] %v9357_v62  ;;  %12103 = vst [vmem:[#allocation113_spill] sm:$0xff] %v9360_v48  ;;  %v3369_v18 = vadd.f32 %v9345_v40, %v12123_v53  ;;  %v3370_v32 = vadd.f32 %v9326_v28, %v12124_v21  ;;  %v3371_v61 = vadd.f32 %v9353_v11, %v12125_v41  ;;  %v12128_v17 = vld [vmem:[#allocation85_spill] sm:$0xff]  ;;  %v12130_v63 = vld [vmem:[#allocation86_spill] sm:$0xff] }
 0x43a   : > { %12105 = vst [vmem:[#allocation56_spill] sm:$0xff] %v9366_v8  ;;  %12108 = vst [vmem:[#allocation62_spill] sm:$0xff] %v9376_v46  ;;  %v3372_v25 = vadd.f32 %v9330_v45, %v12126_v19  ;;  %v3373_v52 = vadd.f32 %v9357_v62, %v12127_v24  ;;  %v9418_v36 = vadd.f32 %v9338_v34, %v12128_v17  ;;  %v12131_v53 = vld [vmem:[#allocation87_spill] sm:$0xff]  ;;  %v12132_v21 = vld [vmem:[#allocation88_spill] sm:$0xff] }
 0x43b   : > { %v3375_v9 = vadd.f32 %v9366_v8, %v12130_v63  ;;  %v3376_v40 = vadd.f32 %v9348_v27, %v12131_v53  ;;  %v3377_v28 = vadd.f32 %v9376_v46, %v12132_v21  ;;  %v12133_v41 = vld [vmem:[#allocation89_spill] sm:$0xff]  ;;  %v12134_v24 = vmax.f32 %v8875_v10, %v8902_v39 }
 0x43c   : > { %12129 = vst [vmem:[#allocation66_spill] sm:$0xff] %v9418_v36  ;;  %v3378_v11 = vadd.f32 %v9360_v48, %v12133_v41  ;;  %v12136_v17 = vmax.f32 %v8881_v44, %v8891_v55  ;;  %v12138_v53 = vmax.f32 %v8884_v37, %v8919_v26  ;;  %v12140_v41 = vmax.f32 %v8888_v13, %v8908_v2  ;;  %v12154_v26 = vld [vmem:[#allocation14_spill] sm:$0xff] }
 0x43d   : > { %v9432_v19 = vmax.f32 %v12134_v24, %v9270_v14  ;;  %v12142_v10 = vmax.f32 %v8894_v1, %v8937_v20  ;;  %v12144_v44 = vmax.f32 %v8898_v29, %v8925_v22  ;;  %v12148_v24 = vld [vmem:[#allocation92_spill] sm:$0xff]  ;;  %v12160_v22 = vld [vmem:[#allocation27_spill] sm:$0xff] }
 0x43e   : > { %v9438_v63 = vmax.f32 %v12136_v17, %v9258_v31  ;;  %v9444_v21 = vmax.f32 %v12138_v53, %v9279_v0  ;;  %v9450_v36 = vmax.f32 %v12140_v41, %v9262_v50  ;;  %v12146_v31 = vmax.f32 %v8905_v33, %v8957_v54  ;;  %v12149_v17 = vld [vmem:[#allocation13_spill] sm:$0xff]  ;;  %v12150_v53 = vld [vmem:[#allocation22_spill] sm:$0xff] }
 0x43f   : > { %12135 = vst [vmem:[#allocation65_spill] sm:$0xff] %v9432_v19  ;;  %v9456_v39 = vmax.f32 %v12142_v10, %v9283_v38  ;;  %v9462_v55 = vmax.f32 %v12144_v44, %v9266_v5  ;;  %v12151_v41 = vmax.f32 %v12149_v17, %v12150_v53  ;;  %v12153_v10 = vld [vmem:[#allocation99_spill] sm:$0xff]  ;;  %v12159_v5 = vld [vmem:[#allocation16_spill] sm:$0xff]  ;;  %v12165_v54 = vld [vmem:[#allocation33_spill] sm:$0xff] }
 0x440   : > { %12137 = vst [vmem:[#allocation67_spill] sm:$0xff] %v9438_v63  ;;  %12139 = vst [vmem:[#allocation68_spill] sm:$0xff] %v9444_v21  ;;  %v9468_v14 = vmax.f32 %v12146_v31, %v9291_v51  ;;  %v12155_v38 = vld [vmem:[#allocation31_spill] sm:$0xff]  ;;  %v12161_v2 = vmax.f32 %v12159_v5, %v12160_v22  ;;  %v12163_v31 = vld [vmem:[#allocation101_spill] sm:$0xff] }
 0x441   : > { %12141 = vst [vmem:[#allocation69_spill] sm:$0xff] %v9450_v36  ;;  %12143 = vst [vmem:[#allocation70_spill] sm:$0xff] %v9456_v39  ;;  %v9474_v0 = vmax.f32 %v12151_v41, %v12148_v24  ;;  %v12156_v20 = vmax.f32 %v12154_v26, %v12155_v38  ;;  %v12158_v44 = vld [vmem:[#allocation95_spill] sm:$0xff]  ;;  %v12164_v51 = vld [vmem:[#allocation18_spill] sm:$0xff] }
 0x442   : > { %12145 = vst [vmem:[#allocation71_spill] sm:$0xff] %v9462_v55  ;;  %12147 = vst [vmem:[#allocation72_spill] sm:$0xff] %v9468_v14  ;;  %v9486_v55 = vmax.f32 %v12161_v2, %v12158_v44  ;;  %v12166_v14 = vmax.f32 %v12164_v51, %v12165_v54  ;;  %v12168_v41 = vld [vmem:[#allocation97_spill] sm:$0xff]  ;;  %v12169_v24 = vld [vmem:[#allocation19_spill] sm:$0xff] }
 0x443   : > { %12152 = vst [vmem:[#allocation73_spill] sm:$0xff] %v9474_v0  ;;  %v9480_v50 = vmax.f32 %v12156_v20, %v12153_v10  ;;  %v12170_v53 = vld [vmem:[#allocation29_spill] sm:$0xff]  ;;  %v12173_v20 = vld [vmem:[#allocation102_spill] sm:$0xff]  ;;  %v12179_v44 = vld [vmem:[#allocation23_spill] sm:$0xff] }
 0x444   : > { %12162 = vst [vmem:[#allocation75_spill] sm:$0xff] %v9486_v55  ;;  %v9492_v39 = vmax.f32 %v12166_v14, %v12163_v31  ;;  %v12171_v0 = vmax.f32 %v12169_v24, %v12170_v53  ;;  %v12174_v10 = vld [vmem:[#allocation21_spill] sm:$0xff]  ;;  %v12175_v38 = vld [vmem:[#allocation38_spill] sm:$0xff]  ;;  %v12183_v14 = vld [vmem:[#allocation104_spill] sm:$0xff] }
 0x445   : > { %12157 = vst [vmem:[#allocation74_spill] sm:$0xff] %v9480_v50  ;;  %v12176_v50 = vmax.f32 %v12174_v10, %v12175_v38  ;;  %v12178_v2 = vld [vmem:[#allocation98_spill] sm:$0xff]  ;;  %v12184_v31 = vld [vmem:[#allocation24_spill] sm:$0xff] }
 0x446   : > { %12167 = vst [vmem:[#allocation76_spill] sm:$0xff] %v9492_v39  ;;  %v9498_v36 = vmax.f32 %v12171_v0, %v12168_v41  ;;  %v12180_v22 = vld [vmem:[#allocation34_spill] sm:$0xff]  ;;  %v12185_v54 = vld [vmem:[#allocation40_spill] sm:$0xff] }
 0x447   : > { %v9504_v21 = vmax.f32 %v12176_v50, %v12173_v20  ;;  %v12181_v55 = vmax.f32 %v12179_v44, %v12180_v22  ;;  %v12186_v39 = vmax.f32 %v12184_v31, %v12185_v54  ;;  %v12188_v0 = vld [vmem:[#allocation100_spill] sm:$0xff]  ;;  %v12189_v41 = vld [vmem:[#allocation26_spill] sm:$0xff]  ;;  %v12194_v20 = vld [vmem:[#allocation45_spill] sm:$0xff] }
 0x448   : > { %12172 = vst [vmem:[#allocation77_spill] sm:$0xff] %v9498_v36  ;;  %v12190_v53 = vld [vmem:[#allocation36_spill] sm:$0xff]  ;;  %v12199_v22 = vld [vmem:[#allocation41_spill] sm:$0xff]  ;;  %v12204_v54 = vld [vmem:[#allocation51_spill] sm:$0xff] }
 0x449   : > { %12177 = vst [vmem:[#allocation78_spill] sm:$0xff] %v9504_v21  ;;  %v9510_v63 = vmax.f32 %v12181_v55, %v12178_v2  ;;  %v9516_v19 = vmax.f32 %v12186_v39, %v12183_v14  ;;  %v12191_v36 = vmax.f32 %v12189_v41, %v12190_v53  ;;  %v12193_v50 = vld [vmem:[#allocation28_spill] sm:$0xff]  ;;  %v12197_v55 = vld [vmem:[#allocation103_spill] sm:$0xff]  ;;  %v12198_v2 = vld [vmem:[#allocation30_spill] sm:$0xff] }
 0x44a   : > { %v12195_v38 = vmax.f32 %v12193_v50, %v12194_v20  ;;  %v12202_v39 = vld [vmem:[#allocation109_spill] sm:$0xff]  ;;  %v12203_v14 = vld [vmem:[#allocation32_spill] sm:$0xff]  ;;  %v12209_v53 = vld [vmem:[#allocation43_spill] sm:$0xff] }
 0x44b   : > { %12182 = vst [vmem:[#allocation79_spill] sm:$0xff] %v9510_v63  ;;  %12187 = vst [vmem:[#allocation80_spill] sm:$0xff] %v9516_v19  ;;  %v9522_v48 = vmax.f32 %v12191_v36, %v12188_v0  ;;  %v12200_v63 = vmax.f32 %v12198_v2, %v12199_v22  ;;  %v12205_v19 = vmax.f32 %v12203_v14, %v12204_v54  ;;  %v12207_v36 = vld [vmem:[#allocation105_spill] sm:$0xff]  ;;  %v12208_v0 = vld [vmem:[#allocation35_spill] sm:$0xff] }
 0x44c   : > { %v9528_v21 = vmax.f32 %v12195_v38, %v9334_v16  ;;  %v12212_v38 = vld [vmem:[#allocation111_spill] sm:$0xff]  ;;  %v12213_v16 = vld [vmem:[#allocation37_spill] sm:$0xff] }
 0x44d   : > { %12192 = vst [vmem:[#allocation81_spill] sm:$0xff] %v9522_v48  ;;  %v9534_v44 = vmax.f32 %v12200_v63, %v12197_v55  ;;  %v9540_v31 = vmax.f32 %v12205_v19, %v12202_v39  ;;  %v12210_v48 = vmax.f32 %v12208_v0, %v12209_v53  ;;  %v12214_v20 = vld [vmem:[#allocation53_spill] sm:$0xff]  ;;  %v12217_v63 = vld [vmem:[#allocation39_spill] sm:$0xff]  ;;  %v12221_v19 = vld [vmem:[#allocation42_spill] sm:$0xff] }
 0x44e   : > { %12196 = vst [vmem:[#allocation82_spill] sm:$0xff] %v9528_v21  ;;  %v12215_v21 = vmax.f32 %v12213_v16, %v12214_v20  ;;  %v12218_v55 = vld [vmem:[#allocation47_spill] sm:$0xff] }
 0x44f   : > { %12201 = vst [vmem:[#allocation83_spill] sm:$0xff] %v9534_v44  ;;  %12206 = vst [vmem:[#allocation84_spill] sm:$0xff] %v9540_v31  ;;  %v9546_v41 = vmax.f32 %v12210_v48, %v12207_v36  ;;  %v12219_v22 = vmax.f32 %v12217_v63, %v12218_v55  ;;  %v12222_v39 = vld [vmem:[#allocation55_spill] sm:$0xff]  ;;  %v12225_v48 = vld [vmem:[#allocation44_spill] sm:$0xff] }
 0x450   : > { %v9552_v50 = vmax.f32 %v12215_v21, %v12212_v38  ;;  %v12223_v54 = vmax.f32 %v12221_v19, %v12222_v39  ;;  %v12226_v36 = vld [vmem:[#allocation49_spill] sm:$0xff]  ;;  %v12229_v21 = vld [vmem:[#allocation46_spill] sm:$0xff] }
 0x451   : > { %12211 = vst [vmem:[#allocation85_spill] sm:$0xff] %v9546_v41  ;;  %v9558_v44 = vmax.f32 %v12219_v22, %v9330_v45  ;;  %v12227_v53 = vmax.f32 %v12225_v48, %v12226_v36  ;;  %v12230_v38 = vld [vmem:[#allocation58_spill] sm:$0xff]  ;;  %v12232_v22 = vld [vmem:[#allocation48_spill] sm:$0xff]  ;;  %v9598_v36 = vadd.f32 %v3354_v57, %v8898_v29  ;;  %v9619_v57 = vadd.f32 %v3361_v30, %v12174_v10 }
 0x452   : > { %12216 = vst [vmem:[#allocation86_spill] sm:$0xff] %v9552_v50  ;;  %v9564_v31 = vmax.f32 %v12223_v54, %v9357_v62  ;;  %v12231_v20 = vmax.f32 %v12229_v21, %v12230_v38  ;;  %v12235_v54 = vld [vmem:[#allocation50_spill] sm:$0xff]  ;;  %v12236_v62 = vld [vmem:[#allocation64_spill] sm:$0xff] }
 0x453   : > { %12220 = vst [vmem:[#allocation87_spill] sm:$0xff] %v9558_v44  ;;  %v9570_v41 = vmax.f32 %v12227_v53, %v9338_v34  ;;  %v12233_v44 = vld [vmem:[#allocation54_spill] sm:$0xff]  ;;  %v12237_v39 = vmax.f32 %v12235_v54, %v12236_v62  ;;  %v9591_v53 = vadd.f32 %v3351_v12, %v8884_v37  ;;  %v3408_v34 = vadd.f32 %v3352_v15, %v8888_v13  ;;  %v12275_v37 = vld [vmem:[#allocation80_spill] sm:$0xff] }
 0x454   : > { %12224 = vst [vmem:[#allocation88_spill] sm:$0xff] %v9564_v31  ;;  %v9576_v50 = vmax.f32 %v12231_v20, %v9366_v8  ;;  %v12234_v45 = vmax.f32 %v12232_v22, %v12233_v44  ;;  %v9595_v20 = vadd.f32 %v3353_v6, %v8894_v1  ;;  %12240 = vst [vmem:[#allocation30_spill] sm:$0xff] %v9598_v36  ;;  %v12253_v36 = vld [vmem:[#allocation59_spill] sm:$0xff] }
 0x455   : > { %12228 = vst [vmem:[#allocation89_spill] sm:$0xff] %v9570_v41  ;;  %v9588_v31 = vmax.f32 %v12237_v39, %v9376_v46  ;;  %12238 = vst [vmem:[#allocation19_spill] sm:$0xff] %v9591_v53  ;;  %v9607_v39 = vadd.f32 %v3357_v23, %v12154_v26  ;;  %v9610_v12 = vadd.f32 %v3358_v49, %v12159_v5  ;;  %v12249_v23 = vld [vmem:[#allocation26_spill] sm:$0xff]  ;;  %v12250_v49 = vld [vmem:[#allocation28_spill] sm:$0xff] }
 0x456   : > { %v9582_v55 = vmax.f32 %v12234_v45, %v9348_v27  ;;  %12239 = vst [vmem:[#allocation21_spill] sm:$0xff] %v9595_v20  ;;  %v9601_v45 = vadd.f32 %v3355_v60, %v8905_v33  ;;  %v9604_v27 = vadd.f32 %v3356_v58, %v12149_v17  ;;  %v9613_v15 = vadd.f32 %v3359_v35, %v12164_v51  ;;  %v12247_v60 = vld [vmem:[#allocation23_spill] sm:$0xff]  ;;  %v12248_v58 = vld [vmem:[#allocation24_spill] sm:$0xff]  ;;  %v12279_v1 = vld [vmem:[#allocation82_spill] sm:$0xff] }
 0x457   : > { %12243 = vst [vmem:[#allocation37_spill] sm:$0xff] %v9607_v39  ;;  %12244 = vst [vmem:[#allocation114_spill] sm:$0xff] %v9610_v12  ;;  %v9616_v6 = vadd.f32 %v3360_v7, %v12169_v24  ;;  %v9622_v8 = vadd.f32 %v3362_v3, %v12247_v60  ;;  %v9625_v44 = vadd.f32 %v3363_v43, %v12248_v58  ;;  %v12251_v7 = vld [vmem:[#allocation113_spill] sm:$0xff]  ;;  %v12252_v20 = vld [vmem:[#allocation52_spill] sm:$0xff] }
 0x458   : > { %12241 = vst [vmem:[#allocation32_spill] sm:$0xff] %v9601_v45  ;;  %12242 = vst [vmem:[#allocation35_spill] sm:$0xff] %v9604_v27  ;;  %v9628_v38 = vadd.f32 %v3364_v59, %v12249_v23  ;;  %v9631_v53 = vadd.f32 %v3365_v56, %v12250_v49  ;;  %v9634_v35 = vadd.f32 %v3366_v4, %v12198_v2  ;;  %v12259_v12 = vld [vmem:[#allocation57_spill] sm:$0xff]  ;;  %v12281_v29 = vld [vmem:[#allocation84_spill] sm:$0xff] }
 0x459   : > { %12245 = vst [vmem:[#allocation115_spill] sm:$0xff] %v9613_v15  ;;  %12246 = vst [vmem:[#allocation116_spill] sm:$0xff] %v9616_v6  ;;  %v12254_v30 = vmax.f32 %v12252_v20, %v12253_v36  ;;  %v9641_v3 = vadd.f32 %v3367_v47, %v12203_v14  ;;  %v9644_v43 = vadd.f32 %v3368_v42, %v12208_v0  ;;  %v12274_v6 = vld [vmem:[#allocation79_spill] sm:$0xff]  ;;  %v12285_v33 = vld [vmem:[#allocation12_spill] sm:$0xff] }
 0x45a   : > { %v9647_v59 = vadd.f32 %v3369_v18, %v12213_v16  ;;  %v9650_v56 = vadd.f32 %v3370_v32, %v12217_v63  ;;  %v9653_v4 = vadd.f32 %v3371_v61, %v12221_v19  ;;  %v9656_v27 = vadd.f32 %v3372_v25, %v12225_v48  ;;  %v12260_v18 = vld [vmem:[#allocation60_spill] sm:$0xff]  ;;  %v12262_v61 = vld [vmem:[#allocation67_spill] sm:$0xff]  ;;  %v12272_v48 = vld [vmem:[#allocation77_spill] sm:$0xff] }
 0x45b   : > { %v3406_v45 = vmax.f32 %v12254_v30, %v12251_v7  ;;  %v9659_v30 = vadd.f32 %v3373_v52, %v12229_v21  ;;  %v3431_v47 = vadd.f32 %v3375_v9, %v12235_v54  ;;  %v3432_v42 = vadd.f32 %v3376_v40, %v12252_v20  ;;  %v12277_v32 = vld [vmem:[#allocation66_spill] sm:$0xff]  ;;  %v12280_v25 = vld [vmem:[#allocation83_spill] sm:$0xff] }
 0x45c   : > { %12255 = vst [vmem:[#allocation23_spill] sm:$0xff] %v9650_v56  ;;  %12256 = vst [vmem:[#allocation24_spill] sm:$0xff] %v9653_v4  ;;  %v3433_v39 = vadd.f32 %v3377_v28, %v12259_v12  ;;  %v3434_v15 = vadd.f32 %v3378_v11, %v12260_v18  ;;  %v3436_v4 = vmax.f32 %v12262_v61, %v8888_v13  ;;  %v12269_v13 = vld [vmem:[#allocation74_spill] sm:$0xff]  ;;  %v12276_v61 = vld [vmem:[#allocation81_spill] sm:$0xff]  ;;  %v3465_v52 = vrot.slane %v12259_v12, 1 }
 0x45d   : > { %12257 = vst [vmem:[#allocation26_spill] sm:$0xff] %v9656_v27  ;;  %12258 = vst [vmem:[#allocation28_spill] sm:$0xff] %v9659_v30  ;;  %v12270_v27 = vld [vmem:[#allocation75_spill] sm:$0xff]  ;;  %v12271_v30 = vld [vmem:[#allocation76_spill] sm:$0xff]  ;;  %v9699_v17 = vadd.f32 %v12277_v32, %v12232_v22  ;;  %v3459_v40 = vmax.f32 %v9576_v50, %v12235_v54  ;;  %v3460_v5 = vmax.f32 %v9582_v55, %v12252_v20  ;;  %v3466_v11 = vrot.slane %v12260_v18, 1 }
 0x45e   : > { %v12273_v28 = vld [vmem:[#allocation78_spill] sm:$0xff]  ;;  %v3461_v56 = vmax.f32 %v9588_v31, %v12259_v12  ;;  %v3462_v26 = vmax.f32 %v3406_v45, %v12260_v18  ;;  %v3471_v51 = vadd.f32 %v3408_v34, %v12285_v33  ;;  %v3494_v21 = vadd.f32 %v3431_v47, %v12236_v62 }
 0x45f   : > { %12278 = vst [vmem:[#allocation57_spill] sm:$0xff] %v9699_v17  ;;  %v3495_v32 = vadd.f32 %v3432_v42, %v12253_v36  ;;  %v9728_v50 = vmax.f32 %v3436_v4, %v12285_v33  ;;  %v3522_v55 = vmax.f32 %v3459_v40, %v12236_v62  ;;  %v3523_v20 = vmax.f32 %v3460_v5, %v12253_v36  ;;  %v12287_v47 = vld [vmem:[#allocation90_spill] sm:$0xff] }
 0x460   : > { %v3467_v31 = vsel %vm3153_vm9, %v3465_v52, %v3466_v11  ;;  %v3497_v45 = vadd.f32 %v3466_v11, %v3434_v15  ;;  %v3525_v54 = vmax.f32 %v3462_v26, %v3466_v11  ;;  %v3526_v22 = vrot.slane %v12259_v12, 2 }
 0x461   : > { %12286 = vst [vmem:[#allocation60_spill] sm:$0xff] %v9728_v50  ;;  %v3496_v41 = vadd.f32 %v3467_v31, %v3433_v39  ;;  %v3524_v9 = vmax.f32 %v3461_v56, %v3467_v31  ;;  %v3527_v34 = vrot.slane %v12260_v18, 2  ;;  %v9736_v17 = vadd.f32 %v3471_v51, %v12287_v47 }
 0x462   : > { %v3555_v33 = vadd.f32 %v3494_v21, %v9376_v46  ;;  %v3556_v4 = vadd.f32 %v3495_v32, %v12251_v7  ;;  %v3583_v42 = vmax.f32 %v3522_v55, %v9376_v46  ;;  %v3584_v39 = vmax.f32 %v3523_v20, %v12251_v7  ;;  %v12288_v21 = vld [vmem:[#allocation63_spill] sm:$0xff]  ;;  %v12289_v46 = vld [vmem:[#allocation61_spill] sm:$0xff] }
 0x463   : > { %v3528_v26 = vsel %vm3280_vm10, %v3526_v22, %v3527_v34  ;;  %v3558_v15 = vadd.f32 %v3527_v34, %v3497_v45  ;;  %v3586_v56 = vmax.f32 %v3525_v54, %v3527_v34  ;;  %v3645_v54 = vrot.slane %v12289_v46, 1 }
 0x464   : > { %v3557_v52 = vadd.f32 %v3528_v26, %v3496_v41  ;;  %v3585_v40 = vmax.f32 %v3524_v9, %v3528_v26  ;;  %v3611_v51 = vadd.f32 %v3555_v33, %v12259_v12  ;;  %v3612_v36 = vadd.f32 %v3556_v4, %v12260_v18 }
 0x465   : > { %v3614_v62 = vadd.f32 %v3558_v15, %v12288_v21  ;;  %v3639_v32 = vmax.f32 %v3583_v42, %v12259_v12  ;;  %v3640_v5 = vmax.f32 %v3584_v39, %v12260_v18  ;;  %v3642_v55 = vmax.f32 %v3586_v56, %v12288_v21 }
 0x466   : > { %v3613_v22 = vadd.f32 %v3557_v52, %v12289_v46  ;;  %v3641_v45 = vmax.f32 %v3585_v40, %v12289_v46  ;;  %v3646_v41 = vrot.slane %v12288_v21, 1  ;;  %v3674_v20 = vadd.f32 %v3611_v51, %v3467_v31  ;;  %v12290_v51 = vld [vmem:[#allocation43_spill] sm:$0xff] }
 0x467   : > { %v3675_v9 = vadd.f32 %v3612_v36, %v3466_v11  ;;  %v3702_v33 = vmax.f32 %v3639_v32, %v3467_v31  ;;  %v3703_v4 = vmax.f32 %v3640_v5, %v3466_v11  ;;  %v3706_v18 = vrot.slane %v12289_v46, 2  ;;  %v12291_v46 = vld [vmem:[#allocation7_spill] sm:$0xff] }
 0x468   : > { %v3647_v15 = vsel %vm3153_vm9, %v3645_v54, %v3646_v41  ;;  %v3677_v7 = vadd.f32 %v3646_v41, %v3614_v62  ;;  %v3705_v12 = vmax.f32 %v3642_v55, %v3646_v41  ;;  %v3707_v56 = vrot.slane %v12288_v21, 2  ;;  %v12295_v41 = vld [vmem:[#allocation105_spill] sm:$0xff] }
 0x469   : > { %v3676_v42 = vadd.f32 %v3647_v15, %v3613_v22  ;;  %v3704_v39 = vmax.f32 %v3641_v45, %v3647_v15  ;;  %v3735_v52 = vadd.f32 %v3674_v20, %v3528_v26  ;;  %v3736_v40 = vadd.f32 %v3675_v9, %v3527_v34 }
 0x46a   : > { %v9758_v47 = vmax.f32 %v3702_v33, %v3528_v26  ;;  %v9760_v50 = vmax.f32 %v3703_v4, %v3527_v34  ;;  %v3487_v36 = vadd.f32 %v9644_v43, %v12290_v51  ;;  %v3708_v11 = vsel %vm3280_vm10, %v3706_v18, %v3707_v56  ;;  %v12292_v26 = vld [vmem:[#allocation53_spill] sm:$0xff]  ;;  %v12296_v33 = vld [vmem:[#allocation111_spill] sm:$0xff] }
 0x46b   : > { %v3738_v31 = vadd.f32 %v3707_v56, %v3677_v7  ;;  %v9765_v62 = vmax.f32 %v3705_v12, %v3707_v56  ;;  %v9767_v5 = vmul.f32 0.11111111, %v3735_v52  ;;  %vm3769_vm11 = vcmp.lt.s32.totalorder %v12291_v46, 32  ;;  %v3855_v46 = vld [vmem:[%s11785_s8] sm:$0xff] }
 0x46c   : > { %v3737_v32 = vadd.f32 %v3708_v11, %v3676_v42  ;;  %v9770_v21 = vmax.f32 %v3704_v39, %v3708_v11  ;;  %v9772_v55 = vmul.f32 0.11111111, %v3736_v40  ;;  %v3488_v34 = vadd.f32 %v9647_v59, %v12292_v26  ;;  %v12297_v59 = vld [vmem:[#allocation51_spill] sm:$0xff]  ;;  %v12299_v39 = vld [vmem:[#allocation45_spill] sm:$0xff] }
 0x46d   : > { %v9776_v22 = vmul.f32 0.11111111, %v3738_v31  ;;  %v12293_v7 = vmax.f32 %v12280_v25, %v12208_v0  ;;  %v12294_v45 = vmax.f32 %v12281_v29, %v12213_v16  ;;  %v3548_v20 = vadd.f32 %v3487_v36, %v12295_v41  ;;  %v12300_v40 = vld [vmem:[#allocation109_spill] sm:$0xff] }
 0x46e   : > { %v9787_v9 = vmul.f32 0.11111111, %v3737_v32  ;;  %v3549_v4 = vadd.f32 %v3488_v34, %v12296_v33  ;;  %v3486_v15 = vadd.f32 %v9641_v3, %v12297_v59  ;;  %v12298_v25 = vmax.f32 %v12279_v1, %v12203_v14  ;;  %v12301_v11 = vld [vmem:[#allocation41_spill] sm:$0xff]  ;;  %v12302_v34 = vld [vmem:[#allocation47_spill] sm:$0xff] }
 0x46f   : > { %v3515_v43 = vmax.f32 %v12293_v7, %v12290_v51  ;;  %v3516_v54 = vmax.f32 %v12294_v45, %v12292_v26  ;;  %v3604_v42 = vadd.f32 %v3548_v20, %v12217_v63  ;;  %v3484_v56 = vadd.f32 %v9631_v53, %v12299_v39  ;;  %v12304_v45 = vld [vmem:[#allocation55_spill] sm:$0xff] }
 0x470   : > { %v3514_v12 = vmax.f32 %v12298_v25, %v12297_v59  ;;  %v3605_v52 = vadd.f32 %v3549_v4, %v12221_v19  ;;  %v3547_v36 = vadd.f32 %v3486_v15, %v12300_v40  ;;  %v3485_v31 = vadd.f32 %v9634_v35, %v12301_v11 }
 0x471   : > { %v3576_v18 = vmax.f32 %v3515_v43, %v12295_v41  ;;  %v3577_v29 = vmax.f32 %v3516_v54, %v12296_v33  ;;  %v3667_v7 = vadd.f32 %v3604_v42, %v12302_v34  ;;  %v12303_v43 = vmax.f32 %v12275_v37, %v12250_v49  ;;  %v12307_v42 = vld [vmem:[#allocation107_spill] sm:$0xff] }
 0x472   : > { %v3575_v3 = vmax.f32 %v3514_v12, %v12300_v40  ;;  %v3668_v54 = vadd.f32 %v3605_v52, %v12304_v45  ;;  %v3603_v20 = vadd.f32 %v3547_v36, %v12213_v16  ;;  %v12305_v35 = vmax.f32 %v12276_v61, %v12198_v2 }
 0x473   : > { %v3632_v1 = vmax.f32 %v3576_v18, %v12217_v63  ;;  %v3633_v32 = vmax.f32 %v3577_v29, %v12221_v19  ;;  %v3512_v53 = vmax.f32 %v12303_v43, %v12299_v39  ;;  %v12306_v18 = vld [vmem:[#allocation106_spill] sm:$0xff]  ;;  %v3545_v37 = vadd.f32 %v3484_v56, %v12307_v42  ;;  %v12308_v43 = vld [vmem:[#allocation112_spill] sm:$0xff] }
 0x474   : > { %v3631_v4 = vmax.f32 %v3575_v3, %v12213_v16  ;;  %v3513_v15 = vmax.f32 %v12305_v35, %v12301_v11  ;;  %v3728_v29 = vadd.f32 %v3667_v7, %v12306_v18  ;;  %v3729_v63 = vadd.f32 %v3668_v54, %v12308_v43  ;;  %v12309_v16 = vld [vmem:[#allocation103_spill] sm:$0xff] }
 0x475   : > { %v3695_v25 = vmax.f32 %v3632_v1, %v12302_v34  ;;  %v3696_v12 = vmax.f32 %v3633_v32, %v12304_v45  ;;  %v3666_v52 = vadd.f32 %v3603_v20, %v12292_v26  ;;  %v3546_v3 = vadd.f32 %v3485_v31, %v12309_v16 }
 0x476   : > { %v3694_v36 = vmax.f32 %v3631_v4, %v12292_v26  ;;  %v3787_v35 = vmul.f32 0.11111111, %v3728_v29  ;;  %v3573_v1 = vmax.f32 %v3512_v53, %v12307_v42  ;;  %v3788_v32 = vmul.f32 0.11111111, %v3729_v63 }
 0x477   : > { %v3756_v19 = vmax.f32 %v3695_v25, %v12306_v18  ;;  %v3757_v61 = vmax.f32 %v3696_v12, %v12308_v43  ;;  %v3727_v7 = vadd.f32 %v3666_v52, %v12296_v33  ;;  %v3574_v54 = vmax.f32 %v3513_v15, %v12309_v16 }
 0x478   : > { %v3755_v56 = vmax.f32 %v3694_v36, %v12296_v33  ;;  %v3601_v26 = vadd.f32 %v3545_v37, %v12203_v14  ;;  %v3602_v31 = vadd.f32 %v3546_v3, %v12208_v0  ;;  %v3629_v4 = vmax.f32 %v3573_v1, %v12203_v14  ;;  %v12310_v33 = vld [vmem:[#allocation36_spill] sm:$0xff] }
 0x479   : > { %v3815_v20 = vsel %vm3769_vm11, %v3787_v35, %v3756_v19  ;;  %v3816_v25 = vsel %vm3769_vm11, %v3788_v32, %v3757_v61  ;;  %v3786_v63 = vmul.f32 0.11111111, %v3727_v7  ;;  %v3630_v53 = vmax.f32 %v3574_v54, %v12208_v0  ;;  %v12312_v36 = vld [vmem:[#allocation100_spill] sm:$0xff] }
 0x47a   : > { %3844 = vst.msk [vmem:[#allocation4 + $0x78] sm:$0x3f] %vm3827_vm12, %v3815_v20  ;;  %v3483_v15 = vadd.f32 %v9628_v38, %v12310_v33  ;;  %v3664_v19 = vadd.f32 %v3601_v26, %v12297_v59  ;;  %v3665_v12 = vadd.f32 %v3602_v31, %v12290_v51  ;;  %v3692_v29 = vmax.f32 %v3629_v4, %v12297_v59  ;;  %v12313_v3 = vld [vmem:[#allocation40_spill] sm:$0xff]  ;;  %v12316_v4 = vld [vmem:[#allocation34_spill] sm:$0xff] }
 0x47b   : > { %3845 = vst.msk [vmem:[#allocation4 + $0x7e] sm:$0xff] %vm379_vm6, %v3816_v25  ;;  %v12311_v14 = vmax.f32 %v12274_v6, %v12249_v23  ;;  %v3814_v52 = vsel %vm3769_vm11, %v3786_v63, %v3755_v56  ;;  %v3693_v0 = vmax.f32 %v3630_v53, %v12290_v51  ;;  %v3482_v61 = vadd.f32 %v9625_v44, %v12313_v3  ;;  %v12315_v44 = vld [vmem:[#allocation104_spill] sm:$0xff] }
 0x47c   : > { %v3544_v38 = vadd.f32 %v3483_v15, %v12312_v36  ;;  %3843 = vst.msk [vmem:[#allocation4 + $0x70] sm:$0xff] %vm379_vm6, %v3814_v52  ;;  %v3725_v35 = vadd.f32 %v3664_v19, %v12300_v40  ;;  %v3726_v59 = vadd.f32 %v3665_v12, %v12295_v41  ;;  %v3753_v1 = vmax.f32 %v3692_v29, %v12300_v40 }
 0x47d   : > { %v3511_v37 = vmax.f32 %v12311_v14, %v12310_v33  ;;  %v3754_v32 = vmax.f32 %v3693_v0, %v12295_v41  ;;  %v12314_v51 = vmax.f32 %v12273_v28, %v12248_v58  ;;  %v3543_v54 = vadd.f32 %v3482_v61, %v12315_v44 }
 0x47e   : > { %v3600_v7 = vadd.f32 %v3544_v38, %v12198_v2  ;;  %v3784_v20 = vmul.f32 0.11111111, %v3725_v35  ;;  %v3785_v26 = vmul.f32 0.11111111, %v3726_v59  ;;  %v3481_v40 = vadd.f32 %v9622_v8, %v12316_v4  ;;  %v12318_v8 = vld [vmem:[#allocation98_spill] sm:$0xff] }
 0x47f   : > { %v3572_v6 = vmax.f32 %v3511_v37, %v12312_v36  ;;  %v3510_v56 = vmax.f32 %v12314_v51, %v12313_v3  ;;  %v3599_v63 = vadd.f32 %v3543_v54, %v12250_v49  ;;  %v12317_v28 = vmax.f32 %v12272_v48, %v12247_v60  ;;  %v12319_v38 = vld [vmem:[#allocation38_spill] sm:$0xff] }
 0x480   : > { %v3663_v25 = vadd.f32 %v3600_v7, %v12301_v11  ;;  %v3812_v15 = vsel %vm3769_vm11, %v3784_v20, %v3753_v1  ;;  %v3542_v12 = vadd.f32 %v3481_v40, %v12318_v8  ;;  %v3480_v61 = vadd.f32 %v9619_v57, %v12319_v38  ;;  %v12323_v20 = vld [vmem:[#allocation29_spill] sm:$0xff] }
 0x481   : > { %v3628_v31 = vmax.f32 %v3572_v6, %v12198_v2  ;;  %v3571_v41 = vmax.f32 %v3510_v56, %v12315_v44  ;;  %v3509_v53 = vmax.f32 %v12317_v28, %v12316_v4  ;;  %v3813_v2 = vsel %vm3769_vm11, %v3785_v26, %v3754_v32  ;;  %3841 = vst.msk [vmem:[#allocation4 + $0x62] sm:$0xff] %vm379_vm6, %v3812_v15  ;;  %v12322_v56 = vld [vmem:[#allocation102_spill] sm:$0xff] }
 0x482   : > { %v3934_v29 = vld [vmem:[#allocation4 + $0x78] sm:$0xff]  ;;  %3842 = vst.msk [vmem:[#allocation4 + $0x6a] sm:$0x3f] %vm3827_vm12, %v3813_v2  ;;  %v3724_v14 = vadd.f32 %v3663_v25, %v12309_v16  ;;  %v3662_v37 = vadd.f32 %v3599_v63, %v12299_v39  ;;  %v12320_v35 = vmax.f32 %v12271_v30, %v12174_v10  ;;  %v12321_v1 = vmov 0.0   ;;  %v12324_v30 = vld [vmem:[#allocation116_spill] sm:$0xff] }
 0x483   : > { %v3691_v19 = vmax.f32 %v3628_v31, %v12301_v11  ;;  %v3627_v48 = vmax.f32 %v3571_v41, %v12250_v49  ;;  %v3570_v52 = vmax.f32 %v3509_v53, %v12318_v8  ;;  %4046 = vmatpush1.msra.mxu1 %v3934_v29  ;;  %v3598_v11 = vadd.f32 %v3542_v12, %v12249_v23  ;;  %v3933_v49 = vld [vmem:[#allocation4 + $0x70] sm:$0xff]  ;;  %v12326_v2 = vld [vmem:[#allocation97_spill] sm:$0xff]  ;;  %v12328_v12 = vld [vmem:[#allocation115_spill] sm:$0xff] }
 0x484   : > { %v3508_v59 = vmax.f32 %v12320_v35, %v12319_v38  ;;  %4047 = vmatprep.subr.mxu1 %v12321_v1  ;;  %v3783_v6 = vmul.f32 0.11111111, %v3724_v14  ;;  %v3723_v7 = vadd.f32 %v3662_v37, %v12307_v42  ;;  %v3541_v57 = vadd.f32 %v3480_v61, %v12322_v56  ;;  %v12331_v61 = vld [vmem:[#allocation101_spill] sm:$0xff]  ;;  %383 = vst.msk [vmem:[#allocation3 + $0x10] sm:$0x3] %vm382_vm15, %v12321_v1 }
 0x485   : > { %v3752_v0 = vmax.f32 %v3691_v19, %v12309_v16  ;;  %v3690_v32 = vmax.f32 %v3627_v48, %v12299_v39  ;;  %v3626_v16 = vmax.f32 %v3570_v52, %v12249_v23  ;;  %4048 = vmatpush1.msra.mxu1 %v3933_v49  ;;  %v3661_v51 = vadd.f32 %v3598_v11, %v12310_v33  ;;  %v12327_v19 = vld [vmem:[#allocation33_spill] sm:$0xff] }
 0x486   : > { %v3569_v54 = vmax.f32 %v3508_v59, %v12322_v56  ;;  %v3479_v26 = vadd.f32 %v12324_v30, %v12323_v20  ;;  %4049 = vmatprep.subr.mxu1 %v12321_v1  ;;  %v3782_v40 = vmul.f32 0.11111111, %v3723_v7  ;;  %v3597_v41 = vadd.f32 %v3541_v57, %v12248_v58  ;;  %v12332_v59 = vld [vmem:[#allocation31_spill] sm:$0xff]  ;;  %v12333_v49 = vld [vmem:[#allocation37_spill] sm:$0xff]  ;;  %v12335_v30 = vld [vmem:[#allocation114_spill] sm:$0xff] }
 0x487   : > { %v3811_v31 = vsel %vm3769_vm11, %v3783_v6, %v3752_v0  ;;  %v3751_v39 = vmax.f32 %v3690_v32, %v12307_v42  ;;  %v3689_v23 = vmax.f32 %v3626_v16, %v12310_v33  ;;  %v3722_v25 = vadd.f32 %v3661_v51, %v12312_v36  ;;  %387 = vst.msk [vmem:[#allocation3 + $0x1a8] sm:$0x3] %vm382_vm15, %v12321_v1 }
 0x488   : > { %3840 = vst.msk [vmem:[#allocation4 + $0x5c] sm:$0x3f] %vm3827_vm12, %v3811_v31  ;;  %v3625_v63 = vmax.f32 %v3569_v54, %v12248_v58  ;;  %v12325_v28 = vmax.f32 %v12270_v27, %v12169_v24  ;;  %v3540_v33 = vadd.f32 %v3479_v26, %v12326_v2  ;;  %v3478_v29 = vadd.f32 %v12328_v12, %v12327_v19  ;;  %v12334_v54 = vld [vmem:[#allocation27_spill] sm:$0xff] }
 0x489   : > { %v3810_v15 = vsel %vm3769_vm11, %v3782_v40, %v3751_v39  ;;  %v3750_v42 = vmax.f32 %v3689_v23, %v12312_v36  ;;  %v3932_v14 = vld [vmem:[#allocation4 + $0x68] sm:$0xff]  ;;  %v3781_v48 = vmul.f32 0.11111111, %v3722_v25  ;;  %v3660_v58 = vadd.f32 %v3597_v41, %v12313_v3  ;;  %v12329_v36 = vld [vmem:[#allocation18_spill] sm:$0xff]  ;;  %v12336_v40 = vld [vmem:[#allocation72_spill] sm:$0xff] }
 0x48a   : > { %v3507_v53 = vmax.f32 %v12325_v28, %v12323_v20  ;;  %3839 = vst.msk [vmem:[#allocation4 + $0x54] sm:$0xff] %vm379_vm6, %v3810_v15  ;;  %v3688_v37 = vmax.f32 %v3625_v63, %v12313_v3  ;;  %4050 = vmatpush1.msra.mxu1 %v3932_v14  ;;  %v3596_v52 = vadd.f32 %v3540_v33, %v12247_v60  ;;  %v12337_v23 = vld [vmem:[#allocation14_spill] sm:$0xff]  ;;  %v12340_v41 = vld [vmem:[#allocation16_spill] sm:$0xff]  ;;  %v12342_v12 = vld [vmem:[#allocation99_spill] sm:$0xff] }
 0x48b   : > { %v12330_v0 = vmax.f32 %v12269_v13, %v12329_v36  ;;  %v3539_v35 = vadd.f32 %v3478_v29, %v12331_v61  ;;  %v3476_v6 = vadd.f32 %v12333_v49, %v12332_v59  ;;  %4051 = vmatprep.subr.mxu1 %v12321_v1  ;;  %v3809_v3 = vsel %vm3769_vm11, %v3781_v48, %v3750_v42  ;;  %v12343_v48 = vld [vmem:[#allocation95_spill] sm:$0xff] }
 0x48c   : > { %v3568_v27 = vmax.f32 %v3507_v53, %v12326_v2  ;;  %v3721_v32 = vadd.f32 %v3660_v58, %v12315_v44  ;;  %v3749_v7 = vmax.f32 %v3688_v37, %v12315_v44  ;;  %3838 = vst.msk [vmem:[#allocation4 + $0x4e] sm:$0x3f] %vm3827_vm12, %v3809_v3  ;;  %v3659_v13 = vadd.f32 %v3596_v52, %v12316_v4  ;;  %v12345_v3 = vld [vmem:[#allocation35_spill] sm:$0xff] }
 0x48d   : > { %v3506_v11 = vmax.f32 %v12330_v0, %v12327_v19  ;;  %v3595_v57 = vadd.f32 %v3539_v35, %v12174_v10  ;;  %v3477_v26 = vadd.f32 %v12335_v30, %v12334_v54  ;;  %v12338_v44 = vmax.f32 %v12336_v40, %v12337_v23  ;;  %390 = vst.msk [vmem:[#allocation3 + $0x18] sm:$0x1] %vm388_vm1, %v12321_v1 }
 0x48e   : > { %v3624_v16 = vmax.f32 %v3568_v27, %v12247_v60  ;;  %v3780_v31 = vmul.f32 0.11111111, %v3721_v32  ;;  %v12339_v60 = vld [vmem:[#allocation73_spill] sm:$0xff]  ;;  %v3720_v15 = vadd.f32 %v3659_v13, %v12318_v8  ;;  %v3537_v29 = vadd.f32 %v3476_v6, %v12342_v12  ;;  %v12344_v6 = vld [vmem:[#allocation22_spill] sm:$0xff]  ;;  %389 = vst.msk [vmem:[#allocation3] sm:$0x1] %vm388_vm1, %v12321_v1 }
 0x48f   : > { %v3567_v51 = vmax.f32 %v3506_v11, %v12331_v61  ;;  %v3504_v25 = vmax.f32 %v12338_v44, %v12332_v59  ;;  %v12341_v63 = vmax.f32 %v12339_v60, %v12340_v41  ;;  %v3931_v53 = vld [vmem:[#allocation4 + $0x60] sm:$0xff]  ;;  %v3658_v33 = vadd.f32 %v3595_v57, %v12319_v38  ;;  %v12349_v44 = vld [vmem:[#allocation92_spill] sm:$0xff]  ;;  %v12350_v60 = vld [vmem:[#allocation25_spill] sm:$0xff]  ;;  %391 = vst.msk [vmem:[#allocation3 + $0x30] sm:$0x1] %vm388_vm1, %v12321_v1 }
 0x490   : > { %v3687_v39 = vmax.f32 %v3624_v16, %v12316_v4  ;;  %4052 = vmatpush1.msra.mxu1 %v3931_v53  ;;  %v3808_v4 = vsel %vm3769_vm11, %v3780_v31, %v3749_v7  ;;  %v3538_v58 = vadd.f32 %v3477_v26, %v12343_v48  ;;  %v3593_v35 = vadd.f32 %v3537_v29, %v12329_v36  ;;  %v12346_v26 = vld [vmem:[#allocation71_spill] sm:$0xff]  ;;  %v12347_v31 = vld [vmem:[#allocation13_spill] sm:$0xff]  ;;  %v12352_v29 = vld [vmem:[#allocation70_spill] sm:$0xff] }
 0x491   : > { %v3505_v28 = vmax.f32 %v12341_v63, %v12334_v54  ;;  %v3623_v42 = vmax.f32 %v3567_v51, %v12174_v10  ;;  %v3565_v37 = vmax.f32 %v3504_v25, %v12342_v12  ;;  %4053 = vmatprep.subr.mxu1 %v12321_v1  ;;  %v3930_v27 = vld [vmem:[#allocation4 + $0x58] sm:$0xff]  ;;  %3837 = vst.msk [vmem:[#allocation4 + $0x46] sm:$0xff] %vm379_vm6, %v3808_v4  ;;  %v3779_v10 = vmul.f32 0.11111111, %v3720_v15  ;;  %v12351_v63 = vld [vmem:[#allocation32_spill] sm:$0xff]  ;;  %v12353_v4 = vld [vmem:[#allocation11_spill] sm:$0xff] }
 0x492   : > { %v3748_v14 = vmax.f32 %v3687_v39, %v12318_v8  ;;  %v3719_v0 = vadd.f32 %v3658_v33, %v12322_v56  ;;  %4054 = vmatpush1.msra.mxu1 %v3930_v27  ;;  %v3594_v8 = vadd.f32 %v3538_v58, %v12169_v24  ;;  %v3475_v32 = vadd.f32 %v12345_v3, %v12344_v6 }
 0x493   : > { %v3686_v52 = vmax.f32 %v3623_v42, %v12319_v38  ;;  %v3566_v11 = vmax.f32 %v3505_v28, %v12343_v48  ;;  %v3621_v49 = vmax.f32 %v3565_v37, %v12329_v36  ;;  %4055 = vmatprep.subr.mxu1 %v12321_v1  ;;  %v3929_v51 = vld [vmem:[#allocation4 + $0x50] sm:$0xff]  ;;  %v3656_v57 = vadd.f32 %v3593_v35, %v12327_v19  ;;  %v12356_v35 = vld [vmem:[#allocation17_spill] sm:$0xff] }
 0x494   : > { %v3807_v7 = vsel %vm3769_vm11, %v3779_v10, %v3748_v14  ;;  %v3778_v16 = vmul.f32 0.11111111, %v3719_v0  ;;  %v3657_v36 = vadd.f32 %v3594_v8, %v12323_v20  ;;  %v12348_v39 = vmax.f32 %v12346_v26, %v12347_v31  ;;  %4056 = vmatpush1.msra.mxu1 %v3929_v51  ;;  %v12355_v37 = vld [vmem:[#allocation96_spill] sm:$0xff]  ;;  %392 = vst.msk [vmem:[#allocation3 + $0x48] sm:$0x1] %vm388_vm1, %v12321_v1 }
 0x495   : > { %v3747_v38 = vmax.f32 %v3686_v52, %v12322_v56  ;;  %v3622_v13 = vmax.f32 %v3566_v11, %v12169_v24  ;;  %3836 = vst.msk [vmem:[#allocation4 + $0x40] sm:$0x3f] %vm3827_vm12, %v3807_v7  ;;  %v3684_v30 = vmax.f32 %v3621_v49, %v12327_v19  ;;  %v3536_v25 = vadd.f32 %v3475_v32, %v12349_v44  ;;  %v12358_v32 = vld [vmem:[#allocation69_spill] sm:$0xff]  ;;  %v12359_v7 = vld [vmem:[#allocation10_spill] sm:$0xff] }
 0x496   : > { %v3503_v40 = vmax.f32 %v12348_v39, %v12344_v6  ;;  %v3474_v28 = vadd.f32 %v12351_v63, %v12350_v60  ;;  %4057 = vmatprep.subr.mxu1 %v12321_v1  ;;  %v3717_v19 = vadd.f32 %v3656_v57, %v12331_v61  ;;  %v3718_v53 = vadd.f32 %v3657_v36, %v12326_v2  ;;  %v12361_v57 = vld [vmem:[#allocation91_spill] sm:$0xff]  ;;  %v12363_v63 = vld [vmem:[#allocation21_spill] sm:$0xff] }
 0x497   : > { %v3806_v56 = vsel %vm3769_vm11, %v3778_v16, %v3747_v38  ;;  %v3685_v24 = vmax.f32 %v3622_v13, %v12323_v20  ;;  %v3745_v15 = vmax.f32 %v3684_v30, %v12331_v61  ;;  %v3592_v20 = vadd.f32 %v3536_v25, %v12340_v41  ;;  %v12357_v61 = vld [vmem:[#allocation30_spill] sm:$0xff]  ;;  %v12362_v25 = vld [vmem:[#allocation20_spill] sm:$0xff]  ;;  %393 = vst.msk [vmem:[#allocation3 + $0x60] sm:$0x1] %vm388_vm1, %v12321_v1 }
 0x498   : > { %3835 = vst.msk [vmem:[#allocation4 + $0x38] sm:$0xff] %vm379_vm6, %v3806_v56  ;;  %v3564_v42 = vmax.f32 %v3503_v40, %v12349_v44  ;;  %v12354_v14 = vmax.f32 %v12352_v29, %v12353_v4  ;;  %v3535_v27 = vadd.f32 %v3474_v28, %v12355_v37  ;;  %v3928_v10 = vld [vmem:[#allocation4 + $0x48] sm:$0xff]  ;;  %v3776_v52 = vmul.f32 0.11111111, %v3717_v19  ;;  %v12364_v19 = vld [vmem:[#allocation68_spill] sm:$0xff] }
 0x499   : > { %v3746_v33 = vmax.f32 %v3685_v24, %v12326_v2  ;;  %v3777_v0 = vmul.f32 0.11111111, %v3718_v53  ;;  %v3473_v8 = vadd.f32 %v12357_v61, %v12356_v35  ;;  %4058 = vmatpush1.msra.mxu1 %v3928_v10  ;;  %v3655_v2 = vadd.f32 %v3592_v20, %v12334_v54  ;;  %v12365_v53 = vld [vmem:[#allocation9_spill] sm:$0xff]  ;;  %394 = vst.msk [vmem:[#allocation3 + $0x78] sm:$0x1] %vm388_vm1, %v12321_v1 }
 0x49a   : > { %v3502_v58 = vmax.f32 %v12354_v14, %v12350_v60  ;;  %v3620_v11 = vmax.f32 %v3564_v42, %v12340_v41  ;;  %v3591_v3 = vadd.f32 %v3535_v27, %v12337_v23  ;;  %v12360_v38 = vmax.f32 %v12358_v32, %v12359_v7  ;;  %4059 = vmatprep.subr.mxu1 %v12321_v1 }
 0x49b   : > { %v3804_v41 = vsel %vm3769_vm11, %v3776_v52, %v3745_v15  ;;  %v3805_v13 = vsel %vm3769_vm11, %v3777_v0, %v3746_v33  ;;  %v3534_v36 = vadd.f32 %v3473_v8, %v12361_v57  ;;  %v3716_v26 = vadd.f32 %v3655_v2, %v12343_v48  ;;  %395 = vst.msk [vmem:[#allocation3 + $0x90] sm:$0x1] %vm388_vm1, %v12321_v1 }
 0x49c   : > { %v3563_v49 = vmax.f32 %v3502_v58, %v12355_v37  ;;  %v3501_v16 = vmax.f32 %v12360_v38, %v12356_v35  ;;  %v3683_v51 = vmax.f32 %v3620_v11, %v12334_v54  ;;  %v3927_v30 = vld [vmem:[#allocation4 + $0x40] sm:$0xff]  ;;  %3833 = vst.msk [vmem:[#allocation4 + $0x2a] sm:$0xff] %vm379_vm6, %v3804_v41  ;;  %v3654_v40 = vadd.f32 %v3591_v3, %v12332_v59  ;;  %v12372_v41 = vld [vmem:[#allocation19_spill] sm:$0xff] }
 0x49d   : > { %3834 = vst.msk [vmem:[#allocation4 + $0x32] sm:$0x3f] %vm3827_vm12, %v3805_v13  ;;  %4060 = vmatpush1.msra.mxu1 %v3927_v30  ;;  %v3590_v54 = vadd.f32 %v3534_v36, %v12347_v31  ;;  %v3472_v28 = vadd.f32 %v12363_v63, %v12362_v25  ;;  %v12366_v15 = vmax.f32 %v12364_v19, %v12365_v53  ;;  %v3775_v33 = vmul.f32 0.11111111, %v3716_v26  ;;  %v12367_v58 = vld [vmem:[#allocation94_spill] sm:$0xff] }
 0x49e   : > { %v3619_v39 = vmax.f32 %v3563_v49, %v12337_v23  ;;  %v3562_v56 = vmax.f32 %v3501_v16, %v12361_v57  ;;  %v3744_v24 = vmax.f32 %v3683_v51, %v12343_v48  ;;  %4061 = vmatprep.subr.mxu1 %v12321_v1  ;;  %v3715_v29 = vadd.f32 %v3654_v40, %v12342_v12  ;;  %v12369_v49 = vld [vmem:[#allocation90_spill] sm:$0xff]  ;;  %v12371_v16 = vld [vmem:[#allocation15_spill] sm:$0xff] }
 0x49f   : > { %v3500_v42 = vmax.f32 %v12366_v15, %v12362_v25  ;;  %v3926_v23 = vld [vmem:[#allocation4 + $0x38] sm:$0xff]  ;;  %v3653_v14 = vadd.f32 %v3590_v54, %v12344_v6  ;;  %v3533_v27 = vadd.f32 %v3472_v28, %v12367_v58  ;;  %v3588_v52 = vadd.f32 %v9736_v17, %v12359_v7  ;;  %v12368_v17 = vld [vmem:[#allocation60_spill] sm:$0xff]  ;;  %396 = vst.msk [vmem:[#allocation3 + $0xa8] sm:$0x1] %vm388_vm1, %v12321_v1 }
 0x4a0   : > { %v3682_v20 = vmax.f32 %v3619_v39, %v12332_v59  ;;  %v3618_v48 = vmax.f32 %v3562_v56, %v12347_v31  ;;  %4062 = vmatpush1.msra.mxu1 %v3926_v23  ;;  %v3803_v0 = vsel %vm3769_vm11, %v3775_v33, %v3744_v24  ;;  %v3774_v11 = vmul.f32 0.11111111, %v3715_v29  ;;  %v12374_v39 = vld [vmem:[#allocation8_spill] sm:$0xff]  ;;  %v12376_v24 = vld [vmem:[#allocation93_spill] sm:$0xff]  ;;  %397 = vst.msk [vmem:[#allocation3 + $0xc0] sm:$0x1] %vm388_vm1, %v12321_v1 }
 0x4a1   : > { %v3561_v10 = vmax.f32 %v3500_v42, %v12367_v58  ;;  %4063 = vmatprep.subr.mxu1 %v12321_v1  ;;  %3832 = vst.msk [vmem:[#allocation4 + $0x24] sm:$0x3f] %vm3827_vm12, %v3803_v0  ;;  %v3714_v61 = vadd.f32 %v3653_v14, %v12349_v44  ;;  %v3589_v8 = vadd.f32 %v3533_v27, %v12353_v4  ;;  %v12377_v15 = vld [vmem:[#allocation44_spill] sm:$0xff]  ;;  %v12378_v42 = vld [vmem:[#allocation87_spill] sm:$0xff]  ;;  %v12384_v0 = vld [vmem:[#allocation46_spill] sm:$0xff] }
 0x4a2   : > { %v3743_v59 = vmax.f32 %v3682_v20, %v12342_v12  ;;  %v3681_v31 = vmax.f32 %v3618_v48, %v12344_v6  ;;  %v12370_v3 = vmax.f32 %v12368_v17, %v12369_v49  ;;  %v3651_v6 = vadd.f32 %v3588_v52, %v12356_v35  ;;  %v12383_v52 = vld [vmem:[#allocation88_spill] sm:$0xff]  ;;  %398 = vst.msk [vmem:[#allocation3 + $0xd8] sm:$0x1] %vm388_vm1, %v12321_v1 }
 0x4a3   : > { %v3617_v2 = vmax.f32 %v3561_v10, %v12353_v4  ;;  %v3470_v13 = vadd.f32 %v12372_v41, %v12371_v16  ;;  %v3773_v36 = vmul.f32 0.11111111, %v3714_v61  ;;  %v3652_v4 = vadd.f32 %v3589_v8, %v12350_v60  ;;  %v12387_v61 = vld [vmem:[#allocation48_spill] sm:$0xff]  ;;  %v12392_v41 = vld [vmem:[#allocation110_spill] sm:$0xff]  ;;  %399 = vst.msk [vmem:[#allocation3 + $0xf0] sm:$0x1] %vm388_vm1, %v12321_v1 }
 0x4a4   : > { %v3616_v32 = vmax.f32 %v12370_v3, %v12359_v7  ;;  %v3802_v38 = vsel %vm3769_vm11, %v3774_v11, %v3743_v59  ;;  %v3742_v12 = vmax.f32 %v3681_v31, %v12349_v44  ;;  %v3925_v51 = vld [vmem:[#allocation4 + $0x30] sm:$0xff]  ;;  %v3712_v26 = vadd.f32 %v3651_v6, %v12361_v57  ;;  %v12373_v44 = vld [vmem:[#allocation65_spill] sm:$0xff]  ;;  %v12391_v6 = vld [vmem:[#allocation26_spill] sm:$0xff]  ;;  %400 = vst.msk [vmem:[#allocation3 + $0x108] sm:$0x1] %vm388_vm1, %v12321_v1 }
 0x4a5   : > { %3831 = vst.msk [vmem:[#allocation4 + $0x1c] sm:$0xff] %vm379_vm6, %v3802_v38  ;;  %v3680_v30 = vmax.f32 %v3617_v2, %v12350_v60  ;;  %4064 = vmatpush1.msra.mxu1 %v3925_v51  ;;  %v12375_v40 = vmax.f32 %v12373_v44, %v12374_v39  ;;  %v3531_v54 = vadd.f32 %v3470_v13, %v12376_v24  ;;  %v12386_v31 = vld [vmem:[#allocation89_spill] sm:$0xff]  ;;  %v12394_v44 = vld [vmem:[#allocation108_spill] sm:$0xff] }
 0x4a6   : > { %v3679_v7 = vmax.f32 %v3616_v32, %v12356_v35  ;;  %v3825_v63 = vsel %vm3769_vm11, %v9776_v22, %v9765_v62  ;;  %4065 = vmatprep.subr.mxu1 %v12321_v1  ;;  %v3801_v60 = vsel %vm3769_vm11, %v3773_v36, %v3742_v12  ;;  %v3713_v35 = vadd.f32 %v3652_v4, %v12355_v37  ;;  %v12389_v32 = vld [vmem:[#allocation56_spill] sm:$0xff]  ;;  %v12390_v12 = vld [vmem:[#allocation49_spill] sm:$0xff] }
 0x4a7   : > { %v3498_v56 = vmax.f32 %v12375_v40, %v12371_v16  ;;  %v3741_v28 = vmax.f32 %v3680_v30, %v12355_v37  ;;  %3854 = vst.msk [vmem:[#allocation4 + $0xbe] sm:$0x3f] %vm3827_vm12, %v3825_v63  ;;  %v3456_v23 = vmax.f32 %v12378_v42, %v12377_v15  ;;  %3830 = vst.msk [vmem:[#allocation4 + $0x16] sm:$0x3f] %vm3827_vm12, %v3801_v60  ;;  %v3771_v33 = vmul.f32 0.11111111, %v3712_v26 }
 0x4a8   : > { %v3740_v19 = vmax.f32 %v3679_v7, %v12361_v57  ;;  %v3587_v22 = vadd.f32 %v3531_v54, %v12365_v53  ;;  %v3772_v20 = vmul.f32 0.11111111, %v3713_v35  ;;  %v3824_v37 = vsel %vm3769_vm11, %v9787_v9, %v9770_v21  ;;  %v3924_v48 = vld [vmem:[#allocation4 + $0x28] sm:$0xff]  ;;  %v12380_v21 = vld [vmem:[#allocation28_spill] sm:$0xff]  ;;  %v12382_v9 = vld [vmem:[#allocation57_spill] sm:$0xff] }
 0x4a9   : > { %v3559_v62 = vmax.f32 %v3498_v56, %v12376_v24  ;;  %v3823_v57 = vsel %vm3769_vm11, %v9772_v55, %v9760_v50  ;;  %v3822_v29 = vsel %vm3769_vm11, %v9767_v5, %v9758_v47  ;;  %3853 = vst.msk [vmem:[#allocation4 + $0xb6] sm:$0xff] %vm379_vm6, %v3824_v37  ;;  %v12379_v50 = vld [vmem:[#allocation58_spill] sm:$0xff]  ;;  %4066 = vmatpush1.msra.mxu1 %v3924_v48  ;;  %v12395_v56 = vld [vmem:[#allocation52_spill] sm:$0xff] }
 0x4aa   : > { %v3799_v14 = vsel %vm3769_vm11, %v3771_v33, %v3740_v19  ;;  %v3650_v10 = vadd.f32 %v3587_v22, %v12362_v25  ;;  %3852 = vst.msk [vmem:[#allocation4 + $0xb0] sm:$0x3f] %vm3827_vm12, %v3823_v57  ;;  %v3492_v55 = vadd.f32 %v12380_v21, %v12379_v50  ;;  %v3800_v47 = vsel %vm3769_vm11, %v3772_v20, %v3741_v28  ;;  %v12381_v5 = vld [vmem:[#allocation54_spill] sm:$0xff]  ;;  %v12396_v28 = vld [vmem:[#allocation64_spill] sm:$0xff]  ;;  %v12398_v33 = vld [vmem:[#allocation59_spill] sm:$0xff] }
 0x4ab   : > { %v3615_v27 = vmax.f32 %v3559_v62, %v12365_v53  ;;  %3851 = vst.msk [vmem:[#allocation4 + $0xa8] sm:$0xff] %vm379_vm6, %v3822_v29  ;;  %v3493_v53 = vadd.f32 %v12382_v9, %v12381_v5  ;;  %v12385_v59 = vmax.f32 %v12383_v52, %v12384_v0  ;;  %v12388_v8 = vmax.f32 %v12386_v31, %v12387_v61  ;;  %v12393_v7 = vld [vmem:[#allocation50_spill] sm:$0xff]  ;;  %v12397_v42 = vld [vmem:[#allocation24_spill] sm:$0xff]  ;;  %v12403_v9 = vld [vmem:[#allocation113_spill] sm:$0xff] }
 0x4ac   : > { %3828 = vst.msk [vmem:[#allocation4 + $0x8] sm:$0x3f] %vm3827_vm12, %v3799_v14  ;;  %4067 = vmatprep.subr.mxu1 %v12321_v1  ;;  %v3923_v17 = vld [vmem:[#allocation4 + $0x20] sm:$0xff]  ;;  %v3711_v3 = vadd.f32 %v3650_v10, %v12367_v58  ;;  %v3553_v38 = vadd.f32 %v3492_v55, %v12389_v32  ;;  %v3491_v16 = vadd.f32 %v12391_v6, %v12390_v12  ;;  %v12405_v6 = vld [vmem:[#allocation85_spill] sm:$0xff] }
 0x4ad   : > { %v3520_v11 = vmax.f32 %v12385_v59, %v12379_v50  ;;  %v3521_v2 = vmax.f32 %v12388_v8, %v12381_v5  ;;  %3829 = vst.msk [vmem:[#allocation4 + $0xe] sm:$0xff] %vm379_vm6, %v3800_v47  ;;  %v3678_v49 = vmax.f32 %v3615_v27, %v12362_v25  ;;  %4068 = vmatpush1.msra.mxu1 %v3923_v17  ;;  %v12399_v57 = vld [vmem:[#allocation62_spill] sm:$0xff] }
 0x4ae   : > { %v3554_v13 = vadd.f32 %v3493_v53, %v12392_v41  ;;  %v3519_v4 = vmax.f32 %v3456_v23, %v12390_v12  ;;  %4069 = vmatprep.subr.mxu1 %v12321_v1  ;;  %v3770_v30 = vmul.f32 0.11111111, %v3711_v3  ;;  %v3609_v26 = vadd.f32 %v3553_v38, %v12393_v7  ;;  %v3922_v40 = vld [vmem:[#allocation4 + $0x18] sm:$0xff]  ;;  %v12400_v14 = vld [vmem:[#allocation86_spill] sm:$0xff]  ;;  %v12404_v3 = vld [vmem:[#allocation23_spill] sm:$0xff] }
 0x4af   : > { %v3581_v51 = vmax.f32 %v3520_v11, %v12389_v32  ;;  %v3582_v36 = vmax.f32 %v3521_v2, %v12392_v41  ;;  %v3739_v25 = vmax.f32 %v3678_v49, %v12367_v58  ;;  %v3552_v39 = vadd.f32 %v3491_v16, %v12394_v44  ;;  %4070 = vmatpush1.msra.mxu1 %v3922_v40  ;;  %v12401_v27 = vld [vmem:[#allocation42_spill] sm:$0xff] }
 0x4b0   : > { %v3610_v24 = vadd.f32 %v3554_v13, %v12395_v56  ;;  %v3580_v60 = vmax.f32 %v3519_v4, %v12394_v44  ;;  %v3672_v58 = vadd.f32 %v3609_v26, %v12396_v28  ;;  %v3490_v23 = vadd.f32 %v12397_v42, %v12304_v45  ;;  %4071 = vmatprep.subr.mxu1 %v12321_v1 }
 0x4b1   : > { %v3637_v54 = vmax.f32 %v3581_v51, %v12393_v7  ;;  %v3638_v63 = vmax.f32 %v3582_v36, %v12395_v56  ;;  %v3798_v35 = vsel %vm3769_vm11, %v3770_v30, %v3739_v25  ;;  %v3608_v19 = vadd.f32 %v3552_v39, %v12387_v61  ;;  %v3943_v56 = vld [vmem:[#allocation4 + $0xc0] sm:$0xf]  ;;  %401 = vst.msk [vmem:[#allocation3 + $0x120] sm:$0x1] %vm388_vm1, %v12321_v1 }
 0x4b2   : > { %3826 = vst.msk [vmem:[#allocation4] sm:$0xff] %vm379_vm6, %v3798_v35  ;;  %v3673_v62 = vadd.f32 %v3610_v24, %v12398_v33  ;;  %v3636_v37 = vmax.f32 %v3580_v60, %v12387_v61  ;;  %v3733_v29 = vadd.f32 %v3672_v58, %v12399_v57  ;;  %v12402_v10 = vmax.f32 %v12400_v14, %v12401_v27  ;;  %v3942_v60 = vld [vmem:[#allocation4 + $0xb8] sm:$0xff]  ;;  %v3864_v14 = vld [vmem:[%s11785_s8 + $0x48] sm:$0xff]  ;;  %v3863_v27 = vld [vmem:[%s11785_s8 + $0x40] sm:$0xff] }
 0x4b3   : > { %v3700_v22 = vmax.f32 %v3637_v54, %v12396_v28  ;;  %v3701_v20 = vmax.f32 %v3638_v63, %v12398_v33  ;;  %v3671_v48 = vadd.f32 %v3608_v19, %v12381_v5  ;;  %v3551_v55 = vadd.f32 %v3490_v23, %v12308_v43  ;;  %402 = vst.msk [vmem:[#allocation3 + $0x138] sm:$0x1] %vm388_vm1, %v12321_v1 }
 0x4b4   : > { %v3518_v21 = vmax.f32 %v12402_v10, %v12304_v45  ;;  %v3921_v47 = vld [vmem:[#allocation4 + $0x10] sm:$0xff]  ;;  %v3734_v53 = vadd.f32 %v3673_v62, %v12403_v9  ;;  %v3699_v11 = vmax.f32 %v3636_v37, %v12381_v5  ;;  %v3792_v31 = vmul.f32 0.11111111, %v3733_v29  ;;  %v3920_v45 = vld [vmem:[#allocation4 + $0x8] sm:$0xff]  ;;  %v3862_v29 = vld [vmem:[%s11785_s8 + $0x38] sm:$0xff] }
 0x4b5   : > { %v3761_v52 = vmax.f32 %v3700_v22, %v12399_v57  ;;  %v3762_v59 = vmax.f32 %v3701_v20, %v12403_v9  ;;  %4072 = vmatpush1.msra.mxu1 %v3921_v47  ;;  %v3732_v61 = vadd.f32 %v3671_v48, %v12392_v41  ;;  %v3607_v2 = vadd.f32 %v3551_v55, %v12384_v0  ;;  %v12406_v5 = vld [vmem:[#allocation39_spill] sm:$0xff]  ;;  %v3858_v22 = vld [vmem:[%s11785_s8 + $0x18] sm:$0xff]  ;;  %v3857_v20 = vld [vmem:[%s11785_s8 + $0x10] sm:$0xff] }
 0x4b6   : > { %v3579_v8 = vmax.f32 %v3518_v21, %v12308_v43  ;;  %4073 = vmatprep.subr.mxu1 %v12321_v1  ;;  %v3793_v17 = vmul.f32 0.11111111, %v3734_v53  ;;  %v3760_v49 = vmax.f32 %v3699_v11, %v12392_v41  ;;  %v3489_v38 = vadd.f32 %v12404_v3, %v12302_v34  ;;  %v3856_v43 = vld [vmem:[%s11785_s8 + $0x8] sm:$0xff]  ;;  %v3859_v57 = vld [vmem:[%s11785_s8 + $0x20] sm:$0xff]  ;;  %v3861_v48 = vld [vmem:[%s11785_s8 + $0x30] sm:$0xff] }
 0x4b7   : > { %v12407_v16 = vmax.f32 %v12405_v6, %v12406_v5  ;;  %4074 = vmatpush1.msra.mxu1 %v3920_v45  ;;  %v3820_v51 = vsel %vm3769_vm11, %v3792_v31, %v3761_v52  ;;  %v3791_v36 = vmul.f32 0.11111111, %v3732_v61  ;;  %v3670_v41 = vadd.f32 %v3607_v2, %v12379_v50  ;;  %6536 = vmatprep.mubr.msk.f32.mxu1 %vm3944_vm13, %v3856_v43  ;;  %v3860_v37 = vld [vmem:[%s11785_s8 + $0x28] sm:$0xff]  ;;  %v3866_v10 = vld [vmem:[%s11785_s8 + $0x58] sm:$0xff]  ;;  %v3865_v21 = vld [vmem:[%s11785_s8 + $0x50] sm:$0xff] }
 0x4b8   : > { %v3635_v4 = vmax.f32 %v3579_v8, %v12384_v0  ;;  %4075 = vmatprep.subr.mxu1 %v12321_v1  ;;  %v3821_v25 = vsel %vm3769_vm11, %v3793_v17, %v3762_v59  ;;  %3849 = vst.msk [vmem:[#allocation4 + $0x9a] sm:$0xff] %vm379_vm6, %v3820_v51  ;;  %v3868_v55 = vld [vmem:[%s11785_s8 + $0x68] sm:$0xff]  ;;  %v3867_v47 = vld [vmem:[%s11785_s8 + $0x60] sm:$0xff]  ;;  %v3870_v9 = vld [vmem:[%s11785_s8 + $0x78] sm:$0xff] }
 0x4b9   : > { %v3517_v13 = vmax.f32 %v12407_v16, %v12302_v34  ;;  %v3550_v34 = vadd.f32 %v3489_v38, %v12306_v18  ;;  %v3919_v7 = vld [vmem:[#allocation4] sm:$0xff]  ;;  %3850 = vst.msk [vmem:[#allocation4 + $0xa2] sm:$0x3f] %vm3827_vm12, %v3821_v25  ;;  %v3819_v0 = vsel %vm3769_vm11, %v3791_v36, %v3760_v49  ;;  %v3731_v39 = vadd.f32 %v3670_v41, %v12389_v32  ;;  %v3869_v53 = vld [vmem:[%s11785_s8 + $0x70] sm:$0xff]  ;;  %v3872_v52 = vld [vmem:[%s11785_s8 + $0x88] sm:$0xff] }
 0x4ba   : > { %v3698_v26 = vmax.f32 %v3635_v4, %v12379_v50  ;;  %4076 = vmatpush1.msra.mxu1 %v3919_v7  ;;  %3848 = vst.msk [vmem:[#allocation4 + $0x94] sm:$0x3f] %vm3827_vm12, %v3819_v0  ;;  %v3871_v59 = vld [vmem:[%s11785_s8 + $0x80] sm:$0xff]  ;;  %v3874_v11 = vld [vmem:[%s11785_s8 + $0x98] sm:$0xff]  ;;  %v3873_v31 = vld [vmem:[%s11785_s8 + $0x90] sm:$0xff] }
 0x4bb   : > { %v3578_v30 = vmax.f32 %v3517_v13, %v12306_v18  ;;  %v3606_v40 = vadd.f32 %v3550_v34, %v12377_v15  ;;  %4091 = vmatprep.subr.mxu1 %v12321_v1  ;;  %v3790_v54 = vmul.f32 0.11111111, %v3731_v39  ;;  %v3876_v61 = vld [vmem:[%s11785_s8 + $0xa8] sm:$0xff]  ;;  %v3875_v8 = vld [vmem:[%s11785_s8 + $0xa0] sm:$0xff]  ;;  %v3878_v2 = vld [vmem:[%s11785_s8 + $0xb8] sm:$0xff] }
 0x4bc   : > { %v3759_v24 = vmax.f32 %v3698_v26, %v12389_v32  ;;  %6535 = vmatpush2.msk.msra.mxu1 %vm4041_vm14, %v3943_v56  ;;  %v3941_v32 = vld [vmem:[#allocation4 + $0xb0] sm:$0xff]  ;;  %v3880_v17 = vld [vmem:[%s11785_s8 + $0xc8] sm:$0xff]  ;;  %v3879_v49 = vld [vmem:[%s11785_s8 + $0xc0] sm:$0xff]  ;;  %403 = vst.msk [vmem:[#allocation3 + $0x150] sm:$0x1] %vm388_vm1, %v12321_v1 }
 0x4bd   : > { %v3634_v18 = vmax.f32 %v3578_v30, %v12377_v15  ;;  %v3669_v50 = vadd.f32 %v3606_v40, %v12390_v12  ;;  %4093 = vmatprep.subr.mxu1 %v12321_v1  ;;  %v3877_v45 = vld [vmem:[%s11785_s8 + $0xb0] sm:$0xff]  ;;  %v3882_v3 = vld [vmem:[%s11785_s8 + $0xd8] sm:$0xff]  ;;  %v3884_v6 = vld [vmem:[%s11785_s8 + $0xe8] sm:$0xff]  ;;  %404 = vst.msk [vmem:[#allocation3 + $0x168] sm:$0x1] %vm388_vm1, %v12321_v1 }
 0x4be   : > { %v3818_v35 = vsel %vm3769_vm11, %v3790_v54, %v3759_v24  ;;  %4094 = vmatpush2.msra.mxu1 %v3942_v60  ;;  %v3881_v38 = vld [vmem:[%s11785_s8 + $0xd0] sm:$0xff]  ;;  %v3883_v5 = vld [vmem:[%s11785_s8 + $0xe0] sm:$0xff]  ;;  %v3886_v16 = vld [vmem:[%s11785_s8 + $0xf8] sm:$0xff]  ;;  %405 = vst.msk [vmem:[#allocation3 + $0x180] sm:$0x1] %vm388_vm1, %v12321_v1 }
 0x4bf   : > { %v3697_v63 = vmax.f32 %v3634_v18, %v12390_v12  ;;  %3847 = vst.msk [vmem:[#allocation4 + $0x8c] sm:$0xff] %vm379_vm6, %v3818_v35  ;;  %v3730_v15 = vadd.f32 %v3669_v50, %v12394_v44  ;;  %4095 = vmatprep.subr.mxu1 %v12321_v1  ;;  %v3940_v12 = vld [vmem:[#allocation4 + $0xa8] sm:$0xff]  ;;  %v3885_v13 = vld [vmem:[%s11785_s8 + $0xf0] sm:$0xff]  ;;  %v3887_v51 = vld [vmem:[%s11785_s8 + $0x100] sm:$0xff] }
 0x4c0   : > { %4096 = vmatpush2.msra.mxu1 %v3941_v32  ;;  %v3939_v42 = vld [vmem:[#allocation4 + $0xa0] sm:$0xff]  ;;  %v3888_v43 = vld [vmem:[%s11785_s8 + $0x108] sm:$0xff]  ;;  %v3890_v36 = vld [vmem:[%s11785_s8 + $0x118] sm:$0xff]  ;;  %406 = vst.msk [vmem:[#allocation3 + $0x198] sm:$0x1] %vm388_vm1, %v12321_v1 }
 0x4c1   : > { %v3758_v28 = vmax.f32 %v3697_v63, %v12394_v44  ;;  %v3789_v58 = vmul.f32 0.11111111, %v3730_v15  ;;  %4097 = vmatprep.subr.mxu1 %v12321_v1  ;;  %v3938_v23 = vld [vmem:[#allocation4 + $0x98] sm:$0xff]  ;;  %v3889_v4 = vld [vmem:[%s11785_s8 + $0x110] sm:$0xff]  ;;  %v3892_v25 = vld [vmem:[%s11785_s8 + $0x128] sm:$0xff] }
 0x4c2   : > { %4098 = vmatpush2.msra.mxu1 %v3940_v12  ;;  %v4367_v41 = vld [vmem:[#allocation3 + $0x1] sm:$0xff]  ;;  %v3891_v34 = vld [vmem:[%s11785_s8 + $0x120] sm:$0xff]  ;;  %v3896_v0 = vld [vmem:[%s11785_s8 + $0x148] sm:$0xff]  ;;  %407 = vst.msk [vmem:[#allocation3 + $0x11] sm:$0x1] %vm388_vm1, %v12321_v1 }
 0x4c3   : > { %v3817_v19 = vsel %vm3769_vm11, %v3789_v58, %v3758_v28  ;;  %4099 = vmatprep.subr.mxu1 %v12321_v1  ;;  %4431 = vrot.lane.b32.xlu1 %v4367_v41, %s6917_s27  ;;  %v3894_v30 = vld [vmem:[%s11785_s8 + $0x138] sm:$0xff]  ;;  %v3893_v7 = vld [vmem:[%s11785_s8 + $0x130] sm:$0xff]  ;;  %408 = vst.msk [vmem:[#allocation3 + $0x29] sm:$0x1] %vm388_vm1, %v12321_v1  ;;  %409 = vst.msk [vmem:[#allocation3 + $0x41] sm:$0x1] %vm388_vm1, %v12321_v1 }
 0x4c4   : > { %3846 = vst.msk [vmem:[#allocation4 + $0x86] sm:$0x3f] %vm3827_vm12, %v3817_v19  ;;  %4100 = vmatpush2.msra.mxu1 %v3939_v42  ;;  %v3895_v26 = vld [vmem:[%s11785_s8 + $0x140] sm:$0xff]  ;;  %v3898_v40 = vld [vmem:[%s11785_s8 + $0x158] sm:$0xff]  ;;  %v3897_v18 = vld [vmem:[%s11785_s8 + $0x150] sm:$0xff] }
 0x4c5   : > { %4101 = vmatprep.subr.mxu1 %v12321_v1  ;;  %410 = vst.msk [vmem:[#allocation3 + $0x59] sm:$0x1] %vm388_vm1, %v12321_v1  ;;  %411 = vst.msk [vmem:[#allocation3 + $0x71] sm:$0x1] %vm388_vm1, %v12321_v1  ;;  %v4368_v39 = vld [vmem:[#allocation3 + $0x9] sm:$0xff]  ;;  %v3900_v56 = vld [vmem:[%s11785_s8 + $0x168] sm:$0xff] }
 0x4c6   : > { %4102 = vmatpush2.msra.mxu1 %v3938_v23  ;;  %v3937_v44 = vld [vmem:[#allocation4 + $0x90] sm:$0xff]  ;;  %412 = vst.msk [vmem:[#allocation3 + $0x89] sm:$0x1] %vm388_vm1, %v12321_v1  ;;  %413 = vst.msk [vmem:[#allocation3 + $0xa1] sm:$0x1] %vm388_vm1, %v12321_v1  ;;  %v3899_v24 = vld [vmem:[%s11785_s8 + $0x160] sm:$0xff] }
 0x4c7   : > { %4103 = vmatprep.subr.mxu1 %v12321_v1  ;;  %414 = vst.msk [vmem:[#allocation3 + $0xb9] sm:$0x1] %vm388_vm1, %v12321_v1  ;;  %415 = vst.msk [vmem:[#allocation3 + $0xd1] sm:$0x1] %vm388_vm1, %v12321_v1  ;;  %4433 = vrot.lane.b32.xlu1 %v4368_v39, %s6917_s27  ;;  %v3902_v54 = vld [vmem:[%s11785_s8 + $0x178] sm:$0xff]  ;;  %v3901_v50 = vld [vmem:[%s11785_s8 + $0x170] sm:$0xff] }
 0x4c8   : > { %4104 = vmatpush2.msra.mxu1 %v3937_v44  ;;  %416 = vst.msk [vmem:[#allocation3 + $0xe9] sm:$0x1] %vm388_vm1, %v12321_v1  ;;  %417 = vst.msk [vmem:[#allocation3 + $0x101] sm:$0x1] %vm388_vm1, %v12321_v1  ;;  %v3904_v63 = vld [vmem:[%s11785_s8 + $0x188] sm:$0xff]  ;;  %v3903_v60 = vld [vmem:[%s11785_s8 + $0x180] sm:$0xff] }
 0x4c9   : > { %4105 = vmatprep.subr.mxu1 %v12321_v1  ;;  %418 = vst.msk [vmem:[#allocation3 + $0x119] sm:$0x1] %vm388_vm1, %v12321_v1  ;;  %419 = vst.msk [vmem:[#allocation3 + $0x131] sm:$0x1] %vm388_vm1, %v12321_v1  ;;  %v3906_v35 = vld [vmem:[%s11785_s8 + $0x198] sm:$0xff]  ;;  %v3905_v15 = vld [vmem:[%s11785_s8 + $0x190] sm:$0xff] }
 0x4ca   : > { %420 = vst.msk [vmem:[#allocation3 + $0x149] sm:$0x1] %vm388_vm1, %v12321_v1  ;;  %421 = vst.msk [vmem:[#allocation3 + $0x161] sm:$0x1] %vm388_vm1, %v12321_v1  ;;  %v3908_v32 = vld [vmem:[%s11785_s8 + $0x1a8] sm:$0xff]  ;;  %v3907_v28 = vld [vmem:[%s11785_s8 + $0x1a0] sm:$0xff] }
 0x4cb   : > { %v3936_v33 = vld [vmem:[#allocation4 + $0x88] sm:$0xff]  ;;  %v3935_v62 = vld [vmem:[#allocation4 + $0x80] sm:$0xff]  ;;  %422 = vst.msk [vmem:[#allocation3 + $0x179] sm:$0x1] %vm388_vm1, %v12321_v1  ;;  %423 = vst.msk [vmem:[#allocation3 + $0x191] sm:$0x1] %vm388_vm1, %v12321_v1 }
 0x4cc   : > { %4106 = vmatpush2.msra.mxu1 %v3936_v33  ;;  %424 = vst.msk [vmem:[#allocation3 + $0x1a9] sm:$0x1] %vm388_vm1, %v12321_v1  ;;  %v3910_v58 = vld [vmem:[%s11785_s8 + $0x1b8] sm:$0xff]  ;;  %v3909_v12 = vld [vmem:[%s11785_s8 + $0x1b0] sm:$0xff]  ;;  %v3912_v19 = vld [vmem:[%s11785_s8 + $0x1c8] sm:$0xff] }
 0x4cd   : > { %4107 = vmatprep.subr.mxu1 %v12321_v1  ;;  %v3911_v42 = vld [vmem:[%s11785_s8 + $0x1c0] sm:$0xff]  ;;  %v3914_v23 = vld [vmem:[%s11785_s8 + $0x1d8] sm:$0xff]  ;;  %v3913_v44 = vld [vmem:[%s11785_s8 + $0x1d0] sm:$0xff] }
 0x4ce   : > { %4108 = vmatpush2.msra.mxu1 %v3935_v62  ;;  %v3916_v33 = vld [vmem:[%s11785_s8 + $0x1e8] sm:$0xff]  ;;  %v3918_v62 = vld [vmem:[%s11785_s8 + $0x1f8] sm:$0xff] }
 0x4cf   : > { %4110 = vmatmul.mubr.f32.vlgmr.msra.gmra.mxu1 %v3855_v46  ;;  %5953 = vmatprep.subr.mxu1 %v12321_v1  ;;  %v3915_v46 = vld [vmem:[%s11785_s8 + $0x1e0] sm:$0xff]  ;;  %v5588_v41 = vld [vmem:[%s11783_s6 + $0x118] sm:$0xff] }
 0x4d0   : > { %6537 = vmatprep.mubr.msk.f32.mxu1 %vm3944_vm13, %v3858_v22  ;;  %v3917_v22 = vld [vmem:[%s11785_s8 + $0x1f0] sm:$0xff]  ;;  %v4304_v39 = vld [vmem:[#allocation3 + $0x8] sm:$0xff] }
 0x4d1   : > { %4336 = vst.msk [vmem:[#allocation6 + $0x28] sm:$0xff] %vm379_vm6, %v4304_v39 }
 0x4d3   : > { %4115 = vmatmul.mubr.f32.gmra.mxu1 %v3857_v20  ;;  %v5568_v20 = vld [vmem:[%s11783_s6 + $0x78] sm:$0xff] }
 0x4d4   : > { %6538 = vmatprep.mubr.msk.f32.mxu1 %vm3944_vm13, %v3860_v37  ;;  %5729 = vmatpush1.msra.mxu0 %v5568_v20  ;;  %v5567_v37 = vld [vmem:[%s11783_s6 + $0x70] sm:$0xff]  ;;  %v5610_v20 = vld [vmem:[%s11783_s6 + $0x1c8] sm:$0xff] }
 0x4d5   : > { %5730 = vmatprep.subr.mxu0 %v12321_v1 }
 0x4d6   : > { %5731 = vmatpush1.msra.mxu0 %v5567_v37  ;;  %v5569_v37 = vld [vmem:[%s11783_s6 + $0x80] sm:$0xff] }
 0x4d7   : > { %4120 = vmatmul.mubr.f32.gmra.mxu1 %v3859_v57  ;;  %v5566_v57 = vld [vmem:[%s11783_s6 + $0x68] sm:$0xff]  ;;  %5732 = vmatprep.subr.mxu0 %v12321_v1 }
 0x4d8   : > { %6539 = vmatprep.mubr.msk.f32.mxu1 %vm3944_vm13, %v3862_v29  ;;  %v5565_v29 = vld [vmem:[%s11783_s6 + $0x60] sm:$0xff]  ;;  %5733 = vmatpush1.msra.mxu0 %v5566_v57 }
 0x4d9   : > { %5734 = vmatprep.subr.mxu0 %v12321_v1 }
 0x4da   : > { %5735 = vmatpush1.msra.mxu0 %v5565_v29 }
 0x4db   : > { %4125 = vmatmul.mubr.f32.gmra.mxu1 %v3861_v48  ;;  %v5564_v48 = vld [vmem:[%s11783_s6 + $0x58] sm:$0xff]  ;;  %5736 = vmatprep.subr.mxu0 %v12321_v1 }
 0x4dc   : > { %6540 = vmatprep.mubr.msk.f32.mxu1 %vm3944_vm13, %v3864_v14  ;;  %v5563_v14 = vld [vmem:[%s11783_s6 + $0x50] sm:$0xff]  ;;  %5737 = vmatpush1.msra.mxu0 %v5564_v48 }
 0x4dd   : > { %5738 = vmatprep.subr.mxu0 %v12321_v1 }
 0x4de   : > { %5739 = vmatpush1.msra.mxu0 %v5563_v14  ;;  %v5609_v14 = vld [vmem:[%s11783_s6 + $0x1c0] sm:$0xff] }
 0x4df   : > { %4130 = vmatmul.mubr.f32.gmra.mxu1 %v3863_v27  ;;  %v5562_v27 = vld [vmem:[%s11783_s6 + $0x48] sm:$0xff]  ;;  %5740 = vmatprep.subr.mxu0 %v12321_v1 }
 0x4e0   : > { %6541 = vmatprep.mubr.msk.f32.mxu1 %vm3944_vm13, %v3866_v10  ;;  %v5561_v10 = vld [vmem:[%s11783_s6 + $0x40] sm:$0xff]  ;;  %5741 = vmatpush1.msra.mxu0 %v5562_v27 }
 0x4e1   : > { %5742 = vmatprep.subr.mxu0 %v12321_v1 }
 0x4e2   : > { %5743 = vmatpush1.msra.mxu0 %v5561_v10  ;;  %v5608_v10 = vld [vmem:[%s11783_s6 + $0x1b8] sm:$0xff] }
 0x4e3   : > { %4135 = vmatmul.mubr.f32.gmra.mxu1 %v3865_v21  ;;  %v5560_v21 = vld [vmem:[%s11783_s6 + $0x38] sm:$0xff]  ;;  %5744 = vmatprep.subr.mxu0 %v12321_v1 }
 0x4e4   : > { %6542 = vmatprep.mubr.msk.f32.mxu1 %vm3944_vm13, %v3868_v55  ;;  %v5600_v55 = vld [vmem:[%s11783_s6 + $0x178] sm:$0xff]  ;;  %5745 = vmatpush1.msra.mxu0 %v5560_v21 }
 0x4e5   : > { %5954 = vmatpush1.msra.mxu1 %v5600_v55  ;;  %5746 = vmatprep.subr.mxu0 %v12321_v1 }
 0x4e6   : > { %5955 = vmatprep.subr.mxu1 %v12321_v1 }
 0x4e7   : > { %4140 = vmatmul.mubr.f32.gmra.mxu1 %v3867_v47  ;;  %v5599_v47 = vld [vmem:[%s11783_s6 + $0x170] sm:$0xff] }
 0x4e8   : > { %6543 = vmatprep.mubr.msk.f32.mxu1 %vm3944_vm13, %v3870_v9  ;;  %v5559_v9 = vld [vmem:[%s11783_s6 + $0x30] sm:$0xff]  ;;  %5956 = vmatpush1.msra.mxu1 %v5599_v47 }
 0x4e9   : > { %5957 = vmatprep.subr.mxu1 %v12321_v1  ;;  %5747 = vmatpush1.msra.mxu0 %v5559_v9 }
 0x4ea   : > { %5748 = vmatprep.subr.mxu0 %v12321_v1 }
 0x4eb   : > { %4145 = vmatmul.mubr.f32.gmra.mxu1 %v3869_v53  ;;  %v5558_v53 = vld [vmem:[%s11783_s6 + $0x28] sm:$0xff] }
 0x4ec   : > { %6544 = vmatprep.mubr.msk.f32.mxu1 %vm3944_vm13, %v3872_v52  ;;  %v5598_v52 = vld [vmem:[%s11783_s6 + $0x168] sm:$0xff]  ;;  %5749 = vmatpush1.msra.mxu0 %v5558_v53 }
 0x4ed   : > { %5958 = vmatpush1.msra.mxu1 %v5598_v52  ;;  %5750 = vmatprep.subr.mxu0 %v12321_v1  ;;  %v5607_v52 = vld [vmem:[%s11783_s6 + $0x1b0] sm:$0xff] }
 0x4ee   : > { %5959 = vmatprep.subr.mxu1 %v12321_v1 }
 0x4ef   : > { %4150 = vmatmul.mubr.f32.gmra.mxu1 %v3871_v59  ;;  %v5597_v59 = vld [vmem:[%s11783_s6 + $0x160] sm:$0xff] }
 0x4f0   : > { %6545 = vmatprep.mubr.msk.f32.mxu1 %vm3944_vm13, %v3874_v11  ;;  %v5557_v11 = vld [vmem:[%s11783_s6 + $0x20] sm:$0xff]  ;;  %5960 = vmatpush1.msra.mxu1 %v5597_v59 }
 0x4f1   : > { %5961 = vmatprep.subr.mxu1 %v12321_v1  ;;  %5751 = vmatpush1.msra.mxu0 %v5557_v11  ;;  %v5606_v11 = vld [vmem:[%s11783_s6 + $0x1a8] sm:$0xff] }
 0x4f2   : > { %5752 = vmatprep.subr.mxu0 %v12321_v1 }
 0x4f3   : > { %4155 = vmatmul.mubr.f32.gmra.mxu1 %v3873_v31  ;;  %v5556_v31 = vld [vmem:[%s11783_s6 + $0x18] sm:$0xff] }
 0x4f4   : > { %6546 = vmatprep.mubr.msk.f32.mxu1 %vm3944_vm13, %v3876_v61  ;;  %v5596_v61 = vld [vmem:[%s11783_s6 + $0x158] sm:$0xff]  ;;  %5753 = vmatpush1.msra.mxu0 %v5556_v31 }
 0x4f5   : > { %5962 = vmatpush1.msra.mxu1 %v5596_v61  ;;  %5754 = vmatprep.subr.mxu0 %v12321_v1 }
 0x4f6   : > { %5963 = vmatprep.subr.mxu1 %v12321_v1 }
 0x4f7   : > { %4160 = vmatmul.mubr.f32.gmra.mxu1 %v3875_v8  ;;  %v5595_v8 = vld [vmem:[%s11783_s6 + $0x150] sm:$0xff] }
 0x4f8   : > { %6547 = vmatprep.mubr.msk.f32.mxu1 %vm3944_vm13, %v3878_v2  ;;  %v5555_v2 = vld [vmem:[%s11783_s6 + $0x10] sm:$0xff]  ;;  %5964 = vmatpush1.msra.mxu1 %v5595_v8  ;;  %v5605_v8 = vld [vmem:[%s11783_s6 + $0x1a0] sm:$0xff] }
 0x4f9   : > { %5965 = vmatprep.subr.mxu1 %v12321_v1  ;;  %5755 = vmatpush1.msra.mxu0 %v5555_v2 }
 0x4fa   : > { %5756 = vmatprep.subr.mxu0 %v12321_v1 }
 0x4fb   : > { %4165 = vmatmul.mubr.f32.gmra.mxu1 %v3877_v45  ;;  %v5554_v45 = vld [vmem:[%s11783_s6 + $0x8] sm:$0xff] }
 0x4fc   : > { %6548 = vmatprep.mubr.msk.f32.mxu1 %vm3944_vm13, %v3880_v17  ;;  %v5594_v17 = vld [vmem:[%s11783_s6 + $0x148] sm:$0xff]  ;;  %5757 = vmatpush1.msra.mxu0 %v5554_v45 }
 0x4fd   : > { %5966 = vmatpush1.msra.mxu1 %v5594_v17  ;;  %5758 = vmatprep.subr.mxu0 %v12321_v1  ;;  %v5604_v17 = vld [vmem:[%s11783_s6 + $0x198] sm:$0xff] }
 0x4fe   : > { %5967 = vmatprep.subr.mxu1 %v12321_v1 }
 0x4ff   : > { %4170 = vmatmul.mubr.f32.gmra.mxu1 %v3879_v49  ;;  %v5593_v49 = vld [vmem:[%s11783_s6 + $0x140] sm:$0xff] }
 0x500   : > { %6549 = vmatprep.mubr.msk.f32.mxu1 %vm3944_vm13, %v3882_v3  ;;  %v5553_v3 = vld [vmem:[%s11783_s6] sm:$0xff]  ;;  %5968 = vmatpush1.msra.mxu1 %v5593_v49 }
 0x501   : > { %5969 = vmatprep.subr.mxu1 %v12321_v1  ;;  %5759 = vmatpush1.msra.mxu0 %v5553_v3 }
 0x502   : > { %5760 = vmatprep.subr.mxu0 %v12321_v1 }
 0x503   : > { %4175 = vmatmul.mubr.f32.gmra.mxu1 %v3881_v38  ;;  %v5584_v38 = vld [vmem:[%s11783_s6 + $0xf8] sm:$0xff] }
 0x504   : > { %6550 = vmatprep.mubr.msk.f32.mxu1 %vm3944_vm13, %v3884_v6  ;;  %v5592_v6 = vld [vmem:[%s11783_s6 + $0x138] sm:$0xff]  ;;  %5761 = vmatpush2.msra.mxu0 %v5584_v38 }
 0x505   : > { %5970 = vmatpush1.msra.mxu1 %v5592_v6  ;;  %5762 = vmatprep.subr.mxu0 %v12321_v1 }
 0x506   : > { %5971 = vmatprep.subr.mxu1 %v12321_v1 }
 0x507   : > { %4180 = vmatmul.mubr.f32.gmra.mxu1 %v3883_v5  ;;  %v5591_v5 = vld [vmem:[%s11783_s6 + $0x130] sm:$0xff] }
 0x508   : > { %6551 = vmatprep.mubr.msk.f32.mxu1 %vm3944_vm13, %v3886_v16  ;;  %v5583_v16 = vld [vmem:[%s11783_s6 + $0xf0] sm:$0xff]  ;;  %5972 = vmatpush1.msra.mxu1 %v5591_v5 }
 0x509   : > { %5973 = vmatprep.subr.mxu1 %v12321_v1  ;;  %5763 = vmatpush2.msra.mxu0 %v5583_v16 }
 0x50a   : > { %5764 = vmatprep.subr.mxu0 %v12321_v1 }
 0x50b   : > { %4185 = vmatmul.mubr.f32.gmra.mxu1 %v3885_v13  ;;  %v5582_v13 = vld [vmem:[%s11783_s6 + $0xe8] sm:$0xff] }
 0x50c   : > { %6552 = vmatprep.mubr.msk.f32.mxu1 %vm3944_vm13, %v3888_v43  ;;  %v5590_v43 = vld [vmem:[%s11783_s6 + $0x128] sm:$0xff]  ;;  %5765 = vmatpush2.msra.mxu0 %v5582_v13  ;;  %v5603_v13 = vld [vmem:[%s11783_s6 + $0x190] sm:$0xff] }
 0x50d   : > { %5974 = vmatpush1.msra.mxu1 %v5590_v43  ;;  %5766 = vmatprep.subr.mxu0 %v12321_v1 }
 0x50e   : > { %5975 = vmatprep.subr.mxu1 %v12321_v1 }
 0x50f   : > { %4190 = vmatmul.mubr.f32.gmra.mxu1 %v3887_v51  ;;  %v5589_v51 = vld [vmem:[%s11783_s6 + $0x120] sm:$0xff] }
 0x510   : > { %6553 = vmatprep.mubr.msk.f32.mxu1 %vm3944_vm13, %v3890_v36  ;;  %v5581_v36 = vld [vmem:[%s11783_s6 + $0xe0] sm:$0xff]  ;;  %5976 = vmatpush1.msra.mxu1 %v5589_v51 }
 0x511   : > { %5977 = vmatprep.subr.mxu1 %v12321_v1  ;;  %5767 = vmatpush2.msra.mxu0 %v5581_v36 }
 0x512   : > { %5978 = vmatpush1.msra.mxu1 %v5588_v41  ;;  %5768 = vmatprep.subr.mxu0 %v12321_v1 }
 0x513   : > { %4195 = vmatmul.mubr.f32.gmra.mxu1 %v3889_v4  ;;  %v5580_v4 = vld [vmem:[%s11783_s6 + $0xd8] sm:$0xff]  ;;  %5979 = vmatprep.subr.mxu1 %v12321_v1 }
 0x514   : > { %6554 = vmatprep.mubr.msk.f32.mxu1 %vm3944_vm13, %v3892_v25  ;;  %v4303_v25 = vld [vmem:[#allocation3] sm:$0xff]  ;;  %5769 = vmatpush2.msra.mxu0 %v5580_v4  ;;  %v5602_v4 = vld [vmem:[%s11783_s6 + $0x188] sm:$0xff] }
 0x515   : > { %4335 = vst.msk [vmem:[#allocation6] sm:$0xff] %vm379_vm6, %v4303_v25  ;;  %5770 = vmatprep.subr.mxu0 %v12321_v1 }
 0x517   : > { %4200 = vmatmul.mubr.f32.gmra.mxu1 %v3891_v34  ;;  %v5587_v34 = vld [vmem:[%s11783_s6 + $0x110] sm:$0xff] }
 0x518   : > { %6555 = vmatprep.mubr.msk.f32.mxu1 %vm3944_vm13, %v3894_v30  ;;  %v5579_v30 = vld [vmem:[%s11783_s6 + $0xd0] sm:$0xff]  ;;  %5980 = vmatpush1.msra.mxu1 %v5587_v34 }
 0x519   : > { %5981 = vmatprep.subr.mxu1 %v12321_v1  ;;  %5771 = vmatpush2.msra.mxu0 %v5579_v30  ;;  %v5601_v30 = vld [vmem:[%s11783_s6 + $0x180] sm:$0xff] }
 0x51a   : > { %5772 = vmatprep.subr.mxu0 %v12321_v1 }
 0x51b   : > { %4205 = vmatmul.mubr.f32.gmra.mxu1 %v3893_v7 }
 0x51c   : > { %6556 = vmatprep.mubr.msk.f32.mxu1 %vm3944_vm13, %v3896_v0  ;;  %v5578_v0 = vld [vmem:[%s11783_s6 + $0xc8] sm:$0xff] }
 0x51d   : > { %5773 = vmatpush2.msra.mxu0 %v5578_v0 }
 0x51e   : > { %5774 = vmatprep.subr.mxu0 %v12321_v1 }
 0x51f   : > { %4210 = vmatmul.mubr.f32.gmra.mxu1 %v3895_v26  ;;  %v5586_v26 = vld [vmem:[%s11783_s6 + $0x108] sm:$0xff] }
 0x520   : > { %6557 = vmatprep.mubr.msk.f32.mxu1 %vm3944_vm13, %v3898_v40  ;;  %5982 = vmatpush1.msra.mxu1 %v5586_v26  ;;  %v5585_v40 = vld [vmem:[%s11783_s6 + $0x100] sm:$0xff] }
 0x521   : > { %5983 = vmatprep.subr.mxu1 %v12321_v1 }
 0x522   : > { %5984 = vmatpush1.msra.mxu1 %v5585_v40 }
 0x523   : > { %4215 = vmatmul.mubr.f32.gmra.mxu1 %v3897_v18  ;;  %v5577_v18 = vld [vmem:[%s11783_s6 + $0xc0] sm:$0xff]  ;;  %5985 = vmatprep.subr.mxu1 %v12321_v1 }
 0x524   : > { %6558 = vmatprep.mubr.msk.f32.mxu1 %vm3944_vm13, %v3900_v56  ;;  %v5576_v56 = vld [vmem:[%s11783_s6 + $0xb8] sm:$0xff]  ;;  %5775 = vmatpush2.msra.mxu0 %v5577_v18 }
 0x525   : > { %5776 = vmatprep.subr.mxu0 %v12321_v1 }
 0x526   : > { %5777 = vmatpush2.msra.mxu0 %v5576_v56 }
 0x527   : > { %4220 = vmatmul.mubr.f32.gmra.mxu1 %v3899_v24  ;;  %v5616_v24 = vld [vmem:[%s11783_s6 + $0x1f8] sm:$0xff]  ;;  %5778 = vmatprep.subr.mxu0 %v12321_v1 }
 0x528   : > { %6559 = vmatprep.mubr.msk.f32.mxu1 %vm3944_vm13, %v3902_v54  ;;  %v4560_v54 = vld [vmem:[#allocation3 + $0x2] sm:$0xff]  ;;  %5986 = vmatpush2.msra.mxu1 %v5616_v24 }
 0x529   : > { %4592 = vst.msk [vmem:[#allocation6 + $0x8] sm:$0xff] %vm379_vm6, %v4560_v54  ;;  %5987 = vmatprep.subr.mxu1 %v12321_v1 }
 0x52b   : > { %4225 = vmatmul.mubr.f32.gmra.mxu1 %v3901_v50  ;;  %v5575_v50 = vld [vmem:[%s11783_s6 + $0xb0] sm:$0xff] }
 0x52c   : > { %6560 = vmatprep.mubr.msk.f32.mxu1 %vm3944_vm13, %v3904_v63  ;;  %v5615_v63 = vld [vmem:[%s11783_s6 + $0x1f0] sm:$0xff]  ;;  %5779 = vmatpush2.msra.mxu0 %v5575_v50 }
 0x52d   : > { %5988 = vmatpush2.msra.mxu1 %v5615_v63  ;;  %5780 = vmatprep.subr.mxu0 %v12321_v1 }
 0x52e   : > { %5989 = vmatprep.subr.mxu1 %v12321_v1 }
 0x52f   : > { %4230 = vmatmul.mubr.f32.gmra.mxu1 %v3903_v60  ;;  %v5574_v60 = vld [vmem:[%s11783_s6 + $0xa8] sm:$0xff] }
 0x530   : > { %6561 = vmatprep.mubr.msk.f32.mxu1 %vm3944_vm13, %v3906_v35  ;;  %v5614_v35 = vld [vmem:[%s11783_s6 + $0x1e8] sm:$0xff]  ;;  %5781 = vmatpush2.msra.mxu0 %v5574_v60 }
 0x531   : > { %5990 = vmatpush2.msra.mxu1 %v5614_v35  ;;  %5782 = vmatprep.subr.mxu0 %v12321_v1 }
 0x532   : > { %5991 = vmatprep.subr.mxu1 %v12321_v1 }
 0x533   : > { %4235 = vmatmul.mubr.f32.gmra.mxu1 %v3905_v15  ;;  %v4561_v15 = vld [vmem:[#allocation3 + $0xa] sm:$0xff] }
 0x534   : > { %6562 = vmatprep.mubr.msk.f32.mxu1 %vm3944_vm13, %v3908_v32  ;;  %4593 = vst.msk [vmem:[#allocation6 + $0x30] sm:$0xff] %vm379_vm6, %v4561_v15  ;;  %v5573_v32 = vld [vmem:[%s11783_s6 + $0xa0] sm:$0xff] }
 0x535   : > { %v4432_v7 = vpop.permute.xlu1 %4431  ;;  %5783 = vmatpush2.msra.mxu0 %v5573_v32 }
 0x536   : > { %4528 = vst.msk [vmem:[#allocation6] sm:$0xff] %vm4527_vm2, %v4432_v7  ;;  %5784 = vmatprep.subr.mxu0 %v12321_v1 }
 0x537   : > { %4240 = vmatmul.mubr.f32.gmra.mxu1 %v3907_v28 }
 0x538   : > { %6563 = vmatprep.mubr.msk.f32.mxu1 %vm3944_vm13, %v3910_v58 }
 0x539   : > { %v4434_v58 = vpop.permute.xlu1 %4433 }
 0x53a   : > { %4529 = vst.msk [vmem:[#allocation6 + $0x28] sm:$0xff] %vm4527_vm2, %v4434_v58 }
 0x53b   : > { %4245 = vmatmul.mubr.f32.gmra.mxu1 %v3909_v12  ;;  %v5613_v12 = vld [vmem:[%s11783_s6 + $0x1e0] sm:$0xff] }
 0x53c   : > { %6564 = vmatprep.mubr.msk.f32.mxu1 %vm3944_vm13, %v3912_v19  ;;  %v5572_v19 = vld [vmem:[%s11783_s6 + $0x98] sm:$0xff]  ;;  %5992 = vmatpush2.msra.mxu1 %v5613_v12 }
 0x53d   : > { %5993 = vmatprep.subr.mxu1 %v12321_v1  ;;  %5785 = vmatpush2.msra.mxu0 %v5572_v19 }
 0x53e   : > { %5786 = vmatprep.subr.mxu0 %v12321_v1 }
 0x53f   : > { %4250 = vmatmul.mubr.f32.gmra.mxu1 %v3911_v42  ;;  %v5612_v42 = vld [vmem:[%s11783_s6 + $0x1d8] sm:$0xff] }
 0x540   : > { %6565 = vmatprep.mubr.msk.f32.mxu1 %vm3944_vm13, %v3914_v23  ;;  %5994 = vmatpush2.msra.mxu1 %v5612_v42 }
 0x541   : > { %5995 = vmatprep.subr.mxu1 %v12321_v1 }
 0x543   : > { %4255 = vmatmul.mubr.f32.gmra.mxu1 %v3913_v44  ;;  %v5571_v44 = vld [vmem:[%s11783_s6 + $0x90] sm:$0xff] }
 0x544   : > { %6566 = vmatprep.mubr.msk.f32.mxu1 %vm3944_vm13, %v3916_v33  ;;  %5787 = vmatpush2.msra.mxu0 %v5571_v44 }
 0x545   : > { %5788 = vmatprep.subr.mxu0 %v12321_v1 }
 0x547   : > { %4260 = vmatmul.mubr.f32.gmra.mxu1 %v3915_v46  ;;  %v5611_v46 = vld [vmem:[%s11783_s6 + $0x1d0] sm:$0xff] }
 0x548   : > { %6567 = vmatprep.mubr.msk.f32.mxu1 %vm3944_vm13, %v3918_v62  ;;  %v5570_v62 = vld [vmem:[%s11783_s6 + $0x88] sm:$0xff]  ;;  %5996 = vmatpush2.msra.mxu1 %v5611_v46 }
 0x549   : > { %5997 = vmatprep.subr.mxu1 %v12321_v1  ;;  %5789 = vmatpush2.msra.mxu0 %v5570_v62 }
 0x54a   : > { %5998 = vmatpush2.msra.mxu1 %v5610_v20  ;;  %5790 = vmatprep.subr.mxu0 %v12321_v1 }
 0x54b   : > { %4265 = vmatmul.mubr.f32.gmra.mxu1 %v3917_v22  ;;  %5999 = vmatprep.subr.mxu1 %v12321_v1 }
 0x54c   : > { %6000 = vmatpush2.msra.mxu1 %v5609_v14  ;;  %5791 = vmatpush2.msra.mxu0 %v5569_v37 }
 0x54d   : > { %6001 = vmatprep.subr.mxu1 %v12321_v1 }
 0x54e   : > { %6002 = vmatpush2.msra.mxu1 %v5608_v10 }
 0x54f   : > { %6003 = vmatprep.subr.mxu1 %v12321_v1 }
 0x550   : > { %6004 = vmatpush2.msra.mxu1 %v5607_v52 }
 0x551   : > { %6005 = vmatprep.subr.mxu1 %v12321_v1 }
 0x552   : > { %6006 = vmatpush2.msra.mxu1 %v5606_v11 }
 0x553   : > { %6007 = vmatprep.subr.mxu1 %v12321_v1 }
 0x554   : > { %6008 = vmatpush2.msra.mxu1 %v5605_v8 }
 0x555   : > { %6009 = vmatprep.subr.mxu1 %v12321_v1 }
 0x556   : > { %6010 = vmatpush2.msra.mxu1 %v5604_v17 }
 0x557   : > { %6011 = vmatprep.subr.mxu1 %v12321_v1 }
 0x558   : > { %6012 = vmatpush2.msra.mxu1 %v5603_v13 }
 0x559   : > { %6013 = vmatprep.subr.mxu1 %v12321_v1 }
 0x55a   : > { %6014 = vmatpush2.msra.mxu1 %v5602_v4 }
 0x55b   : > { %6015 = vmatprep.subr.mxu1 %v12321_v1 }
 0x55c   : > { %6016 = vmatpush2.msra.mxu1 %v5601_v30 }
 0x58f   : > { %v4111_v28 = vpop.f32.mrf.mxu1 }
 0x590   : > { %4271 = vst.msk [vmem:[#allocation3 + $0x19] sm:$0xff] %vm379_vm6, %v4111_v28 }
 0x591   : > { %v4113_v23 = vpop.f32.mrf.mxu1 }
 0x593   : > { %v4116_v33 = vpop.f32.mrf.mxu1 }
 0x594   : > { %4272 = vst.msk [vmem:[#allocation3 + $0x21] sm:$0xff] %vm379_vm6, %v4116_v33 }
 0x595   : > { %v4118_v22 = vpop.f32.mrf.mxu1 }
 0x597   : > { %v4121_v57 = vpop.f32.mrf.mxu1  ;;  %v4624_v29 = vld [vmem:[#allocation3 + $0x18] sm:$0xff] }
 0x598   : > { %v4369_v48 = vld [vmem:[#allocation3 + $0x19] sm:$0xff]  ;;  %4273 = vst.msk [vmem:[#allocation3 + $0x31] sm:$0xff] %vm379_vm6, %v4121_v57  ;;  %4688 = vrot.lane.b32.xlu0 %v4624_v29, %s6917_s27  ;;  %4337 = vst.msk [vmem:[#allocation6 + $0x50] sm:$0xff] %vm379_vm6, %v4624_v29 }
 0x599   : > { %4435 = vrot.lane.b32.xlu1 %v4369_v48, %s6917_s27  ;;  %4848 = vst.msk [vmem:[#allocation6 + $0x10] sm:$0xff] %vm379_vm6, %v4369_v48  ;;  %v4123_v27 = vpop.f32.mrf.mxu1 }
 0x59b   : > { %v4126_v21 = vpop.f32.mrf.mxu1  ;;  %v4625_v55 = vld [vmem:[#allocation3 + $0x20] sm:$0xff] }
 0x59c   : > { %v4370_v47 = vld [vmem:[#allocation3 + $0x21] sm:$0xff]  ;;  %4274 = vst.msk [vmem:[#allocation3 + $0x39] sm:$0xff] %vm379_vm6, %v4126_v21  ;;  %4690 = vrot.lane.b32.xlu0 %v4625_v55, %s6917_s27  ;;  %4338 = vst.msk [vmem:[#allocation6 + $0x78] sm:$0xff] %vm379_vm6, %v4625_v55 }
 0x59d   : > { %v4880_v9 = vld [vmem:[#allocation3 + $0x1a] sm:$0xff]  ;;  %4437 = vrot.lane.b32.xlu1 %v4370_v47, %s6917_s27  ;;  %v4881_v53 = vld [vmem:[#allocation3 + $0x22] sm:$0xff]  ;;  %4849 = vst.msk [vmem:[#allocation6 + $0x38] sm:$0xff] %vm379_vm6, %v4370_v47  ;;  %v4128_v59 = vpop.f32.mrf.mxu1 }
 0x59e   : > { %4594 = vst.msk [vmem:[#allocation6 + $0x58] sm:$0xff] %vm379_vm6, %v4880_v9  ;;  %4595 = vst.msk [vmem:[#allocation6 + $0x80] sm:$0xff] %vm379_vm6, %v4881_v53 }
 0x59f   : > { %v4131_v31 = vpop.f32.mrf.mxu1  ;;  %v4626_v61 = vld [vmem:[#allocation3 + $0x30] sm:$0xff] }
 0x5a0   : > { %4275 = vst.msk [vmem:[#allocation3 + $0x49] sm:$0xff] %vm379_vm6, %v4131_v31  ;;  %4692 = vrot.lane.b32.xlu0 %v4626_v61, %s6917_s27  ;;  %4339 = vst.msk [vmem:[#allocation6 + $0xa0] sm:$0xff] %vm379_vm6, %v4626_v61  ;;  %v4818_v2 = vld [vmem:[#allocation3 + $0x31] sm:$0xff] }
 0x5a1   : > { %4944 = vrot.lane.b32.xlu1 %v4880_v9, %s6917_s27  ;;  %5105 = vst.msk [vmem:[#allocation6 + $0x18] sm:$0xff] %vm379_vm6, %v4626_v61  ;;  %v4133_v45 = vpop.f32.mrf.mxu1  ;;  %4850 = vst.msk [vmem:[#allocation6 + $0x60] sm:$0xff] %vm379_vm6, %v4818_v2  ;;  %v4371_v51 = vld [vmem:[#allocation3 + $0x31] sm:$0xff] }
 0x5a3   : > { %v10791_v49 = vld [vmem:[#allocation3 + $0x32] sm:$0xff]  ;;  %v10793_v3 = vld [vmem:[#allocation3 + $0x3a] sm:$0xff]  ;;  %v4136_v38 = vpop.f32.mrf.mxu1 }
 0x5a4   : > { %v4627_v6 = vld [vmem:[#allocation3 + $0x38] sm:$0xff]  ;;  %5361 = vst.msk [vmem:[#allocation6 + $0x20] sm:$0xff] %vm379_vm6, %v10791_v49  ;;  %5362 = vst.msk [vmem:[#allocation6 + $0x48] sm:$0xff] %vm379_vm6, %v10793_v3 }
 0x5a5   : > { %4276 = vst.msk [vmem:[#allocation3 + $0x51] sm:$0xff] %vm379_vm6, %v4136_v38  ;;  %4946 = vrot.lane.b32.xlu1 %v4881_v53, %s6917_s27  ;;  %4694 = vrot.lane.b32.xlu0 %v4627_v6, %s6917_s27  ;;  %4596 = vst.msk [vmem:[#allocation6 + $0xa8] sm:$0xff] %vm379_vm6, %v10791_v49  ;;  %v4819_v5 = vld [vmem:[#allocation3 + $0x39] sm:$0xff]  ;;  %v4138_v16 = vpop.f32.mrf.mxu1 }
 0x5a6   : > { %4597 = vst.msk [vmem:[#allocation6 + $0xd0] sm:$0xff] %vm379_vm6, %v10793_v3  ;;  %4340 = vst.msk [vmem:[#allocation6 + $0xc8] sm:$0xff] %vm379_vm6, %v4627_v6  ;;  %v4372_v50 = vld [vmem:[#allocation3 + $0x39] sm:$0xff] }
 0x5a7   : > { %5106 = vst.msk [vmem:[#allocation6 + $0x40] sm:$0xff] %vm379_vm6, %v4627_v6  ;;  %4851 = vst.msk [vmem:[#allocation6 + $0x88] sm:$0xff] %vm379_vm6, %v4819_v5  ;;  %v4141_v43 = vpop.f32.mrf.mxu1  ;;  %v4628_v36 = vld [vmem:[#allocation3 + $0x48] sm:$0xff] }
 0x5a8   : > { %4277 = vst.msk [vmem:[#allocation3 + $0x61] sm:$0xff] %vm379_vm6, %v4141_v43  ;;  %v4309_v41 = vld [vmem:[#allocation3 + $0x48] sm:$0xff] }
 0x5a9   : > { %4439 = vrot.lane.b32.xlu1 %v4371_v51, %s6917_s27  ;;  %4696 = vrot.lane.b32.xlu0 %v4628_v36, %s6917_s27  ;;  %v4820_v25 = vld [vmem:[#allocation3 + $0x49] sm:$0xff]  ;;  %v4143_v34 = vpop.f32.mrf.mxu1  ;;  %4341 = vst.msk [vmem:[#allocation6 + $0xf0] sm:$0xff] %vm379_vm6, %v4309_v41  ;;  %5107 = vst.msk [vmem:[#allocation6 + $0x68] sm:$0xff] %vm379_vm6, %v4309_v41 }
 0x5aa   : > { %4852 = vst.msk [vmem:[#allocation6 + $0xb0] sm:$0xff] %vm379_vm6, %v4820_v25  ;;  %v4373_v9 = vld [vmem:[#allocation3 + $0x49] sm:$0xff] }
 0x5ab   : > { %v4146_v26 = vpop.f32.mrf.mxu1 }
 0x5ac   : > { %v10827_v7 = vld [vmem:[#allocation3 + $0x4a] sm:$0xff]  ;;  %v10829_v0 = vld [vmem:[#allocation3 + $0x52] sm:$0xff]  ;;  %4278 = vst.msk [vmem:[#allocation3 + $0x69] sm:$0xff] %vm379_vm6, %v4146_v26 }
 0x5ad   : > { %v4629_v39 = vld [vmem:[#allocation3 + $0x50] sm:$0xff]  ;;  %5363 = vst.msk [vmem:[#allocation6 + $0x70] sm:$0xff] %vm379_vm6, %v10827_v7  ;;  %5364 = vst.msk [vmem:[#allocation6 + $0x98] sm:$0xff] %vm379_vm6, %v10829_v0  ;;  %5201 = vrot.lane.b32.xlu1 %v4371_v51, %s6917_s27  ;;  %v4148_v56 = vpop.f32.mrf.mxu1 }
 0x5ae   : > { %4698 = vrot.lane.b32.xlu0 %v4629_v39, %s6917_s27  ;;  %4598 = vst.msk [vmem:[#allocation6 + $0xf8] sm:$0xff] %vm379_vm6, %v10827_v7  ;;  %v4567_v40 = vld [vmem:[#allocation3 + $0x52] sm:$0xff] }
 0x5af   : > { %v4310_v18 = vld [vmem:[#allocation3 + $0x50] sm:$0xff]  ;;  %4599 = vst.msk [vmem:[#allocation6 + $0x120] sm:$0xff] %vm379_vm6, %v4567_v40  ;;  %v4151_v54 = vpop.f32.mrf.mxu1  ;;  %v4630_v63 = vld [vmem:[#allocation3 + $0x60] sm:$0xff] }
 0x5b0   : > { %4342 = vst.msk [vmem:[#allocation6 + $0x118] sm:$0xff] %vm379_vm6, %v4310_v18  ;;  %5108 = vst.msk [vmem:[#allocation6 + $0x90] sm:$0xff] %vm379_vm6, %v4310_v18  ;;  %v4821_v24 = vld [vmem:[#allocation3 + $0x51] sm:$0xff]  ;;  %v4311_v60 = vld [vmem:[#allocation3 + $0x60] sm:$0xff] }
 0x5b1   : > { %4853 = vst.msk [vmem:[#allocation6 + $0xd8] sm:$0xff] %vm379_vm6, %v4821_v24  ;;  %4279 = vst.msk [vmem:[#allocation3 + $0x79] sm:$0xff] %vm379_vm6, %v4151_v54  ;;  %4441 = vrot.lane.b32.xlu1 %v4372_v50, %s6917_s27  ;;  %v4822_v1 = vld [vmem:[#allocation3 + $0x61] sm:$0xff]  ;;  %v4153_v35 = vpop.f32.mrf.mxu1  ;;  %v4374_v5 = vld [vmem:[#allocation3 + $0x51] sm:$0xff] }
 0x5b2   : > { %4700 = vrot.lane.b32.xlu0 %v4630_v63, %s6917_s27  ;;  %4343 = vst.msk [vmem:[#allocation6 + $0x140] sm:$0xff] %vm379_vm6, %v4311_v60  ;;  %5109 = vst.msk [vmem:[#allocation6 + $0xb8] sm:$0xff] %vm379_vm6, %v4311_v60 }
 0x5b3   : > { %4854 = vst.msk [vmem:[#allocation6 + $0x100] sm:$0xff] %vm379_vm6, %v4822_v1  ;;  %v10851_v15 = vld [vmem:[#allocation3 + $0x62] sm:$0xff]  ;;  %v10853_v32 = vld [vmem:[#allocation3 + $0x6a] sm:$0xff]  ;;  %v4156_v28 = vpop.f32.mrf.mxu1 }
 0x5b4   : > { %v4631_v58 = vld [vmem:[#allocation3 + $0x68] sm:$0xff]  ;;  %5365 = vst.msk [vmem:[#allocation6 + $0xc0] sm:$0xff] %vm379_vm6, %v10851_v15  ;;  %5366 = vst.msk [vmem:[#allocation6 + $0xe8] sm:$0xff] %vm379_vm6, %v10853_v32 }
 0x5b5   : > { %4280 = vst.msk [vmem:[#allocation3 + $0x81] sm:$0xff] %vm379_vm6, %v4156_v28  ;;  %5203 = vrot.lane.b32.xlu1 %v4372_v50, %s6917_s27  ;;  %v4568_v12 = vld [vmem:[#allocation3 + $0x62] sm:$0xff]  ;;  %v4569_v19 = vld [vmem:[#allocation3 + $0x6a] sm:$0xff]  ;;  %v4158_v42 = vpop.f32.mrf.mxu1 }
 0x5b6   : > { %4702 = vrot.lane.b32.xlu0 %v4631_v58, %s6917_s27  ;;  %4600 = vst.msk [vmem:[#allocation6 + $0x148] sm:$0xff] %vm379_vm6, %v4568_v12  ;;  %4601 = vst.msk [vmem:[#allocation6 + $0x170] sm:$0xff] %vm379_vm6, %v4569_v19  ;;  %v4312_v23 = vld [vmem:[#allocation3 + $0x68] sm:$0xff] }
 0x5b7   : > { %v4823_v44 = vld [vmem:[#allocation3 + $0x69] sm:$0xff]  ;;  %4344 = vst.msk [vmem:[#allocation6 + $0x168] sm:$0xff] %vm379_vm6, %v4312_v23  ;;  %5110 = vst.msk [vmem:[#allocation6 + $0xe0] sm:$0xff] %vm379_vm6, %v4312_v23  ;;  %v4161_v33 = vpop.f32.mrf.mxu1  ;;  %v4375_v42 = vld [vmem:[#allocation3 + $0x61] sm:$0xff] }
 0x5b8   : > { %4855 = vst.msk [vmem:[#allocation6 + $0x128] sm:$0xff] %vm379_vm6, %v4823_v44  ;;  %v4632_v46 = vld [vmem:[#allocation3 + $0x78] sm:$0xff]  ;;  %4281 = vst.msk [vmem:[#allocation3 + $0x91] sm:$0xff] %vm379_vm6, %v4161_v33  ;;  %v10960_v19 = vld [vmem:[%s11783_s6 + $0x238] sm:$0xff] }
 0x5b9   : > { %v4313_v62 = vld [vmem:[#allocation3 + $0x78] sm:$0xff]  ;;  %4948 = vrot.lane.b32.xlu1 %v10791_v49, %s6917_s27  ;;  %v4163_v20 = vpop.f32.mrf.mxu1  ;;  %6765 = vmatprep.subr.mxu0 %v10960_v19 }
 0x5ba   : > { %4704 = vrot.lane.b32.xlu0 %v4632_v46, %s6917_s27  ;;  %4345 = vst.msk [vmem:[#allocation6 + $0x190] sm:$0xff] %vm379_vm6, %v4313_v62  ;;  %5111 = vst.msk [vmem:[#allocation6 + $0x108] sm:$0xff] %vm379_vm6, %v4313_v62  ;;  %v4824_v22 = vld [vmem:[#allocation3 + $0x79] sm:$0xff] }
 0x5bb   : > { %4856 = vst.msk [vmem:[#allocation6 + $0x150] sm:$0xff] %vm379_vm6, %v4824_v22  ;;  %v4166_v29 = vpop.f32.mrf.mxu1 }
 0x5bc   : > { %v10874_v37 = vld [vmem:[#allocation3 + $0x7a] sm:$0xff]  ;;  %v10876_v57 = vld [vmem:[#allocation3 + $0x82] sm:$0xff]  ;;  %4282 = vst.msk [vmem:[#allocation3 + $0x99] sm:$0xff] %vm379_vm6, %v4166_v29 }
 0x5bd   : > { %v4633_v48 = vld [vmem:[#allocation3 + $0x80] sm:$0xff]  ;;  %5367 = vst.msk [vmem:[#allocation6 + $0x110] sm:$0xff] %vm379_vm6, %v10874_v37  ;;  %5368 = vst.msk [vmem:[#allocation6 + $0x138] sm:$0xff] %vm379_vm6, %v10876_v57  ;;  %4950 = vrot.lane.b32.xlu1 %v10793_v3, %s6917_s27  ;;  %v4168_v10 = vpop.f32.mrf.mxu1 }
 0x5be   : > { %4706 = vrot.lane.b32.xlu0 %v4633_v48, %s6917_s27  ;;  %v4570_v14 = vld [vmem:[#allocation3 + $0x7a] sm:$0xff]  ;;  %v4571_v27 = vld [vmem:[#allocation3 + $0x82] sm:$0xff] }
 0x5bf   : > { %4602 = vst.msk [vmem:[#allocation6 + $0x198] sm:$0xff] %vm379_vm6, %v4570_v14  ;;  %4603 = vst.msk [vmem:[#allocation6 + $0x1c0] sm:$0xff] %vm379_vm6, %v4571_v27  ;;  %v4314_v21 = vld [vmem:[#allocation3 + $0x80] sm:$0xff]  ;;  %v4171_v47 = vpop.f32.mrf.mxu1  ;;  %v4634_v53 = vld [vmem:[#allocation3 + $0x90] sm:$0xff] }
 0x5c0   : > { %v4825_v55 = vld [vmem:[#allocation3 + $0x81] sm:$0xff]  ;;  %4346 = vst.msk [vmem:[#allocation6 + $0x1b8] sm:$0xff] %vm379_vm6, %v4314_v21  ;;  %5112 = vst.msk [vmem:[#allocation6 + $0x130] sm:$0xff] %vm379_vm6, %v4314_v21  ;;  %v4315_v52 = vld [vmem:[#allocation3 + $0x90] sm:$0xff] }
 0x5c1   : > { %4857 = vst.msk [vmem:[#allocation6 + $0x178] sm:$0xff] %vm379_vm6, %v4825_v55  ;;  %4283 = vst.msk [vmem:[#allocation3 + $0xa9] sm:$0xff] %vm379_vm6, %v4171_v47  ;;  %4443 = vrot.lane.b32.xlu1 %v4373_v9, %s6917_s27  ;;  %v4826_v59 = vld [vmem:[#allocation3 + $0x91] sm:$0xff]  ;;  %v4173_v11 = vpop.f32.mrf.mxu1 }
 0x5c2   : > { %4708 = vrot.lane.b32.xlu0 %v4634_v53, %s6917_s27  ;;  %4347 = vst.msk [vmem:[#allocation6 + $0x1e0] sm:$0xff] %vm379_vm6, %v4315_v52  ;;  %5113 = vst.msk [vmem:[#allocation6 + $0x158] sm:$0xff] %vm379_vm6, %v4315_v52 }
 0x5c3   : > { %4858 = vst.msk [vmem:[#allocation6 + $0x1a0] sm:$0xff] %vm379_vm6, %v4826_v59  ;;  %v10897_v31 = vld [vmem:[#allocation3 + $0x92] sm:$0xff]  ;;  %v10899_v61 = vld [vmem:[#allocation3 + $0x9a] sm:$0xff]  ;;  %v4176_v8 = vpop.f32.mrf.mxu1 }
 0x5c4   : > { %v4635_v2 = vld [vmem:[#allocation3 + $0x98] sm:$0xff]  ;;  %5369 = vst.msk [vmem:[#allocation6 + $0x160] sm:$0xff] %vm379_vm6, %v10897_v31  ;;  %5370 = vst.msk [vmem:[#allocation6 + $0x188] sm:$0xff] %vm379_vm6, %v10899_v61 }
 0x5c5   : > { %4284 = vst.msk [vmem:[#allocation3 + $0xb1] sm:$0xff] %vm379_vm6, %v4176_v8  ;;  %5205 = vrot.lane.b32.xlu1 %v4373_v9, %s6917_s27  ;;  %v4572_v45 = vld [vmem:[#allocation3 + $0x92] sm:$0xff]  ;;  %v4573_v17 = vld [vmem:[#allocation3 + $0x9a] sm:$0xff]  ;;  %v4178_v49 = vpop.f32.mrf.mxu1  ;;  %v4376_v9 = vld [vmem:[#allocation3 + $0x69] sm:$0xff] }
 0x5c6   : > { %4710 = vrot.lane.b32.xlu0 %v4635_v2, %s6917_s27  ;;  %4604 = vst.msk [vmem:[#allocation6 + $0x1e8] sm:$0xff] %vm379_vm6, %v4572_v45  ;;  %4605 = vst.msk [vmem:[#allocation6 + $0x210] sm:$0xff] %vm379_vm6, %v4573_v17  ;;  %v4316_v3 = vld [vmem:[#allocation3 + $0x98] sm:$0xff] }
 0x5c7   : > { %v4827_v38 = vld [vmem:[#allocation3 + $0x99] sm:$0xff]  ;;  %4348 = vst.msk [vmem:[#allocation6 + $0x208] sm:$0xff] %vm379_vm6, %v4316_v3  ;;  %5114 = vst.msk [vmem:[#allocation6 + $0x180] sm:$0xff] %vm379_vm6, %v4316_v3  ;;  %v4181_v6 = vpop.f32.mrf.mxu1 }
 0x5c8   : > { %4859 = vst.msk [vmem:[#allocation6 + $0x1c8] sm:$0xff] %vm379_vm6, %v4827_v38  ;;  %v4636_v16 = vld [vmem:[#allocation3 + $0xa8] sm:$0xff]  ;;  %4285 = vst.msk [vmem:[#allocation3 + $0xc1] sm:$0xff] %vm379_vm6, %v4181_v6 }
 0x5c9   : > { %v4317_v13 = vld [vmem:[#allocation3 + $0xa8] sm:$0xff]  ;;  %4445 = vrot.lane.b32.xlu1 %v4374_v5, %s6917_s27  ;;  %v4183_v51 = vpop.f32.mrf.mxu1 }
 0x5ca   : > { %4712 = vrot.lane.b32.xlu0 %v4636_v16, %s6917_s27  ;;  %4349 = vst.msk [vmem:[#allocation6 + $0x230] sm:$0xff] %vm379_vm6, %v4317_v13  ;;  %5115 = vst.msk [vmem:[#allocation6 + $0x1a8] sm:$0xff] %vm379_vm6, %v4317_v13  ;;  %v4828_v43 = vld [vmem:[#allocation3 + $0xa9] sm:$0xff] }
 0x5cb   : > { %4860 = vst.msk [vmem:[#allocation6 + $0x1f0] sm:$0xff] %vm379_vm6, %v4828_v43  ;;  %v4186_v41 = vpop.f32.mrf.mxu1 }
 0x5cc   : > { %v10919_v36 = vld [vmem:[#allocation3 + $0xaa] sm:$0xff]  ;;  %v10921_v4 = vld [vmem:[#allocation3 + $0xb2] sm:$0xff]  ;;  %4286 = vst.msk [vmem:[#allocation3 + $0xc9] sm:$0xff] %vm379_vm6, %v4186_v41 }
 0x5cd   : > { %v4637_v25 = vld [vmem:[#allocation3 + $0xb0] sm:$0xff]  ;;  %5371 = vst.msk [vmem:[#allocation6 + $0x1b0] sm:$0xff] %vm379_vm6, %v10919_v36  ;;  %5372 = vst.msk [vmem:[#allocation6 + $0x1d8] sm:$0xff] %vm379_vm6, %v10921_v4  ;;  %5207 = vrot.lane.b32.xlu1 %v4374_v5, %s6917_s27  ;;  %v4188_v26 = vpop.f32.mrf.mxu1 }
 0x5ce   : > { %4714 = vrot.lane.b32.xlu0 %v4637_v25, %s6917_s27  ;;  %v4574_v34 = vld [vmem:[#allocation3 + $0xaa] sm:$0xff]  ;;  %v4575_v30 = vld [vmem:[#allocation3 + $0xb2] sm:$0xff] }
 0x5cf   : > { %4606 = vst.msk [vmem:[#allocation6 + $0x238] sm:$0xff] %vm379_vm6, %v4574_v34  ;;  %4607 = vst.msk [vmem:[#allocation6 + $0x260] sm:$0xff] %vm379_vm6, %v4575_v30  ;;  %v4318_v39 = vld [vmem:[#allocation3 + $0xb0] sm:$0xff]  ;;  %v4638_v18 = vld [vmem:[#allocation3 + $0xc0] sm:$0xff]  ;;  %v4191_v56 = vpop.f32.mrf.mxu1 }
 0x5d0   : > { %v4829_v40 = vld [vmem:[#allocation3 + $0xb1] sm:$0xff]  ;;  %4350 = vst.msk [vmem:[#allocation6 + $0x258] sm:$0xff] %vm379_vm6, %v4318_v39  ;;  %5116 = vst.msk [vmem:[#allocation6 + $0x1d0] sm:$0xff] %vm379_vm6, %v4318_v39  ;;  %v4319_v24 = vld [vmem:[#allocation3 + $0xc0] sm:$0xff] }
 0x5d1   : > { %4861 = vst.msk [vmem:[#allocation6 + $0x218] sm:$0xff] %vm379_vm6, %v4829_v40  ;;  %4952 = vrot.lane.b32.xlu1 %v10827_v7, %s6917_s27  ;;  %4287 = vst.msk [vmem:[#allocation3 + $0xd9] sm:$0xff] %vm379_vm6, %v4191_v56  ;;  %v4830_v54 = vld [vmem:[#allocation3 + $0xc1] sm:$0xff]  ;;  %v4193_v50 = vpop.f32.mrf.mxu1 }
 0x5d2   : > { %4716 = vrot.lane.b32.xlu0 %v4638_v18, %s6917_s27  ;;  %4351 = vst.msk [vmem:[#allocation6 + $0x280] sm:$0xff] %vm379_vm6, %v4319_v24  ;;  %5117 = vst.msk [vmem:[#allocation6 + $0x1f8] sm:$0xff] %vm379_vm6, %v4319_v24  ;;  %v10942_v1 = vld [vmem:[#allocation3 + $0xc1] sm:$0xff]  ;;  %v4377_v24 = vld [vmem:[#allocation3 + $0x79] sm:$0xff] }
 0x5d3   : > { %4862 = vst.msk [vmem:[#allocation6 + $0x240] sm:$0xff] %vm379_vm6, %v4830_v54  ;;  %v5341_v63 = vld [vmem:[#allocation3 + $0xc2] sm:$0xff]  ;;  %v5342_v60 = vld [vmem:[#allocation3 + $0xca] sm:$0xff]  ;;  %v4196_v35 = vpop.f32.mrf.mxu1 }
 0x5d4   : > { %5373 = vst.msk [vmem:[#allocation6 + $0x200] sm:$0xff] %vm379_vm6, %v5341_v63  ;;  %5374 = vst.msk [vmem:[#allocation6 + $0x228] sm:$0xff] %vm379_vm6, %v5342_v60  ;;  %v10951_v7 = vld [vmem:[#allocation3 + $0xc2] sm:$0xff]  ;;  %v10953_v28 = vld [vmem:[#allocation3 + $0xca] sm:$0xff] }
 0x5d5   : > { %4954 = vrot.lane.b32.xlu1 %v10829_v0, %s6917_s27  ;;  %4288 = vst.msk [vmem:[#allocation3 + $0xe1] sm:$0xff] %vm379_vm6, %v4196_v35  ;;  %v4198_v58 = vpop.f32.mrf.mxu1  ;;  %v4320_v12 = vld [vmem:[#allocation3 + $0xc8] sm:$0xff]  ;;  %4608 = vst.msk [vmem:[#allocation6 + $0x288] sm:$0xff] %vm379_vm6, %v10951_v7 }
 0x5d6   : > { %4463 = vrot.lane.b32.xlu0 %v10942_v1, %s6917_s27  ;;  %4609 = vst.msk [vmem:[#allocation6 + $0x2b0] sm:$0xff] %vm379_vm6, %v10953_v28  ;;  %v4831_v0 = vld [vmem:[#allocation3 + $0xc9] sm:$0xff]  ;;  %4352 = vst.msk [vmem:[#allocation6 + $0x2a8] sm:$0xff] %vm379_vm6, %v4320_v12 }
 0x5d7   : > { %5118 = vst.msk [vmem:[#allocation6 + $0x220] sm:$0xff] %vm379_vm6, %v4320_v12  ;;  %4863 = vst.msk [vmem:[#allocation6 + $0x268] sm:$0xff] %vm379_vm6, %v4831_v0  ;;  %v4639_v23 = vld [vmem:[#allocation3 + $0xc8] sm:$0xff]  ;;  %v4201_v44 = vpop.f32.mrf.mxu1 }
 0x5d8   : > { %v4321_v33 = vld [vmem:[#allocation3 + $0xd8] sm:$0xff]  ;;  %4289 = vst.msk [vmem:[#allocation3 + $0xf1] sm:$0xff] %vm379_vm6, %v4201_v44  ;;  %v10974_v29 = vld [vmem:[#allocation3 + $0xc9] sm:$0xff] }
 0x5d9   : > { %4447 = vrot.lane.b32.xlu1 %v4375_v42, %s6917_s27  ;;  %4353 = vst.msk [vmem:[#allocation6 + $0x2d0] sm:$0xff] %vm379_vm6, %v4321_v33  ;;  %5119 = vst.msk [vmem:[#allocation6 + $0x248] sm:$0xff] %vm379_vm6, %v4321_v33  ;;  %v4832_v46 = vld [vmem:[#allocation3 + $0xd9] sm:$0xff]  ;;  %v4203_v62 = vpop.f32.mrf.mxu1 }
 0x5da   : > { %4718 = vrot.lane.b32.xlu0 %v4639_v23, %s6917_s27  ;;  %4864 = vst.msk [vmem:[#allocation6 + $0x290] sm:$0xff] %vm379_vm6, %v4832_v46  ;;  %v4640_v10 = vld [vmem:[#allocation3 + $0xd8] sm:$0xff]  ;;  %v4378_v62 = vld [vmem:[#allocation3 + $0x81] sm:$0xff] }
 0x5db   : > { %v4206_v48 = vpop.f32.mrf.mxu1  ;;  %v10999_v8 = vld [vmem:[#allocation3 + $0xd9] sm:$0xff] }
 0x5dc   : > { %v5343_v22 = vld [vmem:[#allocation3 + $0xda] sm:$0xff]  ;;  %v5344_v20 = vld [vmem:[#allocation3 + $0xe2] sm:$0xff]  ;;  %4290 = vst.msk [vmem:[#allocation3 + $0xf9] sm:$0xff] %vm379_vm6, %v4206_v48 }
 0x5dd   : > { %5375 = vst.msk [vmem:[#allocation6 + $0x250] sm:$0xff] %vm379_vm6, %v5343_v22  ;;  %5376 = vst.msk [vmem:[#allocation6 + $0x278] sm:$0xff] %vm379_vm6, %v5344_v20  ;;  %5209 = vrot.lane.b32.xlu1 %v4375_v42, %s6917_s27  ;;  %v10982_v14 = vld [vmem:[#allocation3 + $0xda] sm:$0xff]  ;;  %v10984_v27 = vld [vmem:[#allocation3 + $0xe2] sm:$0xff]  ;;  %v4208_v21 = vpop.f32.mrf.mxu1 }
 0x5de   : > { %4465 = vrot.lane.b32.xlu0 %v10974_v29, %s6917_s27  ;;  %v4322_v55 = vld [vmem:[#allocation3 + $0xe0] sm:$0xff]  ;;  %4610 = vst.msk [vmem:[#allocation6 + $0x2d8] sm:$0xff] %vm379_vm6, %v10982_v14  ;;  %4611 = vst.msk [vmem:[#allocation6 + $0x300] sm:$0xff] %vm379_vm6, %v10984_v27 }
 0x5df   : > { %v4833_v47 = vld [vmem:[#allocation3 + $0xe1] sm:$0xff]  ;;  %4354 = vst.msk [vmem:[#allocation6 + $0x2f8] sm:$0xff] %vm379_vm6, %v4322_v55  ;;  %5120 = vst.msk [vmem:[#allocation6 + $0x270] sm:$0xff] %vm379_vm6, %v4322_v55  ;;  %v4211_v53 = vpop.f32.mrf.mxu1  ;;  %v4323_v52 = vld [vmem:[#allocation3 + $0xf0] sm:$0xff] }
 0x5e0   : > { %4865 = vst.msk [vmem:[#allocation6 + $0x2b8] sm:$0xff] %vm379_vm6, %v4833_v47  ;;  %4291 = vst.msk [vmem:[#allocation3 + $0x109] sm:$0xff] %vm379_vm6, %v4211_v53  ;;  %v4834_v59 = vld [vmem:[#allocation3 + $0xf1] sm:$0xff]  ;;  %v4641_v16 = vld [vmem:[#allocation3 + $0xe0] sm:$0xff] }
 0x5e1   : > { %4449 = vrot.lane.b32.xlu1 %v4376_v9, %s6917_s27  ;;  %4355 = vst.msk [vmem:[#allocation6 + $0x320] sm:$0xff] %vm379_vm6, %v4323_v52  ;;  %5121 = vst.msk [vmem:[#allocation6 + $0x298] sm:$0xff] %vm379_vm6, %v4323_v52  ;;  %v4213_v11 = vpop.f32.mrf.mxu1  ;;  %v11025_v25 = vld [vmem:[#allocation3 + $0xe1] sm:$0xff]  ;;  %v4642_v40 = vld [vmem:[#allocation3 + $0xf0] sm:$0xff] }
 0x5e2   : > { %4720 = vrot.lane.b32.xlu0 %v4640_v10, %s6917_s27  ;;  %4866 = vst.msk [vmem:[#allocation6 + $0x2e0] sm:$0xff] %vm379_vm6, %v4834_v59  ;;  %v11051_v35 = vld [vmem:[#allocation3 + $0xf1] sm:$0xff] }
 0x5e3   : > { %v5345_v2 = vld [vmem:[#allocation3 + $0xf2] sm:$0xff]  ;;  %v5346_v45 = vld [vmem:[#allocation3 + $0xfa] sm:$0xff]  ;;  %v4216_v17 = vpop.f32.mrf.mxu1 }
 0x5e4   : > { %5377 = vst.msk [vmem:[#allocation6 + $0x2a0] sm:$0xff] %vm379_vm6, %v5345_v2  ;;  %5378 = vst.msk [vmem:[#allocation6 + $0x2c8] sm:$0xff] %vm379_vm6, %v5346_v45  ;;  %v11007_v49 = vld [vmem:[#allocation3 + $0xf2] sm:$0xff]  ;;  %v11009_v3 = vld [vmem:[#allocation3 + $0xfa] sm:$0xff] }
 0x5e5   : > { %5211 = vrot.lane.b32.xlu1 %v4376_v9, %s6917_s27  ;;  %4292 = vst.msk [vmem:[#allocation3 + $0x111] sm:$0xff] %vm379_vm6, %v4216_v17  ;;  %v4218_v38 = vpop.f32.mrf.mxu1  ;;  %v4324_v6 = vld [vmem:[#allocation3 + $0xf8] sm:$0xff]  ;;  %4612 = vst.msk [vmem:[#allocation6 + $0x328] sm:$0xff] %vm379_vm6, %v11007_v49 }
 0x5e6   : > { %4467 = vrot.lane.b32.xlu0 %v10999_v8, %s6917_s27  ;;  %4613 = vst.msk [vmem:[#allocation6 + $0x350] sm:$0xff] %vm379_vm6, %v11009_v3  ;;  %v4835_v5 = vld [vmem:[#allocation3 + $0xf9] sm:$0xff]  ;;  %4356 = vst.msk [vmem:[#allocation6 + $0x348] sm:$0xff] %vm379_vm6, %v4324_v6 }
 0x5e7   : > { %4867 = vst.msk [vmem:[#allocation6 + $0x308] sm:$0xff] %vm379_vm6, %v4835_v5  ;;  %5122 = vst.msk [vmem:[#allocation6 + $0x2c0] sm:$0xff] %vm379_vm6, %v4324_v6  ;;  %v4221_v13 = vpop.f32.mrf.mxu1  ;;  %v4325_v43 = vld [vmem:[#allocation3 + $0x108] sm:$0xff]  ;;  %v4643_v22 = vld [vmem:[#allocation3 + $0xf8] sm:$0xff] }
 0x5e8   : > { %4293 = vst.msk [vmem:[#allocation3 + $0x121] sm:$0xff] %vm379_vm6, %v4221_v13  ;;  %4357 = vst.msk [vmem:[#allocation6 + $0x370] sm:$0xff] %vm379_vm6, %v4325_v43  ;;  %v4836_v51 = vld [vmem:[#allocation3 + $0x109] sm:$0xff]  ;;  %v11079_v47 = vld [vmem:[#allocation3 + $0xf9] sm:$0xff] }
 0x5e9   : > { %4956 = vrot.lane.b32.xlu1 %v10851_v15, %s6917_s27  ;;  %5123 = vst.msk [vmem:[#allocation6 + $0x2e8] sm:$0xff] %vm379_vm6, %v4325_v43  ;;  %v4223_v41 = vpop.f32.mrf.mxu1  ;;  %4868 = vst.msk [vmem:[#allocation6 + $0x330] sm:$0xff] %vm379_vm6, %v4836_v51  ;;  %v4644_v45 = vld [vmem:[#allocation3 + $0x108] sm:$0xff]  ;;  %v11101_v5 = vld [vmem:[#allocation3 + $0x91] sm:$0xff] }
 0x5ea   : > { %4722 = vrot.lane.b32.xlu0 %v4641_v16, %s6917_s27 }
 0x5eb   : > { %v4226_v26 = vpop.f32.mrf.mxu1 }
 0x5ec   : > { %v5347_v34 = vld [vmem:[#allocation3 + $0x10a] sm:$0xff]  ;;  %v5348_v30 = vld [vmem:[#allocation3 + $0x112] sm:$0xff]  ;;  %4294 = vst.msk [vmem:[#allocation3 + $0x129] sm:$0xff] %vm379_vm6, %v4226_v26 }
 0x5ed   : > { %4958 = vrot.lane.b32.xlu1 %v10853_v32, %s6917_s27  ;;  %5379 = vst.msk [vmem:[#allocation6 + $0x2f0] sm:$0xff] %vm379_vm6, %v5347_v34  ;;  %5380 = vst.msk [vmem:[#allocation6 + $0x318] sm:$0xff] %vm379_vm6, %v5348_v30  ;;  %v11034_v15 = vld [vmem:[#allocation3 + $0x10a] sm:$0xff]  ;;  %v11036_v39 = vld [vmem:[#allocation3 + $0x112] sm:$0xff]  ;;  %v4228_v18 = vpop.f32.mrf.mxu1 }
 0x5ee   : > { %4469 = vrot.lane.b32.xlu0 %v11025_v25, %s6917_s27  ;;  %v4326_v56 = vld [vmem:[#allocation3 + $0x110] sm:$0xff]  ;;  %4614 = vst.msk [vmem:[#allocation6 + $0x378] sm:$0xff] %vm379_vm6, %v11034_v15  ;;  %4615 = vst.msk [vmem:[#allocation6 + $0x3a0] sm:$0xff] %vm379_vm6, %v11036_v39  ;;  %v11113_v34 = vld [vmem:[#allocation3 + $0x99] sm:$0xff] }
 0x5ef   : > { %v4837_v32 = vld [vmem:[#allocation3 + $0x111] sm:$0xff]  ;;  %4358 = vst.msk [vmem:[#allocation6 + $0x398] sm:$0xff] %vm379_vm6, %v4326_v56  ;;  %5124 = vst.msk [vmem:[#allocation6 + $0x310] sm:$0xff] %vm379_vm6, %v4326_v56  ;;  %v4231_v54 = vpop.f32.mrf.mxu1  ;;  %v4327_v50 = vld [vmem:[#allocation3 + $0x120] sm:$0xff] }
 0x5f0   : > { %4869 = vst.msk [vmem:[#allocation6 + $0x358] sm:$0xff] %vm379_vm6, %v4837_v32  ;;  %4295 = vst.msk [vmem:[#allocation3 + $0x139] sm:$0xff] %vm379_vm6, %v4231_v54  ;;  %v4838_v63 = vld [vmem:[#allocation3 + $0x121] sm:$0xff]  ;;  %v11115_v30 = vld [vmem:[#allocation3 + $0x109] sm:$0xff] }
 0x5f1   : > { %4451 = vrot.lane.b32.xlu1 %v4377_v24, %s6917_s27  ;;  %4359 = vst.msk [vmem:[#allocation6 + $0x3c0] sm:$0xff] %vm379_vm6, %v4327_v50  ;;  %5125 = vst.msk [vmem:[#allocation6 + $0x338] sm:$0xff] %vm379_vm6, %v4327_v50  ;;  %v4233_v60 = vpop.f32.mrf.mxu1 }
 0x5f2   : > { %4724 = vrot.lane.b32.xlu0 %v4642_v40, %s6917_s27  ;;  %4870 = vst.msk [vmem:[#allocation6 + $0x380] sm:$0xff] %vm379_vm6, %v4838_v63  ;;  %v11135_v60 = vld [vmem:[#allocation3 + $0xa9] sm:$0xff] }
 0x5f3   : > { %v11053_v58 = vld [vmem:[#allocation3 + $0x122] sm:$0xff]  ;;  %v11055_v12 = vld [vmem:[#allocation3 + $0x12a] sm:$0xff]  ;;  %v4236_v0 = vpop.f32.mrf.mxu1 }
 0x5f4   : > { %5381 = vst.msk [vmem:[#allocation6 + $0x340] sm:$0xff] %vm379_vm6, %v11053_v58  ;;  %5382 = vst.msk [vmem:[#allocation6 + $0x368] sm:$0xff] %vm379_vm6, %v11055_v12  ;;  %v4328_v42 = vld [vmem:[#allocation3 + $0x128] sm:$0xff] }
 0x5f5   : > { %5213 = vrot.lane.b32.xlu1 %v4377_v24, %s6917_s27  ;;  %4296 = vst.msk [vmem:[#allocation3 + $0x141] sm:$0xff] %vm379_vm6, %v4236_v0  ;;  %v4238_v23 = vpop.f32.mrf.mxu1  ;;  %4360 = vst.msk [vmem:[#allocation6 + $0x3e8] sm:$0xff] %vm379_vm6, %v4328_v42  ;;  %v4584_v44 = vld [vmem:[#allocation3 + $0x122] sm:$0xff]  ;;  %v4585_v33 = vld [vmem:[#allocation3 + $0x12a] sm:$0xff] }
 0x5f6   : > { %4471 = vrot.lane.b32.xlu0 %v11051_v35, %s6917_s27  ;;  %v4839_v46 = vld [vmem:[#allocation3 + $0x129] sm:$0xff]  ;;  %5126 = vst.msk [vmem:[#allocation6 + $0x360] sm:$0xff] %vm379_vm6, %v4328_v42  ;;  %4616 = vst.msk [vmem:[#allocation6 + $0x3c8] sm:$0xff] %vm379_vm6, %v4584_v44 }
 0x5f7   : > { %4617 = vst.msk [vmem:[#allocation6 + $0x3f0] sm:$0xff] %vm379_vm6, %v4585_v33  ;;  %4871 = vst.msk [vmem:[#allocation6 + $0x3a8] sm:$0xff] %vm379_vm6, %v4839_v46  ;;  %v11070_v20 = vld [vmem:[#allocation3 + $0x138] sm:$0xff]  ;;  %v4241_v48 = vpop.f32.mrf.mxu1  ;;  %v4645_v0 = vld [vmem:[#allocation3 + $0x110] sm:$0xff] }
 0x5f8   : > { %v4840_v10 = vld [vmem:[#allocation3 + $0x139] sm:$0xff]  ;;  %4297 = vst.msk [vmem:[#allocation3 + $0x151] sm:$0xff] %vm379_vm6, %v4241_v48  ;;  %4361 = vst.msk [vmem:[#allocation6 + $0x410] sm:$0xff] %vm379_vm6, %v11070_v20  ;;  %v11150_v48 = vld [vmem:[#allocation3 + $0xb1] sm:$0xff] }
 0x5f9   : > { %4453 = vrot.lane.b32.xlu1 %v4378_v62, %s6917_s27  ;;  %4872 = vst.msk [vmem:[#allocation6 + $0x3d0] sm:$0xff] %vm379_vm6, %v4840_v10  ;;  %v5095_v21 = vld [vmem:[#allocation3 + $0x138] sm:$0xff]  ;;  %v4243_v55 = vpop.f32.mrf.mxu1 }
 0x5fa   : > { %4726 = vrot.lane.b32.xlu0 %v4643_v22, %s6917_s27  ;;  %5127 = vst.msk [vmem:[#allocation6 + $0x388] sm:$0xff] %vm379_vm6, %v5095_v21  ;;  %v11152_v10 = vld [vmem:[#allocation3 + $0x111] sm:$0xff] }
 0x5fb   : > { %v4246_v52 = vpop.f32.mrf.mxu1 }
 0x5fc   : > { %v11081_v9 = vld [vmem:[#allocation3 + $0x13a] sm:$0xff]  ;;  %v11083_v53 = vld [vmem:[#allocation3 + $0x142] sm:$0xff]  ;;  %4298 = vst.msk [vmem:[#allocation3 + $0x159] sm:$0xff] %vm379_vm6, %v4246_v52 }
 0x5fd   : > { %v11085_v59 = vld [vmem:[#allocation3 + $0x140] sm:$0xff]  ;;  %5215 = vrot.lane.b32.xlu1 %v4378_v62, %s6917_s27  ;;  %5383 = vst.msk [vmem:[#allocation6 + $0x390] sm:$0xff] %vm379_vm6, %v11081_v9  ;;  %5384 = vst.msk [vmem:[#allocation6 + $0x3b8] sm:$0xff] %vm379_vm6, %v11083_v53  ;;  %v4248_v17 = vpop.f32.mrf.mxu1 }
 0x5fe   : > { %4473 = vrot.lane.b32.xlu0 %v11079_v47, %s6917_s27  ;;  %4362 = vst.msk [vmem:[#allocation6 + $0x438] sm:$0xff] %vm379_vm6, %v11085_v59  ;;  %v4586_v11 = vld [vmem:[#allocation3 + $0x13a] sm:$0xff]  ;;  %v4587_v2 = vld [vmem:[#allocation3 + $0x142] sm:$0xff] }
 0x5ff   : > { %4618 = vst.msk [vmem:[#allocation6 + $0x418] sm:$0xff] %vm379_vm6, %v4586_v11  ;;  %4619 = vst.msk [vmem:[#allocation6 + $0x440] sm:$0xff] %vm379_vm6, %v4587_v2  ;;  %v4841_v38 = vld [vmem:[#allocation3 + $0x141] sm:$0xff]  ;;  %v11103_v16 = vld [vmem:[#allocation3 + $0x150] sm:$0xff]  ;;  %v4251_v13 = vpop.f32.mrf.mxu1 }
 0x600   : > { %v5096_v6 = vld [vmem:[#allocation3 + $0x140] sm:$0xff]  ;;  %4873 = vst.msk [vmem:[#allocation6 + $0x3f8] sm:$0xff] %vm379_vm6, %v4841_v38  ;;  %v4842_v43 = vld [vmem:[#allocation3 + $0x151] sm:$0xff]  ;;  %4299 = vst.msk [vmem:[#allocation3 + $0x169] sm:$0xff] %vm379_vm6, %v4251_v13 }
 0x601   : > { %5128 = vst.msk [vmem:[#allocation6 + $0x3b0] sm:$0xff] %vm379_vm6, %v5096_v6  ;;  %4455 = vrot.lane.b32.xlu1 %v11101_v5, %s6917_s27  ;;  %4363 = vst.msk [vmem:[#allocation6 + $0x460] sm:$0xff] %vm379_vm6, %v11103_v16  ;;  %v5097_v51 = vld [vmem:[#allocation3 + $0x150] sm:$0xff]  ;;  %v4253_v41 = vpop.f32.mrf.mxu1  ;;  %v4646_v17 = vld [vmem:[#allocation3 + $0x120] sm:$0xff] }
 0x602   : > { %4728 = vrot.lane.b32.xlu0 %v4644_v45, %s6917_s27  ;;  %4874 = vst.msk [vmem:[#allocation6 + $0x420] sm:$0xff] %vm379_vm6, %v4842_v43  ;;  %5129 = vst.msk [vmem:[#allocation6 + $0x3d8] sm:$0xff] %vm379_vm6, %v5097_v51 }
 0x603   : > { %v11117_v26 = vld [vmem:[#allocation3 + $0x152] sm:$0xff]  ;;  %v11119_v40 = vld [vmem:[#allocation3 + $0x15a] sm:$0xff]  ;;  %v4256_v18 = vpop.f32.mrf.mxu1 }
 0x604   : > { %v11121_v56 = vld [vmem:[#allocation3 + $0x158] sm:$0xff]  ;;  %5385 = vst.msk [vmem:[#allocation6 + $0x3e0] sm:$0xff] %vm379_vm6, %v11117_v26  ;;  %5386 = vst.msk [vmem:[#allocation6 + $0x408] sm:$0xff] %vm379_vm6, %v11119_v40 }
 0x605   : > { %4457 = vrot.lane.b32.xlu1 %v11113_v34, %s6917_s27  ;;  %4300 = vst.msk [vmem:[#allocation3 + $0x171] sm:$0xff] %vm379_vm6, %v4256_v18  ;;  %4364 = vst.msk [vmem:[#allocation6 + $0x488] sm:$0xff] %vm379_vm6, %v11121_v56  ;;  %v4588_v32 = vld [vmem:[#allocation3 + $0x152] sm:$0xff]  ;;  %v4258_v24 = vpop.f32.mrf.mxu1  ;;  %v4589_v54 = vld [vmem:[#allocation3 + $0x15a] sm:$0xff] }
 0x606   : > { %4475 = vrot.lane.b32.xlu0 %v11115_v30, %s6917_s27  ;;  %4620 = vst.msk [vmem:[#allocation6 + $0x468] sm:$0xff] %vm379_vm6, %v4588_v32  ;;  %v4843_v50 = vld [vmem:[#allocation3 + $0x159] sm:$0xff]  ;;  %4621 = vst.msk [vmem:[#allocation6 + $0x490] sm:$0xff] %vm379_vm6, %v4589_v54 }
 0x607   : > { %v5098_v63 = vld [vmem:[#allocation3 + $0x158] sm:$0xff]  ;;  %4875 = vst.msk [vmem:[#allocation6 + $0x448] sm:$0xff] %vm379_vm6, %v4843_v50  ;;  %v11140_v42 = vld [vmem:[#allocation3 + $0x168] sm:$0xff]  ;;  %v4261_v23 = vpop.f32.mrf.mxu1 }
 0x608   : > { %5130 = vst.msk [vmem:[#allocation6 + $0x400] sm:$0xff] %vm379_vm6, %v5098_v63  ;;  %v4844_v44 = vld [vmem:[#allocation3 + $0x169] sm:$0xff]  ;;  %4301 = vst.msk [vmem:[#allocation3 + $0x181] sm:$0xff] %vm379_vm6, %v4261_v23  ;;  %v5393_v32 = vld [vmem:[#allocation6] sm:$0xff] }
 0x609   : > { %4459 = vrot.lane.b32.xlu1 %v11135_v60, %s6917_s27  ;;  %4365 = vst.msk [vmem:[#allocation6 + $0x4b0] sm:$0xff] %vm379_vm6, %v11140_v42  ;;  %4876 = vst.msk [vmem:[#allocation6 + $0x470] sm:$0xff] %vm379_vm6, %v4844_v44  ;;  %v5099_v33 = vld [vmem:[#allocation3 + $0x168] sm:$0xff]  ;;  %v4263_v46 = vpop.f32.mrf.mxu1 }
 0x60a   : > { %4730 = vrot.lane.b32.xlu0 %v4645_v0, %s6917_s27  ;;  %5131 = vst.msk [vmem:[#allocation6 + $0x428] sm:$0xff] %vm379_vm6, %v5099_v33  ;;  %v4689_v62 = vpop.permute.xlu0 %4688  ;;  %v11198_v23 = vld [vmem:[#allocation3 + $0x121] sm:$0xff] }
 0x60b   : > { %v4436_v22 = vpop.permute.xlu1 %4435  ;;  %4784 = vst.msk [vmem:[#allocation6 + $0x8] sm:$0xff] %vm4527_vm2, %v4689_v62  ;;  %v4266_v52 = vpop.f32.mrf.mxu1  ;;  %v5398_v33 = vld [vmem:[#allocation6 + $0x28] sm:$0xff] }
 0x60c   : > { %4530 = vst.msk [vmem:[#allocation6 + $0x50] sm:$0xff] %vm4527_vm2, %v4436_v22  ;;  %v11156_v21 = vld [vmem:[#allocation3 + $0x16a] sm:$0xff]  ;;  %v11158_v55 = vld [vmem:[#allocation3 + $0x172] sm:$0xff] }
 0x60d   : > { %v11160_v11 = vld [vmem:[#allocation3 + $0x170] sm:$0xff]  ;;  %4461 = vrot.lane.b32.xlu1 %v11150_v48, %s6917_s27  ;;  %5387 = vst.msk [vmem:[#allocation6 + $0x430] sm:$0xff] %vm379_vm6, %v11156_v21  ;;  %5388 = vst.msk [vmem:[#allocation6 + $0x458] sm:$0xff] %vm379_vm6, %v11158_v55  ;;  %v4268_v38 = vpop.f32.mrf.mxu1 }
 0x60e   : > { %4477 = vrot.lane.b32.xlu0 %v11152_v10, %s6917_s27  ;;  %4302 = vst.msk [vmem:[#allocation3 + $0x189] sm:$0xff] %vm379_vm6, %v4266_v52  ;;  %4366 = vst.msk [vmem:[#allocation6 + $0x4d8] sm:$0xff] %vm379_vm6, %v11160_v11  ;;  %v4590_v2 = vld [vmem:[#allocation3 + $0x16a] sm:$0xff]  ;;  %v4591_v45 = vld [vmem:[#allocation3 + $0x172] sm:$0xff]  ;;  %v4691_v43 = vpop.permute.xlu0 %4690 }
 0x60f   : > { %4622 = vst.msk [vmem:[#allocation6 + $0x4b8] sm:$0xff] %vm379_vm6, %v4590_v2  ;;  %4623 = vst.msk [vmem:[#allocation6 + $0x4e0] sm:$0xff] %vm379_vm6, %v4591_v45  ;;  %v4845_v6 = vld [vmem:[#allocation3 + $0x171] sm:$0xff]  ;;  %v4438_v51 = vpop.permute.xlu1 %4437  ;;  %v11179_v41 = vld [vmem:[#allocation3 + $0x181] sm:$0xff] }
 0x610   : > { %v5100_v13 = vld [vmem:[#allocation3 + $0x170] sm:$0xff]  ;;  %4877 = vst.msk [vmem:[#allocation6 + $0x498] sm:$0xff] %vm379_vm6, %v4845_v6  ;;  %v5101_v18 = vld [vmem:[#allocation3 + $0x180] sm:$0xff]  ;;  %4878 = vst.msk [vmem:[#allocation6 + $0x4c0] sm:$0xff] %vm379_vm6, %v11179_v41 }
 0x611   : > { %5132 = vst.msk [vmem:[#allocation6 + $0x450] sm:$0xff] %vm379_vm6, %v5100_v13  ;;  %5217 = vrot.lane.b32.xlu1 %v11101_v5, %s6917_s27  ;;  %5133 = vst.msk [vmem:[#allocation6 + $0x478] sm:$0xff] %vm379_vm6, %v5101_v18  ;;  %v5623_v5 = vld [vmem:[%s11783_s6 + $0x230] sm:$0xff]  ;;  %v5622_v52 = vld [vmem:[%s11783_s6 + $0x228] sm:$0xff] }
 0x612   : > { %4785 = vst.msk [vmem:[#allocation6 + $0x30] sm:$0xff] %vm4527_vm2, %v4691_v43  ;;  %4531 = vst.msk [vmem:[#allocation6 + $0x78] sm:$0xff] %vm4527_vm2, %v4438_v51  ;;  %4732 = vrot.lane.b32.xlu0 %v4646_v17, %s6917_s27  ;;  %v4693_v54 = vpop.permute.xlu0 %4692  ;;  %v5394_v50 = vld [vmem:[#allocation6 + $0x8] sm:$0xff]  ;;  %v5621_v2 = vld [vmem:[%s11783_s6 + $0x220] sm:$0xff] }
 0x613   : > { %v4945_v24 = vpop.permute.xlu1 %4944  ;;  %4786 = vst.msk [vmem:[#allocation6 + $0x58] sm:$0xff] %vm4527_vm2, %v4693_v54  ;;  %5792 = vmatprep.mubr.f32.mxu0 %v5394_v50  ;;  %v5403_v6 = vld [vmem:[#allocation6 + $0x50] sm:$0xff] }
 0x614   : > { %5040 = vst.msk [vmem:[#allocation6 + $0x10] sm:$0xff] %vm4527_vm2, %v4945_v24  ;;  %5793 = vmatmul.mubr.f32.vlgmr.msra.gmra.mxu0 %v5393_v32  ;;  %v11230_v13 = vld [vmem:[#allocation3 + $0x129] sm:$0xff] }
 0x615   : > { %v11189_v63 = vld [vmem:[#allocation3 + $0x182] sm:$0xff]  ;;  %v11191_v0 = vld [vmem:[#allocation3 + $0x18a] sm:$0xff]  ;;  %4960 = vrot.lane.b32.xlu1 %v10874_v37, %s6917_s27  ;;  %6766 = vmatpush3.msra.mxu0 %v10960_v19 }
 0x616   : > { %5389 = vst.msk [vmem:[#allocation6 + $0x480] sm:$0xff] %vm379_vm6, %v11189_v63  ;;  %5390 = vst.msk [vmem:[#allocation6 + $0x4a8] sm:$0xff] %vm379_vm6, %v11191_v0  ;;  %v11204_v44 = vld [vmem:[#allocation3 + $0x189] sm:$0xff]  ;;  %4479 = vrot.lane.b32.xlu0 %v11198_v23, %s6917_s27  ;;  %6767 = vmatprep.subr.mxu0 %v5623_v5 }
 0x617   : > { %4879 = vst.msk [vmem:[#allocation6 + $0x4e8] sm:$0xff] %vm379_vm6, %v11204_v44  ;;  %v5102_v37 = vld [vmem:[#allocation3 + $0x188] sm:$0xff]  ;;  %v4947_v46 = vpop.permute.xlu1 %4946  ;;  %v4695_v62 = vpop.permute.xlu0 %4694  ;;  %6768 = vmatpush3.msra.mxu0 %v5623_v5  ;;  %v11244_v5 = vld [vmem:[#allocation3 + $0x139] sm:$0xff] }
 0x618   : > { %5134 = vst.msk [vmem:[#allocation6 + $0x4a0] sm:$0xff] %vm379_vm6, %v5102_v37  ;;  %v4647_v19 = vld [vmem:[#allocation3 + $0x128] sm:$0xff]  ;;  %6769 = vmatprep.subr.mxu0 %v5622_v52 }
 0x619   : > { %v5399_v22 = vld [vmem:[#allocation6 + $0x30] sm:$0xff]  ;;  %5041 = vst.msk [vmem:[#allocation6 + $0x38] sm:$0xff] %vm4527_vm2, %v4947_v46  ;;  %4787 = vst.msk [vmem:[#allocation6 + $0x80] sm:$0xff] %vm4527_vm2, %v4695_v62  ;;  %5219 = vrot.lane.b32.xlu1 %v11113_v34, %s6917_s27  ;;  %6770 = vmatpush3.msra.mxu0 %v5622_v52  ;;  %v5408_v32 = vld [vmem:[#allocation6 + $0x78] sm:$0xff] }
 0x61a   : > { %5797 = vmatprep.mubr.f32.mxu0 %v5399_v22  ;;  %4734 = vrot.lane.b32.xlu0 %v4647_v19, %s6917_s27  ;;  %v5404_v38 = vld [vmem:[#allocation6 + $0x58] sm:$0xff]  ;;  %v5620_v34 = vld [vmem:[%s11783_s6 + $0x218] sm:$0xff] }
 0x61b   : > { %5798 = vmatmul.mubr.f32.gmra.mxu0 %v5398_v33  ;;  %v4440_v45 = vpop.permute.xlu1 %4439  ;;  %v4697_v17 = vpop.permute.xlu0 %4696  ;;  %6771 = vmatprep.subr.mxu0 %v5621_v2 }
 0x61c   : > { %4532 = vst.msk [vmem:[#allocation6 + $0xa0] sm:$0xff] %vm4527_vm2, %v4440_v45  ;;  %4788 = vst.msk [vmem:[#allocation6 + $0xa8] sm:$0xff] %vm4527_vm2, %v4697_v17  ;;  %5802 = vmatprep.mubr.f32.mxu0 %v5404_v38  ;;  %6772 = vmatpush3.msra.mxu0 %v5621_v2  ;;  %v11261_v2 = vld [vmem:[#allocation3 + $0x141] sm:$0xff] }
 0x61d   : > { %4962 = vrot.lane.b32.xlu1 %v10876_v57, %s6917_s27  ;;  %6773 = vmatprep.subr.mxu0 %v5620_v34 }
 0x61e   : > { %4481 = vrot.lane.b32.xlu0 %v11230_v13, %s6917_s27  ;;  %6774 = vmatpush3.msra.mxu0 %v5620_v34  ;;  %v5618_v34 = vld [vmem:[%s11783_s6 + $0x208] sm:$0xff] }
 0x61f   : > { %5803 = vmatmul.mubr.f32.gmra.mxu0 %v5403_v6  ;;  %v5202_v43 = vpop.permute.xlu1 %5201  ;;  %v11275_v6 = vld [vmem:[#allocation3 + $0x151] sm:$0xff] }
 0x620   : > { %v4699_v51 = vpop.permute.xlu0 %4698  ;;  %v5409_v18 = vld [vmem:[#allocation6 + $0x80] sm:$0xff]  ;;  %5297 = vst.msk [vmem:[#allocation6 + $0x18] sm:$0xff] %vm4527_vm2, %v5202_v43  ;;  %v5400_v17 = vld [vmem:[#allocation6 + $0x38] sm:$0xff] }
 0x621   : > { %4789 = vst.msk [vmem:[#allocation6 + $0xd0] sm:$0xff] %vm4527_vm2, %v4699_v51  ;;  %5807 = vmatprep.mubr.f32.mxu0 %v5409_v18  ;;  %5221 = vrot.lane.b32.xlu1 %v11135_v60, %s6917_s27  ;;  %v5619_v60 = vld [vmem:[%s11783_s6 + $0x210] sm:$0xff] }
 0x622   : > { %4736 = vrot.lane.b32.xlu0 %v11070_v20, %s6917_s27  ;;  %6775 = vmatprep.subr.mxu0 %v5619_v60 }
 0x623   : > { %5808 = vmatmul.mubr.f32.gmra.mxu0 %v5408_v32  ;;  %v4442_v57 = vpop.permute.xlu1 %4441  ;;  %v5414_v54 = vld [vmem:[#allocation6 + $0xa8] sm:$0xff]  ;;  %v5413_v50 = vld [vmem:[#allocation6 + $0xa0] sm:$0xff] }
 0x624   : > { %v4701_v24 = vpop.permute.xlu0 %4700  ;;  %4533 = vst.msk [vmem:[#allocation6 + $0xc8] sm:$0xff] %vm4527_vm2, %v4442_v57  ;;  %5812 = vmatprep.mubr.f32.mxu0 %v5414_v54  ;;  %6776 = vmatpush3.msra.mxu0 %v5619_v60  ;;  %v11292_v32 = vld [vmem:[#allocation3 + $0x159] sm:$0xff] }
 0x625   : > { %4790 = vst.msk [vmem:[#allocation6 + $0xf8] sm:$0xff] %vm4527_vm2, %v4701_v24  ;;  %4964 = vrot.lane.b32.xlu1 %v10897_v31, %s6917_s27  ;;  %v5395_v31 = vld [vmem:[#allocation6 + $0x10] sm:$0xff]  ;;  %6777 = vmatprep.subr.mxu0 %v5618_v34 }
 0x626   : > { %4483 = vrot.lane.b32.xlu0 %v11244_v5, %s6917_s27  ;;  %6778 = vmatpush3.msra.mxu0 %v5618_v34 }
 0x627   : > { %5813 = vmatmul.mubr.f32.gmra.mxu0 %v5413_v50  ;;  %v5204_v20 = vpop.permute.xlu1 %5203  ;;  %v5396_v46 = vld [vmem:[#allocation6 + $0x18] sm:$0xff] }
 0x628   : > { %v4703_v33 = vpop.permute.xlu0 %4702  ;;  %v5419_v37 = vld [vmem:[#allocation6 + $0xd0] sm:$0xff]  ;;  %5298 = vst.msk [vmem:[#allocation6 + $0x40] sm:$0xff] %vm4527_vm2, %v5204_v20  ;;  %6017 = vmatprep.mubr.f32.mxu1 %v5396_v46 }
 0x629   : > { %4791 = vst.msk [vmem:[#allocation6 + $0x120] sm:$0xff] %vm4527_vm2, %v4703_v33  ;;  %5817 = vmatprep.mubr.f32.mxu0 %v5419_v37  ;;  %6018 = vmatmul.mubr.f32.vlgmr.msra.gmra.mxu1 %v5395_v31  ;;  %v11306_v20 = vld [vmem:[#allocation3 + $0x169] sm:$0xff] }
 0x62a   : > { %4966 = vrot.lane.b32.xlu1 %v10899_v61, %s6917_s27  ;;  %4738 = vrot.lane.b32.xlu0 %v11085_v59, %s6917_s27 }
 0x62b   : > { %v4949_v62 = vpop.permute.xlu1 %4948  ;;  %v5418_v52 = vld [vmem:[#allocation6 + $0xc8] sm:$0xff] }
 0x62c   : > { %v4705_v22 = vpop.permute.xlu0 %4704  ;;  %v5424_v19 = vld [vmem:[#allocation6 + $0xf8] sm:$0xff]  ;;  %5042 = vst.msk [vmem:[#allocation6 + $0x60] sm:$0xff] %vm4527_vm2, %v4949_v62  ;;  %5818 = vmatmul.mubr.f32.gmra.mxu0 %v5418_v52 }
 0x62d   : > { %4792 = vst.msk [vmem:[#allocation6 + $0x148] sm:$0xff] %vm4527_vm2, %v4705_v22  ;;  %5822 = vmatprep.mubr.f32.mxu0 %v5424_v19  ;;  %v11323_v62 = vld [vmem:[#allocation3 + $0x171] sm:$0xff] }
 0x62e   : > { %5223 = vrot.lane.b32.xlu1 %v11150_v48, %s6917_s27  ;;  %4485 = vrot.lane.b32.xlu0 %v11261_v2, %s6917_s27 }
 0x62f   : > { %v4951_v61 = vpop.permute.xlu1 %4950  ;;  %v5401_v45 = vld [vmem:[#allocation6 + $0x40] sm:$0xff] }
 0x630   : > { %v4707_v59 = vpop.permute.xlu0 %4706  ;;  %5043 = vst.msk [vmem:[#allocation6 + $0x88] sm:$0xff] %vm4527_vm2, %v4951_v61  ;;  %6022 = vmatprep.mubr.f32.mxu1 %v5401_v45  ;;  %v5429_v18 = vld [vmem:[#allocation6 + $0x120] sm:$0xff] }
 0x631   : > { %4793 = vst.msk [vmem:[#allocation6 + $0x170] sm:$0xff] %vm4527_vm2, %v4707_v59  ;;  %6023 = vmatmul.mubr.f32.gmra.mxu1 %v5400_v17  ;;  %v4655_v59 = vld [vmem:[#allocation3 + $0x188] sm:$0xff] }
 0x632   : > { %4968 = vrot.lane.b32.xlu1 %v10919_v36, %s6917_s27  ;;  %4740 = vrot.lane.b32.xlu0 %v11103_v16, %s6917_s27 }
 0x633   : > { %v4444_v48 = vpop.permute.xlu1 %4443  ;;  %v5405_v24 = vld [vmem:[#allocation6 + $0x60] sm:$0xff] }
 0x634   : > { %v4709_v38 = vpop.permute.xlu0 %4708  ;;  %4534 = vst.msk [vmem:[#allocation6 + $0xf0] sm:$0xff] %vm4527_vm2, %v4444_v48  ;;  %v5434_v60 = vld [vmem:[#allocation6 + $0x148] sm:$0xff] }
 0x635   : > { %4794 = vst.msk [vmem:[#allocation6 + $0x198] sm:$0xff] %vm4527_vm2, %v4709_v38 }
 0x636   : > { %4970 = vrot.lane.b32.xlu1 %v10921_v4, %s6917_s27  ;;  %4487 = vrot.lane.b32.xlu0 %v11275_v6, %s6917_s27 }
 0x637   : > { %v5206_v36 = vpop.permute.xlu1 %5205 }
 0x638   : > { %v4711_v16 = vpop.permute.xlu0 %4710  ;;  %5299 = vst.msk [vmem:[#allocation6 + $0x68] sm:$0xff] %vm4527_vm2, %v5206_v36  ;;  %v5439_v61 = vld [vmem:[#allocation6 + $0x170] sm:$0xff] }
 0x639   : > { %4795 = vst.msk [vmem:[#allocation6 + $0x1c0] sm:$0xff] %vm4527_vm2, %v4711_v16 }
 0x63a   : > { %5225 = vrot.lane.b32.xlu1 %v10942_v1, %s6917_s27  ;;  %4742 = vrot.lane.b32.xlu0 %v11121_v56, %s6917_s27 }
 0x63b   : > { %v4446_v4 = vpop.permute.xlu1 %4445  ;;  %v5423_v51 = vld [vmem:[#allocation6 + $0xf0] sm:$0xff] }
 0x63c   : > { %v4713_v43 = vpop.permute.xlu0 %4712  ;;  %4535 = vst.msk [vmem:[#allocation6 + $0x118] sm:$0xff] %vm4527_vm2, %v4446_v4  ;;  %5823 = vmatmul.mubr.f32.gmra.mxu0 %v5423_v51  ;;  %v5444_v36 = vld [vmem:[#allocation6 + $0x198] sm:$0xff] }
 0x63d   : > { %4796 = vst.msk [vmem:[#allocation6 + $0x1e8] sm:$0xff] %vm4527_vm2, %v4713_v43  ;;  %5827 = vmatprep.mubr.f32.mxu0 %v5429_v18 }
 0x63e   : > { %5227 = vrot.lane.b32.xlu1 %v10974_v29, %s6917_s27  ;;  %4489 = vrot.lane.b32.xlu0 %v11292_v32, %s6917_s27 }
 0x63f   : > { %v5208_v1 = vpop.permute.xlu1 %5207  ;;  %v5406_v57 = vld [vmem:[#allocation6 + $0x68] sm:$0xff] }
 0x640   : > { %v4715_v56 = vpop.permute.xlu0 %4714  ;;  %5300 = vst.msk [vmem:[#allocation6 + $0x90] sm:$0xff] %vm4527_vm2, %v5208_v1  ;;  %6027 = vmatprep.mubr.f32.mxu1 %v5406_v57 }
 0x641   : > { %4797 = vst.msk [vmem:[#allocation6 + $0x210] sm:$0xff] %vm4527_vm2, %v4715_v56  ;;  %6028 = vmatmul.mubr.f32.gmra.mxu1 %v5405_v24 }
 0x642   : > { %4972 = vrot.lane.b32.xlu1 %v10951_v7, %s6917_s27  ;;  %4744 = vrot.lane.b32.xlu0 %v11140_v42, %s6917_s27  ;;  %v5617_v7 = vld [vmem:[%s11783_s6 + $0x200] sm:$0xff] }
 0x643   : > { %v4953_v29 = vpop.permute.xlu1 %4952  ;;  %v5428_v50 = vld [vmem:[#allocation6 + $0x118] sm:$0xff]  ;;  %6779 = vmatprep.subr.mxu0 %v5617_v7 }
 0x644   : > { %v4717_v54 = vpop.permute.xlu0 %4716  ;;  %5044 = vst.msk [vmem:[#allocation6 + $0xb0] sm:$0xff] %vm4527_vm2, %v4953_v29  ;;  %5828 = vmatmul.mubr.f32.gmra.mxu0 %v5428_v50 }
 0x645   : > { %4798 = vst.msk [vmem:[#allocation6 + $0x238] sm:$0xff] %vm4527_vm2, %v4717_v54  ;;  %5832 = vmatprep.mubr.f32.mxu0 %v5434_v60  ;;  %6780 = vmatpush3.msra.mxu0 %v5617_v7 }
 0x646   : > { %5229 = vrot.lane.b32.xlu1 %v10999_v8, %s6917_s27  ;;  %4491 = vrot.lane.b32.xlu0 %v11306_v20, %s6917_s27  ;;  %v5410_v8 = vld [vmem:[#allocation6 + $0x88] sm:$0xff] }
 0x647   : > { %v4955_v42 = vpop.permute.xlu1 %4954  ;;  %v5411_v37 = vld [vmem:[#allocation6 + $0x90] sm:$0xff] }
 0x648   : > { %v4464_v33 = vpop.permute.xlu0 %4463  ;;  %5045 = vst.msk [vmem:[#allocation6 + $0xd8] sm:$0xff] %vm4527_vm2, %v4955_v42  ;;  %6032 = vmatprep.mubr.f32.mxu1 %v5411_v37 }
 0x649   : > { %4544 = vst.msk [vmem:[#allocation6 + $0x280] sm:$0xff] %vm4527_vm2, %v4464_v33  ;;  %6033 = vmatmul.mubr.f32.gmra.mxu1 %v5410_v8  ;;  %v5104_v8 = vld [vmem:[#allocation3 + $0x1a0] sm:$0xff] }
 0x64a   : > { %5231 = vrot.lane.b32.xlu1 %v11025_v25, %s6917_s27  ;;  %4746 = vrot.lane.b32.xlu0 %v11160_v11, %s6917_s27  ;;  %v4654_v25 = vld [vmem:[#allocation3 + $0x180] sm:$0xff]  ;;  %5136 = vst.msk [vmem:[#allocation6 + $0x4f0] sm:$0xff] %vm379_vm6, %v5104_v8 }
 0x64b   : > { %v4448_v46 = vpop.permute.xlu1 %4447  ;;  %v5415_v48 = vld [vmem:[#allocation6 + $0xb0] sm:$0xff] }
 0x64c   : > { %v4719_v31 = vpop.permute.xlu0 %4718  ;;  %4536 = vst.msk [vmem:[#allocation6 + $0x140] sm:$0xff] %vm4527_vm2, %v4448_v46 }
 0x64d   : > { %4799 = vst.msk [vmem:[#allocation6 + $0x260] sm:$0xff] %vm4527_vm2, %v4719_v31 }
 0x64e   : > { %4974 = vrot.lane.b32.xlu1 %v10953_v28, %s6917_s27  ;;  %4493 = vrot.lane.b32.xlu0 %v11323_v62, %s6917_s27 }
 0x64f   : > { %v5210_v22 = vpop.permute.xlu1 %5209 }
 0x650   : > { %v4466_v52 = vpop.permute.xlu0 %4465  ;;  %5301 = vst.msk [vmem:[#allocation6 + $0xb8] sm:$0xff] %vm4527_vm2, %v5210_v22 }
 0x651   : > { %4545 = vst.msk [vmem:[#allocation6 + $0x2a8] sm:$0xff] %vm4527_vm2, %v4466_v52 }
 0x652   : > { %4976 = vrot.lane.b32.xlu1 %v10982_v14, %s6917_s27  ;;  %4748 = vrot.lane.b32.xlu0 %v4654_v25, %s6917_s27 }
 0x653   : > { %v4450_v11 = vpop.permute.xlu1 %4449  ;;  %v5433_v28 = vld [vmem:[#allocation6 + $0x140] sm:$0xff] }
 0x654   : > { %v4721_v19 = vpop.permute.xlu0 %4720  ;;  %4537 = vst.msk [vmem:[#allocation6 + $0x168] sm:$0xff] %vm4527_vm2, %v4450_v11  ;;  %5833 = vmatmul.mubr.f32.gmra.mxu0 %v5433_v28  ;;  %v5469_v37 = vld [vmem:[#allocation6 + $0x260] sm:$0xff] }
 0x655   : > { %4800 = vst.msk [vmem:[#allocation6 + $0x288] sm:$0xff] %vm4527_vm2, %v4721_v19  ;;  %5837 = vmatprep.mubr.f32.mxu0 %v5439_v61  ;;  %v5167_v19 = vld [vmem:[#allocation3 + $0x199] sm:$0xff] }
 0x656   : > { %4978 = vrot.lane.b32.xlu1 %v10984_v27, %s6917_s27  ;;  %4750 = vrot.lane.b32.xlu0 %v4655_v59, %s6917_s27  ;;  %v5359_v59 = vld [vmem:[#allocation3 + $0x19a] sm:$0xff] }
 0x657   : > { %v5212_v45 = vpop.permute.xlu1 %5211  ;;  %v5416_v17 = vld [vmem:[#allocation6 + $0xb8] sm:$0xff]  ;;  %5391 = vst.msk [vmem:[#allocation6 + $0x4d0] sm:$0xff] %vm379_vm6, %v5359_v59 }
 0x658   : > { %v4468_v14 = vpop.permute.xlu0 %4467  ;;  %5302 = vst.msk [vmem:[#allocation6 + $0xe0] sm:$0xff] %vm4527_vm2, %v5212_v45  ;;  %6037 = vmatprep.mubr.f32.mxu1 %v5416_v17  ;;  %v5168_v17 = vld [vmem:[#allocation3 + $0x1a1] sm:$0xff] }
 0x659   : > { %4546 = vst.msk [vmem:[#allocation6 + $0x2d0] sm:$0xff] %vm4527_vm2, %v4468_v14  ;;  %6038 = vmatmul.mubr.f32.gmra.mxu1 %v5415_v48 }
 0x65a   : > { %4980 = vrot.lane.b32.xlu1 %v11007_v49, %s6917_s27  ;;  %5233 = vrot.lane.b32.xlu0 %v11051_v35, %s6917_s27  ;;  %v5420_v35 = vld [vmem:[#allocation6 + $0xd8] sm:$0xff] }
 0x65b   : > { %v4957_v27 = vpop.permute.xlu1 %4956  ;;  %v5438_v34 = vld [vmem:[#allocation6 + $0x168] sm:$0xff] }
 0x65c   : > { %v4723_v38 = vpop.permute.xlu0 %4722  ;;  %5046 = vst.msk [vmem:[#allocation6 + $0x100] sm:$0xff] %vm4527_vm2, %v4957_v27  ;;  %5838 = vmatmul.mubr.f32.gmra.mxu0 %v5438_v34  ;;  %v5474_v31 = vld [vmem:[#allocation6 + $0x288] sm:$0xff] }
 0x65d   : > { %4801 = vst.msk [vmem:[#allocation6 + $0x2b0] sm:$0xff] %vm4527_vm2, %v4723_v38  ;;  %5842 = vmatprep.mubr.f32.mxu0 %v5444_v36 }
 0x65e   : > { %4982 = vrot.lane.b32.xlu1 %v11009_v3, %s6917_s27  ;;  %5235 = vrot.lane.b32.xlu0 %v11079_v47, %s6917_s27 }
 0x65f   : > { %v4959_v49 = vpop.permute.xlu1 %4958  ;;  %v5421_v4 = vld [vmem:[#allocation6 + $0xe0] sm:$0xff] }
 0x660   : > { %v4470_v16 = vpop.permute.xlu0 %4469  ;;  %5047 = vst.msk [vmem:[#allocation6 + $0x128] sm:$0xff] %vm4527_vm2, %v4959_v49  ;;  %6042 = vmatprep.mubr.f32.mxu1 %v5421_v4  ;;  %v5483_v45 = vld [vmem:[#allocation6 + $0x2d0] sm:$0xff] }
 0x661   : > { %4547 = vst.msk [vmem:[#allocation6 + $0x2f8] sm:$0xff] %vm4527_vm2, %v4470_v16  ;;  %6043 = vmatmul.mubr.f32.gmra.mxu1 %v5420_v35 }
 0x662   : > { %4984 = vrot.lane.b32.xlu1 %v11034_v15, %s6917_s27  ;;  %5237 = vrot.lane.b32.xlu0 %v11115_v30, %s6917_s27 }
 0x663   : > { %v4452_v3 = vpop.permute.xlu1 %4451 }
 0x664   : > { %v4725_v43 = vpop.permute.xlu0 %4724  ;;  %4538 = vst.msk [vmem:[#allocation6 + $0x190] sm:$0xff] %vm4527_vm2, %v4452_v3  ;;  %v5479_v25 = vld [vmem:[#allocation6 + $0x2b0] sm:$0xff] }
 0x665   : > { %4802 = vst.msk [vmem:[#allocation6 + $0x2d8] sm:$0xff] %vm4527_vm2, %v4725_v43 }
 0x666   : > { %4986 = vrot.lane.b32.xlu1 %v11036_v39, %s6917_s27  ;;  %5239 = vrot.lane.b32.xlu0 %v11152_v10, %s6917_s27  ;;  %v5449_v39 = vld [vmem:[#allocation6 + $0x1c0] sm:$0xff] }
 0x667   : > { %v5214_v47 = vpop.permute.xlu1 %5213 }
 0x668   : > { %v4472_v51 = vpop.permute.xlu0 %4471  ;;  %5303 = vst.msk [vmem:[#allocation6 + $0x108] sm:$0xff] %vm4527_vm2, %v5214_v47  ;;  %v5488_v34 = vld [vmem:[#allocation6 + $0x2f8] sm:$0xff] }
 0x669   : > { %4548 = vst.msk [vmem:[#allocation6 + $0x320] sm:$0xff] %vm4527_vm2, %v4472_v51 }
 0x66a   : > { %4988 = vrot.lane.b32.xlu1 %v11053_v58, %s6917_s27  ;;  %5241 = vrot.lane.b32.xlu0 %v11198_v23, %s6917_s27  ;;  %v5425_v23 = vld [vmem:[#allocation6 + $0x100] sm:$0xff] }
 0x66b   : > { %v4454_v15 = vpop.permute.xlu1 %4453  ;;  %v5443_v18 = vld [vmem:[#allocation6 + $0x190] sm:$0xff] }
 0x66c   : > { %v4727_v30 = vpop.permute.xlu0 %4726  ;;  %4539 = vst.msk [vmem:[#allocation6 + $0x1b8] sm:$0xff] %vm4527_vm2, %v4454_v15  ;;  %5843 = vmatmul.mubr.f32.gmra.mxu0 %v5443_v18  ;;  %v5484_v61 = vld [vmem:[#allocation6 + $0x2d8] sm:$0xff] }
 0x66d   : > { %4803 = vst.msk [vmem:[#allocation6 + $0x300] sm:$0xff] %vm4527_vm2, %v4727_v30  ;;  %5847 = vmatprep.mubr.f32.mxu0 %v5449_v39 }
 0x66e   : > { %4990 = vrot.lane.b32.xlu1 %v11055_v12, %s6917_s27  ;;  %5243 = vrot.lane.b32.xlu0 %v11230_v13, %s6917_s27  ;;  %v5454_v13 = vld [vmem:[#allocation6 + $0x1e8] sm:$0xff] }
 0x66f   : > { %v5216_v58 = vpop.permute.xlu1 %5215  ;;  %v5426_v1 = vld [vmem:[#allocation6 + $0x108] sm:$0xff] }
 0x670   : > { %v4474_v10 = vpop.permute.xlu0 %4473  ;;  %5304 = vst.msk [vmem:[#allocation6 + $0x130] sm:$0xff] %vm4527_vm2, %v5216_v58  ;;  %6047 = vmatprep.mubr.f32.mxu1 %v5426_v1  ;;  %v5493_v35 = vld [vmem:[#allocation6 + $0x320] sm:$0xff] }
 0x671   : > { %4549 = vst.msk [vmem:[#allocation6 + $0x348] sm:$0xff] %vm4527_vm2, %v4474_v10  ;;  %6048 = vmatmul.mubr.f32.gmra.mxu1 %v5425_v23 }
 0x672   : > { %4992 = vrot.lane.b32.xlu1 %v11081_v9, %s6917_s27  ;;  %5245 = vrot.lane.b32.xlu0 %v11244_v5, %s6917_s27  ;;  %v5430_v5 = vld [vmem:[#allocation6 + $0x128] sm:$0xff] }
 0x673   : > { %v4456_v12 = vpop.permute.xlu1 %4455  ;;  %v5448_v57 = vld [vmem:[#allocation6 + $0x1b8] sm:$0xff] }
 0x674   : > { %v4729_v56 = vpop.permute.xlu0 %4728  ;;  %4540 = vst.msk [vmem:[#allocation6 + $0x1e0] sm:$0xff] %vm4527_vm2, %v4456_v12  ;;  %5848 = vmatmul.mubr.f32.gmra.mxu0 %v5448_v57  ;;  %v5489_v27 = vld [vmem:[#allocation6 + $0x300] sm:$0xff] }
 0x675   : > { %4804 = vst.msk [vmem:[#allocation6 + $0x328] sm:$0xff] %vm4527_vm2, %v4729_v56  ;;  %5852 = vmatprep.mubr.f32.mxu0 %v5454_v13 }
 0x676   : > { %4994 = vrot.lane.b32.xlu1 %v11083_v53, %s6917_s27  ;;  %5247 = vrot.lane.b32.xlu0 %v11261_v2, %s6917_s27  ;;  %v5459_v2 = vld [vmem:[#allocation6 + $0x210] sm:$0xff] }
 0x677   : > { %v4458_v9 = vpop.permute.xlu1 %4457  ;;  %v5431_v29 = vld [vmem:[#allocation6 + $0x130] sm:$0xff] }
 0x678   : > { %v4476_v24 = vpop.permute.xlu0 %4475  ;;  %4541 = vst.msk [vmem:[#allocation6 + $0x208] sm:$0xff] %vm4527_vm2, %v4458_v9  ;;  %6052 = vmatprep.mubr.f32.mxu1 %v5431_v29  ;;  %v5498_v15 = vld [vmem:[#allocation6 + $0x348] sm:$0xff] }
 0x679   : > { %4550 = vst.msk [vmem:[#allocation6 + $0x370] sm:$0xff] %vm4527_vm2, %v4476_v24  ;;  %6053 = vmatmul.mubr.f32.gmra.mxu1 %v5430_v5 }
 0x67a   : > { %4996 = vrot.lane.b32.xlu1 %v11117_v26, %s6917_s27  ;;  %5249 = vrot.lane.b32.xlu0 %v11275_v6, %s6917_s27  ;;  %v5464_v6 = vld [vmem:[#allocation6 + $0x238] sm:$0xff] }
 0x67b   : > { %v4460_v53 = vpop.permute.xlu1 %4459  ;;  %v5453_v50 = vld [vmem:[#allocation6 + $0x1e0] sm:$0xff] }
 0x67c   : > { %v4731_v54 = vpop.permute.xlu0 %4730  ;;  %4542 = vst.msk [vmem:[#allocation6 + $0x230] sm:$0xff] %vm4527_vm2, %v4460_v53  ;;  %5853 = vmatmul.mubr.f32.gmra.mxu0 %v5453_v50  ;;  %v5494_v16 = vld [vmem:[#allocation6 + $0x328] sm:$0xff] }
 0x67d   : > { %4805 = vst.msk [vmem:[#allocation6 + $0x350] sm:$0xff] %vm4527_vm2, %v4731_v54  ;;  %5857 = vmatprep.mubr.f32.mxu0 %v5459_v2 }
 0x67e   : > { %4998 = vrot.lane.b32.xlu1 %v11119_v40, %s6917_s27  ;;  %5251 = vrot.lane.b32.xlu0 %v11292_v32, %s6917_s27  ;;  %v5103_v32 = vld [vmem:[#allocation3 + $0x198] sm:$0xff] }
 0x67f   : > { %v4462_v26 = vpop.permute.xlu1 %4461  ;;  %v5458_v7 = vld [vmem:[#allocation6 + $0x208] sm:$0xff]  ;;  %5135 = vst.msk [vmem:[#allocation6 + $0x4c8] sm:$0xff] %vm379_vm6, %v5103_v32 }
 0x680   : > { %v4478_v60 = vpop.permute.xlu0 %4477  ;;  %4543 = vst.msk [vmem:[#allocation6 + $0x258] sm:$0xff] %vm4527_vm2, %v4462_v26  ;;  %5858 = vmatmul.mubr.f32.gmra.mxu0 %v5458_v7  ;;  %v5503_v10 = vld [vmem:[#allocation6 + $0x370] sm:$0xff] }
 0x681   : > { %4551 = vst.msk [vmem:[#allocation6 + $0x398] sm:$0xff] %vm4527_vm2, %v4478_v60  ;;  %5862 = vmatprep.mubr.f32.mxu0 %v5464_v6 }
 0x682   : > { %5000 = vrot.lane.b32.xlu1 %v11156_v21, %s6917_s27  ;;  %5253 = vrot.lane.b32.xlu0 %v11306_v20, %s6917_s27 }
 0x683   : > { %v5218_v40 = vpop.permute.xlu1 %5217  ;;  %v5463_v33 = vld [vmem:[#allocation6 + $0x230] sm:$0xff] }
 0x684   : > { %v4733_v42 = vpop.permute.xlu0 %4732  ;;  %5305 = vst.msk [vmem:[#allocation6 + $0x158] sm:$0xff] %vm4527_vm2, %v5218_v40  ;;  %5863 = vmatmul.mubr.f32.gmra.mxu0 %v5463_v33  ;;  %v5499_v47 = vld [vmem:[#allocation6 + $0x350] sm:$0xff] }
 0x685   : > { %4806 = vst.msk [vmem:[#allocation6 + $0x378] sm:$0xff] %vm4527_vm2, %v4733_v42  ;;  %5867 = vmatprep.mubr.f32.mxu0 %v5469_v37 }
 0x686   : > { %5002 = vrot.lane.b32.xlu1 %v11158_v55, %s6917_s27  ;;  %5255 = vrot.lane.b32.xlu0 %v11323_v62, %s6917_s27  ;;  %v5473_v62 = vld [vmem:[#allocation6 + $0x280] sm:$0xff] }
 0x687   : > { %v4961_v21 = vpop.permute.xlu1 %4960  ;;  %v5468_v20 = vld [vmem:[#allocation6 + $0x258] sm:$0xff] }
 0x688   : > { %5048 = vst.msk [vmem:[#allocation6 + $0x150] sm:$0xff] %vm4527_vm2, %v4961_v21  ;;  %v4480_v46 = vpop.permute.xlu0 %4479  ;;  %5868 = vmatmul.mubr.f32.gmra.mxu0 %v5468_v20  ;;  %v5508_v56 = vld [vmem:[#allocation6 + $0x398] sm:$0xff] }
 0x689   : > { %4552 = vst.msk [vmem:[#allocation6 + $0x3c0] sm:$0xff] %vm4527_vm2, %v4480_v46  ;;  %5872 = vmatprep.mubr.f32.mxu0 %v5474_v31 }
 0x68a   : > { %5004 = vrot.lane.b32.xlu1 %v11189_v63, %s6917_s27  ;;  %5257 = vrot.lane.b32.xlu0 %v11179_v41, %s6917_s27  ;;  %v5478_v41 = vld [vmem:[#allocation6 + $0x2a8] sm:$0xff] }
 0x68b   : > { %v5220_v55 = vpop.permute.xlu1 %5219  ;;  %v5436_v22 = vld [vmem:[#allocation6 + $0x158] sm:$0xff] }
 0x68c   : > { %5306 = vst.msk [vmem:[#allocation6 + $0x180] sm:$0xff] %vm4527_vm2, %v5220_v55  ;;  %v4735_v52 = vpop.permute.xlu0 %4734  ;;  %5873 = vmatmul.mubr.f32.gmra.mxu0 %v5473_v62  ;;  %6057 = vmatprep.mubr.f32.mxu1 %v5436_v22  ;;  %v5504_v39 = vld [vmem:[#allocation6 + $0x378] sm:$0xff] }
 0x68d   : > { %4807 = vst.msk [vmem:[#allocation6 + $0x3a0] sm:$0xff] %vm4527_vm2, %v4735_v52  ;;  %5877 = vmatprep.mubr.f32.mxu0 %v5479_v25 }
 0x68e   : > { %5006 = vrot.lane.b32.xlu1 %v11191_v0, %s6917_s27  ;;  %5259 = vrot.lane.b32.xlu0 %v11204_v44, %s6917_s27  ;;  %v5360_v0 = vld [vmem:[#allocation3 + $0x1a2] sm:$0xff] }
 0x68f   : > { %v4963_v63 = vpop.permute.xlu1 %4962  ;;  %v5435_v11 = vld [vmem:[#allocation6 + $0x150] sm:$0xff]  ;;  %5392 = vst.msk [vmem:[#allocation6 + $0x4f8] sm:$0xff] %vm379_vm6, %v5360_v0 }
 0x690   : > { %5049 = vst.msk [vmem:[#allocation6 + $0x178] sm:$0xff] %vm4527_vm2, %v4963_v63  ;;  %v4482_v28 = vpop.permute.xlu0 %4481  ;;  %5878 = vmatmul.mubr.f32.gmra.mxu0 %v5478_v41  ;;  %6058 = vmatmul.mubr.f32.gmra.mxu1 %v5435_v11  ;;  %v5513_v5 = vld [vmem:[#allocation6 + $0x3c0] sm:$0xff] }
 0x691   : > { %4553 = vst.msk [vmem:[#allocation6 + $0x3e8] sm:$0xff] %vm4527_vm2, %v4482_v28  ;;  %5882 = vmatprep.mubr.f32.mxu0 %v5484_v61 }
 0x692   : > { %5261 = vrot.lane.b32.xlu0 %v5167_v19, %s6917_s27 }
 0x693   : > { %v5222_v44 = vpop.permute.xlu1 %5221  ;;  %v5441_v14 = vld [vmem:[#allocation6 + $0x180] sm:$0xff] }
 0x694   : > { %5307 = vst.msk [vmem:[#allocation6 + $0x1a8] sm:$0xff] %vm4527_vm2, %v5222_v44  ;;  %v4737_v48 = vpop.permute.xlu0 %4736  ;;  %5883 = vmatmul.mubr.f32.gmra.mxu0 %v5483_v45  ;;  %6062 = vmatprep.mubr.f32.mxu1 %v5441_v14  ;;  %v5509_v23 = vld [vmem:[#allocation6 + $0x3a0] sm:$0xff] }
 0x695   : > { %4808 = vst.msk [vmem:[#allocation6 + $0x3c8] sm:$0xff] %vm4527_vm2, %v4737_v48  ;;  %5887 = vmatprep.mubr.f32.mxu0 %v5489_v27 }
 0x696   : > { %5263 = vrot.lane.b32.xlu0 %v5168_v17, %s6917_s27 }
 0x697   : > { %v4965_v38 = vpop.permute.xlu1 %4964  ;;  %v5440_v36 = vld [vmem:[#allocation6 + $0x178] sm:$0xff] }
 0x698   : > { %5050 = vst.msk [vmem:[#allocation6 + $0x1a0] sm:$0xff] %vm4527_vm2, %v4965_v38  ;;  %v4484_v49 = vpop.permute.xlu0 %4483  ;;  %5888 = vmatmul.mubr.f32.gmra.mxu0 %v5488_v34  ;;  %6063 = vmatmul.mubr.f32.gmra.mxu1 %v5440_v36  ;;  %v5518_v2 = vld [vmem:[#allocation6 + $0x3e8] sm:$0xff] }
 0x699   : > { %4554 = vst.msk [vmem:[#allocation6 + $0x410] sm:$0xff] %vm4527_vm2, %v4484_v49  ;;  %5892 = vmatprep.mubr.f32.mxu0 %v5494_v16  ;;  %v5397_v16 = vld [vmem:[#allocation6 + $0x20] sm:$0xff] }
 0x69b   : > { %v5446_v3 = vld [vmem:[#allocation6 + $0x1a8] sm:$0xff] }
 0x69c   : > { %v4967_v4 = vpop.permute.xlu1 %4966  ;;  %v4739_v43 = vpop.permute.xlu0 %4738  ;;  %5893 = vmatmul.mubr.f32.gmra.mxu0 %v5493_v35  ;;  %6067 = vmatprep.mubr.f32.mxu1 %v5446_v3  ;;  %v5514_v9 = vld [vmem:[#allocation6 + $0x3c8] sm:$0xff] }
 0x69d   : > { %5051 = vst.msk [vmem:[#allocation6 + $0x1c8] sm:$0xff] %vm4527_vm2, %v4967_v4  ;;  %4809 = vst.msk [vmem:[#allocation6 + $0x3f0] sm:$0xff] %vm4527_vm2, %v4739_v43  ;;  %5897 = vmatprep.mubr.f32.mxu0 %v5499_v47 }
 0x69f   : > { %v5445_v30 = vld [vmem:[#allocation6 + $0x1a0] sm:$0xff] }
 0x6a0   : > { %v5224_v51 = vpop.permute.xlu1 %5223  ;;  %v4486_v18 = vpop.permute.xlu0 %4485  ;;  %5898 = vmatmul.mubr.f32.gmra.mxu0 %v5498_v15  ;;  %6068 = vmatmul.mubr.f32.gmra.mxu1 %v5445_v30  ;;  %v5523_v6 = vld [vmem:[#allocation6 + $0x410] sm:$0xff] }
 0x6a1   : > { %5308 = vst.msk [vmem:[#allocation6 + $0x1d0] sm:$0xff] %vm4527_vm2, %v5224_v51  ;;  %4555 = vst.msk [vmem:[#allocation6 + $0x438] sm:$0xff] %vm4527_vm2, %v4486_v18  ;;  %5902 = vmatprep.mubr.f32.mxu0 %v5504_v39  ;;  %v5402_v51 = vld [vmem:[#allocation6 + $0x48] sm:$0xff]  ;;  %v5407_v15 = vld [vmem:[#allocation6 + $0x70] sm:$0xff] }
 0x6a4   : > { %v4969_v58 = vpop.permute.xlu1 %4968  ;;  %v4741_v1 = vpop.permute.xlu0 %4740  ;;  %5903 = vmatmul.mubr.f32.gmra.mxu0 %v5503_v10  ;;  %v5450_v24 = vld [vmem:[#allocation6 + $0x1c8] sm:$0xff]  ;;  %v5519_v54 = vld [vmem:[#allocation6 + $0x3f0] sm:$0xff] }
 0x6a5   : > { %5052 = vst.msk [vmem:[#allocation6 + $0x1f0] sm:$0xff] %vm4527_vm2, %v4969_v58  ;;  %4810 = vst.msk [vmem:[#allocation6 + $0x418] sm:$0xff] %vm4527_vm2, %v4741_v1  ;;  %5907 = vmatprep.mubr.f32.mxu0 %v5509_v23  ;;  %v5412_v23 = vld [vmem:[#allocation6 + $0x98] sm:$0xff] }
 0x6a8   : > { %v4971_v12 = vpop.permute.xlu1 %4970  ;;  %v5451_v57 = vld [vmem:[#allocation6 + $0x1d0] sm:$0xff]  ;;  %v4488_v13 = vpop.permute.xlu0 %4487  ;;  %5908 = vmatmul.mubr.f32.gmra.mxu0 %v5508_v56  ;;  %v5528_v21 = vld [vmem:[#allocation6 + $0x438] sm:$0xff] }
 0x6a9   : > { %5053 = vst.msk [vmem:[#allocation6 + $0x218] sm:$0xff] %vm4527_vm2, %v4971_v12  ;;  %6072 = vmatprep.mubr.f32.mxu1 %v5451_v57  ;;  %4556 = vst.msk [vmem:[#allocation6 + $0x460] sm:$0xff] %vm4527_vm2, %v4488_v13  ;;  %5912 = vmatprep.mubr.f32.mxu0 %v5514_v9  ;;  %v5417_v12 = vld [vmem:[#allocation6 + $0xc0] sm:$0xff] }
 0x6aa   : > { %6073 = vmatmul.mubr.f32.gmra.mxu1 %v5450_v24 }
 0x6ac   : > { %v5226_v29 = vpop.permute.xlu1 %5225  ;;  %v4743_v53 = vpop.permute.xlu0 %4742  ;;  %5913 = vmatmul.mubr.f32.gmra.mxu0 %v5513_v5  ;;  %v5524_v60 = vld [vmem:[#allocation6 + $0x418] sm:$0xff]  ;;  %v5455_v32 = vld [vmem:[#allocation6 + $0x1f0] sm:$0xff]  ;;  %v5422_v5 = vld [vmem:[#allocation6 + $0xe8] sm:$0xff] }
 0x6ad   : > { %5309 = vst.msk [vmem:[#allocation6 + $0x1f8] sm:$0xff] %vm4527_vm2, %v5226_v29  ;;  %4811 = vst.msk [vmem:[#allocation6 + $0x440] sm:$0xff] %vm4527_vm2, %v4743_v53  ;;  %5917 = vmatprep.mubr.f32.mxu0 %v5519_v54  ;;  %v5427_v53 = vld [vmem:[#allocation6 + $0x110] sm:$0xff] }
 0x6b0   : > { %v5228_v50 = vpop.permute.xlu1 %5227  ;;  %v4490_v26 = vpop.permute.xlu0 %4489  ;;  %5918 = vmatmul.mubr.f32.gmra.mxu0 %v5518_v2  ;;  %v5460_v46 = vld [vmem:[#allocation6 + $0x218] sm:$0xff]  ;;  %v5533_v22 = vld [vmem:[#allocation6 + $0x460] sm:$0xff] }
 0x6b1   : > { %5310 = vst.msk [vmem:[#allocation6 + $0x220] sm:$0xff] %vm4527_vm2, %v5228_v50  ;;  %4557 = vst.msk [vmem:[#allocation6 + $0x488] sm:$0xff] %vm4527_vm2, %v4490_v26  ;;  %5922 = vmatprep.mubr.f32.mxu0 %v5524_v60 }
 0x6b4   : > { %v4973_v7 = vpop.permute.xlu1 %4972  ;;  %v5456_v40 = vld [vmem:[#allocation6 + $0x1f8] sm:$0xff]  ;;  %v4745_v42 = vpop.permute.xlu0 %4744  ;;  %5923 = vmatmul.mubr.f32.gmra.mxu0 %v5523_v6  ;;  %v5529_v33 = vld [vmem:[#allocation6 + $0x440] sm:$0xff] }
 0x6b5   : > { %5054 = vst.msk [vmem:[#allocation6 + $0x240] sm:$0xff] %vm4527_vm2, %v4973_v7  ;;  %6077 = vmatprep.mubr.f32.mxu1 %v5456_v40  ;;  %4812 = vst.msk [vmem:[#allocation6 + $0x468] sm:$0xff] %vm4527_vm2, %v4745_v42  ;;  %5927 = vmatprep.mubr.f32.mxu0 %v5529_v33  ;;  %v5432_v6 = vld [vmem:[#allocation6 + $0x138] sm:$0xff]  ;;  %v5437_v40 = vld [vmem:[#allocation6 + $0x160] sm:$0xff] }
 0x6b6   : > { %6078 = vmatmul.mubr.f32.gmra.mxu1 %v5455_v32 }
 0x6b8   : > { %v5230_v37 = vpop.permute.xlu1 %5229  ;;  %v5461_v20 = vld [vmem:[#allocation6 + $0x220] sm:$0xff]  ;;  %v4492_v8 = vpop.permute.xlu0 %4491  ;;  %5928 = vmatmul.mubr.f32.gmra.mxu0 %v5528_v21  ;;  %v5538_v59 = vld [vmem:[#allocation6 + $0x488] sm:$0xff]  ;;  %v11490_v21 = vld [vmem:[%s11784_s7] ss:$0 sm:$0xff] }
 0x6b9   : > { %5311 = vst.msk [vmem:[#allocation6 + $0x248] sm:$0xff] %vm4527_vm2, %v5230_v37  ;;  %6082 = vmatprep.mubr.f32.mxu1 %v5461_v20  ;;  %4558 = vst.msk [vmem:[#allocation6 + $0x4b0] sm:$0xff] %vm4527_vm2, %v4492_v8 }
 0x6ba   : > { %6083 = vmatmul.mubr.f32.gmra.mxu1 %v5460_v46  ;;  %v5442_v46 = vld [vmem:[#allocation6 + $0x188] sm:$0xff] }
 0x6bc   : > { %v5232_v31 = vpop.permute.xlu1 %5231  ;;  %v4747_v55 = vpop.permute.xlu0 %4746  ;;  %v5534_v62 = vld [vmem:[#allocation6 + $0x468] sm:$0xff]  ;;  %v5465_v41 = vld [vmem:[#allocation6 + $0x240] sm:$0xff] }
 0x6bd   : > { %5312 = vst.msk [vmem:[#allocation6 + $0x270] sm:$0xff] %vm4527_vm2, %v5232_v31  ;;  %4813 = vst.msk [vmem:[#allocation6 + $0x490] sm:$0xff] %vm4527_vm2, %v4747_v55  ;;  %5932 = vmatprep.mubr.f32.mxu0 %v5534_v62  ;;  %v5447_v31 = vld [vmem:[#allocation6 + $0x1b0] sm:$0xff] }
 0x6be   : > { %5933 = vmatmul.mubr.f32.gmra.mxu0 %v5533_v22 }
 0x6c0   : > { %v4975_v52 = vpop.permute.xlu1 %4974  ;;  %v5466_v25 = vld [vmem:[#allocation6 + $0x248] sm:$0xff]  ;;  %v4494_v63 = vpop.permute.xlu0 %4493  ;;  %v5543_v27 = vld [vmem:[#allocation6 + $0x4b0] sm:$0xff] }
 0x6c1   : > { %5055 = vst.msk [vmem:[#allocation6 + $0x268] sm:$0xff] %vm4527_vm2, %v4975_v52  ;;  %6087 = vmatprep.mubr.f32.mxu1 %v5466_v25  ;;  %4559 = vst.msk [vmem:[#allocation6 + $0x4d8] sm:$0xff] %vm4527_vm2, %v4494_v63 }
 0x6c2   : > { %6088 = vmatmul.mubr.f32.gmra.mxu1 %v5465_v41 }
 0x6c4   : > { %v4977_v11 = vpop.permute.xlu1 %4976  ;;  %v5471_v19 = vld [vmem:[#allocation6 + $0x270] sm:$0xff]  ;;  %v4749_v28 = vpop.permute.xlu0 %4748 }
 0x6c5   : > { %5056 = vst.msk [vmem:[#allocation6 + $0x290] sm:$0xff] %vm4527_vm2, %v4977_v11  ;;  %v5539_v61 = vld [vmem:[#allocation6 + $0x490] sm:$0xff]  ;;  %6092 = vmatprep.mubr.f32.mxu1 %v5471_v19  ;;  %4814 = vst.msk [vmem:[#allocation6 + $0x4b8] sm:$0xff] %vm4527_vm2, %v4749_v28  ;;  %v5452_v11 = vld [vmem:[#allocation6 + $0x1d8] sm:$0xff] }
 0x6c6   : > { %5937 = vmatprep.mubr.f32.mxu0 %v5539_v61  ;;  %v5457_v28 = vld [vmem:[#allocation6 + $0x200] sm:$0xff] }
 0x6c7   : > { %5938 = vmatmul.mubr.f32.gmra.mxu0 %v5538_v59 }
 0x6c8   : > { %v4979_v0 = vpop.permute.xlu1 %4978  ;;  %v5470_v44 = vld [vmem:[#allocation6 + $0x268] sm:$0xff]  ;;  %v4751_v45 = vpop.permute.xlu0 %4750  ;;  %v5548_v49 = vld [vmem:[#allocation6 + $0x4d8] sm:$0xff] }
 0x6c9   : > { %5057 = vst.msk [vmem:[#allocation6 + $0x2b8] sm:$0xff] %vm4527_vm2, %v4979_v0  ;;  %6093 = vmatmul.mubr.f32.gmra.mxu1 %v5470_v44  ;;  %4815 = vst.msk [vmem:[#allocation6 + $0x4e0] sm:$0xff] %vm4527_vm2, %v4751_v45 }
 0x6cc   : > { %v4981_v14 = vpop.permute.xlu1 %4980  ;;  %v5234_v17 = vpop.permute.xlu0 %5233  ;;  %v5544_v48 = vld [vmem:[#allocation6 + $0x4b8] sm:$0xff]  ;;  %v5475_v47 = vld [vmem:[#allocation6 + $0x290] sm:$0xff] }
 0x6cd   : > { %5058 = vst.msk [vmem:[#allocation6 + $0x2e0] sm:$0xff] %vm4527_vm2, %v4981_v14  ;;  %5313 = vst.msk [vmem:[#allocation6 + $0x298] sm:$0xff] %vm4527_vm2, %v5234_v17  ;;  %5942 = vmatprep.mubr.f32.mxu0 %v5544_v48  ;;  %v5462_v17 = vld [vmem:[#allocation6 + $0x228] sm:$0xff] }
 0x6ce   : > { %5943 = vmatmul.mubr.f32.gmra.mxu0 %v5543_v27  ;;  %v5467_v27 = vld [vmem:[#allocation6 + $0x250] sm:$0xff] }
 0x6d0   : > { %v4983_v38 = vpop.permute.xlu1 %4982  ;;  %v5236_v34 = vpop.permute.xlu0 %5235  ;;  %v5549_v36 = vld [vmem:[#allocation6 + $0x4e0] sm:$0xff]  ;;  %v5480_v1 = vld [vmem:[#allocation6 + $0x2b8] sm:$0xff] }
 0x6d1   : > { %5059 = vst.msk [vmem:[#allocation6 + $0x308] sm:$0xff] %vm4527_vm2, %v4983_v38  ;;  %5314 = vst.msk [vmem:[#allocation6 + $0x2c0] sm:$0xff] %vm4527_vm2, %v5236_v34  ;;  %5947 = vmatprep.mubr.f32.mxu0 %v5549_v36 }
 0x6d2   : > { %5948 = vmatmul.mubr.f32.gmra.mxu0 %v5548_v49 }
 0x6d3   : > { %6781 = vmatprep.mubr.msk.f32.mxu0 %vm379_vm6, %v5397_v16 }
 0x6d4   : > { %v4985_v4 = vpop.permute.xlu1 %4984  ;;  %v5238_v35 = vpop.permute.xlu0 %5237  ;;  %v5476_v3 = vld [vmem:[#allocation6 + $0x298] sm:$0xff]  ;;  %v5485_v29 = vld [vmem:[#allocation6 + $0x2e0] sm:$0xff] }
 0x6d5   : > { %5060 = vst.msk [vmem:[#allocation6 + $0x330] sm:$0xff] %vm4527_vm2, %v4985_v4  ;;  %5315 = vst.msk [vmem:[#allocation6 + $0x2e8] sm:$0xff] %vm4527_vm2, %v5238_v35  ;;  %6097 = vmatprep.mubr.f32.mxu1 %v5476_v3  ;;  %v11464_v43 = vpop.f32.mrf.mxu0  ;;  %v5472_v35 = vld [vmem:[#allocation6 + $0x278] sm:$0xff] }
 0x6d6   : > { %6098 = vmatmul.mubr.f32.gmra.mxu1 %v5475_v47  ;;  %6782 = vmatmul.mubr.msk.f32.vlgmr.msra.gmra.mxu0 %vm379_vm6, %v5402_v51  ;;  %v5795_v22 = vadd.f32 %v11490_v21, %v11464_v43  ;;  %v5477_v43 = vld [vmem:[#allocation6 + $0x2a0] sm:$0xff] }
 0x6d7   : > { %6784 = vmatprep.mubr.msk.f32.mxu0 %vm379_vm6, %v5407_v15  ;;  %v5796_v30 = vpop.f32.mrf.mxu0 }
 0x6d8   : > { %v4987_v18 = vpop.permute.xlu1 %4986  ;;  %v5240_v39 = vpop.permute.xlu0 %5239  ;;  %v5481_v58 = vld [vmem:[#allocation6 + $0x2c0] sm:$0xff]  ;;  %v5490_v7 = vld [vmem:[#allocation6 + $0x308] sm:$0xff] }
 0x6d9   : > { %5061 = vst.msk [vmem:[#allocation6 + $0x358] sm:$0xff] %vm4527_vm2, %v4987_v18  ;;  %5316 = vst.msk [vmem:[#allocation6 + $0x310] sm:$0xff] %vm4527_vm2, %v5240_v39  ;;  %6102 = vmatprep.mubr.f32.mxu1 %v5481_v58  ;;  %v5482_v39 = vld [vmem:[#allocation6 + $0x2c8] sm:$0xff]  ;;  %v5487_v58 = vld [vmem:[#allocation6 + $0x2f0] sm:$0xff] }
 0x6da   : > { %6103 = vmatmul.mubr.f32.gmra.mxu1 %v5480_v1  ;;  %6785 = vmatmul.mubr.msk.f32.gmra.mxu0 %vm379_vm6, %v5412_v23 }
 0x6db   : > { %v11470_v10 = vpop.f32.mrf.mxu0  ;;  %6787 = vmatprep.mubr.msk.f32.mxu0 %vm379_vm6, %v5417_v12 }
 0x6dc   : > { %v4989_v57 = vpop.permute.xlu1 %4988  ;;  %v5242_v13 = vpop.permute.xlu0 %5241  ;;  %v5486_v9 = vld [vmem:[#allocation6 + $0x2e8] sm:$0xff]  ;;  %v5495_v8 = vld [vmem:[#allocation6 + $0x330] sm:$0xff]  ;;  %v5800_v34 = vadd.f32 %v11490_v21, %v11470_v10 }
 0x6dd   : > { %v5801_v56 = vpop.f32.mrf.mxu0  ;;  %5062 = vst.msk [vmem:[#allocation6 + $0x380] sm:$0xff] %vm4527_vm2, %v4989_v57  ;;  %5317 = vst.msk [vmem:[#allocation6 + $0x338] sm:$0xff] %vm4527_vm2, %v5242_v13  ;;  %6107 = vmatprep.mubr.f32.mxu1 %v5486_v9  ;;  %v5497_v57 = vld [vmem:[#allocation6 + $0x340] sm:$0xff] }
 0x6de   : > { %6108 = vmatmul.mubr.f32.gmra.mxu1 %v5485_v29  ;;  %6788 = vmatmul.mubr.msk.f32.gmra.mxu0 %vm379_vm6, %v5422_v5  ;;  %v5492_v56 = vld [vmem:[#allocation6 + $0x318] sm:$0xff] }
 0x6df   : > { %v11476_v24 = vpop.f32.mrf.mxu0  ;;  %6790 = vmatprep.mubr.msk.f32.mxu0 %vm379_vm6, %v5427_v53 }
 0x6e0   : > { %v4991_v50 = vpop.permute.xlu1 %4990  ;;  %v5244_v2 = vpop.permute.xlu0 %5243  ;;  %v5491_v26 = vld [vmem:[#allocation6 + $0x310] sm:$0xff]  ;;  %v5500_v41 = vld [vmem:[#allocation6 + $0x358] sm:$0xff] }
 0x6e1   : > { %v5806_v54 = vpop.f32.mrf.mxu0  ;;  %5063 = vst.msk [vmem:[#allocation6 + $0x3a8] sm:$0xff] %vm4527_vm2, %v4991_v50  ;;  %5318 = vst.msk [vmem:[#allocation6 + $0x360] sm:$0xff] %vm4527_vm2, %v5244_v2  ;;  %6112 = vmatprep.mubr.f32.mxu1 %v5491_v26  ;;  %v5507_v2 = vld [vmem:[#allocation6 + $0x390] sm:$0xff] }
 0x6e2   : > { %6113 = vmatmul.mubr.f32.gmra.mxu1 %v5490_v7  ;;  %6791 = vmatmul.mubr.msk.f32.gmra.mxu0 %vm379_vm6, %v5432_v6  ;;  %v5502_v54 = vld [vmem:[#allocation6 + $0x368] sm:$0xff]  ;;  %v5805_v7 = vadd.f32 %v11490_v21, %v11476_v24 }
 0x6e3   : > { %v11482_v60 = vpop.f32.mrf.mxu0  ;;  %6793 = vmatprep.mubr.msk.f32.mxu0 %vm379_vm6, %v5437_v40 }
 0x6e4   : > { %v4993_v33 = vpop.permute.xlu1 %4992  ;;  %v5246_v32 = vpop.permute.xlu0 %5245  ;;  %v5496_v37 = vld [vmem:[#allocation6 + $0x338] sm:$0xff]  ;;  %v5505_v14 = vld [vmem:[#allocation6 + $0x380] sm:$0xff] }
 0x6e5   : > { %v5811_v42 = vpop.f32.mrf.mxu0  ;;  %5064 = vst.msk [vmem:[#allocation6 + $0x3d0] sm:$0xff] %vm4527_vm2, %v4993_v33  ;;  %5319 = vst.msk [vmem:[#allocation6 + $0x388] sm:$0xff] %vm4527_vm2, %v5246_v32  ;;  %6117 = vmatprep.mubr.f32.mxu1 %v5496_v37  ;;  %v5512_v32 = vld [vmem:[#allocation6 + $0x3b8] sm:$0xff] }
 0x6e6   : > { %6118 = vmatmul.mubr.f32.gmra.mxu1 %v5495_v8  ;;  %6794 = vmatmul.mubr.msk.f32.gmra.mxu0 %vm379_vm6, %v5442_v46  ;;  %v5517_v8 = vld [vmem:[#allocation6 + $0x3e0] sm:$0xff] }
 0x6e7   : > { %v11493_v20 = vpop.f32.mrf.mxu0  ;;  %6796 = vmatprep.mubr.msk.f32.mxu0 %vm379_vm6, %v5447_v31 }
 0x6e8   : > { %v4995_v62 = vpop.permute.xlu1 %4994  ;;  %v5248_v52 = vpop.permute.xlu0 %5247  ;;  %v5501_v25 = vld [vmem:[#allocation6 + $0x360] sm:$0xff]  ;;  %v5510_v4 = vld [vmem:[#allocation6 + $0x3a8] sm:$0xff] }
 0x6e9   : > { %v5816_v55 = vpop.f32.mrf.mxu0  ;;  %5065 = vst.msk [vmem:[#allocation6 + $0x3f8] sm:$0xff] %vm4527_vm2, %v4995_v62  ;;  %5320 = vst.msk [vmem:[#allocation6 + $0x3b0] sm:$0xff] %vm4527_vm2, %v5248_v52  ;;  %6122 = vmatprep.mubr.f32.mxu1 %v5501_v25  ;;  %v6019_v63 = vpop.f32.mrf.mxu1  ;;  %v5527_v25 = vld [vmem:[#allocation6 + $0x430] sm:$0xff] }
 0x6ea   : > { %v11501_v19 = vadd.f32 %v6019_v63, %v5795_v22  ;;  %6123 = vmatmul.mubr.f32.gmra.mxu1 %v5500_v41  ;;  %6797 = vmatmul.mubr.msk.f32.gmra.mxu0 %vm379_vm6, %v5452_v11  ;;  %v5522_v22 = vld [vmem:[#allocation6 + $0x408] sm:$0xff]  ;;  %v5810_v63 = vadd.f32 %v11490_v21, %v11482_v60 }
 0x6eb   : > { %6799 = vmatprep.mubr.msk.f32.mxu0 %vm379_vm6, %v5457_v28  ;;  %v6021_v59 = vpop.f32.mrf.mxu1 }
 0x6ec   : > { %v4997_v61 = vpop.permute.xlu1 %4996  ;;  %v5250_v0 = vpop.permute.xlu0 %5249  ;;  %v5506_v45 = vld [vmem:[#allocation6 + $0x388] sm:$0xff]  ;;  %v5515_v18 = vld [vmem:[#allocation6 + $0x3d0] sm:$0xff]  ;;  %v5532_v59 = vld [vmem:[#allocation6 + $0x458] sm:$0xff] }
 0x6ed   : > { %5066 = vst.msk [vmem:[#allocation6 + $0x420] sm:$0xff] %vm4527_vm2, %v4997_v61  ;;  %v11506_v44 = vpop.f32.mrf.mxu0  ;;  %5321 = vst.msk [vmem:[#allocation6 + $0x3d8] sm:$0xff] %vm4527_vm2, %v5250_v0  ;;  %6127 = vmatprep.mubr.f32.mxu1 %v5506_v45  ;;  %v5537_v45 = vld [vmem:[#allocation6 + $0x480] sm:$0xff] }
 0x6ee   : > { %6128 = vmatmul.mubr.f32.gmra.mxu1 %v5505_v14  ;;  %6800 = vmatmul.mubr.msk.f32.gmra.mxu0 %vm379_vm6, %v5462_v17 }
 0x6ef   : > { %v5821_v48 = vpop.f32.mrf.mxu0  ;;  %6802 = vmatprep.mubr.msk.f32.mxu0 %vm379_vm6, %v5467_v27  ;;  %v5542_v27 = vld [vmem:[#allocation6 + $0x4a8] sm:$0xff] }
 0x6f0   : > { %v4999_v38 = vpop.permute.xlu1 %4998  ;;  %v5252_v36 = vpop.permute.xlu0 %5251  ;;  %v5511_v49 = vld [vmem:[#allocation6 + $0x3b0] sm:$0xff]  ;;  %v5520_v12 = vld [vmem:[#allocation6 + $0x3f8] sm:$0xff] }
 0x6f1   : > { %5067 = vst.msk [vmem:[#allocation6 + $0x448] sm:$0xff] %vm4527_vm2, %v4999_v38  ;;  %5322 = vst.msk [vmem:[#allocation6 + $0x400] sm:$0xff] %vm4527_vm2, %v5252_v36  ;;  %6132 = vmatprep.mubr.f32.mxu1 %v5511_v49  ;;  %v6024_v16 = vpop.f32.mrf.mxu1  ;;  %v5547_v48 = vld [vmem:[#allocation6 + $0x4d0] sm:$0xff]  ;;  %v5552_v38 = vld [vmem:[#allocation6 + $0x4f8] sm:$0xff] }
 0x6f2   : > { %v11515_v3 = vadd.f32 %v6024_v16, %v5800_v34  ;;  %6133 = vmatmul.mubr.f32.gmra.mxu1 %v5510_v4  ;;  %6803 = vmatmul.mubr.msk.f32.gmra.mxu0 %vm379_vm6, %v5472_v35  ;;  %v5815_v4 = vadd.f32 %v11490_v21, %v11493_v20 }
 0x6f3   : > { %6805 = vmatprep.mubr.msk.f32.mxu0 %vm379_vm6, %v5477_v43  ;;  %v6026_v51 = vpop.f32.mrf.mxu1 }
 0x6f4   : > { %v5001_v47 = vpop.permute.xlu1 %5000  ;;  %v5254_v15 = vpop.permute.xlu0 %5253  ;;  %v5516_v30 = vld [vmem:[#allocation6 + $0x3d8] sm:$0xff]  ;;  %v5525_v53 = vld [vmem:[#allocation6 + $0x420] sm:$0xff] }
 0x6f5   : > { %5068 = vst.msk [vmem:[#allocation6 + $0x470] sm:$0xff] %vm4527_vm2, %v5001_v47  ;;  %5323 = vst.msk [vmem:[#allocation6 + $0x428] sm:$0xff] %vm4527_vm2, %v5254_v15  ;;  %6137 = vmatprep.mubr.f32.mxu1 %v5516_v30  ;;  %v5820_v30 = vadd.f32 %v11490_v21, %v11506_v44 }
 0x6f6   : > { %6138 = vmatmul.mubr.f32.gmra.mxu1 %v5515_v18  ;;  %6806 = vmatmul.mubr.msk.f32.gmra.mxu0 %vm379_vm6, %v5482_v39 }
 0x6f7   : > { %6808 = vmatprep.mubr.msk.f32.mxu0 %vm379_vm6, %v5487_v58 }
 0x6f8   : > { %v5003_v10 = vpop.permute.xlu1 %5002  ;;  %v5256_v1 = vpop.permute.xlu0 %5255  ;;  %v5521_v23 = vld [vmem:[#allocation6 + $0x400] sm:$0xff]  ;;  %v5530_v33 = vld [vmem:[#allocation6 + $0x448] sm:$0xff] }
 0x6f9   : > { %5069 = vst.msk [vmem:[#allocation6 + $0x498] sm:$0xff] %vm4527_vm2, %v5003_v10  ;;  %5324 = vst.msk [vmem:[#allocation6 + $0x450] sm:$0xff] %vm4527_vm2, %v5256_v1  ;;  %6142 = vmatprep.mubr.f32.mxu1 %v5521_v23 }
 0x6fa   : > { %6143 = vmatmul.mubr.f32.gmra.mxu1 %v5520_v12  ;;  %6809 = vmatmul.mubr.msk.f32.gmra.mxu0 %vm379_vm6, %v5492_v56 }
 0x6fb   : > { %6811 = vmatprep.mubr.msk.f32.mxu0 %vm379_vm6, %v5497_v57 }
 0x6fc   : > { %v5005_v13 = vpop.permute.xlu1 %5004  ;;  %v5258_v9 = vpop.permute.xlu0 %5257  ;;  %v5526_v5 = vld [vmem:[#allocation6 + $0x428] sm:$0xff]  ;;  %v5535_v62 = vld [vmem:[#allocation6 + $0x470] sm:$0xff] }
 0x6fd   : > { %5070 = vst.msk [vmem:[#allocation6 + $0x4c0] sm:$0xff] %vm4527_vm2, %v5005_v13  ;;  %v11528_v29 = vpop.f32.mrf.mxu0  ;;  %5325 = vst.msk [vmem:[#allocation6 + $0x478] sm:$0xff] %vm4527_vm2, %v5258_v9  ;;  %6147 = vmatprep.mubr.f32.mxu1 %v5526_v5 }
 0x6fe   : > { %6148 = vmatmul.mubr.f32.gmra.mxu1 %v5525_v53  ;;  %6812 = vmatmul.mubr.msk.f32.gmra.mxu0 %vm379_vm6, %v5502_v54  ;;  %v5825_v23 = vadd.f32 %v11490_v21, %v11528_v29 }
 0x6ff   : > { %v5826_v50 = vpop.f32.mrf.mxu0  ;;  %6814 = vmatprep.mubr.msk.f32.mxu0 %vm379_vm6, %v5507_v2 }
 0x700   : > { %v5007_v26 = vpop.permute.xlu1 %5006  ;;  %v5260_v6 = vpop.permute.xlu0 %5259  ;;  %v5531_v40 = vld [vmem:[#allocation6 + $0x450] sm:$0xff]  ;;  %v5540_v61 = vld [vmem:[#allocation6 + $0x498] sm:$0xff] }
 0x701   : > { %5071 = vst.msk [vmem:[#allocation6 + $0x4e8] sm:$0xff] %vm4527_vm2, %v5007_v26  ;;  %5326 = vst.msk [vmem:[#allocation6 + $0x4a0] sm:$0xff] %vm4527_vm2, %v5260_v6  ;;  %6152 = vmatprep.mubr.f32.mxu1 %v5531_v40  ;;  %v6029_v42 = vpop.f32.mrf.mxu1 }
 0x702   : > { %v11537_v37 = vadd.f32 %v6029_v42, %v5805_v7  ;;  %6153 = vmatmul.mubr.f32.gmra.mxu1 %v5530_v33  ;;  %6815 = vmatmul.mubr.msk.f32.gmra.mxu0 %vm379_vm6, %v5512_v32 }
 0x703   : > { %6817 = vmatprep.mubr.msk.f32.mxu0 %vm379_vm6, %v5517_v8  ;;  %v6031_v46 = vpop.f32.mrf.mxu1 }
 0x704   : > { %v5262_v24 = vpop.permute.xlu0 %5261  ;;  %v5829_v31 = vpop.f32.mrf.mxu0  ;;  %v5536_v55 = vld [vmem:[#allocation6 + $0x478] sm:$0xff]  ;;  %v5545_v60 = vld [vmem:[#allocation6 + $0x4c0] sm:$0xff] }
 0x705   : > { %5327 = vst.msk [vmem:[#allocation6 + $0x4c8] sm:$0xff] %vm4527_vm2, %v5262_v24  ;;  %6157 = vmatprep.mubr.f32.mxu1 %v5536_v55  ;;  %v5830_v9 = vadd.f32 %v11490_v21, %v5829_v31 }
 0x706   : > { %6158 = vmatmul.mubr.f32.gmra.mxu1 %v5535_v62  ;;  %6818 = vmatmul.mubr.msk.f32.gmra.mxu0 %vm379_vm6, %v5522_v22  ;;  %v5831_v52 = vpop.f32.mrf.mxu0 }
 0x707   : > { %6820 = vmatprep.mubr.msk.f32.mxu0 %vm379_vm6, %v5527_v25 }
 0x708   : > { %v5264_v41 = vpop.permute.xlu0 %5263  ;;  %v5541_v11 = vld [vmem:[#allocation6 + $0x4a0] sm:$0xff]  ;;  %v5550_v36 = vld [vmem:[#allocation6 + $0x4e8] sm:$0xff] }
 0x709   : > { %5328 = vst.msk [vmem:[#allocation6 + $0x4f0] sm:$0xff] %vm4527_vm2, %v5264_v41  ;;  %6162 = vmatprep.mubr.f32.mxu1 %v5541_v11  ;;  %v6034_v28 = vpop.f32.mrf.mxu1 }
 0x70a   : > { %v11547_v0 = vadd.f32 %v6034_v28, %v5810_v63  ;;  %6163 = vmatmul.mubr.f32.gmra.mxu1 %v5540_v61  ;;  %6821 = vmatmul.mubr.msk.f32.gmra.mxu0 %vm379_vm6, %v5532_v59 }
 0x70b   : > { %6823 = vmatprep.mubr.msk.f32.mxu0 %vm379_vm6, %v5537_v45  ;;  %v6036_v14 = vpop.f32.mrf.mxu1 }
 0x70c   : > { %v5546_v17 = vld [vmem:[#allocation6 + $0x4c8] sm:$0xff] }
 0x70d   : > { %6167 = vmatprep.mubr.f32.mxu1 %v5546_v17 }
 0x70e   : > { %6168 = vmatmul.mubr.f32.gmra.mxu1 %v5545_v60  ;;  %6824 = vmatmul.mubr.msk.f32.gmra.mxu0 %vm379_vm6, %v5542_v27 }
 0x70f   : > { %6826 = vmatprep.mubr.msk.f32.mxu0 %vm379_vm6, %v5547_v48 }
 0x710   : > { %v5551_v34 = vld [vmem:[#allocation6 + $0x4f0] sm:$0xff] }
 0x711   : > { %6172 = vmatprep.mubr.f32.mxu1 %v5551_v34 }
 0x712   : > { %6173 = vmatmul.mubr.f32.gmra.mxu1 %v5550_v36  ;;  %6827 = vmatmul.mubr.msk.f32.gmra.mxu0 %vm379_vm6, %v5552_v38 }
 0x714   : > { %v5834_v49 = vpop.f32.mrf.mxu0 }
 0x715   : > { %v5835_v32 = vadd.f32 %v11490_v21, %v5834_v49 }
 0x716   : > { %v5836_v16 = vpop.f32.mrf.mxu0 }
 0x719   : > { %v6039_v35 = vpop.f32.mrf.mxu1 }
 0x71a   : > { %v11556_v43 = vadd.f32 %v6039_v35, %v5815_v4 }
 0x71b   : > { %v6041_v47 = vpop.f32.mrf.mxu1 }
 0x71c   : > { %v5839_v51 = vpop.f32.mrf.mxu0 }
 0x71d   : > { %v5840_v52 = vadd.f32 %v11490_v21, %v5839_v51 }
 0x71e   : > { %v5841_v15 = vpop.f32.mrf.mxu0 }
 0x721   : > { %v6044_v18 = vpop.f32.mrf.mxu1 }
 0x722   : > { %v11560_v39 = vadd.f32 %v6044_v18, %v5820_v30 }
 0x723   : > { %v6046_v58 = vpop.f32.mrf.mxu1 }
 0x72c   : > { %v5844_v10 = vpop.f32.mrf.mxu0 }
 0x72d   : > { %v5845_v45 = vadd.f32 %v11490_v21, %v5844_v10 }
 0x72e   : > { %v5846_v1 = vpop.f32.mrf.mxu0 }
 0x731   : > { %v6049_v12 = vpop.f32.mrf.mxu1 }
 0x732   : > { %v11564_v20 = vadd.f32 %v6049_v12, %v5825_v23 }
 0x733   : > { %v6051_v56 = vpop.f32.mrf.mxu1 }
 0x734   : > { %v11566_v57 = vpop.f32.mrf.mxu0 }
 0x736   : > { %v5851_v13 = vpop.f32.mrf.mxu0 }
 0x739   : > { %v6054_v5 = vpop.f32.mrf.mxu1 }
 0x73a   : > { %v11569_v44 = vadd.f32 %v6054_v5, %v5830_v9 }
 0x73b   : > { %v6056_v53 = vpop.f32.mrf.mxu1 }
 0x73c   : > { %v11571_v54 = vpop.f32.mrf.mxu0 }
 0x73e   : > { %v5856_v50 = vpop.f32.mrf.mxu0 }
 0x740   : > { %v11573_v2 = vpop.f32.mrf.mxu0 }
 0x742   : > { %v5861_v26 = vpop.f32.mrf.mxu0 }
 0x744   : > { %v11575_v29 = vpop.f32.mrf.mxu0 }
 0x746   : > { %v5866_v7 = vpop.f32.mrf.mxu0 }
 0x748   : > { %v11577_v6 = vpop.f32.mrf.mxu0 }
 0x74a   : > { %v5871_v40 = vpop.f32.mrf.mxu0 }
 0x74c   : > { %v11579_v42 = vpop.f32.mrf.mxu0 }
 0x74e   : > { %v5876_v33 = vpop.f32.mrf.mxu0 }
 0x750   : > { %v11582_v8 = vpop.f32.mrf.mxu0  ;;  %v6059_v46 = vpop.f32.mrf.mxu1 }
 0x751   : > { %v11584_v24 = vadd.f32 %v6059_v46, %v5835_v32 }
 0x752   : > { %v5881_v31 = vpop.f32.mrf.mxu0  ;;  %v6061_v55 = vpop.f32.mrf.mxu1 }
 0x754   : > { %v11586_v62 = vpop.f32.mrf.mxu0 }
 0x756   : > { %v5886_v22 = vpop.f32.mrf.mxu0 }
 0x758   : > { %v11589_v25 = vpop.f32.mrf.mxu0  ;;  %v6064_v63 = vpop.f32.mrf.mxu1 }
 0x759   : > { %v11591_v41 = vadd.f32 %v6064_v63, %v5840_v52 }
 0x75a   : > { %v5891_v11 = vpop.f32.mrf.mxu0  ;;  %v6066_v28 = vpop.f32.mrf.mxu1 }
 0x75c   : > { %v11593_v61 = vpop.f32.mrf.mxu0 }
 0x75e   : > { %v5896_v59 = vpop.f32.mrf.mxu0 }
 0x760   : > { %v11596_v14 = vpop.f32.mrf.mxu0  ;;  %v6069_v17 = vpop.f32.mrf.mxu1 }
 0x761   : > { %v11598_v48 = vadd.f32 %v6069_v17, %v5845_v45 }
 0x762   : > { %v5901_v60 = vpop.f32.mrf.mxu0  ;;  %v6071_v27 = vpop.f32.mrf.mxu1 }
 0x764   : > { %v11600_v38 = vpop.f32.mrf.mxu0 }
 0x766   : > { %v5906_v34 = vpop.f32.mrf.mxu0 }
 0x768   : > { %v11602_v36 = vpop.f32.mrf.mxu0 }
 0x76a   : > { %v11604_v49 = vpop.f32.mrf.mxu1  ;;  %v5911_v16 = vpop.f32.mrf.mxu0 }
 0x76c   : > { %v6076_v4 = vpop.f32.mrf.mxu1  ;;  %v11606_v35 = vpop.f32.mrf.mxu0 }
 0x76e   : > { %v5916_v47 = vpop.f32.mrf.mxu0 }
 0x770   : > { %v11608_v51 = vpop.f32.mrf.mxu0 }
 0x772   : > { %v5921_v15 = vpop.f32.mrf.mxu0 }
 0x774   : > { %v11610_v30 = vpop.f32.mrf.mxu0 }
 0x776   : > { %v11612_v18 = vpop.f32.mrf.mxu1  ;;  %v5926_v58 = vpop.f32.mrf.mxu0 }
 0x778   : > { %v6081_v10 = vpop.f32.mrf.mxu1  ;;  %v11614_v1 = vpop.f32.mrf.mxu0 }
 0x77a   : > { %v11616_v23 = vpop.f32.mrf.mxu1  ;;  %v5931_v12 = vpop.f32.mrf.mxu0 }
 0x77c   : > { %v6086_v56 = vpop.f32.mrf.mxu1 }
 0x77e   : > { %v11618_v13 = vpop.f32.mrf.mxu0 }
 0x780   : > { %v5936_v9 = vpop.f32.mrf.mxu0 }
 0x782   : > { %v11620_v5 = vpop.f32.mrf.mxu1 }
 0x784   : > { %v6091_v53 = vpop.f32.mrf.mxu1 }
 0x787   : > { %v11622_v50 = vpop.f32.mrf.mxu0 }
 0x789   : > { %v5941_v26 = vpop.f32.mrf.mxu0  ;;  %v11624_v7 = vpop.f32.mrf.mxu1 }
 0x78b   : > { %v6096_v40 = vpop.f32.mrf.mxu1 }
 0x78e   : > { %v11626_v33 = vpop.f32.mrf.mxu0 }
 0x790   : > { %v5946_v32 = vpop.f32.mrf.mxu0 }
 0x792   : > { %v11628_v46 = vpop.f32.mrf.mxu0 }
 0x794   : > { %v5951_v31 = vpop.f32.mrf.mxu0 }
 0x796   : > { %v11630_v55 = vpop.f32.mrf.mxu1  ;;  %v6783_v22 = vpop.f32.mrf.mxu0 }
 0x797   : > { %v6250_v52 = vadd.f32 %v6783_v22, %v11515_v3  ;;  %v5860_v22 = vadd.f32 %v11490_v21, %v11573_v2  ;;  %v5870_v2 = vadd.f32 %v11490_v21, %v11577_v6  ;;  %v5880_v6 = vadd.f32 %v11490_v21, %v11582_v8 }
 0x798   : > { %v6101_v63 = vpop.f32.mrf.mxu1  ;;  %v6244_v11 = vpop.f32.mrf.mxu0  ;;  %v5890_v8 = vadd.f32 %v11490_v21, %v11589_v25  ;;  %v5900_v25 = vadd.f32 %v11490_v21, %v11596_v14  ;;  %v5910_v14 = vadd.f32 %v11490_v21, %v11602_v36  ;;  %v5920_v36 = vadd.f32 %v11490_v21, %v11608_v51 }
 0x799   : > { %6404 = vst.msk [vmem:[%s11637_s20 + $0x8] sm:$0xff] %vm333_vm0, %v6250_v52  ;;  %v6245_v28 = vadd.f32 %v6244_v11, %v11501_v19  ;;  %v5855_v63 = vadd.f32 %v11490_v21, %v11571_v54  ;;  %v5930_v51 = vadd.f32 %v11490_v21, %v11614_v1  ;;  %v5940_v1 = vadd.f32 %v11490_v21, %v11622_v50 }
 0x79a   : > { %v11643_v59 = vpop.f32.mrf.mxu1  ;;  %v6786_v45 = vpop.f32.mrf.mxu0 }
 0x79b   : > { %6403 = vst.msk [vmem:[%s11637_s20] sm:$0xff] %vm333_vm0, %v6245_v28  ;;  %v6260_v17 = vadd.f32 %v6786_v45, %v11547_v0  ;;  %v6080_v45 = vadd.f32 %v11612_v18, %v5855_v63 }
 0x79c   : > { %v6106_v60 = vpop.f32.mrf.mxu1  ;;  %v6254_v27 = vpop.f32.mrf.mxu0 }
 0x79d   : > { %6406 = vst.msk [vmem:[%s11637_s20 + $0x18] sm:$0xff] %vm333_vm0, %v6260_v17  ;;  %v6255_v3 = vadd.f32 %v6254_v27, %v11537_v37 }
 0x79e   : > { %v11651_v34 = vpop.f32.mrf.mxu1  ;;  %v6789_v16 = vpop.f32.mrf.mxu0 }
 0x79f   : > { %6405 = vst.msk [vmem:[%s11637_s20 + $0x10] sm:$0xff] %vm333_vm0, %v6255_v3  ;;  %v6270_v19 = vadd.f32 %v6789_v16, %v11560_v39 }
 0x7a0   : > { %v6111_v4 = vpop.f32.mrf.mxu1  ;;  %v6264_v47 = vpop.f32.mrf.mxu0 }
 0x7a1   : > { %6408 = vst.msk [vmem:[%s11637_s20 + $0x28] sm:$0xff] %vm333_vm0, %v6270_v19  ;;  %v6265_v0 = vadd.f32 %v6264_v47, %v11556_v43  ;;  %v5850_v43 = vadd.f32 %v11490_v21, %v11566_v57 }
 0x7a2   : > { %v6114_v15 = vpop.f32.mrf.mxu1  ;;  %v6792_v58 = vpop.f32.mrf.mxu0 }
 0x7a3   : > { %6407 = vst.msk [vmem:[%s11637_s20 + $0x20] sm:$0xff] %vm333_vm0, %v6265_v0  ;;  %v6280_v37 = vadd.f32 %v6792_v58, %v11569_v44  ;;  %v6075_v40 = vadd.f32 %v11604_v49, %v5850_v43  ;;  %v6085_v49 = vadd.f32 %v11616_v23, %v5860_v22  ;;  %v5865_v23 = vadd.f32 %v11490_v21, %v11575_v29 }
 0x7a4   : > { %v6116_v10 = vpop.f32.mrf.mxu1  ;;  %v6274_v12 = vpop.f32.mrf.mxu0  ;;  %v5875_v29 = vadd.f32 %v11490_v21, %v11579_v42  ;;  %v5885_v42 = vadd.f32 %v11490_v21, %v11586_v62  ;;  %v5895_v62 = vadd.f32 %v11490_v21, %v11593_v61  ;;  %v5905_v61 = vadd.f32 %v11490_v21, %v11600_v38 }
 0x7a5   : > { %6410 = vst.msk [vmem:[%s11637_s20 + $0x38] sm:$0xff] %vm333_vm0, %v6280_v37  ;;  %v6275_v39 = vadd.f32 %v6274_v12, %v11564_v20  ;;  %v6090_v18 = vadd.f32 %v11620_v5, %v5865_v23  ;;  %v5915_v38 = vadd.f32 %v11490_v21, %v11606_v35  ;;  %v5925_v35 = vadd.f32 %v11490_v21, %v11610_v30 }
 0x7a6   : > { %v11665_v56 = vpop.f32.mrf.mxu1  ;;  %v6795_v9 = vpop.f32.mrf.mxu0  ;;  %v6100_v5 = vadd.f32 %v11630_v55, %v5875_v29  ;;  %v6110_v55 = vadd.f32 %v11651_v34, %v5885_v42  ;;  %v5935_v30 = vadd.f32 %v11490_v21, %v11618_v13  ;;  %v5950_v13 = vadd.f32 %v11490_v21, %v11628_v46 }
 0x7a7   : > { %6409 = vst.msk [vmem:[%s11637_s20 + $0x30] sm:$0xff] %vm333_vm0, %v6275_v39  ;;  %v6290_v53 = vadd.f32 %v6795_v9, %v11591_v41  ;;  %v6120_v34 = vadd.f32 %v11665_v56, %v5895_v62 }
 0x7a8   : > { %v6121_v26 = vpop.f32.mrf.mxu1  ;;  %v6284_v44 = vpop.f32.mrf.mxu0 }
 0x7a9   : > { %6412 = vst.msk [vmem:[%s11637_s20 + $0x48] sm:$0xff] %vm333_vm0, %v6290_v53  ;;  %v6285_v32 = vadd.f32 %v6284_v44, %v11584_v24 }
 0x7aa   : > { %v6124_v20 = vpop.f32.mrf.mxu1  ;;  %v6798_v31 = vpop.f32.mrf.mxu0 }
 0x7ab   : > { %6411 = vst.msk [vmem:[%s11637_s20 + $0x40] sm:$0xff] %vm333_vm0, %v6285_v32  ;;  %v6300_v57 = vadd.f32 %v6798_v31, %v6075_v40 }
 0x7ac   : > { %v6126_v52 = vpop.f32.mrf.mxu1  ;;  %v6294_v41 = vpop.f32.mrf.mxu0 }
 0x7ad   : > { %6414 = vst.msk [vmem:[%s11637_s20 + $0x58] sm:$0xff] %vm333_vm0, %v6300_v57  ;;  %v6295_v24 = vadd.f32 %v6294_v41, %v11598_v48  ;;  %v6095_v48 = vadd.f32 %v11624_v7, %v5870_v2  ;;  %v6105_v7 = vadd.f32 %v11643_v59, %v5880_v6  ;;  %v6115_v59 = vadd.f32 %v6114_v15, %v5890_v8 }
 0x7ae   : > { %v11686_v11 = vpop.f32.mrf.mxu1  ;;  %v6801_v28 = vpop.f32.mrf.mxu0  ;;  %v6125_v15 = vadd.f32 %v6124_v20, %v5900_v25 }
 0x7af   : > { %6413 = vst.msk [vmem:[%s11637_s20 + $0x50] sm:$0xff] %vm333_vm0, %v6295_v24  ;;  %v6310_v17 = vadd.f32 %v6801_v28, %v6085_v49  ;;  %v6130_v56 = vadd.f32 %v11686_v11, %v5905_v61 }
 0x7b0   : > { %v6131_v60 = vpop.f32.mrf.mxu1  ;;  %v6304_v54 = vpop.f32.mrf.mxu0 }
 0x7b1   : > { %6416 = vst.msk [vmem:[%s11637_s20 + $0x68] sm:$0xff] %vm333_vm0, %v6310_v17  ;;  %v6305_v27 = vadd.f32 %v6304_v54, %v6080_v45 }
 0x7b2   : > { %v6134_v3 = vpop.f32.mrf.mxu1  ;;  %v6804_v16 = vpop.f32.mrf.mxu0 }
 0x7b3   : > { %6415 = vst.msk [vmem:[%s11637_s20 + $0x60] sm:$0xff] %vm333_vm0, %v6305_v27  ;;  %v6320_v19 = vadd.f32 %v6804_v16, %v6095_v48  ;;  %v6135_v20 = vadd.f32 %v6134_v3, %v5910_v14 }
 0x7b4   : > { %v6136_v4 = vpop.f32.mrf.mxu1  ;;  %v6314_v47 = vpop.f32.mrf.mxu0 }
 0x7b5   : > { %6418 = vst.msk [vmem:[%s11637_s20 + $0x78] sm:$0xff] %vm333_vm0, %v6320_v19  ;;  %v6315_v0 = vadd.f32 %v6314_v47, %v6090_v18 }
 0x7b6   : > { %v6139_v58 = vpop.f32.mrf.mxu1  ;;  %v6807_v37 = vpop.f32.mrf.mxu0 }
 0x7b7   : > { %6417 = vst.msk [vmem:[%s11637_s20 + $0x70] sm:$0xff] %vm333_vm0, %v6315_v0  ;;  %v6330_v10 = vadd.f32 %v6807_v37, %v6105_v7  ;;  %v6140_v11 = vadd.f32 %v6139_v58, %v5915_v38 }
 0x7b8   : > { %v6141_v12 = vpop.f32.mrf.mxu1  ;;  %v6324_v39 = vpop.f32.mrf.mxu0 }
 0x7b9   : > { %6420 = vst.msk [vmem:[%s11637_s20 + $0x88] sm:$0xff] %vm333_vm0, %v6330_v10  ;;  %v6325_v9 = vadd.f32 %v6324_v39, %v6100_v5  ;;  %v5945_v39 = vadd.f32 %v11490_v21, %v11626_v33 }
 0x7ba   : > { %v6144_v43 = vpop.f32.mrf.mxu1  ;;  %v6810_v53 = vpop.f32.mrf.mxu0 }
 0x7bb   : > { %6419 = vst.msk [vmem:[%s11637_s20 + $0x80] sm:$0xff] %vm333_vm0, %v6325_v9  ;;  %v6340_v26 = vadd.f32 %v6810_v53, %v6115_v59  ;;  %v6145_v17 = vadd.f32 %v6144_v43, %v5920_v36 }
 0x7bc   : > { %v6146_v44 = vpop.f32.mrf.mxu1  ;;  %v6334_v40 = vpop.f32.mrf.mxu0 }
 0x7bd   : > { %6422 = vst.msk [vmem:[%s11637_s20 + $0x98] sm:$0xff] %vm333_vm0, %v6340_v26  ;;  %v6335_v32 = vadd.f32 %v6334_v40, %v6110_v55 }
 0x7be   : > { %v6149_v31 = vpop.f32.mrf.mxu1  ;;  %v6813_v22 = vpop.f32.mrf.mxu0 }
 0x7bf   : > { %6421 = vst.msk [vmem:[%s11637_s20 + $0x90] sm:$0xff] %vm333_vm0, %v6335_v32  ;;  %v6350_v57 = vadd.f32 %v6813_v22, %v6125_v15  ;;  %v6150_v4 = vadd.f32 %v6149_v31, %v5925_v35 }
 0x7c0   : > { %v6151_v52 = vpop.f32.mrf.mxu1  ;;  %v6344_v41 = vpop.f32.mrf.mxu0 }
 0x7c1   : > { %6424 = vst.msk [vmem:[%s11637_s20 + $0xa8] sm:$0xff] %vm333_vm0, %v6350_v57  ;;  %v6345_v63 = vadd.f32 %v6344_v41, %v6120_v34 }
 0x7c2   : > { %v6154_v49 = vpop.f32.mrf.mxu1  ;;  %v6816_v24 = vpop.f32.mrf.mxu0 }
 0x7c3   : > { %6423 = vst.msk [vmem:[%s11637_s20 + $0xa0] sm:$0xff] %vm333_vm0, %v6345_v63  ;;  %v6360_v28 = vadd.f32 %v6816_v24, %v6135_v20  ;;  %v6155_v16 = vadd.f32 %v6154_v49, %v5930_v51 }
 0x7c4   : > { %v6156_v2 = vpop.f32.mrf.mxu1  ;;  %v6354_v45 = vpop.f32.mrf.mxu0 }
 0x7c5   : > { %6426 = vst.msk [vmem:[%s11637_s20 + $0xb8] sm:$0xff] %vm333_vm0, %v6360_v28  ;;  %v6355_v60 = vadd.f32 %v6354_v45, %v6130_v56 }
 0x7c6   : > { %v6159_v54 = vpop.f32.mrf.mxu1  ;;  %v6819_v23 = vpop.f32.mrf.mxu0 }
 0x7c7   : > { %6425 = vst.msk [vmem:[%s11637_s20 + $0xb0] sm:$0xff] %vm333_vm0, %v6355_v60  ;;  %v6370_v48 = vadd.f32 %v6819_v23, %v6145_v17  ;;  %v6160_v5 = vadd.f32 %v6159_v54, %v5935_v30 }
 0x7c8   : > { %v6161_v27 = vpop.f32.mrf.mxu1  ;;  %v6364_v3 = vpop.f32.mrf.mxu0 }
 0x7c9   : > { %6428 = vst.msk [vmem:[%s11637_s20 + $0xc8] sm:$0xff] %vm333_vm0, %v6370_v48  ;;  %v6365_v6 = vadd.f32 %v6364_v3, %v6140_v11 }
 0x7ca   : > { %v6164_v18 = vpop.f32.mrf.mxu1  ;;  %v6822_v19 = vpop.f32.mrf.mxu0 }
 0x7cb   : > { %6427 = vst.msk [vmem:[%s11637_s20 + $0xc0] sm:$0xff] %vm333_vm0, %v6365_v6  ;;  %v6380_v47 = vadd.f32 %v6822_v19, %v6155_v16  ;;  %v6165_v0 = vadd.f32 %v6164_v18, %v5940_v1 }
 0x7cc   : > { %v6166_v29 = vpop.f32.mrf.mxu1  ;;  %v6374_v7 = vpop.f32.mrf.mxu0 }
 0x7cd   : > { %6430 = vst.msk [vmem:[%s11637_s20 + $0xd8] sm:$0xff] %vm333_vm0, %v6380_v47  ;;  %v6375_v58 = vadd.f32 %v6374_v7, %v6150_v4 }
 0x7ce   : > { %v6169_v37 = vpop.f32.mrf.mxu1  ;;  %v6825_v8 = vpop.f32.mrf.mxu0 }
 0x7cf   : > { %6429 = vst.msk [vmem:[%s11637_s20 + $0xd0] sm:$0xff] %vm333_vm0, %v6375_v58  ;;  %v6390_v50 = vadd.f32 %v6825_v8, %v6165_v0  ;;  %v6170_v43 = vadd.f32 %v6169_v37, %v5945_v39 }
 0x7d0   : > { %v6171_v10 = vpop.f32.mrf.mxu1  ;;  %v6384_v12 = vpop.f32.mrf.mxu0 }
 0x7d1   : > { %6432 = vst.msk [vmem:[%s11637_s20 + $0xe8] sm:$0xff] %vm333_vm0, %v6390_v50  ;;  %v6385_v42 = vadd.f32 %v6384_v12, %v6160_v5 }
 0x7d2   : > { %v6174_v59 = vpop.f32.mrf.mxu1  ;;  %v6828_v9 = vpop.f32.mrf.mxu0 }
 0x7d3   : > { %6431 = vst.msk [vmem:[%s11637_s20 + $0xe0] sm:$0xff] %vm333_vm0, %v6385_v42  ;;  %v6175_v53 = vadd.f32 %v6174_v59, %v5950_v13 }
 0x7d4   : > { %v6176_v25 = vpop.f32.mrf.mxu1  ;;  %v6394_v55 = vpop.f32.mrf.mxu0 }
 0x7d5   : > { %v6400_v26 = vadd.f32 %v6828_v9, %v6175_v53  ;;  %v6395_v44 = vadd.f32 %v6394_v55, %v6170_v43 }
 0x7d7   : > { %6434 = vst.msk [vmem:[%s11637_s20 + $0xf8] sm:$0xff] %vm333_vm0, %v6400_v26  ;;  %6433 = vst.msk [vmem:[%s11637_s20 + $0xf0] sm:$0xff] %vm333_vm0, %v6395_v44 }
 0x7d8 PF: > { %s19_s30 = sadd.s32 1, %s6914_s30  }
 0x7d9   : > { %p16_p4 = scmp.ge.s32.totalorder %s19_s30, 4  }
 0x7db   :  { %18 = sbr.rel (!%p16_p4) target bundleno = 1 (0x1), region = 92 }

</bundles_post_ra>
